<compile_context>
chip_gen: v5e
topology: v5e:2x2
jax: 0.10.0
libtpu: 0.0.40
codegen_flags: <defaults>
</compile_context>

<pallas_src>
import jax
import jax.numpy as jnp
from jax.experimental import pallas as pl
from jax.experimental.pallas import tpu as pltpu


MODEL_DIM = 512
NUM_LATENT = 128  # module default is 512; kept small for the demo shapes

# lattice (tensor) sizes declared for the 12 MultiHeadUnionAdaIn blocks
_DECODER_TENSOR_SIZES = [[128, 32], [64, 16], [16, 8]] * 4


# ----------------------------------------------------------------------------
# Fused kernel: mapping + start(conv/AdaIN/ReLU) + final(conv/AdaIN/ReLU/conv/sigmoid)
# ----------------------------------------------------------------------------
def _fused_kernel(feat_ref, noise_ref, w_map_ref, bias_ref, w_start_ref,
                  w_ada_ref, w_f1_hbm, w2t_ref, b2_ref, out_ref,
                  w_f1_vmem, dma_sem):
    B = out_ref.shape[0]
    N = out_ref.shape[2]
    D = w_f1_vmem.shape[0]          # 512
    L = w_map_ref.shape[1]          # num_latent
    BN = noise_ref.shape[0]         # B * N
    inv_n = 1.0 / N

    # ---- start the largest weight DMA (w_f1, bf16 DxD); wait right before use
    w_f1_copy = pltpu.make_async_copy(w_f1_hbm, w_f1_vmem, dma_sem)
    w_f1_copy.start()

    # ---- mapping: z = relu(feat @ w_map + b_map), batched over B (bf16/f32) -
    b_map = bias_ref[:, :L]                                           # (1, L)
    b_ada = bias_ref[:, L:]                                           # (1, 4D)
    feat_bf = feat_ref[...].astype(jnp.bfloat16)                      # (B, 2048)
    z = jnp.maximum(
        jnp.dot(feat_bf, w_map_ref[...], preferred_element_type=jnp.float32)
        + b_map, 0.0)                                                 # (B, L) f32
    z_bf = z.astype(jnp.bfloat16)

    # ---- single fused AdaIN style matmul: (B, L) @ (L, 4D) ------------------
    style = (jnp.dot(z_bf, w_ada_ref[...],
                     preferred_element_type=jnp.float32) + b_ada)     # (B, 4D)
    g_s = style[:, 0 * D:1 * D][:, None, :]                           # (B, 1, D)
    b_s = style[:, 1 * D:2 * D][:, None, :]
    g_f = style[:, 2 * D:3 * D][:, None, :]
    b_f = style[:, 3 * D:4 * D][:, None, :]

    # ---- start: Conv1d(3 -> D, k=1, no bias) as 3 broadcast FMAs on the VPU -
    x = noise_ref[...]                                                # (BN, 3) f32
    w0 = w_start_ref[...]                                             # (3, D)  f32
    h = (x[:, 0:1] * w0[0:1, :]
         + x[:, 1:2] * w0[1:2, :]
         + x[:, 2:3] * w0[2:3, :])                                    # (BN, D) f32
    h = h.reshape(B, N, D)

    def _adain_relu(hv, gamma, beta):
        # per-batch instance norm over the point dim (f32 stats), strength
        # reduced epilogue: one FMA + max per element.
        s1 = jnp.sum(hv, axis=1, keepdims=True)                       # (B, 1, D)
        s2 = jnp.sum(hv * hv, axis=1, keepdims=True)                  # (B, 1, D)
        mu = s1 * inv_n
        var = jnp.maximum(s2 * inv_n - mu * mu, 0.0)                  # clamp
        scale = gamma * jax.lax.rsqrt(var + 1e-5)                     # (B, 1, D)
        shift = beta - mu * scale
        return jnp.maximum(hv * scale + shift, 0.0)

    x1 = _adain_relu(h, g_s, b_s)                                     # (B, N, D)

    # ---- final: Conv1d(D -> D, k=1, no bias), M = B*N (full MXU fill) -------
    x1_flat = x1.reshape(BN, D).astype(jnp.bfloat16)
    w_f1_copy.wait()
    h2 = jnp.dot(x1_flat, w_f1_vmem[...],
                 preferred_element_type=jnp.float32)                  # (BN, D)
    x2 = _adain_relu(h2.reshape(B, N, D), g_f, b_f)                   # (B, N, D)

    # ---- tail: Conv1d(D -> 3, k=1, bias) + sigmoid, lane-dense (3, N) slabs -
    w2t = w2t_ref[...]                                                # (3, D)
    b2 = b2_ref[...]                                                  # (3, 1)
    for b in range(B):
        yb = jax.lax.dot_general(
            w2t, x2[b], (((1,), (1,)), ((), ())),
            preferred_element_type=jnp.float32) + b2                  # (3, N)
        out_ref[b] = jax.nn.sigmoid(yb)


# ----------------------------------------------------------------------------
# pallas_call wrapper
# ----------------------------------------------------------------------------
def pallas_reconstruct(feat, noise_flat, p):
    B = feat.shape[0]
    BN, Cin = noise_flat.shape
    N = BN // B
    L = p["w_map"].shape[1]
    D = p["w_f1"].shape[0]

    args = (feat, noise_flat, p["w_map"], p["biases"], p["w_start"],
            p["w_ada"], p["w_f1"], p["w_f2_t"], p["b_f2"])

    bytes_accessed = sum(int(a.size) * a.dtype.itemsize for a in args) \
        + B * 3 * N * 4
    flops = (2 * B * 2048 * L          # mapping
             + 2 * B * L * 4 * D       # fused AdaIN style matmul
             + 2 * BN * Cin * D        # start conv (FMAs)
             + 2 * BN * D * D          # final conv
             + 2 * BN * D * 3)         # tail conv
    cost = pl.CostEstimate(flops=int(flops),
                           transcendentals=int(3 * BN + 2 * B * D),
                           bytes_accessed=int(bytes_accessed))

    return pl.pallas_call(
        _fused_kernel,
        out_shape=jax.ShapeDtypeStruct((B, 3, N), jnp.float32),
        grid=(1,),
        in_specs=[
            pl.BlockSpec((B, 2048), lambda i: (0, 0)),         # feat
            pl.BlockSpec((BN, Cin), lambda i: (0, 0)),         # noise (B*N, 3)
            pl.BlockSpec((2048, L), lambda i: (0, 0)),         # w_map (bf16)
            pl.BlockSpec((1, L + 4 * D), lambda i: (0, 0)),    # packed f32 biases
            pl.BlockSpec((Cin, D), lambda i: (0, 0)),          # w_start
            pl.BlockSpec((L, 4 * D), lambda i: (0, 0)),        # fused w_ada (bf16)
            pl.BlockSpec(memory_space=pl.ANY),                 # w_f1 (manual DMA)
            pl.BlockSpec((3, D), lambda i: (0, 0)),            # w_f2^T
            pl.BlockSpec((3, 1), lambda i: (0, 0)),            # b_f2
        ],
        out_specs=pl.BlockSpec((B, 3, N), lambda i: (0, 0, 0)),
        scratch_shapes=[pltpu.VMEM((D, D), jnp.bfloat16),      # w_f1 landing buf
                        pltpu.SemaphoreType.DMA],
        compiler_params=pltpu.CompilerParams(
            dimension_semantics=("arbitrary",)),
        cost_estimate=cost,
    )(*args)


# ----------------------------------------------------------------------------
# Parameters (deterministic, PyTorch-default-like uniform(-1/sqrt(fan_in), ...))
# Large weight matrices stored in bf16 (halves HBM->VMEM DMA bytes, MXU native).
# ----------------------------------------------------------------------------
def build_params(num_latent=NUM_LATENT, model_dim=MODEL_DIM):
    key = jax.random.PRNGKey(42)
    ks = jax.random.split(key, 12)
    bf = jnp.bfloat16
    D, L = model_dim, num_latent

    def u(k, shape, fan_in, dtype=jnp.float32):
        bound = 1.0 / jnp.sqrt(jnp.float32(fan_in))
        return jax.random.uniform(k, shape, jnp.float32, -bound, bound).astype(dtype)

    w_ada_s = u(ks[4], (L, 2 * D), L, bf)      # AdaIn (start): Linear(L, 2D)
    w_ada_f = u(ks[7], (L, 2 * D), L, bf)      # AdaIn (final): Linear(L, 2D)
    b_map = u(ks[2], (1, L), 2048)
    b_ada_s = u(ks[5], (1, 2 * D), L)
    b_ada_f = u(ks[8], (1, 2 * D), L)

    return {
        # ResNet-50 stand-in lift: (3 -> 2048)
        "w_lift": u(ks[0], (3, 2048), 3),
        # mapping: Linear(2048, num_latent) (stored transposed)
        "w_map": u(ks[1], (2048, L), 2048, bf),
        # start: Conv1d(3, model_dim, k=1, bias=False) stored as (Cin, Cout)
        "w_start": u(ks[3], (3, D), 3),
        # fused AdaIN style projection [(gamma_s, beta_s, gamma_f, beta_f)]
        "w_ada": jnp.concatenate([w_ada_s, w_ada_f], axis=1),         # (L, 4D) bf16
        # packed f32 biases: [b_map | b_ada_s | b_ada_f]
        "biases": jnp.concatenate([b_map, b_ada_s, b_ada_f], axis=1), # (1, L+4D)
        # final: Conv1d(model_dim, model_dim, k=1, bias=False)
        "w_f1": u(ks[6], (D, D), D, bf),
        # final tail: Conv1d(model_dim, 3, k=1) + bias, stored pre-transposed
        "w_f2_t": u(ks[9], (3, D), D),
        "b_f2": u(ks[10], (3, 1), D),
    }


# ----------------------------------------------------------------------------
# Full forward (mirrors Model.forward(noise, input))
# ----------------------------------------------------------------------------
@jax.jit
def model_forward(noise_bcn, image_bchw, params):
    # --- res50_model(input).reshape(-1, 2048) --------------------------------
    # TODO(synk): stand-in for the pretrained ResNet-50 backbone (see header).
    pooled = jnp.mean(image_bchw, axis=(2, 3))             # (B, 3)
    feat = pooled @ params["w_lift"]                       # (B, 2048) plain-JAX glue

    # NCW -> flat (B*N, C) layout plumbing for the point cloud
    B, C, N = noise_bcn.shape
    noise_flat = jnp.transpose(noise_bcn, (0, 2, 1)).reshape(B * N, C)

    # --- attentions_decoder --------------------------------------------------
    # TODO(synk): MultiHeadUnionAdaIn blocks treated as identity (undefined).
    lattices_sizes = []
    for sizes in _DECODER_TENSOR_SIZES:
        lattices_sizes += sizes

    # --- mapping + forward_style(start) + forward_style(final), fused --------
    y_cn = pallas_reconstruct(feat, noise_flat, params)    # (B, 3, N) lane-dense

    # unsqueeze(2): (B, 3, 1, N)  (kernel already emits NCW, no transpose)
    return y_cn[:, :, None, :], lattices_sizes


# ----------------------------------------------------------------------------
if __name__ == "__main__":
    B, N, H, W = 2, 128, 16, 16
    key = jax.random.PRNGKey(0)
    k_noise, k_img = jax.random.split(key)
    noise = jax.random.normal(k_noise, (B, 3, N), jnp.float32)   # Conv1d input (B, C=3, N)
    image = jax.random.normal(k_img, (B, 3, H, W), jnp.float32)  # NCHW image

    params = build_params()
    out, lattices = model_forward(noise, image, params)
    out = jax.block_until_ready(out)

    assert out.shape == (B, 3, 1, N), out.shape
    assert bool(jnp.all(jnp.isfinite(out)))
    assert bool(jnp.all(out >= 0.0)) and bool(jnp.all(out <= 1.0))  # sigmoid range
    print("KERNEL_OK")
</pallas_src>

<mosaic_0001>
module attributes {stable_mosaic.version = 11 : i64} {
  func.func @_fused_kernel(%arg0: i32, %arg1: memref<2x2048xf32, #tpu.memory_space<vmem>>, %arg2: memref<256x3xf32, #tpu.memory_space<vmem>>, %arg3: memref<2048x128xbf16, #tpu.memory_space<vmem>>, %arg4: memref<1x2176xf32, #tpu.memory_space<vmem>>, %arg5: memref<3x512xf32, #tpu.memory_space<vmem>>, %arg6: memref<128x2048xbf16, #tpu.memory_space<vmem>>, %arg7: memref<512x512xbf16, #tpu.memory_space<any>>, %arg8: memref<3x512xf32, #tpu.memory_space<vmem>>, %arg9: memref<3x1xf32, #tpu.memory_space<vmem>>, %arg10: memref<2x3x128xf32, #tpu.memory_space<vmem>>, %arg11: memref<512x512xbf16, #tpu.memory_space<vmem>>, %arg12: memref<!tpu.dma_semaphore, #tpu.memory_space<semaphore_mem>>) attributes {dimension_semantics = [#tpu.dimension_semantics<arbitrary>], iteration_bounds = array<i64: 1>, scalar_prefetch = 0 : i64, scratch_operands = 2 : i64, tpu.core_type = #tpu.core_type<tc>, window_params = [{pipeline_mode = #tpu.pipeline_mode<synchronous>, transform_indices = @transform_0, window_bounds = array<i64: 2, 2048>}, {pipeline_mode = #tpu.pipeline_mode<synchronous>, transform_indices = @transform_1, window_bounds = array<i64: 256, 3>}, {pipeline_mode = #tpu.pipeline_mode<synchronous>, transform_indices = @transform_2, window_bounds = array<i64: 2048, 128>}, {pipeline_mode = #tpu.pipeline_mode<synchronous>, transform_indices = @transform_3, window_bounds = array<i64: 1, 2176>}, {pipeline_mode = #tpu.pipeline_mode<synchronous>, transform_indices = @transform_4, window_bounds = array<i64: 3, 512>}, {pipeline_mode = #tpu.pipeline_mode<synchronous>, transform_indices = @transform_5, window_bounds = array<i64: 128, 2048>}, {}, {pipeline_mode = #tpu.pipeline_mode<synchronous>, transform_indices = @transform_7, window_bounds = array<i64: 3, 512>}, {pipeline_mode = #tpu.pipeline_mode<synchronous>, transform_indices = @transform_8, window_bounds = array<i64: 3, 1>}, {pipeline_mode = #tpu.pipeline_mode<synchronous>, transform_indices = @transform_9, window_bounds = array<i64: 2, 3, 128>}]} {
    tpu.enqueue_dma source(%arg7 : memref<512x512xbf16, #tpu.memory_space<any>>) target(%arg11 : memref<512x512xbf16, #tpu.memory_space<vmem>>) target_semaphore(%arg12 : memref<!tpu.dma_semaphore, #tpu.memory_space<semaphore_mem>>)
    %c0 = arith.constant 0 : index
    %c0_0 = arith.constant 0 : index
    %0 = vector.load %arg4[%c0, %c0_0] : memref<1x2176xf32, #tpu.memory_space<vmem>>, vector<1x128xf32>
    %c0_1 = arith.constant 0 : index
    %c128 = arith.constant 128 : index
    %1 = vector.load %arg4[%c0_1, %c128] : memref<1x2176xf32, #tpu.memory_space<vmem>>, vector<1x2048xf32>
    %c0_2 = arith.constant 0 : index
    %c0_3 = arith.constant 0 : index
    %2 = vector.load %arg1[%c0_2, %c0_3] : memref<2x2048xf32, #tpu.memory_space<vmem>>, vector<2x2048xf32>
    %3 = arith.truncf %2 : vector<2x2048xf32> to vector<2x2048xbf16>
    %c0_4 = arith.constant 0 : index
    %c0_5 = arith.constant 0 : index
    %4 = vector.load %arg3[%c0_4, %c0_5] : memref<2048x128xbf16, #tpu.memory_space<vmem>>, vector<2048x128xbf16>
    %cst = arith.constant dense<0.000000e+00> : vector<2x128xf32>
    %5 = tpu.matmul %3, %4, %cst {dimension_numbers = #tpu.dot_dimension_numbers<[1], [0], [0], [1], [0, 0, 1, 1], [], []>} : vector<2x2048xbf16>, vector<2048x128xbf16>, vector<2x128xf32> -> vector<2x128xf32>
    %6 = vector.broadcast %0 : vector<1x128xf32> to vector<2x128xf32>
    %7 = arith.addf %5, %6 : vector<2x128xf32>
    %cst_6 = arith.constant 0.000000e+00 : f32
    %8 = vector.broadcast %cst_6 : f32 to vector<2x128xf32>
    %9 = arith.maximumf %7, %8 : vector<2x128xf32>
    %10 = arith.truncf %9 : vector<2x128xf32> to vector<2x128xbf16>
    %c0_7 = arith.constant 0 : index
    %c0_8 = arith.constant 0 : index
    %11 = vector.load %arg6[%c0_7, %c0_8] : memref<128x2048xbf16, #tpu.memory_space<vmem>>, vector<128x2048xbf16>
    %cst_9 = arith.constant dense<0.000000e+00> : vector<2x2048xf32>
    %12 = tpu.matmul %10, %11, %cst_9 {dimension_numbers = #tpu.dot_dimension_numbers<[1], [0], [0], [1], [0, 0, 1, 1], [], []>} : vector<2x128xbf16>, vector<128x2048xbf16>, vector<2x2048xf32> -> vector<2x2048xf32>
    %13 = vector.broadcast %1 : vector<1x2048xf32> to vector<2x2048xf32>
    %14 = arith.addf %12, %13 : vector<2x2048xf32>
    %15 = vector.extract_strided_slice %14 {offsets = [0, 0], sizes = [2, 512], strides = [1, 1]} : vector<2x2048xf32> to vector<2x512xf32>
    %16 = vector.shape_cast %15 : vector<2x512xf32> to vector<2x1x512xf32>
    %17 = vector.extract_strided_slice %14 {offsets = [0, 512], sizes = [2, 512], strides = [1, 1]} : vector<2x2048xf32> to vector<2x512xf32>
    %18 = vector.shape_cast %17 : vector<2x512xf32> to vector<2x1x512xf32>
    %19 = vector.extract_strided_slice %14 {offsets = [0, 1024], sizes = [2, 512], strides = [1, 1]} : vector<2x2048xf32> to vector<2x512xf32>
    %20 = vector.shape_cast %19 : vector<2x512xf32> to vector<2x1x512xf32>
    %21 = vector.extract_strided_slice %14 {offsets = [0, 1536], sizes = [2, 512], strides = [1, 1]} : vector<2x2048xf32> to vector<2x512xf32>
    %22 = vector.shape_cast %21 : vector<2x512xf32> to vector<2x1x512xf32>
    %c0_10 = arith.constant 0 : index
    %c0_11 = arith.constant 0 : index
    %23 = vector.load %arg2[%c0_10, %c0_11] : memref<256x3xf32, #tpu.memory_space<vmem>>, vector<256x3xf32>
    %c0_12 = arith.constant 0 : index
    %c0_13 = arith.constant 0 : index
    %24 = vector.load %arg5[%c0_12, %c0_13] : memref<3x512xf32, #tpu.memory_space<vmem>>, vector<3x512xf32>
    %25 = vector.extract_strided_slice %23 {offsets = [0, 0], sizes = [256, 1], strides = [1, 1]} : vector<256x3xf32> to vector<256x1xf32>
    %26 = vector.extract_strided_slice %24 {offsets = [0, 0], sizes = [1, 512], strides = [1, 1]} : vector<3x512xf32> to vector<1x512xf32>
    %27 = vector.broadcast %25 : vector<256x1xf32> to vector<256x512xf32>
    %28 = vector.broadcast %26 : vector<1x512xf32> to vector<256x512xf32>
    %29 = arith.mulf %27, %28 : vector<256x512xf32>
    %30 = vector.extract_strided_slice %23 {offsets = [0, 1], sizes = [256, 1], strides = [1, 1]} : vector<256x3xf32> to vector<256x1xf32>
    %31 = vector.extract_strided_slice %24 {offsets = [1, 0], sizes = [1, 512], strides = [1, 1]} : vector<3x512xf32> to vector<1x512xf32>
    %32 = vector.broadcast %30 : vector<256x1xf32> to vector<256x512xf32>
    %33 = vector.broadcast %31 : vector<1x512xf32> to vector<256x512xf32>
    %34 = arith.mulf %32, %33 : vector<256x512xf32>
    %35 = arith.addf %29, %34 : vector<256x512xf32>
    %36 = vector.extract_strided_slice %23 {offsets = [0, 2], sizes = [256, 1], strides = [1, 1]} : vector<256x3xf32> to vector<256x1xf32>
    %37 = vector.extract_strided_slice %24 {offsets = [2, 0], sizes = [1, 512], strides = [1, 1]} : vector<3x512xf32> to vector<1x512xf32>
    %38 = vector.broadcast %36 : vector<256x1xf32> to vector<256x512xf32>
    %39 = vector.broadcast %37 : vector<1x512xf32> to vector<256x512xf32>
    %40 = arith.mulf %38, %39 : vector<256x512xf32>
    %41 = arith.addf %35, %40 : vector<256x512xf32>
    %42 = vector.shape_cast %41 : vector<256x512xf32> to vector<2x128x512xf32>
    %cst_14 = arith.constant dense<0.000000e+00> : vector<2x512xf32>
    %43 = vector.multi_reduction <add>, %42, %cst_14 [1] : vector<2x128x512xf32> to vector<2x512xf32>
    %44 = vector.shape_cast %43 : vector<2x512xf32> to vector<2x1x512xf32>
    %45 = arith.mulf %42, %42 : vector<2x128x512xf32>
    %cst_15 = arith.constant dense<0.000000e+00> : vector<2x512xf32>
    %46 = vector.multi_reduction <add>, %45, %cst_15 [1] : vector<2x128x512xf32> to vector<2x512xf32>
    %47 = vector.shape_cast %46 : vector<2x512xf32> to vector<2x1x512xf32>
    %cst_16 = arith.constant 7.812500e-03 : f32
    %48 = vector.broadcast %cst_16 : f32 to vector<2x1x512xf32>
    %49 = arith.mulf %44, %48 : vector<2x1x512xf32>
    %cst_17 = arith.constant 7.812500e-03 : f32
    %50 = vector.broadcast %cst_17 : f32 to vector<2x1x512xf32>
    %51 = arith.mulf %47, %50 : vector<2x1x512xf32>
    %52 = arith.mulf %49, %49 : vector<2x1x512xf32>
    %53 = arith.subf %51, %52 : vector<2x1x512xf32>
    %cst_18 = arith.constant 0.000000e+00 : f32
    %54 = vector.broadcast %cst_18 : f32 to vector<2x1x512xf32>
    %55 = arith.maximumf %53, %54 : vector<2x1x512xf32>
    %cst_19 = arith.constant 9.99999974E-6 : f32
    %56 = vector.broadcast %cst_19 : f32 to vector<2x1x512xf32>
    %57 = arith.addf %55, %56 : vector<2x1x512xf32>
    %58 = math.rsqrt %57 : vector<2x1x512xf32>
    %59 = arith.mulf %16, %58 : vector<2x1x512xf32>
    %60 = arith.mulf %49, %59 : vector<2x1x512xf32>
    %61 = arith.subf %18, %60 : vector<2x1x512xf32>
    %62 = vector.broadcast %59 : vector<2x1x512xf32> to vector<2x128x512xf32>
    %63 = arith.mulf %42, %62 : vector<2x128x512xf32>
    %64 = vector.broadcast %61 : vector<2x1x512xf32> to vector<2x128x512xf32>
    %65 = arith.addf %63, %64 : vector<2x128x512xf32>
    %cst_20 = arith.constant 0.000000e+00 : f32
    %66 = vector.broadcast %cst_20 : f32 to vector<2x128x512xf32>
    %67 = arith.maximumf %65, %66 : vector<2x128x512xf32>
    %68 = vector.shape_cast %67 : vector<2x128x512xf32> to vector<256x512xf32>
    %69 = arith.truncf %68 : vector<256x512xf32> to vector<256x512xbf16>
    tpu.wait_dma2 semaphore(%arg12 : memref<!tpu.dma_semaphore, #tpu.memory_space<semaphore_mem>>) src(%arg7 : memref<512x512xbf16, #tpu.memory_space<any>>) dst(%arg11 : memref<512x512xbf16, #tpu.memory_space<vmem>>)
    %c0_21 = arith.constant 0 : index
    %c0_22 = arith.constant 0 : index
    %70 = vector.load %arg11[%c0_21, %c0_22] : memref<512x512xbf16, #tpu.memory_space<vmem>>, vector<512x512xbf16>
    %cst_23 = arith.constant dense<0.000000e+00> : vector<256x512xf32>
    %71 = tpu.matmul %69, %70, %cst_23 {dimension_numbers = #tpu.dot_dimension_numbers<[1], [0], [0], [1], [0, 0, 1, 1], [], []>} : vector<256x512xbf16>, vector<512x512xbf16>, vector<256x512xf32> -> vector<256x512xf32>
    %72 = vector.shape_cast %71 : vector<256x512xf32> to vector<2x128x512xf32>
    %cst_24 = arith.constant dense<0.000000e+00> : vector<2x512xf32>
    %73 = vector.multi_reduction <add>, %72, %cst_24 [1] : vector<2x128x512xf32> to vector<2x512xf32>
    %74 = vector.shape_cast %73 : vector<2x512xf32> to vector<2x1x512xf32>
    %75 = arith.mulf %72, %72 : vector<2x128x512xf32>
    %cst_25 = arith.constant dense<0.000000e+00> : vector<2x512xf32>
    %76 = vector.multi_reduction <add>, %75, %cst_25 [1] : vector<2x128x512xf32> to vector<2x512xf32>
    %77 = vector.shape_cast %76 : vector<2x512xf32> to vector<2x1x512xf32>
    %cst_26 = arith.constant 7.812500e-03 : f32
    %78 = vector.broadcast %cst_26 : f32 to vector<2x1x512xf32>
    %79 = arith.mulf %74, %78 : vector<2x1x512xf32>
    %cst_27 = arith.constant 7.812500e-03 : f32
    %80 = vector.broadcast %cst_27 : f32 to vector<2x1x512xf32>
    %81 = arith.mulf %77, %80 : vector<2x1x512xf32>
    %82 = arith.mulf %79, %79 : vector<2x1x512xf32>
    %83 = arith.subf %81, %82 : vector<2x1x512xf32>
    %cst_28 = arith.constant 0.000000e+00 : f32
    %84 = vector.broadcast %cst_28 : f32 to vector<2x1x512xf32>
    %85 = arith.maximumf %83, %84 : vector<2x1x512xf32>
    %cst_29 = arith.constant 9.99999974E-6 : f32
    %86 = vector.broadcast %cst_29 : f32 to vector<2x1x512xf32>
    %87 = arith.addf %85, %86 : vector<2x1x512xf32>
    %88 = math.rsqrt %87 : vector<2x1x512xf32>
    %89 = arith.mulf %20, %88 : vector<2x1x512xf32>
    %90 = arith.mulf %79, %89 : vector<2x1x512xf32>
    %91 = arith.subf %22, %90 : vector<2x1x512xf32>
    %92 = vector.broadcast %89 : vector<2x1x512xf32> to vector<2x128x512xf32>
    %93 = arith.mulf %72, %92 : vector<2x128x512xf32>
    %94 = vector.broadcast %91 : vector<2x1x512xf32> to vector<2x128x512xf32>
    %95 = arith.addf %93, %94 : vector<2x128x512xf32>
    %cst_30 = arith.constant 0.000000e+00 : f32
    %96 = vector.broadcast %cst_30 : f32 to vector<2x128x512xf32>
    %97 = arith.maximumf %95, %96 : vector<2x128x512xf32>
    %c0_31 = arith.constant 0 : index
    %c0_32 = arith.constant 0 : index
    %98 = vector.load %arg8[%c0_31, %c0_32] : memref<3x512xf32, #tpu.memory_space<vmem>>, vector<3x512xf32>
    %c0_33 = arith.constant 0 : index
    %c0_34 = arith.constant 0 : index
    %99 = vector.load %arg9[%c0_33, %c0_34] : memref<3x1xf32, #tpu.memory_space<vmem>>, vector<3x1xf32>
    %100 = vector.extract_strided_slice %97 {offsets = [0, 0, 0], sizes = [1, 128, 512], strides = [1, 1, 1]} : vector<2x128x512xf32> to vector<1x128x512xf32>
    %101 = vector.shape_cast %100 : vector<1x128x512xf32> to vector<128x512xf32>
    %cst_35 = arith.constant dense<0.000000e+00> : vector<3x128xf32>
    %102 = tpu.matmul %98, %101, %cst_35 {dimension_numbers = #tpu.dot_dimension_numbers<[1], [1], [0], [0], [0, 0, 1, 0], [], []>} : vector<3x512xf32>, vector<128x512xf32>, vector<3x128xf32> -> vector<3x128xf32>
    %103 = vector.broadcast %99 : vector<3x1xf32> to vector<3x128xf32>
    %104 = arith.addf %102, %103 : vector<3x128xf32>
    %105 = arith.negf %104 : vector<3x128xf32>
    %106 = math.exp %105 : vector<3x128xf32>
    %cst_36 = arith.constant 1.000000e+00 : f32
    %107 = vector.broadcast %cst_36 : f32 to vector<3x128xf32>
    %108 = arith.addf %107, %106 : vector<3x128xf32>
    %109 = arith.divf %107, %108 : vector<3x128xf32>
    %c0_37 = arith.constant 0 : index
    %c0_38 = arith.constant 0 : index
    %c0_39 = arith.constant 0 : index
    %110 = vector.load %arg10[%c0_37, %c0_38, %c0_39] : memref<2x3x128xf32, #tpu.memory_space<vmem>>, vector<1x3x128xf32>
    %111 = vector.shape_cast %110 : vector<1x3x128xf32> to vector<3x128xf32>
    %112 = vector.shape_cast %109 : vector<3x128xf32> to vector<1x3x128xf32>
    tpu.vector_store %arg10[%c0_37, %c0_38, %c0_39], %112 {strides = array<i32>} : memref<2x3x128xf32, #tpu.memory_space<vmem>>, vector<1x3x128xf32>,
    %113 = vector.extract_strided_slice %97 {offsets = [1, 0, 0], sizes = [1, 128, 512], strides = [1, 1, 1]} : vector<2x128x512xf32> to vector<1x128x512xf32>
    %114 = vector.shape_cast %113 : vector<1x128x512xf32> to vector<128x512xf32>
    %cst_40 = arith.constant dense<0.000000e+00> : vector<3x128xf32>
    %115 = tpu.matmul %98, %114, %cst_40 {dimension_numbers = #tpu.dot_dimension_numbers<[1], [1], [0], [0], [0, 0, 1, 0], [], []>} : vector<3x512xf32>, vector<128x512xf32>, vector<3x128xf32> -> vector<3x128xf32>
    %116 = vector.broadcast %99 : vector<3x1xf32> to vector<3x128xf32>
    %117 = arith.addf %115, %116 : vector<3x128xf32>
    %118 = arith.negf %117 : vector<3x128xf32>
    %119 = math.exp %118 : vector<3x128xf32>
    %cst_41 = arith.constant 1.000000e+00 : f32
    %120 = vector.broadcast %cst_41 : f32 to vector<3x128xf32>
    %121 = arith.addf %120, %119 : vector<3x128xf32>
    %122 = arith.divf %120, %121 : vector<3x128xf32>
    %c1 = arith.constant 1 : index
    %c0_42 = arith.constant 0 : index
    %c0_43 = arith.constant 0 : index
    %123 = vector.load %arg10[%c1, %c0_42, %c0_43] : memref<2x3x128xf32, #tpu.memory_space<vmem>>, vector<1x3x128xf32>
    %124 = vector.shape_cast %123 : vector<1x3x128xf32> to vector<3x128xf32>
    %125 = vector.shape_cast %122 : vector<3x128xf32> to vector<1x3x128xf32>
    tpu.vector_store %arg10[%c1, %c0_42, %c0_43], %125 {strides = array<i32>} : memref<2x3x128xf32, #tpu.memory_space<vmem>>, vector<1x3x128xf32>,
    return
  }
  func.func @transform_0(%arg0: i32) -> (i32, i32) {
    %c0_i32 = arith.constant 0 : i32
    %c0_i32_0 = arith.constant 0 : i32
    %c0_i32_1 = arith.constant 0 : i32
    return %c0_i32, %c0_i32_0 : i32, i32
  }
  func.func @transform_1(%arg0: i32) -> (i32, i32) {
    %c0_i32 = arith.constant 0 : i32
    %c0_i32_0 = arith.constant 0 : i32
    %c0_i32_1 = arith.constant 0 : i32
    return %c0_i32, %c0_i32_0 : i32, i32
  }
  func.func @transform_2(%arg0: i32) -> (i32, i32) {
    %c0_i32 = arith.constant 0 : i32
    %c0_i32_0 = arith.constant 0 : i32
    %c0_i32_1 = arith.constant 0 : i32
    return %c0_i32, %c0_i32_0 : i32, i32
  }
  func.func @transform_3(%arg0: i32) -> (i32, i32) {
    %c0_i32 = arith.constant 0 : i32
    %c0_i32_0 = arith.constant 0 : i32
    %c0_i32_1 = arith.constant 0 : i32
    return %c0_i32, %c0_i32_0 : i32, i32
  }
  func.func @transform_4(%arg0: i32) -> (i32, i32) {
    %c0_i32 = arith.constant 0 : i32
    %c0_i32_0 = arith.constant 0 : i32
    %c0_i32_1 = arith.constant 0 : i32
    return %c0_i32, %c0_i32_0 : i32, i32
  }
  func.func @transform_5(%arg0: i32) -> (i32, i32) {
    %c0_i32 = arith.constant 0 : i32
    %c0_i32_0 = arith.constant 0 : i32
    %c0_i32_1 = arith.constant 0 : i32
    return %c0_i32, %c0_i32_0 : i32, i32
  }
  func.func @transform_7(%arg0: i32) -> (i32, i32) {
    %c0_i32 = arith.constant 0 : i32
    %c0_i32_0 = arith.constant 0 : i32
    %c0_i32_1 = arith.constant 0 : i32
    return %c0_i32, %c0_i32_0 : i32, i32
  }
  func.func @transform_8(%arg0: i32) -> (i32, i32) {
    %c0_i32 = arith.constant 0 : i32
    %c0_i32_0 = arith.constant 0 : i32
    %c0_i32_1 = arith.constant 0 : i32
    return %c0_i32, %c0_i32_0 : i32, i32
  }
  func.func @transform_9(%arg0: i32) -> (i32, i32, i32) {
    %c0_i32 = arith.constant 0 : i32
    %c0_i32_0 = arith.constant 0 : i32
    %c0_i32_1 = arith.constant 0 : i32
    %c0_i32_2 = arith.constant 0 : i32
    return %c0_i32, %c0_i32_0, %c0_i32_1 : i32, i32, i32
  }
}

</mosaic_0001>

<bundles_post_ra>
// kernel: model_forward.1
= control target key start
LH: loop header
LB: loop body
LE: loop exit
PB: predicated region body
PF: predicated region fallthrough
CT: control target
= control target key end

     0   :  { %14 = vsyncpa [#allocation5], 0  ;;  %s17032_s0 = inlined_call_operand.vmem [shape: f32[2,2048], index: 0, kind: input, shape index: {}]   ;;  %s17033_s1 = inlined_call_operand.vmem [shape: f32[256,3], index: 1, kind: input, shape index: {}]   ;;  %s17034_s2 = inlined_call_operand.hbm [shape: bf16[2048,128], index: 2, kind: input, shape index: {}]   ;;  %s17035_s3 = inlined_call_operand.vmem [shape: f32[1,2176], index: 3, kind: input, shape index: {}]   ;;  %s17036_s4 = inlined_call_operand.vmem [shape: f32[3,512], index: 4, kind: input, shape index: {}]   ;;  %s17037_s5 = inlined_call_operand.hbm [shape: bf16[128,2048], index: 5, kind: input, shape index: {}]   ;;  %s17038_s6 = inlined_call_operand.hbm [shape: bf16[512,512], index: 6, kind: input, shape index: {}]   ;;  %s17039_s7 = inlined_call_operand.vmem [shape: f32[3,512], index: 7, kind: input, shape index: {}]   ;;  %s17040_s8 = inlined_call_operand.vmem [shape: f32[3,1], index: 8, kind: input, shape index: {}]   ;;  %s17041_s9 = inlined_call_operand.vmem [shape: f32[2,3,128], index: 9, kind: output, shape index: {}]  }
   0x1   :  { %s24_s11 = sshll.u32 %s17034_s2, 4  ;;  %s25_s11 = int_to_ptr.hbm [resolvable:$true] %s24_s11 }
   0x2   :  { %15 = vsyncpa [#allocation7], 0  ;;  %s10321_s12 = smov [#allocation4]   ;;  %s41_s16 = sshll.u32 %s17037_s5, 4  ;;  %s42_s16 = int_to_ptr.hbm [resolvable:$true] %s41_s16 }
   0x3   :  { %s26_s13 = sshll.u32 %s10321_s12, 4  ;;  %s10322_s17 = smov 64   ;;  %s27_s13 = int_to_ptr.vmem [resolvable:$true] %s26_s13 }
   0x4   :  { %s10323_s18 = smov 4   ;;  %s10324_s19 = smov [#allocation6]  }
   0x5   :  { %32 = dma.hbm_to_vmem [thread:$0]  %s25_s11, 16384, %s27_s13, [#allocation5], %s10322_s17, %s10322_s17, %s10323_s18  }
   0x6   :  { %s43_s20 = sshll.u32 %s10324_s19, 4  ;;  %s10325_s21 = smov 1024   ;;  %s44_s20 = int_to_ptr.vmem [resolvable:$true] %s43_s20 }
   0x7   :  { %49 = dma.hbm_to_vmem [thread:$0]  %s42_s16, 16384, %s44_s20, [#allocation7], %s10325_s21, %s10325_s21, %s10322_s17  }
   0x8   :  { %10315 = dma.done.wait [#allocation5], 16384  }
   0x9   :  { %10316 = vsyncadd [#allocation5], 4294950912 }
   0xa   :  { %10317 = dma.done.wait [#allocation7], 16384  }
   0xb   :  { %10318 = vsyncadd [#allocation7], 4294950912  ;;  %v17042_v0 = vmov 0   ;;  %v10392_v1 = vld [vmem:[%s17033_s1 + $0x20] sm:$0xff]  ;;  %v10397_v2 = vld [vmem:[%s17033_s1 + $0x10] sm:$0xff]  ;;  %vm2393_vm0 = vcmask 1040384  }
   0xc   :  { %10160 = vset.pattern.permute.xlu2 %v17042_v0  ;;  %10159 = vset.pattern.permute.xlu1 %v17042_v0  ;;  %v10402_v3 = vld [vmem:[%s17033_s1] sm:$0xff]  ;;  %v9771_v8 = vld [vmem:[#allocation4 + $0x30] sm:$0xff]  ;;  %v10410_v12 = vld [vmem:[%s17033_s1 + $0x28] sm:$0xff]  ;;  %vm17173_vm1 = vcmask 1041409   ;;  %vm17175_vm2 = vcmask 1042434   ;;  %vm17174_vm3 = vcmask 1041408  }
   0xd   :  { %10158 = vset.pattern.permute.xlu0 %v17042_v0  ;;  %2512 = vperm.xlu2 %10160, %v10392_v1   ;;  %v9772_v4 = vld [vmem:[#allocation4 + $0x38] sm:$0xff]  ;;  %v9779_v9 = vld [vmem:[#allocation4 + $0x70] sm:$0xff]  ;;  %v10420_v14 = vld [vmem:[%s17033_s1 + $0x8] sm:$0xff]  ;;  %vm17172_vm4 = vcmask 1043459   ;;  %vm17171_vm5 = vcmask 1042433   ;;  %s69_s25 = sshll.u32 %s17038_s6, 4  ;;  %s70_s25 = int_to_ptr.hbm [resolvable:$true] %s69_s25 }
   0xe   :  { %2502 = vperm.xlu1 %10159, %v10397_v2   ;;  %v9780_v5 = vld [vmem:[#allocation4 + $0x78] sm:$0xff]  ;;  %2492 = vperm.xlu0 %10158, %v10402_v3   ;;  %v9787_v10 = vld [vmem:[#allocation4 + $0xb0] sm:$0xff]  ;;  %v9770_v15 = vld [vmem:[#allocation4 + $0x28] sm:$0xff]  ;;  %s10329_s26 = smov [#allocation2]  }
   0xf   :  { %v9788_v6 = vld [vmem:[#allocation4 + $0xb8] sm:$0xff]  ;;  %1166 = vmatpush.bf16.msra.mxu0 %v9772_v4  ;;  %1179 = vmatpush.bf16.msra.mxu1 %v9780_v5  ;;  %v9795_v11 = vld [vmem:[#allocation4 + $0xf0] sm:$0xff]  ;;  %v9778_v16 = vld [vmem:[#allocation4 + $0x68] sm:$0xff]  ;;  %s71_s27 = sshll.u32 %s10329_s26, 4  ;;  %s72_s27 = int_to_ptr.vmem [resolvable:$true] %s71_s27 }
  0x10   :  { %v9796_v7 = vld [vmem:[#allocation4 + $0xf8] sm:$0xff]  ;;  %1192 = vmatpush.bf16.msra.mxu2 %v9788_v6  ;;  %v10415_v13 = vld [vmem:[%s17033_s1 + $0x18] sm:$0xff]  ;;  %v9786_v17 = vld [vmem:[#allocation4 + $0xa8] sm:$0xff]  ;;  %74 = dma.hbm_to_vmem [thread:$0]  %s70_s25, 16384, %s72_s27, [#allocation3] }
  0x11   :  { %1205 = vmatpush.bf16.msra.mxu3 %v9796_v7  ;;  %v9794_v18 = vld [vmem:[#allocation4 + $0xe8] sm:$0xff]  ;;  %v9769_v19 = vld [vmem:[#allocation4 + $0x20] sm:$0xff]  ;;  %v10428_v23 = vld [vmem:[%s17033_s1 + $0x40] sm:$0xff] }
  0x12   :  { %v9777_v20 = vld [vmem:[#allocation4 + $0x60] sm:$0xff]  ;;  %v10433_v24 = vld [vmem:[%s17033_s1 + $0x38] sm:$0xff]  ;;  %v10438_v25 = vld [vmem:[%s17033_s1 + $0x30] sm:$0xff] }
  0x13   :  { %1167 = vmatpush.bf16.msra.mxu0 %v9771_v8  ;;  %1180 = vmatpush.bf16.msra.mxu1 %v9779_v9  ;;  %v9785_v21 = vld [vmem:[#allocation4 + $0xa0] sm:$0xff]  ;;  %v9768_v26 = vld [vmem:[#allocation4 + $0x18] sm:$0xff]  ;;  %v9767_v30 = vld [vmem:[#allocation4 + $0x10] sm:$0xff] }
  0x14   :  { %1193 = vmatpush.bf16.msra.mxu2 %v9787_v10  ;;  %v9793_v22 = vld [vmem:[#allocation4 + $0xe0] sm:$0xff]  ;;  %v9776_v27 = vld [vmem:[#allocation4 + $0x58] sm:$0xff]  ;;  %v9775_v31 = vld [vmem:[#allocation4 + $0x50] sm:$0xff] }
  0x15   :  { %1206 = vmatpush.bf16.msra.mxu3 %v9795_v11  ;;  %2517 = vperm.xlu2 %10160, %v10410_v12   ;;  %v9784_v28 = vld [vmem:[#allocation4 + $0x98] sm:$0xff]  ;;  %v9783_v32 = vld [vmem:[#allocation4 + $0x90] sm:$0xff]  ;;  %v10451_v35 = vld [vmem:[%s17033_s1 + $0x50] sm:$0xff] }
  0x16   :  { %2507 = vperm.xlu1 %10159, %v10415_v13   ;;  %2497 = vperm.xlu0 %10158, %v10420_v14   ;;  %v9792_v29 = vld [vmem:[#allocation4 + $0xd8] sm:$0xff]  ;;  %v9791_v33 = vld [vmem:[#allocation4 + $0xd0] sm:$0xff]  ;;  %v10456_v36 = vld [vmem:[%s17033_s1 + $0x48] sm:$0xff] }
  0x17   :  { %1168 = vmatpush.bf16.msra.mxu0 %v9770_v15  ;;  %1181 = vmatpush.bf16.msra.mxu1 %v9778_v16  ;;  %v10446_v34 = vld [vmem:[%s17033_s1 + $0x58] sm:$0xff]  ;;  %v9766_v37 = vld [vmem:[#allocation4 + $0x8] sm:$0xff]  ;;  %v78_v41 = vld [vmem:[%s17032_s0] sm:$0xff] }
  0x18   :  { %1194 = vmatpush.bf16.msra.mxu2 %v9786_v17  ;;  %v9774_v38 = vld [vmem:[#allocation4 + $0x48] sm:$0xff]  ;;  %86 = vst [vmem:[#allocation1] ss:$4 sm:$0xff] %v78_v41  ;;  %v9765_v42 = vld [vmem:[#allocation4] sm:$0xff]  ;;  %v9804_v46 = vld [vmem:[#allocation4 + $0x138] sm:$0xff] }
  0x19   :  { %1207 = vmatpush.bf16.msra.mxu3 %v9794_v18  ;;  %v9782_v39 = vld [vmem:[#allocation4 + $0x88] sm:$0xff]  ;;  %v9773_v43 = vld [vmem:[#allocation4 + $0x40] sm:$0xff]  ;;  %v9812_v47 = vld [vmem:[#allocation4 + $0x178] sm:$0xff] }
  0x1a   :  { %v9790_v40 = vld [vmem:[#allocation4 + $0xc8] sm:$0xff]  ;;  %v9781_v44 = vld [vmem:[#allocation4 + $0x80] sm:$0xff]  ;;  %v9820_v48 = vld [vmem:[#allocation4 + $0x1b8] sm:$0xff] }
  0x1b   :  { %1169 = vmatpush.bf16.msra.mxu0 %v9769_v19  ;;  %1182 = vmatpush.bf16.msra.mxu1 %v9777_v20  ;;  %v9789_v45 = vld [vmem:[#allocation4 + $0xc0] sm:$0xff]  ;;  %v9828_v49 = vld [vmem:[#allocation4 + $0x1f8] sm:$0xff]  ;;  %v10467_v50 = vld [vmem:[%s17033_s1 + $0x70] sm:$0xff] }
  0x1c   :  { %1195 = vmatpush.bf16.msra.mxu2 %v9785_v21  ;;  %v10472_v51 = vld [vmem:[%s17033_s1 + $0x68] sm:$0xff]  ;;  %v10477_v52 = vld [vmem:[%s17033_s1 + $0x60] sm:$0xff]  ;;  %v9803_v53 = vld [vmem:[#allocation4 + $0x130] sm:$0xff] }
  0x1d   :  { %1208 = vmatpush.bf16.msra.mxu3 %v9793_v22  ;;  %2532 = vperm.xlu2 %10160, %v10428_v23   ;;  %v9811_v54 = vld [vmem:[#allocation4 + $0x170] sm:$0xff]  ;;  %v79_v55 = vld [vmem:[%s17032_s0 + $0x8] sm:$0xff]  ;;  %v80_v58 = vld [vmem:[%s17032_s0 + $0x10] sm:$0xff] }
  0x1e   :  { %2527 = vperm.xlu1 %10159, %v10433_v24   ;;  %2522 = vperm.xlu0 %10158, %v10438_v25   ;;  %v9819_v56 = vld [vmem:[#allocation4 + $0x1b0] sm:$0xff]  ;;  %88 = vst [vmem:[#allocation1 + $0x20] ss:$4 sm:$0xff] %v79_v55  ;;  %v9802_v7 = vld [vmem:[#allocation4 + $0x128] sm:$0xff]  ;;  %v10491_v11 = vld [vmem:[%s17033_s1 + $0x88] sm:$0xff] }
  0x1f   :  { %1170 = vmatpush.bf16.msra.mxu0 %v9768_v26  ;;  %1183 = vmatpush.bf16.msra.mxu1 %v9776_v27  ;;  %v9827_v57 = vld [vmem:[#allocation4 + $0x1f0] sm:$0xff]  ;;  %v91_v59 = vld.sshfl [vmem:[#allocation1 + $0x10] sm:$0xff pattern:$0x73625140]  ;;  %v10496_v15 = vld [vmem:[%s17033_s1 + $0x80] sm:$0xff] }
  0x20   :  { %1196 = vmatpush.bf16.msra.mxu2 %v9784_v28  ;;  %v89_v60 = vld.sshfl [vmem:[#allocation1] sm:$0xff pattern:$0x73625140]  ;;  %v125_v61 = vpack.c.bf16 %v91_v59, %v91_v59  ;;  %v92_v62 = vld.sshfl [vmem:[#allocation1 + $0x18] sm:$0xff pattern:$0x73625140] }
  0x21   :  { %1209 = vmatpush.bf16.msra.mxu3 %v9792_v29  ;;  %v90_v63 = vld.sshfl [vmem:[#allocation1 + $0x8] sm:$0xff pattern:$0x73625140]  ;;  %v123_v4 = vpack.c.bf16 %v89_v60, %v89_v60  ;;  %v126_v5 = vpack.c.bf16 %v92_v62, %v92_v62  ;;  %v9810_v8 = vld [vmem:[#allocation4 + $0x168] sm:$0xff]  ;;  %v10501_v16 = vld [vmem:[%s17033_s1 + $0x78] sm:$0xff] }
  0x22   :  { %97 = vst [vmem:[#allocation1] ss:$4 sm:$0xff] %v80_v58  ;;  %v124_v6 = vpack.c.bf16 %v90_v63, %v90_v63  ;;  %v9818_v9 = vld [vmem:[#allocation4 + $0x1a8] sm:$0xff]  ;;  %v9801_v17 = vld [vmem:[#allocation4 + $0x120] sm:$0xff]  ;;  %v81_v27 = vld [vmem:[%s17032_s0 + $0x18] sm:$0xff] }
  0x23   :  { %1171 = vmatpush.bf16.msra.mxu0 %v9767_v30  ;;  %1184 = vmatpush.bf16.msra.mxu1 %v9775_v31  ;;  %v9826_v10 = vld [vmem:[#allocation4 + $0x1e8] sm:$0xff]  ;;  %v9809_v18 = vld [vmem:[#allocation4 + $0x160] sm:$0xff]  ;;  %v9800_v29 = vld [vmem:[#allocation4 + $0x118] sm:$0xff] }
  0x24   :  { %1197 = vmatpush.bf16.msra.mxu2 %v9783_v32  ;;  %v9817_v19 = vld [vmem:[#allocation4 + $0x1a0] sm:$0xff]  ;;  %v9808_v30 = vld [vmem:[#allocation4 + $0x158] sm:$0xff]  ;;  %v9815_v41 = vld [vmem:[#allocation4 + $0x190] sm:$0xff] }
  0x25   :  { %1210 = vmatpush.bf16.msra.mxu3 %v9791_v33  ;;  %2547 = vperm.xlu2 %10160, %v10446_v34   ;;  %v9825_v20 = vld [vmem:[#allocation4 + $0x1e0] sm:$0xff]  ;;  %v10503_v21 = vld.sshfl [vmem:[#allocation1 + $0x30] sm:$0xff pattern:$0x73625140]  ;;  %v9816_v31 = vld [vmem:[#allocation4 + $0x198] sm:$0xff] }
  0x26   :  { %2542 = vperm.xlu1 %10159, %v10451_v35   ;;  %2537 = vperm.xlu0 %10158, %v10456_v36   ;;  %v10507_v22 = vld.sshfl [vmem:[#allocation1 + $0x20] sm:$0xff pattern:$0x73625140]  ;;  %v10509_v26 = vld.sshfl [vmem:[#allocation1 + $0x38] sm:$0xff pattern:$0x73625140] }
  0x27   :  { %1172 = vmatpush.bf16.msra.mxu0 %v9766_v37  ;;  %1185 = vmatpush.bf16.msra.mxu1 %v9774_v38  ;;  %v10515_v28 = vld.sshfl [vmem:[#allocation1 + $0x28] sm:$0xff pattern:$0x73625140]  ;;  %v9824_v32 = vld [vmem:[#allocation4 + $0x1d8] sm:$0xff]  ;;  %v10525_v37 = vld [vmem:[%s17033_s1 + $0x98] sm:$0xff]  ;;  %v127_v62 = vpack.c.bf16 %v10507_v22, %v10507_v22  ;;  %v130_v63 = vpack.c.bf16 %v10509_v26, %v10509_v26 }
  0x28   :  { %1198 = vmatpush.bf16.msra.mxu2 %v9782_v39  ;;  %98 = vst [vmem:[#allocation1 + $0x20] ss:$4 sm:$0xff] %v81_v27  ;;  %v10520_v33 = vld [vmem:[%s17033_s1 + $0xa0] sm:$0xff]  ;;  %v10530_v38 = vld [vmem:[%s17033_s1 + $0x90] sm:$0xff]  ;;  %v9799_v39 = vld [vmem:[#allocation4 + $0x110] sm:$0xff] }
  0x29   :  { %1211 = vmatpush.bf16.msra.mxu3 %v9790_v40  ;;  %v9807_v40 = vld [vmem:[#allocation4 + $0x150] sm:$0xff]  ;;  %v9813_v55 = vld [vmem:[#allocation4 + $0x180] sm:$0xff]  ;;  %v9844_v58 = vld [vmem:[#allocation4 + $0x278] sm:$0xff] }
  0x2a   :  { %v9852_v59 = vld [vmem:[#allocation4 + $0x2b8] sm:$0xff]  ;;  %v10582_v22 = vld [vmem:[%s17033_s1 + $0xe8] sm:$0xff] }
  0x2b   :  { %1173 = vmatpush.bf16.msra.mxu0 %v9765_v42  ;;  %1186 = vmatpush.bf16.msra.mxu1 %v9773_v43  ;;  %v9823_v42 = vld [vmem:[#allocation4 + $0x1d0] sm:$0xff]  ;;  %v9798_v43 = vld [vmem:[#allocation4 + $0x108] sm:$0xff]  ;;  %v9860_v60 = vld [vmem:[#allocation4 + $0x2f8] sm:$0xff] }
  0x2c   :  { %1199 = vmatpush.bf16.msra.mxu2 %v9781_v44  ;;  %v9806_v44 = vld [vmem:[#allocation4 + $0x148] sm:$0xff]  ;;  %v10587_v26 = vld [vmem:[%s17033_s1 + $0xe0] sm:$0xff]  ;;  %v9833_v27 = vld [vmem:[#allocation4 + $0x220] sm:$0xff] }
  0x2d   :  { %1212 = vmatpush.bf16.msra.mxu3 %v9789_v45  ;;  %2562 = vperm.xlu2 %10160, %v10467_v50   ;;  %v9814_v45 = vld [vmem:[#allocation4 + $0x188] sm:$0xff] }
  0x2e   :  { %2557 = vperm.xlu1 %10159, %v10472_v51   ;;  %2552 = vperm.xlu0 %10158, %v10477_v52  }
  0x2f   :  { %1218 = vmatpush.bf16.msrb.mxu0 %v9804_v46  ;;  %1231 = vmatpush.bf16.msrb.mxu1 %v9812_v47  ;;  %v9822_v46 = vld [vmem:[#allocation4 + $0x1c8] sm:$0xff]  ;;  %v10538_v47 = vld [vmem:[%s17033_s1 + $0xb8] sm:$0xff] }
  0x30   :  { %1244 = vmatpush.bf16.msrb.mxu2 %v9820_v48  ;;  %1174 = vmatmul.bf16.vlgmr.msra.gmra.mxu0 %v123_v4  ;;  %v10543_v48 = vld [vmem:[%s17033_s1 + $0xb0] sm:$0xff]  ;;  %v128_v4 = vpack.c.bf16 %v10515_v28, %v10515_v28  ;;  %v10592_v28 = vld [vmem:[%s17033_s1 + $0xd8] sm:$0xff] }
  0x31   :  { %1257 = vmatpush.bf16.msrb.mxu3 %v9828_v49  ;;  %1200 = vmatmul.bf16.vlgmr.msra.gmra.mxu2 %v125_v61  ;;  %v10548_v49 = vld [vmem:[%s17033_s1 + $0xa8] sm:$0xff]  ;;  %v129_v61 = vpack.c.bf16 %v10503_v21, %v10503_v21  ;;  %v9858_v21 = vld [vmem:[#allocation4 + $0x2e8] sm:$0xff] }
  0x32   :  { %1213 = vmatmul.bf16.vlgmr.msra.gmra.mxu3 %v126_v5  ;;  %1187 = vmatmul.bf16.vlgmr.msra.gmra.mxu1 %v124_v6  ;;  %v10564_v5 = vld [vmem:[%s17033_s1 + $0xd0] sm:$0xff]  ;;  %v10569_v6 = vld [vmem:[%s17033_s1 + $0xc8] sm:$0xff] }
  0x33   :  { %1219 = vmatpush.bf16.msrb.mxu0 %v9803_v53  ;;  %1232 = vmatpush.bf16.msrb.mxu1 %v9811_v54  ;;  %v9797_v53 = vld [vmem:[#allocation4 + $0x100] sm:$0xff] }
  0x34   :  { %1245 = vmatpush.bf16.msrb.mxu2 %v9819_v56  ;;  %v9805_v54 = vld [vmem:[#allocation4 + $0x140] sm:$0xff] }
  0x35   :  { %1258 = vmatpush.bf16.msrb.mxu3 %v9827_v57  ;;  %2577 = vperm.xlu2 %10160, %v10491_v11   ;;  %v9821_v56 = vld [vmem:[#allocation4 + $0x1c0] sm:$0xff]  ;;  %v9836_v57 = vld [vmem:[#allocation4 + $0x238] sm:$0xff] }
  0x36   :  { %2572 = vperm.xlu1 %10159, %v10496_v15   ;;  %2567 = vperm.xlu0 %10158, %v10501_v16  }
  0x37   :  { %1220 = vmatpush.bf16.msrb.mxu0 %v9802_v7  ;;  %1233 = vmatpush.bf16.msrb.mxu1 %v9810_v8  ;;  %v9835_v7 = vld [vmem:[#allocation4 + $0x230] sm:$0xff]  ;;  %v10574_v8 = vld [vmem:[%s17033_s1 + $0xc0] sm:$0xff] }
  0x38   :  { %1246 = vmatpush.bf16.msrb.mxu2 %v9818_v9  ;;  %v9843_v9 = vld [vmem:[#allocation4 + $0x270] sm:$0xff] }
  0x39   :  { %1259 = vmatpush.bf16.msrb.mxu3 %v9826_v10  ;;  %v9851_v10 = vld [vmem:[#allocation4 + $0x2b0] sm:$0xff] }
  0x3b   :  { %1221 = vmatpush.bf16.msrb.mxu0 %v9801_v17  ;;  %1234 = vmatpush.bf16.msrb.mxu1 %v9809_v18  ;;  %v9859_v17 = vld [vmem:[#allocation4 + $0x2f0] sm:$0xff]  ;;  %v9834_v18 = vld [vmem:[#allocation4 + $0x228] sm:$0xff] }
  0x3c   :  { %1247 = vmatpush.bf16.msrb.mxu2 %v9817_v19  ;;  %v9842_v19 = vld [vmem:[#allocation4 + $0x268] sm:$0xff] }
  0x3d   :  { %1260 = vmatpush.bf16.msrb.mxu3 %v9825_v20  ;;  %2592 = vperm.xlu2 %10160, %v10520_v33   ;;  %v9850_v20 = vld [vmem:[#allocation4 + $0x2a8] sm:$0xff] }
  0x3e   :  { %2587 = vperm.xlu1 %10159, %v10525_v37   ;;  %2582 = vperm.xlu0 %10158, %v10530_v38  }
  0x3f   :  { %1222 = vmatpush.bf16.msrb.mxu0 %v9800_v29  ;;  %1235 = vmatpush.bf16.msrb.mxu1 %v9808_v30  ;;  %v9841_v29 = vld [vmem:[#allocation4 + $0x260] sm:$0xff] }
  0x40   :  { %1248 = vmatpush.bf16.msrb.mxu2 %v9816_v31  ;;  %v9849_v30 = vld [vmem:[#allocation4 + $0x2a0] sm:$0xff] }
  0x41   :  { %1261 = vmatpush.bf16.msrb.mxu3 %v9824_v32  ;;  %v9857_v31 = vld [vmem:[#allocation4 + $0x2e0] sm:$0xff]  ;;  %v9832_v32 = vld [vmem:[#allocation4 + $0x218] sm:$0xff] }
  0x43   :  { %1223 = vmatpush.bf16.msrb.mxu0 %v9799_v39  ;;  %1236 = vmatpush.bf16.msrb.mxu1 %v9807_v40  ;;  %v9840_v39 = vld [vmem:[#allocation4 + $0x258] sm:$0xff] }
  0x44   :  { %1249 = vmatpush.bf16.msrb.mxu2 %v9815_v41  ;;  %v9848_v40 = vld [vmem:[#allocation4 + $0x298] sm:$0xff] }
  0x45   :  { %1262 = vmatpush.bf16.msrb.mxu3 %v9823_v42  ;;  %2607 = vperm.xlu2 %10160, %v10538_v47   ;;  %v9856_v41 = vld [vmem:[#allocation4 + $0x2d8] sm:$0xff]  ;;  %v10600_v42 = vld [vmem:[%s17033_s1 + $0xf8] sm:$0xff] }
  0x46   :  { %2602 = vperm.xlu1 %10159, %v10543_v48   ;;  %2597 = vperm.xlu0 %10158, %v10548_v49  }
  0x47   :  { %1224 = vmatpush.bf16.msrb.mxu0 %v9798_v43  ;;  %1237 = vmatpush.bf16.msrb.mxu1 %v9806_v44  ;;  %v9831_v43 = vld [vmem:[#allocation4 + $0x210] sm:$0xff]  ;;  %v10605_v44 = vld [vmem:[%s17033_s1 + $0xf0] sm:$0xff] }
  0x48   :  { %1250 = vmatpush.bf16.msrb.mxu2 %v9814_v45  ;;  %v9839_v45 = vld [vmem:[#allocation4 + $0x250] sm:$0xff] }
  0x49   :  { %1263 = vmatpush.bf16.msrb.mxu3 %v9822_v46  ;;  %v9847_v46 = vld [vmem:[#allocation4 + $0x290] sm:$0xff] }
  0x4b   :  { %1225 = vmatpush.bf16.msrb.mxu0 %v9797_v53  ;;  %1238 = vmatpush.bf16.msrb.mxu1 %v9805_v54  ;;  %v9855_v53 = vld [vmem:[#allocation4 + $0x2d0] sm:$0xff]  ;;  %v10327_v54 = vmov 1  }
  0x4c   :  { %1251 = vmatpush.bf16.msrb.mxu2 %v9813_v55  ;;  %v9830_v55 = vld [vmem:[#allocation4 + $0x208] sm:$0xff] }
  0x4d   :  { %1264 = vmatpush.bf16.msrb.mxu3 %v9821_v56  ;;  %2622 = vperm.xlu2 %10160, %v10564_v5   ;;  %v9838_v56 = vld [vmem:[#allocation4 + $0x248] sm:$0xff] }
  0x4e   :  { %1226 = vmatmul.bf16.vlgmr.msrb.gmra.mxu0 %v127_v62  ;;  %1239 = vmatmul.bf16.vlgmr.msrb.gmra.mxu1 %v128_v4  ;;  %v9853_v62 = vld [vmem:[#allocation4 + $0x2c0] sm:$0xff]  ;;  %v9876_v4 = vld [vmem:[#allocation4 + $0x378] sm:$0xff] }
  0x4f   :  { %1270 = vmatpush.bf16.msra.mxu0 %v9836_v57  ;;  %1283 = vmatpush.bf16.msra.mxu1 %v9844_v58  ;;  %v9846_v57 = vld [vmem:[#allocation4 + $0x288] sm:$0xff] }
  0x50   :  { %1296 = vmatpush.bf16.msra.mxu2 %v9852_v59  ;;  %1265 = vmatmul.bf16.vlgmr.msrb.gmra.mxu3 %v130_v63  ;;  %v9854_v58 = vld [vmem:[#allocation4 + $0x2c8] sm:$0xff]  ;;  %v9829_v59 = vld [vmem:[#allocation4 + $0x200] sm:$0xff]  ;;  %v9868_v63 = vld [vmem:[#allocation4 + $0x338] sm:$0xff] }
  0x51   :  { %1309 = vmatpush.bf16.msra.mxu3 %v9860_v60  ;;  %1252 = vmatmul.bf16.vlgmr.msrb.gmra.mxu2 %v129_v61  ;;  %v9837_v60 = vld [vmem:[#allocation4 + $0x240] sm:$0xff] }
  0x52   :  { %2617 = vperm.xlu1 %10159, %v10569_v6   ;;  %2612 = vperm.xlu0 %10158, %v10574_v8   ;;  %v9845_v61 = vld [vmem:[#allocation4 + $0x280] sm:$0xff] }
  0x53   :  { %1271 = vmatpush.bf16.msra.mxu0 %v9835_v7  ;;  %1284 = vmatpush.bf16.msra.mxu1 %v9843_v9  ;;  %v99_v9 = vld.sshfl [vmem:[#allocation1] sm:$0xff pattern:$0x73625140] }
  0x54   :  { %1297 = vmatpush.bf16.msra.mxu2 %v9851_v10  ;;  %v101_v10 = vld.sshfl [vmem:[#allocation1 + $0x10] sm:$0xff pattern:$0x73625140] }
  0x55   :  { %1310 = vmatpush.bf16.msra.mxu3 %v9859_v17  ;;  %2637 = vperm.xlu2 %10160, %v10582_v22   ;;  %v100_v17 = vld.sshfl [vmem:[#allocation1 + $0x8] sm:$0xff pattern:$0x73625140] }
  0x57   :  { %1272 = vmatpush.bf16.msra.mxu0 %v9834_v18  ;;  %1285 = vmatpush.bf16.msra.mxu1 %v9842_v19  ;;  %v9884_v18 = vld [vmem:[#allocation4 + $0x3b8] sm:$0xff] }
  0x58   :  { %1298 = vmatpush.bf16.msra.mxu2 %v9850_v20  ;;  %v9892_v19 = vld [vmem:[#allocation4 + $0x3f8] sm:$0xff]  ;;  %v131_v20 = vpack.c.bf16 %v99_v9, %v99_v9  ;;  %v9869_v9 = vld [vmem:[#allocation4 + $0x340] sm:$0xff] }
  0x59   :  { %1311 = vmatpush.bf16.msra.mxu3 %v9858_v21  ;;  %v133_v21 = vpack.c.bf16 %v101_v10, %v101_v10  ;;  %v9877_v10 = vld [vmem:[#allocation4 + $0x380] sm:$0xff] }
  0x5a   :  { %2632 = vperm.xlu1 %10159, %v10587_v26   ;;  %2627 = vperm.xlu0 %10158, %v10592_v28  }
  0x5b   :  { %1273 = vmatpush.bf16.msra.mxu0 %v9833_v27  ;;  %1286 = vmatpush.bf16.msra.mxu1 %v9841_v29  ;;  %v132_v27 = vpack.c.bf16 %v100_v17, %v100_v17  ;;  %v9885_v17 = vld [vmem:[#allocation4 + $0x3c0] sm:$0xff] }
  0x5c   :  { %1299 = vmatpush.bf16.msra.mxu2 %v9849_v30  ;;  %v9867_v30 = vld [vmem:[#allocation4 + $0x330] sm:$0xff] }
  0x5d   :  { %1312 = vmatpush.bf16.msra.mxu3 %v9857_v31  ;;  %10161 = vset.pattern.permute.xlu2 %v10327_v54  ;;  %v9875_v31 = vld [vmem:[#allocation4 + $0x370] sm:$0xff] }
  0x5e   :  { %2793 = vperm.xlu2 %10161, %v10402_v3   ;;  %v102_v3 = vld.sshfl [vmem:[#allocation1 + $0x18] sm:$0xff pattern:$0x73625140] }
  0x5f   :  { %1274 = vmatpush.bf16.msra.mxu0 %v9832_v32  ;;  %1287 = vmatpush.bf16.msra.mxu1 %v9840_v39  ;;  %v134_v29 = vpack.c.bf16 %v102_v3, %v102_v3  ;;  %v9883_v32 = vld [vmem:[#allocation4 + $0x3b0] sm:$0xff]  ;;  %v103_v3 = vld.sshfl [vmem:[#allocation1 + $0x20] sm:$0xff pattern:$0x73625140] }
  0x60   :  { %1300 = vmatpush.bf16.msra.mxu2 %v9848_v40  ;;  %v9891_v39 = vld [vmem:[#allocation4 + $0x3f0] sm:$0xff]  ;;  %v9882_v40 = vld [vmem:[#allocation4 + $0x3a8] sm:$0xff] }
  0x61   :  { %1313 = vmatpush.bf16.msra.mxu3 %v9856_v41  ;;  %v9890_v41 = vld [vmem:[#allocation4 + $0x3e8] sm:$0xff] }
  0x62   :  { %2647 = vperm.xlu1 %10159, %v10600_v42   ;;  %2642 = vperm.xlu0 %10158, %v10605_v44  }
  0x63   :  { %1275 = vmatpush.bf16.msra.mxu0 %v9831_v43  ;;  %1288 = vmatpush.bf16.msra.mxu1 %v9839_v45  ;;  %v9865_v43 = vld [vmem:[#allocation4 + $0x320] sm:$0xff] }
  0x64   :  { %1301 = vmatpush.bf16.msra.mxu2 %v9847_v46  ;;  %v9873_v45 = vld [vmem:[#allocation4 + $0x360] sm:$0xff] }
  0x65   :  { %1314 = vmatpush.bf16.msra.mxu3 %v9855_v53  ;;  %v9881_v46 = vld [vmem:[#allocation4 + $0x3a0] sm:$0xff] }
  0x66   :  { %2805 = vperm.xlu2 %10161, %v10415_v13   ;;  %v9866_v13 = vld [vmem:[#allocation4 + $0x328] sm:$0xff]  ;;  %v9889_v53 = vld [vmem:[#allocation4 + $0x3e0] sm:$0xff] }
  0x67   :  { %1276 = vmatpush.bf16.msra.mxu0 %v9830_v55  ;;  %1289 = vmatpush.bf16.msra.mxu1 %v9838_v56  ;;  %v10610_v7 = vpop.permute.xlu2 %2512  ;;  %v9864_v55 = vld [vmem:[#allocation4 + $0x318] sm:$0xff] }
  0x68   :  { %1302 = vmatpush.bf16.msra.mxu2 %v9846_v57  ;;  %v9872_v56 = vld [vmem:[#allocation4 + $0x358] sm:$0xff]  ;;  %v9871_v57 = vld [vmem:[#allocation4 + $0x350] sm:$0xff] }
  0x69   :  { %1315 = vmatpush.bf16.msra.mxu3 %v9854_v58  ;;  %v9879_v58 = vld [vmem:[#allocation4 + $0x390] sm:$0xff] }
  0x6a   :  { %10163 = vset.pattern.permute.xlu1 %v10327_v54  ;;  %10162 = vset.pattern.permute.xlu0 %v10327_v54 }
  0x6b   :  { %1277 = vmatpush.bf16.msra.mxu0 %v9829_v59  ;;  %1290 = vmatpush.bf16.msra.mxu1 %v9837_v60  ;;  %v9887_v59 = vld [vmem:[#allocation4 + $0x3d0] sm:$0xff] }
  0x6c   :  { %1303 = vmatpush.bf16.msra.mxu2 %v9845_v61  ;;  %2801 = vperm.xlu1 %10163, %v10397_v2  }
  0x6d   :  { %1316 = vmatpush.bf16.msra.mxu3 %v9853_v62  ;;  %2797 = vperm.xlu0 %10162, %v10420_v14   ;;  %v9874_v14 = vld [vmem:[#allocation4 + $0x368] sm:$0xff] }
  0x6e   :  { %1278 = vmatmul.bf16.vlgmr.msra.gmra.mxu0 %v131_v20  ;;  %1291 = vmatmul.bf16.vlgmr.msra.gmra.mxu1 %v132_v27  ;;  %v9862_v62 = vld [vmem:[#allocation4 + $0x308] sm:$0xff]  ;;  %v106_v20 = vld.sshfl [vmem:[#allocation1 + $0x38] sm:$0xff pattern:$0x73625140] }
  0x6f   :  { %1322 = vmatpush.bf16.msrb.mxu0 %v9868_v63  ;;  %1335 = vmatpush.bf16.msrb.mxu1 %v9876_v4  ;;  %v10615_v2 = vpop.permute.xlu2 %2517  ;;  %v9861_v4 = vld [vmem:[#allocation4 + $0x300] sm:$0xff] }
  0x70   :  { %1348 = vmatpush.bf16.msrb.mxu2 %v9884_v18  ;;  %1317 = vmatmul.bf16.vlgmr.msra.gmra.mxu3 %v134_v29  ;;  %v104_v18 = vld.sshfl [vmem:[#allocation1 + $0x28] sm:$0xff pattern:$0x73625140] }
  0x71   :  { %1361 = vmatpush.bf16.msrb.mxu3 %v9892_v19  ;;  %1304 = vmatmul.bf16.vlgmr.msra.gmra.mxu2 %v133_v21  ;;  %v105_v19 = vld.sshfl [vmem:[#allocation1 + $0x30] sm:$0xff pattern:$0x73625140]  ;;  %v135_v21 = vpack.c.bf16 %v103_v3, %v103_v3  ;;  %v136_v27 = vpack.c.bf16 %v104_v18, %v104_v18 }
  0x72   :  { %2813 = vperm.xlu2 %10161, %v10410_v12   ;;  %v9888_v12 = vld [vmem:[#allocation4 + $0x3d8] sm:$0xff] }
  0x73   :  { %1323 = vmatpush.bf16.msrb.mxu0 %v9867_v30  ;;  %1336 = vmatpush.bf16.msrb.mxu1 %v9875_v31 }
  0x74   :  { %1349 = vmatpush.bf16.msrb.mxu2 %v9883_v32  ;;  %2809 = vperm.xlu1 %10163, %v10392_v1   ;;  %v9880_v1 = vld [vmem:[#allocation4 + $0x398] sm:$0xff] }
  0x75   :  { %1362 = vmatpush.bf16.msrb.mxu3 %v9891_v39  ;;  %2817 = vperm.xlu0 %10162, %v10438_v25   ;;  %v9863_v25 = vld [vmem:[#allocation4 + $0x310] sm:$0xff] }
  0x77   :  { %1324 = vmatpush.bf16.msrb.mxu0 %v9866_v13  ;;  %1337 = vmatpush.bf16.msrb.mxu1 %v9874_v14  ;;  %v10620_v54 = vpop.permute.xlu2 %2532 }
  0x78   :  { %1350 = vmatpush.bf16.msrb.mxu2 %v9882_v40 }
  0x79   :  { %1363 = vmatpush.bf16.msrb.mxu3 %v9890_v41 }
  0x7a   :  { %2825 = vperm.xlu2 %10161, %v10428_v23   ;;  %v9878_v23 = vld [vmem:[#allocation4 + $0x388] sm:$0xff] }
  0x7b   :  { %1325 = vmatpush.bf16.msrb.mxu0 %v9865_v43  ;;  %1338 = vmatpush.bf16.msrb.mxu1 %v9873_v45 }
  0x7c   :  { %1351 = vmatpush.bf16.msrb.mxu2 %v9881_v46  ;;  %2821 = vperm.xlu1 %10163, %v10433_v24   ;;  %v9870_v24 = vld [vmem:[#allocation4 + $0x348] sm:$0xff] }
  0x7d   :  { %1364 = vmatpush.bf16.msrb.mxu3 %v9889_v53  ;;  %2829 = vperm.xlu0 %10162, %v10456_v36   ;;  %v9886_v36 = vld [vmem:[#allocation4 + $0x3c8] sm:$0xff] }
  0x7f   :  { %1326 = vmatpush.bf16.msrb.mxu0 %v9864_v55  ;;  %1339 = vmatpush.bf16.msrb.mxu1 %v9872_v56  ;;  %v10625_v60 = vpop.permute.xlu2 %2547 }
  0x80   :  { %1352 = vmatpush.bf16.msrb.mxu2 %v9880_v1  ;;  %v10627_v61 = vpop.permute.xlu1 %2502  ;;  %v10629_v63 = vpop.permute.xlu0 %2492 }
  0x81   :  { %1365 = vmatpush.bf16.msrb.mxu3 %v9888_v12 }
  0x82   :  { %2837 = vperm.xlu2 %10161, %v10446_v34   ;;  %v137_v34 = vpack.c.bf16 %v105_v19, %v105_v19 }
  0x83   :  { %1327 = vmatpush.bf16.msrb.mxu0 %v9863_v25  ;;  %1340 = vmatpush.bf16.msrb.mxu1 %v9871_v57 }
  0x84   :  { %1353 = vmatpush.bf16.msrb.mxu2 %v9879_v58  ;;  %2833 = vperm.xlu1 %10163, %v10451_v35   ;;  %v138_v35 = vpack.c.bf16 %v106_v20, %v106_v20 }
  0x85   :  { %1366 = vmatpush.bf16.msrb.mxu3 %v9887_v59  ;;  %2841 = vperm.xlu0 %10162, %v10477_v52  }
  0x87   :  { %1328 = vmatpush.bf16.msrb.mxu0 %v9862_v62  ;;  %1341 = vmatpush.bf16.msrb.mxu1 %v9870_v24  ;;  %v10638_v30 = vpop.permute.xlu2 %2562 }
  0x88   :  { %1354 = vmatpush.bf16.msrb.mxu2 %v9878_v23  ;;  %v10634_v29 = vpop.permute.xlu1 %2507  ;;  %v10636_v52 = vpop.permute.xlu0 %2497 }
  0x89   :  { %1367 = vmatpush.bf16.msrb.mxu3 %v9886_v36 }
  0x8a   :  { %2849 = vperm.xlu2 %10161, %v10467_v50   ;;  %v10661_v50 = vld [vmem:[%s17036_s4] sm:$0x77] }
  0x8b   :  { %1329 = vmatpush.bf16.msrb.mxu0 %v9861_v4  ;;  %1342 = vmatpush.bf16.msrb.mxu1 %v9869_v9 }
  0x8c   :  { %1355 = vmatpush.bf16.msrb.mxu2 %v9877_v10  ;;  %2845 = vperm.xlu1 %10163, %v10472_v51  }
  0x8d   :  { %1368 = vmatpush.bf16.msrb.mxu3 %v9885_v17  ;;  %2853 = vperm.xlu0 %10162, %v10501_v16   ;;  %v10666_v16 = vld [vmem:[%s17036_s4 + $0x8] sm:$0x77] }
  0x8e   :  { %1330 = vmatmul.bf16.vlgmr.msrb.gmra.mxu0 %v135_v21  ;;  %1343 = vmatmul.bf16.vlgmr.msrb.gmra.mxu1 %v136_v27  ;;  %v2655_v40 = vperm.slane %v10666_v16, 4 }
  0x8f   :  { %1356 = vmatmul.bf16.vlgmr.msrb.gmra.mxu2 %v137_v34  ;;  %v10647_v39 = vpop.permute.xlu2 %2577 }
  0x90   :  { %1369 = vmatmul.bf16.vlgmr.msrb.gmra.mxu3 %v138_v35  ;;  %v10643_v31 = vpop.permute.xlu1 %2527  ;;  %v10645_v32 = vpop.permute.xlu0 %2522  ;;  %v10685_v53 = vperm.slane %v2655_v40, 0 }
  0x92   :  { %2861 = vperm.xlu2 %10161, %v10491_v11   ;;  %v2652_v11 = vperm.slane %v10661_v50, 0  ;;  %v10704_v1 = vmul.f32 %v10685_v53, %v10610_v7  ;;  %v10720_v57 = vmul.f32 %v10685_v53, %v10615_v2  ;;  %v10770_v4 = vmul.f32 %v10685_v53, %v10627_v61 }
  0x93   :  { %v10786_v17 = vmul.f32 %v10685_v53, %v10629_v63 }
  0x94   :  { %2857 = vperm.xlu1 %10163, %v10496_v15   ;;  %v2653_v15 = vperm.slane %v10661_v50, 4  ;;  %v10675_v41 = vperm.slane %v2652_v11, 0  ;;  %17461 = vst [vmem:[#allocation18_spill] sm:$0xff] %v10704_v1 }
  0x95   :  { %2865 = vperm.xlu0 %10162, %v10530_v38   ;;  %v2654_v38 = vperm.slane %v10666_v16, 0 }
  0x96   :  { %v10677_v43 = vperm.slane %v2653_v15, 0  ;;  %v10742_v62 = vmul.f32 %v10675_v41, %v10625_v60  ;;  %v10810_v21 = vmul.f32 %v10675_v41, %v10636_v52  ;;  %v10821_v35 = vmul.f32 %v10675_v41, %v10638_v30 }
  0x97   :  { %v10656_v14 = vpop.permute.xlu2 %2592  ;;  %v10679_v45 = vperm.slane %v2654_v38, 0  ;;  %v10833_v15 = vmul.f32 %v10685_v53, %v10638_v30  ;;  %v10841_v38 = vmul.f32 %v10685_v53, %v10636_v52  ;;  %v10845_v40 = vmul.f32 %v10675_v41, %v10643_v31 }
  0x98   :  { %v10652_v51 = vpop.permute.xlu1 %2542  ;;  %v10654_v13 = vpop.permute.xlu0 %2537  ;;  %v10712_v12 = vmul.f32 %v10677_v43, %v10615_v2  ;;  %v10728_v58 = vmul.f32 %v10677_v43, %v10620_v54  ;;  %v10746_v24 = vmul.f32 %v10677_v43, %v10625_v60  ;;  %v10762_v23 = vmul.f32 %v10677_v43, %v10627_v61  ;;  %17462 = vst [vmem:[#allocation19_spill] sm:$0xff] %v10821_v35 }
  0x99   :  { %v10700_v56 = vmul.f32 %v10679_v45, %v10610_v7  ;;  %v10716_v25 = vmul.f32 %v10679_v45, %v10615_v2  ;;  %v10734_v59 = vmul.f32 %v10679_v45, %v10620_v54  ;;  %v10766_v36 = vmul.f32 %v10679_v45, %v10627_v61  ;;  %17465 = vst [vmem:[#allocation22_spill] sm:$0xff] %v10833_v15 }
  0x9a   :  { %2873 = vperm.xlu2 %10161, %v10520_v33   ;;  %v10692_v33 = vmul.f32 %v10675_v41, %v10610_v7  ;;  %v10778_v9 = vmul.f32 %v10677_v43, %v10629_v63  ;;  %v10782_v10 = vmul.f32 %v10679_v45, %v10629_v63  ;;  %v10794_v3 = vmul.f32 %v10677_v43, %v10634_v29 }
  0x9b   :  { %17460 = vst [vmem:[#allocation17_spill] sm:$0xff] %v10700_v56  ;;  %v10802_v20 = vmul.f32 %v10679_v45, %v10634_v29  ;;  %v10814_v27 = vmul.f32 %v10677_v43, %v10636_v52  ;;  %v10829_v11 = vmul.f32 %v10679_v45, %v10638_v30  ;;  %v10849_v0 = vmul.f32 %v10677_v43, %v10643_v31 }
  0x9c   :  { %2869 = vperm.xlu1 %10163, %v10525_v37   ;;  %17458 = vst [vmem:[#allocation15_spill] sm:$0xff] %v10692_v33  ;;  %v10857_v15 = vmul.f32 %v10685_v53, %v10643_v31  ;;  %v9123_v33 = vld [vmem:[#allocation6 + $0x300] sm:$0xf] }
  0x9d   :  { %2877 = vperm.xlu0 %10162, %v10548_v49   ;;  %v10696_v49 = vmul.f32 %v10677_v43, %v10610_v7  ;;  %v10724_v7 = vmul.f32 %v10675_v41, %v10620_v54  ;;  %17464 = vst [vmem:[#allocation21_spill] sm:$0xff] %v10829_v11  ;;  %v10898_v11 = vmul.f32 %v10675_v41, %v10652_v51 }
  0x9e   :  { %17467 = vst [vmem:[#allocation24_spill] sm:$0xff] %v10841_v38  ;;  %v9997_v38 = vld [vmem:[#allocation6 + $0x33c] sm:$0xf0] }
  0x9f   :  { %v10681_v46 = vpop.permute.xlu2 %2607  ;;  %17459 = vst [vmem:[#allocation16_spill] sm:$0xff] %v10696_v49 }
  0xa0   :  { %v10683_v37 = vpop.permute.xlu1 %2557  ;;  %v10688_v55 = vpop.permute.xlu0 %2552  ;;  %17468 = vst [vmem:[#allocation25_spill] sm:$0xff] %v10845_v40  ;;  %v10870_v40 = vmul.f32 %v10675_v41, %v10647_v39 }
  0xa1   :  { %17469 = vst [vmem:[#allocation26_spill] sm:$0xff] %v10849_v0  ;;  %v10167_v0 = vld [vmem:[%s17035_s3] ss:$0 sm:$0xff] }
  0xa2   :  { %2885 = vperm.xlu2 %10161, %v10538_v47   ;;  %v10750_v47 = vmul.f32 %v10679_v45, %v10625_v60  ;;  %17471 = vst [vmem:[#allocation28_spill] sm:$0xff] %v10857_v15  ;;  %v10878_v15 = vmul.f32 %v10679_v45, %v10645_v32 }
  0xa3   :  { %17473 = vst [vmem:[#allocation30_spill] sm:$0xff] %v10870_v40  ;;  %v10894_v40 = vmul.f32 %v10685_v53, %v10647_v39 }
  0xa4   :  { %2881 = vperm.xlu1 %10163, %v10543_v48   ;;  %v10708_v48 = vmul.f32 %v10675_v41, %v10615_v2  ;;  %v10738_v2 = vmul.f32 %v10685_v53, %v10620_v54  ;;  %v10758_v54 = vmul.f32 %v10675_v41, %v10627_v61  ;;  %v10790_v61 = vmul.f32 %v10675_v41, %v10634_v29 }
  0xa5   :  { %2889 = vperm.xlu0 %10162, %v10574_v8   ;;  %v10754_v8 = vmul.f32 %v10685_v53, %v10625_v60  ;;  %v10774_v60 = vmul.f32 %v10675_v41, %v10629_v63  ;;  %v10806_v63 = vmul.f32 %v10685_v53, %v10634_v29  ;;  %v10825_v29 = vmul.f32 %v10677_v43, %v10638_v30 }
  0xa6   :  { %v10853_v30 = vmul.f32 %v10679_v45, %v10643_v31  ;;  %v10874_v31 = vmul.f32 %v10677_v43, %v10645_v32  ;;  %17475 = vst [vmem:[#allocation32_spill] sm:$0xff] %v10878_v15 }
  0xa7   :  { %v10796_v18 = vpop.permute.xlu2 %2622  ;;  %17463 = vst [vmem:[#allocation20_spill] sm:$0xff] %v10825_v29  ;;  %v2922_v29 = vperm.slane %v10666_v16, 1 }
  0xa8   :  { %v10798_v19 = vpop.permute.xlu1 %2572  ;;  %v10817_v34 = vpop.permute.xlu0 %2567  ;;  %17470 = vst [vmem:[#allocation27_spill] sm:$0xff] %v10853_v30  ;;  %v10890_v30 = vmul.f32 %v10679_v45, %v10647_v39 }
  0xa9   :  { %17474 = vst [vmem:[#allocation31_spill] sm:$0xff] %v10874_v31  ;;  %v10926_v31 = vmul.f32 %v10677_v43, %v10654_v13 }
  0xaa   :  { %2897 = vperm.xlu2 %10161, %v10564_v5   ;;  %v10882_v5 = vmul.f32 %v10685_v53, %v10645_v32  ;;  %17478 = vst [vmem:[#allocation35_spill] sm:$0xff] %v10890_v30  ;;  %v10909_v30 = vmul.f32 %v10679_v45, %v10652_v51 }
  0xab   :  { %17479 = vst [vmem:[#allocation36_spill] sm:$0xff] %v10894_v40 }
  0xac   :  { %2893 = vperm.xlu1 %10163, %v10569_v6   ;;  %v10837_v6 = vmul.f32 %v10679_v45, %v10636_v52  ;;  %v10861_v52 = vmul.f32 %v10675_v41, %v10645_v32  ;;  %17476 = vst [vmem:[#allocation33_spill] sm:$0xff] %v10882_v5  ;;  %v10902_v32 = vmul.f32 %v10677_v43, %v10652_v51  ;;  %v2920_v5 = vperm.slane %v10661_v50, 1 }
  0xad   :  { %2901 = vperm.xlu0 %10162, %v10592_v28   ;;  %v10886_v28 = vmul.f32 %v10677_v43, %v10647_v39  ;;  %17480 = vst [vmem:[#allocation37_spill] sm:$0xff] %v10898_v11  ;;  %v1175_v35 = vpop.f32.mrf.mxu0  ;;  %v10913_v39 = vmul.f32 %v10685_v53, %v10652_v51  ;;  %v10934_v51 = vmul.f32 %v10685_v53, %v10654_v13 }
  0xae   :  { %17466 = vst [vmem:[#allocation23_spill] sm:$0xff] %v10837_v6  ;;  %v1176_v15 = vadd.f32 %v10167_v0, %v1175_v35  ;;  %v10941_v35 = vmul.f32 %v10675_v41, %v10656_v14  ;;  %v9989_v6 = vld [vmem:[#allocation6 + $0x304] sm:$0xf] }
  0xaf   :  { %17472 = vst [vmem:[#allocation29_spill] sm:$0xff] %v10861_v52  ;;  %v10915_v11 = vpop.permute.xlu2 %2637  ;;  %v1188_v0 = vpop.f32.mrf.mxu1 }
  0xb0   :  { %17477 = vst [vmem:[#allocation34_spill] sm:$0xff] %v10886_v28  ;;  %v2921_v28 = vperm.slane %v10661_v50, 5  ;;  %v10917_v40 = vpop.permute.xlu1 %2587  ;;  %v10922_v50 = vmul.f32 %v10675_v41, %v10654_v13 }
  0xb1   :  { %17481 = vst [vmem:[#allocation38_spill] sm:$0xff] %v10902_v32  ;;  %v2923_v32 = vperm.slane %v10666_v16, 5  ;;  %v10937_v16 = vpop.permute.xlu0 %2582 }
  0xb2   :  { %17482 = vst [vmem:[#allocation39_spill] sm:$0xff] %v10909_v30  ;;  %v10930_v30 = vmul.f32 %v10679_v45, %v10654_v13  ;;  %v10953_v13 = vmul.f32 %v10685_v53, %v10656_v14  ;;  %2909 = vperm.xlu2 %10161, %v10582_v22   ;;  %v10987_v22 = vmul.f32 %v10677_v43, %v10683_v37 }
  0xb3   :  { %17483 = vst [vmem:[#allocation40_spill] sm:$0xff] %v10913_v39  ;;  %v10945_v39 = vmul.f32 %v10677_v43, %v10656_v14 }
  0xb4   :  { %17484 = vst [vmem:[#allocation41_spill] sm:$0xff] %v10922_v50  ;;  %2905 = vperm.xlu1 %10163, %v10587_v26   ;;  %v1201_v26 = vpop.f32.mrf.mxu2  ;;  %v10959_v50 = vperm.slane %v2922_v29, 1  ;;  %v10979_v29 = vmul.f32 %v10685_v53, %v10681_v46 }
  0xb5   :  { %17485 = vst [vmem:[#allocation42_spill] sm:$0xff] %v10926_v31  ;;  %v10957_v31 = vperm.slane %v2921_v28, 1  ;;  %2913 = vperm.xlu0 %10162, %v10605_v44   ;;  %v10975_v28 = vmul.f32 %v10679_v45, %v10681_v46  ;;  %v1214_v44 = vpop.f32.mrf.mxu3 }
  0xb6   :  { %17486 = vst [vmem:[#allocation43_spill] sm:$0xff] %v10930_v30  ;;  %v10949_v30 = vmul.f32 %v10679_v45, %v10656_v14  ;;  %v10971_v14 = vperm.slane %v2923_v32, 1  ;;  %v10995_v32 = vmul.f32 %v10685_v53, %v10683_v37 }
  0xb7   :  { %17487 = vst [vmem:[#allocation44_spill] sm:$0xff] %v10934_v51  ;;  %v10955_v51 = vperm.slane %v2920_v5, 1  ;;  %v1189_v5 = vadd.f32 %v1188_v0, %v1176_v15  ;;  %v10991_v15 = vmul.f32 %v10679_v45, %v10683_v37 }
  0xb8   :  { %17488 = vst [vmem:[#allocation45_spill] sm:$0xff] %v10941_v35  ;;  %v10963_v35 = vmul.f32 %v10675_v41, %v10681_v46 }
  0xb9   :  { %17489 = vst [vmem:[#allocation46_spill] sm:$0xff] %v10945_v39  ;;  %v10967_v39 = vmul.f32 %v10677_v43, %v10681_v46  ;;  %v10999_v46 = vmul.f32 %v10675_v41, %v10688_v55  ;;  %v1202_v0 = vadd.f32 %v1201_v26, %v1189_v5  ;;  %v11019_v26 = vmul.f32 %v10677_v43, %v10796_v18 }
  0xba   :  { %17490 = vst [vmem:[#allocation47_spill] sm:$0xff] %v10949_v30  ;;  %v11023_v5 = vmul.f32 %v10679_v45, %v10796_v18  ;;  %v10006_v30 = vld [vmem:[#allocation6 + $0x38c] sm:$0xf] }
  0xbb   :  { %17491 = vst [vmem:[#allocation48_spill] sm:$0xff] %v10953_v13 }
  0xbc   :  { %17492 = vst [vmem:[#allocation49_spill] sm:$0xff] %v10963_v35  ;;  %v10983_v35 = vmul.f32 %v10675_v41, %v10683_v37  ;;  %v11015_v37 = vmul.f32 %v10675_v41, %v10796_v18  ;;  %2917 = vperm.xlu1 %10163, %v10600_v42   ;;  %v1203_v42 = vpop.f32.mrf.mxu2 }
  0xbd   :  { %17493 = vst [vmem:[#allocation50_spill] sm:$0xff] %v10967_v39  ;;  %v11011_v39 = vmul.f32 %v10685_v53, %v10688_v55  ;;  %v10014_v42 = vld [vmem:[#allocation6 + $0x3c4] sm:$0xf0] }
  0xbe   :  { %17494 = vst [vmem:[#allocation51_spill] sm:$0xff] %v10975_v28  ;;  %v11007_v28 = vmul.f32 %v10679_v45, %v10688_v55 }
  0xbf   :  { %17495 = vst [vmem:[#allocation52_spill] sm:$0xff] %v10979_v29  ;;  %v11003_v29 = vmul.f32 %v10677_v43, %v10688_v55  ;;  %v11031_v55 = vadd.f32 %v1214_v44, %v1202_v0  ;;  %v11050_v44 = vpop.permute.xlu0 %2597  ;;  %v1190_v0 = vpop.f32.mrf.mxu1 }
  0xc0   :  { %17496 = vst [vmem:[#allocation53_spill] sm:$0xff] %v10983_v35  ;;  %v10005_v0 = vld [vmem:[#allocation6 + $0x384] sm:$0xf] }
  0xc1   :  { %17497 = vst [vmem:[#allocation54_spill] sm:$0xff] %v10987_v22  ;;  %v11029_v22 = vpop.permute.xlu1 %2602 }
  0xc2   :  { %17498 = vst [vmem:[#allocation55_spill] sm:$0xff] %v10991_v15  ;;  %v11027_v15 = vmul.f32 %v10685_v53, %v10796_v18  ;;  %v11047_v18 = vmul.f32 %v10685_v53, %v10798_v19 }
  0xc3   :  { %17499 = vst [vmem:[#allocation56_spill] sm:$0xff] %v10995_v32  ;;  %v1177_v32 = vpop.f32.mrf.mxu0 }
  0xc4   :  { %17500 = vst [vmem:[#allocation57_spill] sm:$0xff] %v10999_v46  ;;  %v11039_v32 = vmul.f32 %v10677_v43, %v10798_v19 }
  0xc5   :  { %17501 = vst [vmem:[#allocation58_spill] sm:$0xff] %v11003_v29  ;;  %v1216_v29 = vpop.f32.mrf.mxu3 }
  0xc6   :  { %17502 = vst [vmem:[#allocation59_spill] sm:$0xff] %v11007_v28 }
  0xc7   :  { %17503 = vst [vmem:[#allocation60_spill] sm:$0xff] %v11011_v39  ;;  %v10328_v39 = vmov 2  }
  0xc8   :  { %17504 = vst [vmem:[#allocation61_spill] sm:$0xff] %v11015_v37  ;;  %v11035_v37 = vmul.f32 %v10675_v41, %v10798_v19  ;;  %10164 = vset.pattern.permute.xlu2 %v10328_v39  ;;  %10165 = vset.pattern.permute.xlu0 %v10328_v39 }
  0xc9   :  { %17505 = vst [vmem:[#allocation62_spill] sm:$0xff] %v11019_v26  ;;  %v11043_v26 = vmul.f32 %v10679_v45, %v10798_v19  ;;  %v11066_v19 = vmul.f32 %v10685_v53, %v10817_v34  ;;  %10166 = vset.pattern.permute.xlu1 %v10328_v39  ;;  %v10186_v39 = vld [vmem:[%s17033_s1 + $0x10] sm:$0xff] }
  0xca   :  { %17506 = vst [vmem:[#allocation63_spill] sm:$0xff] %v11023_v5  ;;  %v11058_v5 = vmul.f32 %v10677_v43, %v10817_v34  ;;  %3197 = vperm.xlu1 %10166, %v10186_v39   ;;  %v11163_v39 = vmul.f32 %v10675_v41, %v11050_v44 }
  0xcb   :  { %17507 = vst [vmem:[#allocation64_spill] sm:$0xff] %v11027_v15  ;;  %v11054_v15 = vmul.f32 %v10675_v41, %v10817_v34 }
  0xcc   :  { %17508 = vst [vmem:[#allocation65_spill] sm:$0xff] %v11035_v37  ;;  %v11070_v37 = vmul.f32 %v10675_v41, %v10915_v11 }
  0xcd   :  { %17509 = vst [vmem:[#allocation66_spill] sm:$0xff] %v11039_v32  ;;  %v10013_v32 = vld [vmem:[#allocation6 + $0x3bc] sm:$0xf0] }
  0xce   :  { %17510 = vst [vmem:[#allocation67_spill] sm:$0xff] %v11043_v26  ;;  %v11062_v26 = vmul.f32 %v10679_v45, %v10817_v34  ;;  %v9189_v34 = vld [vmem:[#allocation6 + $0x3c0] sm:$0xf0] }
  0xcf   :  { %17511 = vst [vmem:[#allocation68_spill] sm:$0xff] %v11047_v18  ;;  %v9187_v18 = vld [vmem:[#allocation6 + $0x380] sm:$0xf]  ;;  %v9192_v46 = vor.u32 %v10005_v0, %v9189_v34  ;;  %v11140_v0 = vmul.f32 %v10685_v53, %v10937_v16  ;;  %v11148_v34 = vmul.f32 %v10677_v43, %v11029_v22 }
  0xd0   :  { %17512 = vst [vmem:[#allocation69_spill] sm:$0xff] %v11054_v15  ;;  %v11074_v15 = vmul.f32 %v10677_v43, %v10915_v11  ;;  %v9188_v35 = vor.u32 %v10013_v32, %v9187_v18  ;;  %v10185_v32 = vld [vmem:[%s17033_s1 + $0x8] sm:$0xff] }
  0xd1   :  { %17513 = vst [vmem:[#allocation70_spill] sm:$0xff] %v11058_v5  ;;  %v11078_v5 = vmul.f32 %v10679_v45, %v10915_v11  ;;  %3193 = vperm.xlu0 %10165, %v10185_v32   ;;  %2191 = vmatpush.bf16.msra.mxu1 %v9192_v46  ;;  %v11130_v46 = vmul.f32 %v10677_v43, %v10937_v16  ;;  %v9981_v32 = vld [vmem:[#allocation6 + $0x2bc] sm:$0xf0] }
  0xd2   :  { %17514 = vst [vmem:[#allocation71_spill] sm:$0xff] %v11062_v26  ;;  %v2794_v26 = vpop.permute.xlu2 %2793  ;;  %2178 = vmatpush.bf16.msra.mxu0 %v9188_v35  ;;  %v11114_v35 = vpop.permute.xlu1 %2617 }
  0xd3   :  { %17515 = vst [vmem:[#allocation72_spill] sm:$0xff] %v11066_v19  ;;  %v9195_v19 = vld [vmem:[#allocation6 + $0x388] sm:$0xf]  ;;  %v2932_v13 = vmul.f32 %v10955_v51, %v2794_v26  ;;  %v2934_v28 = vmul.f32 %v10959_v50, %v2794_v26  ;;  %v2935_v18 = vmul.f32 %v10971_v14, %v2794_v26 }
  0xd4   :  { %17516 = vst [vmem:[#allocation73_spill] sm:$0xff] %v11070_v37  ;;  %v2933_v37 = vmul.f32 %v10957_v31, %v2794_v26  ;;  %v9196_v52 = vor.u32 %v10014_v42, %v9195_v19  ;;  %v11101_v26 = vmul.f32 %v10685_v53, %v10915_v11  ;;  %v11136_v19 = vmul.f32 %v10679_v45, %v10937_v16  ;;  %v9059_v42 = vld [vmem:[#allocation6 + $0x280] sm:$0xf] }
  0xd5   :  { %17517 = vst [vmem:[#allocation74_spill] sm:$0xff] %v11074_v15  ;;  %v9197_v15 = vld [vmem:[#allocation6 + $0x3c8] sm:$0xf0]  ;;  %v11091_v1 = vadd.f32 %v2932_v13, %v10774_v60  ;;  %v11097_v49 = vadd.f32 %v2934_v28, %v10782_v10  ;;  %v11104_v29 = vadd.f32 %v2935_v18, %v10786_v17  ;;  %v9124_v60 = vor.u32 %v9997_v38, %v9123_v33  ;;  %v9131_v13 = vld [vmem:[#allocation6 + $0x308] sm:$0xf] }
  0xd6   :  { %17518 = vst [vmem:[#allocation75_spill] sm:$0xff] %v11078_v5  ;;  %v10184_v5 = vld [vmem:[%s17033_s1] sm:$0xff]  ;;  %v11094_v56 = vadd.f32 %v2933_v37, %v10778_v9  ;;  %2204 = vmatpush.bf16.msra.mxu2 %v9196_v52  ;;  %v9125_v9 = vld [vmem:[#allocation6 + $0x340] sm:$0xf0]  ;;  %v9998_v37 = vld [vmem:[#allocation6 + $0x344] sm:$0xf0]  ;;  %v11108_v10 = vmul.f32 %v10675_v41, %v10917_v40  ;;  %v11118_v33 = vmul.f32 %v10679_v45, %v10917_v40 }
  0xd7   :  { %3189 = vperm.xlu2 %10164, %v10184_v5   ;;  %17519 = vst [vmem:[#allocation76_spill] sm:$0xff] %v11091_v1  ;;  %v9200_v5 = vor.u32 %v10006_v30, %v9197_v15  ;;  %v11112_v30 = vmul.f32 %v10677_v43, %v10917_v40  ;;  %v9128_v11 = vor.u32 %v9989_v6, %v9125_v9  ;;  %v9990_v28 = vld [vmem:[#allocation6 + $0x30c] sm:$0xf]  ;;  %v11132_v6 = vpop.permute.xlu0 %2612  ;;  %v9973_v18 = vld [vmem:[#allocation6 + $0x284] sm:$0xf] }
  0xd8   :  { %17520 = vst [vmem:[#allocation77_spill] sm:$0xff] %v11094_v56  ;;  %v9132_v17 = vor.u32 %v9998_v37, %v9131_v13  ;;  %v9133_v15 = vld [vmem:[#allocation6 + $0x348] sm:$0xf0]  ;;  %v11122_v38 = vmul.f32 %v10685_v53, %v10917_v40  ;;  %v11126_v52 = vmul.f32 %v10675_v41, %v10937_v16  ;;  %v11144_v40 = vmul.f32 %v10675_v41, %v11029_v22  ;;  %v9061_v13 = vld [vmem:[#allocation6 + $0x2c0] sm:$0xf0] }
  0xd9   :  { %17521 = vst [vmem:[#allocation78_spill] sm:$0xff] %v11097_v49  ;;  %2217 = vmatpush.bf16.msra.mxu3 %v9200_v5  ;;  %v11155_v16 = vmul.f32 %v10679_v45, %v11029_v22  ;;  %2179 = vmatpush.bf16.msra.mxu0 %v9124_v60  ;;  %v9136_v5 = vor.u32 %v9990_v28, %v9133_v15  ;;  %v9067_v37 = vld [vmem:[#allocation6 + $0x288] sm:$0xf]  ;;  %v9069_v60 = vld [vmem:[#allocation6 + $0x2c8] sm:$0xf0] }
  0xda   :  { %17522 = vst [vmem:[#allocation79_spill] sm:$0xff] %v11104_v29  ;;  %2192 = vmatpush.bf16.msra.mxu1 %v9128_v11  ;;  %v9060_v9 = vor.u32 %v9981_v32, %v9059_v42  ;;  %v9982_v29 = vld [vmem:[#allocation6 + $0x2c4] sm:$0xf0]  ;;  %v11159_v49 = vmul.f32 %v10685_v53, %v11029_v22  ;;  %v2806_v56 = vpop.permute.xlu2 %2805  ;;  %2205 = vmatpush.bf16.msra.mxu2 %v9132_v17  ;;  %v10187_v11 = vld [vmem:[%s17033_s1 + $0x18] sm:$0xff] }
  0xdb   :  { %17523 = vst [vmem:[#allocation80_spill] sm:$0xff] %v11144_v40  ;;  %v9064_v1 = vor.u32 %v9973_v18, %v9061_v13  ;;  %v10188_v22 = vld [vmem:[%s17033_s1 + $0x30] sm:$0xff]  ;;  %v2944_v28 = vmul.f32 %v10955_v51, %v2806_v56  ;;  %v2945_v15 = vmul.f32 %v10957_v31, %v2806_v56  ;;  %v2946_v17 = vmul.f32 %v10959_v50, %v2806_v56  ;;  %v8995_v13 = vld [vmem:[#allocation6 + $0x200] sm:$0xf] }
  0xdc   :  { %17524 = vst [vmem:[#allocation81_spill] sm:$0xff] %v11148_v34  ;;  %v9068_v34 = vor.u32 %v9982_v29, %v9067_v37  ;;  %3213 = vperm.xlu0 %10165, %v10188_v22   ;;  %v11176_v29 = vmul.f32 %v10677_v43, %v11050_v44  ;;  %v11180_v42 = vmul.f32 %v10679_v45, %v11050_v44  ;;  %v9965_v37 = vld [vmem:[#allocation6 + $0x23c] sm:$0xf0] }
  0xdd   :  { %17525 = vst [vmem:[#allocation82_spill] sm:$0xff] %v11155_v16  ;;  %v9974_v16 = vld [vmem:[#allocation6 + $0x28c] sm:$0xf]  ;;  %v2947_v32 = vmul.f32 %v10971_v14, %v2806_v56  ;;  %2218 = vmatpush.bf16.msra.mxu3 %v9136_v5  ;;  %v11184_v22 = vadd.f32 %v2944_v28, %v10790_v61  ;;  %v11190_v40 = vadd.f32 %v2946_v17, %v10802_v20 }
  0xde   :  { %17526 = vst [vmem:[#allocation83_spill] sm:$0xff] %v11159_v49  ;;  %v9072_v18 = vor.u32 %v9974_v16, %v9069_v60  ;;  %v11187_v49 = vadd.f32 %v2945_v15, %v10794_v3  ;;  %2180 = vmatpush.bf16.msra.mxu0 %v9060_v9  ;;  %2193 = vmatpush.bf16.msra.mxu1 %v9064_v1  ;;  %v11195_v16 = vpop.permute.xlu1 %2632  ;;  %v9958_v28 = vld [vmem:[#allocation6 + $0x20c] sm:$0xf] }
  0xdf   :  { %17527 = vst [vmem:[#allocation84_spill] sm:$0xff] %v11163_v39  ;;  %3201 = vperm.xlu2 %10164, %v10187_v11   ;;  %v9957_v11 = vld [vmem:[#allocation6 + $0x204] sm:$0xf]  ;;  %v9966_v39 = vld [vmem:[#allocation6 + $0x244] sm:$0xf0]  ;;  %v11193_v56 = vadd.f32 %v2947_v32, %v10806_v63  ;;  %2206 = vmatpush.bf16.msra.mxu2 %v9068_v34  ;;  %v8996_v5 = vor.u32 %v9965_v37, %v8995_v13  ;;  %v11213_v9 = vpop.permute.xlu0 %2627  ;;  %v1240_v32 = vpop.f32.mrf.mxu1 }
  0xe0   :  { %17528 = vst [vmem:[#allocation85_spill] sm:$0xff] %v11176_v29  ;;  %v8997_v29 = vld [vmem:[#allocation6 + $0x240] sm:$0xf0]  ;;  %v9005_v3 = vld [vmem:[#allocation6 + $0x248] sm:$0xf0]  ;;  %v11199_v20 = vmul.f32 %v10685_v53, %v11050_v44  ;;  %v11203_v1 = vmul.f32 %v10675_v41, %v11114_v35  ;;  %v11207_v63 = vmul.f32 %v10677_v43, %v11114_v35  ;;  %v11211_v34 = vmul.f32 %v10679_v45, %v11114_v35 }
  0xe1   :  { %17529 = vst [vmem:[#allocation86_spill] sm:$0xff] %v11180_v42  ;;  %v9003_v42 = vld [vmem:[#allocation6 + $0x208] sm:$0xf]  ;;  %v9000_v61 = vor.u32 %v9957_v11, %v8997_v29  ;;  %v11217_v15 = vmul.f32 %v10685_v53, %v11114_v35  ;;  %v11221_v44 = vmul.f32 %v10675_v41, %v11132_v6  ;;  %v11225_v17 = vmul.f32 %v10677_v43, %v11132_v6  ;;  %v8931_v35 = vld [vmem:[#allocation6 + $0x180] sm:$0xf] }
  0xe2   :  { %17530 = vst [vmem:[#allocation87_spill] sm:$0xff] %v11184_v22  ;;  %v9004_v60 = vor.u32 %v9966_v39, %v9003_v42  ;;  %v1227_v39 = vpop.f32.mrf.mxu0  ;;  %v11229_v29 = vmul.f32 %v10679_v45, %v11132_v6  ;;  %v10189_v42 = vld [vmem:[%s17033_s1 + $0x20] sm:$0xff]  ;;  %v9949_v13 = vld [vmem:[#allocation6 + $0x1bc] sm:$0xf0]  ;;  %v9941_v37 = vld [vmem:[#allocation6 + $0x184] sm:$0xf]  ;;  %2219 = vmatpush.bf16.msra.mxu3 %v9072_v18  ;;  %2181 = vmatpush.bf16.msra.mxu0 %v8996_v5 }
  0xe3   :  { %17531 = vst [vmem:[#allocation88_spill] sm:$0xff] %v11187_v49  ;;  %3205 = vperm.xlu1 %10166, %v10189_v42   ;;  %v1228_v11 = vadd.f32 %v1227_v39, %v11031_v55  ;;  %v8933_v49 = vld [vmem:[#allocation6 + $0x1c0] sm:$0xf0]  ;;  %v8939_v22 = vld [vmem:[#allocation6 + $0x188] sm:$0xf]  ;;  %2194 = vmatpush.bf16.msra.mxu1 %v9000_v61 }
  0xe4   :  { %17532 = vst [vmem:[#allocation89_spill] sm:$0xff] %v11190_v40  ;;  %v8932_v40 = vor.u32 %v9949_v13, %v8931_v35  ;;  %2207 = vmatpush.bf16.msra.mxu2 %v9004_v60  ;;  %v8936_v42 = vor.u32 %v9941_v37, %v8933_v49  ;;  %v10190_v55 = vld [vmem:[%s17033_s1 + $0x28] sm:$0xff]  ;;  %v11250_v49 = vmul.f32 %v10675_v41, %v11195_v16  ;;  %v1253_v37 = vpop.f32.mrf.mxu2 }
  0xe5   :  { %17533 = vst [vmem:[#allocation90_spill] sm:$0xff] %v11193_v56  ;;  %v9008_v56 = vor.u32 %v9958_v28, %v9005_v3  ;;  %v10191_v18 = vld [vmem:[%s17033_s1 + $0x48] sm:$0xff]  ;;  %v1241_v60 = vadd.f32 %v1240_v32, %v1228_v11  ;;  %v8875_v32 = vld [vmem:[#allocation6 + $0x108] sm:$0xf] }
  0xe6   :  { %17534 = vst [vmem:[#allocation91_spill] sm:$0xff] %v11203_v1  ;;  %3225 = vperm.xlu0 %10165, %v10191_v18   ;;  %v8867_v3 = vld [vmem:[#allocation6 + $0x100] sm:$0xf]  ;;  %2182 = vmatpush.bf16.msra.mxu0 %v8932_v40  ;;  %v9934_v11 = vld [vmem:[#allocation6 + $0x144] sm:$0xf0]  ;;  %v11275_v40 = vmul.f32 %v10679_v45, %v11195_v16 }
  0xe7   :  { %17535 = vst [vmem:[#allocation92_spill] sm:$0xff] %v11207_v63  ;;  %v2814_v63 = vpop.permute.xlu2 %2813  ;;  %3209 = vperm.xlu2 %10164, %v10190_v55   ;;  %v9933_v39 = vld [vmem:[#allocation6 + $0x13c] sm:$0xf0]  ;;  %2220 = vmatpush.bf16.msra.mxu3 %v9008_v56  ;;  %v9925_v55 = vld [vmem:[#allocation6 + $0x104] sm:$0xf]  ;;  %v11279_v56 = vmul.f32 %v10685_v53, %v11195_v16 }
  0xe8   :  { %17536 = vst [vmem:[#allocation93_spill] sm:$0xff] %v11211_v34  ;;  %v11237_v34 = vmul.f32 %v10685_v53, %v11132_v6  ;;  %v2952_v6 = vmul.f32 %v10955_v51, %v2814_v63  ;;  %v2953_v5 = vmul.f32 %v10957_v31, %v2814_v63  ;;  %v2954_v61 = vmul.f32 %v10959_v50, %v2814_v63  ;;  %v9926_v18 = vld [vmem:[#allocation6 + $0x10c] sm:$0xf] }
  0xe9   :  { %17537 = vst [vmem:[#allocation94_spill] sm:$0xff] %v11217_v15  ;;  %v9950_v15 = vld [vmem:[#allocation6 + $0x1c4] sm:$0xf0]  ;;  %2195 = vmatpush.bf16.msra.mxu1 %v8936_v42  ;;  %v11287_v42 = vmul.f32 %v10677_v43, %v11213_v9 }
  0xea   :  { %17538 = vst [vmem:[#allocation95_spill] sm:$0xff] %v11225_v17  ;;  %v8940_v1 = vor.u32 %v9950_v15, %v8939_v22  ;;  %v8941_v17 = vld [vmem:[#allocation6 + $0x1c8] sm:$0xf0]  ;;  %v2955_v22 = vmul.f32 %v10971_v14, %v2814_v63  ;;  %v11254_v15 = vadd.f32 %v2952_v6, %v10708_v48  ;;  %v11257_v35 = vadd.f32 %v2953_v5, %v10712_v12  ;;  %v11271_v48 = vpop.f32.mrf.mxu3 }
  0xeb   :  { %17539 = vst [vmem:[#allocation96_spill] sm:$0xff] %v11229_v29  ;;  %v9942_v29 = vld [vmem:[#allocation6 + $0x18c] sm:$0xf]  ;;  %v11260_v13 = vadd.f32 %v2954_v61, %v10716_v25  ;;  %v11264_v63 = vmul.f32 %v10677_v43, %v11195_v16  ;;  %v8868_v12 = vor.u32 %v9933_v39, %v8867_v3  ;;  %v8869_v25 = vld [vmem:[#allocation6 + $0x140] sm:$0xf0]  ;;  %v11291_v5 = vmul.f32 %v10679_v45, %v11213_v9  ;;  %v10192_v16 = vld [vmem:[%s17033_s1 + $0x38] sm:$0xff]  ;;  %v2643_v3 = vpop.permute.xlu0 %2642 }
  0xec   :  { %17540 = vst [vmem:[#allocation97_spill] sm:$0xff] %v11250_v49  ;;  %v8944_v28 = vor.u32 %v9942_v29, %v8941_v17  ;;  %v11267_v17 = vadd.f32 %v2955_v22, %v10720_v57  ;;  %v11269_v29 = vpop.permute.xlu1 %2647  ;;  %2208 = vmatpush.bf16.msra.mxu2 %v8940_v1  ;;  %v11283_v57 = vmul.f32 %v10675_v41, %v11213_v9  ;;  %v1229_v1 = vpop.f32.mrf.mxu0  ;;  %v8877_v6 = vld [vmem:[#allocation6 + $0x148] sm:$0xf0] }
  0xed   :  { %17541 = vst [vmem:[#allocation98_spill] sm:$0xff] %v11254_v15  ;;  %v11295_v61 = vmul.f32 %v10685_v53, %v11213_v9  ;;  %3217 = vperm.xlu1 %10166, %v10192_v16   ;;  %v11302_v22 = vmul.f32 %v10675_v41, %v11269_v29  ;;  %v1254_v39 = vadd.f32 %v1253_v37, %v1241_v60  ;;  %v1242_v1 = vpop.f32.mrf.mxu1  ;;  %v8811_v16 = vld [vmem:[#allocation6 + $0x88] sm:$0xf] }
  0xee   :  { %17542 = vst [vmem:[#allocation99_spill] sm:$0xff] %v11257_v35  ;;  %v9909_v35 = vld [vmem:[#allocation6 + $0x84] sm:$0xf]  ;;  %v11306_v15 = vmul.f32 %v10677_v43, %v11269_v29  ;;  %2221 = vmatpush.bf16.msra.mxu3 %v8944_v28  ;;  %2183 = vmatpush.bf16.msra.mxu0 %v8868_v12  ;;  %v8872_v9 = vor.u32 %v9925_v55, %v8869_v25  ;;  %v10193_v28 = vld [vmem:[%s17033_s1 + $0x40] sm:$0xff]  ;;  %v10194_v55 = vld [vmem:[%s17033_s1 + $0x90] sm:$0xff] }
  0xef   :  { %17543 = vst [vmem:[#allocation100_spill] sm:$0xff] %v11260_v13  ;;  %v9917_v13 = vld [vmem:[#allocation6 + $0xbc] sm:$0xf0]  ;;  %v2826_v60 = vpop.permute.xlu2 %2825  ;;  %v8880_v37 = vor.u32 %v9926_v18, %v8877_v6  ;;  %3221 = vperm.xlu2 %10164, %v10193_v28   ;;  %3261 = vperm.xlu0 %10165, %v10194_v55   ;;  %v9893_v18 = vld [vmem:[#allocation6 + $0x4] sm:$0xf] }
  0xf0   :  { %17544 = vst [vmem:[#allocation101_spill] sm:$0xff] %v11264_v63  ;;  %v9918_v63 = vld [vmem:[#allocation6 + $0xc4] sm:$0xf0]  ;;  %v2964_v12 = vmul.f32 %v10955_v51, %v2826_v60  ;;  %v2965_v25 = vmul.f32 %v10957_v31, %v2826_v60  ;;  %2196 = vmatpush.bf16.msra.mxu1 %v8872_v9 }
  0xf1   :  { %17545 = vst [vmem:[#allocation102_spill] sm:$0xff] %v11267_v17  ;;  %v8803_v17 = vld [vmem:[#allocation6 + $0x80] sm:$0xf]  ;;  %v8747_v9 = vld [vmem:[#allocation6 + $0x8] sm:$0xf] }
  0xf2   :  { %17546 = vst [vmem:[#allocation103_spill] sm:$0xff] %v11275_v40  ;;  %v8805_v40 = vld [vmem:[#allocation6 + $0xc0] sm:$0xf0]  ;;  %v8804_v1 = vor.u32 %v9917_v13, %v8803_v17  ;;  %v8812_v13 = vor.u32 %v9918_v63, %v8811_v16  ;;  %v11323_v6 = vadd.f32 %v2964_v12, %v10724_v7  ;;  %v11326_v28 = vadd.f32 %v2965_v25, %v10728_v58  ;;  %v1268_v58 = vpop.f32.mrf.mxu3  ;;  %v8749_v16 = vld [vmem:[#allocation6 + $0x48] sm:$0xf0] }
  0xf3   :  { %17547 = vst [vmem:[#allocation104_spill] sm:$0xff] %v11279_v56  ;;  %v8876_v56 = vor.u32 %v9934_v11, %v8875_v32  ;;  %v8808_v49 = vor.u32 %v9909_v35, %v8805_v40  ;;  %v2966_v32 = vmul.f32 %v10959_v50, %v2826_v60  ;;  %v2967_v35 = vmul.f32 %v10971_v14, %v2826_v60  ;;  %v8739_v11 = vld [vmem:[#allocation6] sm:$0xf]  ;;  %v8741_v60 = vld [vmem:[#allocation6 + $0x40] sm:$0xf0] }
  0xf4   :  { %17548 = vst [vmem:[#allocation105_spill] sm:$0xff] %v11291_v5  ;;  %v8813_v5 = vld [vmem:[#allocation6 + $0xc8] sm:$0xf0]  ;;  %v9901_v40 = vld [vmem:[#allocation6 + $0x3c] sm:$0xf0]  ;;  %2222 = vmatpush.bf16.msra.mxu3 %v8880_v37  ;;  %2184 = vmatpush.bf16.msra.mxu0 %v8804_v1  ;;  %v11333_v63 = vmul.f32 %v10685_v53, %v11269_v29  ;;  %v11342_v37 = vmul.f32 %v10677_v43, %v2643_v3  ;;  %v2802_v58 = vpop.permute.xlu1 %2801 }
  0xf5   :  { %17549 = vst [vmem:[#allocation106_spill] sm:$0xff] %v11295_v61  ;;  %v9910_v61 = vld [vmem:[#allocation6 + $0x8c] sm:$0xf]  ;;  %2209 = vmatpush.bf16.msra.mxu2 %v8876_v56  ;;  %v11329_v55 = vadd.f32 %v2966_v32, %v10734_v59  ;;  %v9902_v56 = vld [vmem:[#allocation6 + $0x44] sm:$0xf0]  ;;  %v11339_v7 = vadd.f32 %v2967_v35, %v10738_v2  ;;  %v11345_v1 = vmul.f32 %v10679_v45, %v2643_v3  ;;  %v10195_v32 = vld [vmem:[%s17033_s1 + $0x80] sm:$0xff] }
  0xf6   :  { %17550 = vst [vmem:[#allocation107_spill] sm:$0xff] %v11302_v22  ;;  %v11310_v22 = vmul.f32 %v10679_v45, %v11269_v29  ;;  %v8816_v17 = vor.u32 %v9910_v61, %v8813_v5  ;;  %v11336_v5 = vmul.f32 %v10675_v41, %v2643_v3  ;;  %v8740_v61 = vor.u32 %v9901_v40, %v8739_v11  ;;  %v9894_v59 = vld [vmem:[#allocation6 + $0xc] sm:$0xf]  ;;  %v10015_v12 = vld [vmem:[#allocation6 + $0x3cc] sm:$0xf0] }
  0xf7   :  { %17551 = vst [vmem:[#allocation108_spill] sm:$0xff] %v11306_v15  ;;  %v11348_v29 = vmul.f32 %v10685_v53, %v2643_v3  ;;  %v11351_v41 = vadd.f32 %v11271_v48, %v1254_v39  ;;  %v10007_v2 = vld [vmem:[#allocation6 + $0x394] sm:$0xf]  ;;  %3253 = vperm.xlu1 %10166, %v10195_v32   ;;  %2197 = vmatpush.bf16.msra.mxu1 %v8808_v49  ;;  %v9211_v45 = vld [vmem:[#allocation6 + $0x398] sm:$0xf]  ;;  %v2838_v49 = vpop.permute.xlu2 %2837 }
  0xf8   :  { %17552 = vst [vmem:[#allocation109_spill] sm:$0xff] %v11310_v22  ;;  %v1255_v22 = vpop.f32.mrf.mxu2  ;;  %v9205_v25 = vld [vmem:[#allocation6 + $0x3d0] sm:$0xf0]  ;;  %v8744_v43 = vor.u32 %v9893_v18, %v8741_v60  ;;  %v8748_v35 = vor.u32 %v9902_v56, %v8747_v9  ;;  %v8752_v11 = vor.u32 %v9894_v59, %v8749_v16  ;;  %v10016_v40 = vld [vmem:[#allocation6 + $0x3d4] sm:$0xf0]  ;;  %2223 = vmatpush.bf16.msra.mxu3 %v8816_v17  ;;  %v2798_v18 = vpop.permute.xlu0 %2797  ;;  %v10196_v60 = vld [vmem:[%s17033_s1 + $0x88] sm:$0xff] }
  0xf9   :  { %17553 = vst [vmem:[#allocation110_spill] sm:$0xff] %v11333_v63  ;;  %v9203_v22 = vld [vmem:[#allocation6 + $0x390] sm:$0xf]  ;;  %2210 = vmatpush.bf16.msra.mxu2 %v8812_v13  ;;  %v9208_v48 = vor.u32 %v10007_v2, %v9205_v25  ;;  %v9212_v3 = vor.u32 %v10016_v40, %v9211_v45  ;;  %v2940_v39 = vmul.f32 %v10955_v51, %v2802_v58  ;;  %v10197_v13 = vld [vmem:[%s17033_s1 + $0xa8] sm:$0xff]  ;;  %v10008_v59 = vld [vmem:[#allocation6 + $0x39c] sm:$0xf] }
  0xfa   :  { %17554 = vst [vmem:[#allocation111_spill] sm:$0xff] %v11336_v5  ;;  %v9204_v53 = vor.u32 %v10015_v12, %v9203_v22  ;;  %v2941_v63 = vmul.f32 %v10957_v31, %v2802_v58  ;;  %v2942_v15 = vmul.f32 %v10959_v50, %v2802_v58  ;;  %v2943_v32 = vmul.f32 %v10971_v14, %v2802_v58  ;;  %v9213_v2 = vld [vmem:[#allocation6 + $0x3d8] sm:$0xf0]  ;;  %v9139_v25 = vld [vmem:[#allocation6 + $0x310] sm:$0xf] }
  0xfb   :  { %17555 = vst [vmem:[#allocation112_spill] sm:$0xff] %v11342_v37  ;;  %2185 = vmatpush.bf16.msra.mxu0 %v8740_v61  ;;  %3257 = vperm.xlu2 %10164, %v10196_v60   ;;  %v2976_v17 = vmul.f32 %v10955_v51, %v2838_v49  ;;  %v2977_v9 = vmul.f32 %v10957_v31, %v2838_v49  ;;  %v9999_v45 = vld [vmem:[#allocation6 + $0x34c] sm:$0xf0] }
  0xfc   :  { %17556 = vst [vmem:[#allocation113_spill] sm:$0xff] %v11345_v1  ;;  %3273 = vperm.xlu0 %10165, %v10197_v13   ;;  %v2978_v56 = vmul.f32 %v10959_v50, %v2838_v49  ;;  %v11370_v16 = vadd.f32 %v2940_v39, %v10758_v54  ;;  %v11373_v61 = vadd.f32 %v2941_v63, %v10762_v23  ;;  %v17584_v1 = vld [vmem:[#allocation32_spill] sm:$0xff]  ;;  %v11459_v5 = vld [vmem:[#allocation6 + $0x24c] sm:$0xf0] }
  0xfd   :  { %17557 = vst [vmem:[#allocation114_spill] sm:$0xff] %v11348_v29  ;;  %v11376_v22 = vadd.f32 %v2942_v15, %v10766_v36  ;;  %v11379_v12 = vadd.f32 %v2943_v32, %v10770_v4  ;;  %2198 = vmatpush.bf16.msra.mxu1 %v8744_v43  ;;  %v2979_v40 = vmul.f32 %v10971_v14, %v2838_v49  ;;  %v9991_v36 = vld [vmem:[#allocation6 + $0x314] sm:$0xf]  ;;  %v9147_v4 = vld [vmem:[#allocation6 + $0x318] sm:$0xf] }
  0xfe   :  { %17558 = vst [vmem:[#allocation115_spill] sm:$0xff] %v11370_v16  ;;  %v11383_v58 = vadd.f32 %v2976_v17, %v10742_v62  ;;  %v11386_v54 = vadd.f32 %v2977_v9, %v10746_v24  ;;  %v11389_v23 = vadd.f32 %v2978_v56, %v10750_v47  ;;  %2211 = vmatpush.bf16.msra.mxu2 %v8748_v35  ;;  %v9141_v15 = vld [vmem:[#allocation6 + $0x350] sm:$0xf0]  ;;  %v10000_v62 = vld [vmem:[#allocation6 + $0x354] sm:$0xf0]  ;;  %v17568_v9 = vld [vmem:[#allocation23_spill] sm:$0xff] }
  0xff   :  { %17559 = vst [vmem:[#allocation116_spill] sm:$0xff] %v11373_v61  ;;  %v2936_v63 = vmul.f32 %v10955_v51, %v2798_v18  ;;  %v2937_v43 = vmul.f32 %v10957_v31, %v2798_v18  ;;  %v2938_v39 = vmul.f32 %v10959_v50, %v2798_v18  ;;  %v2939_v32 = vmul.f32 %v10971_v14, %v2798_v18  ;;  %v11395_v49 = vld [vmem:[#allocation6 + $0x31c] sm:$0xf] }
 0x100   :  { %17560 = vst [vmem:[#allocation117_spill] sm:$0xff] %v11376_v22  ;;  %2224 = vmatpush.bf16.msra.mxu3 %v8752_v11  ;;  %v9149_v24 = vld [vmem:[#allocation6 + $0x358] sm:$0xf0]  ;;  %v11398_v47 = vadd.f32 %v2979_v40, %v10754_v8  ;;  %2230 = vmatpush.bf16.msrb.mxu0 %v9204_v53  ;;  %v9216_v35 = vor.u32 %v10008_v59, %v9213_v2  ;;  %v17570_v11 = vld [vmem:[#allocation24_spill] sm:$0xff]  ;;  %v10198_v8 = vld [vmem:[%s17033_s1 + $0x98] sm:$0xff]  ;;  %v2810_v53 = vpop.permute.xlu1 %2809  ;;  %v2818_v40 = vpop.permute.xlu0 %2817 }
 0x101   :  { %17561 = vst [vmem:[#allocation118_spill] sm:$0xff] %v11379_v12  ;;  %2243 = vmatpush.bf16.msrb.mxu1 %v9208_v48  ;;  %v9140_v60 = vor.u32 %v9999_v45, %v9139_v25  ;;  %v11401_v13 = vadd.f32 %v2936_v63, %v10810_v21  ;;  %v11404_v17 = vadd.f32 %v2937_v43, %v10814_v27  ;;  %v10199_v63 = vld [vmem:[%s17033_s1 + $0xa0] sm:$0xff]  ;;  %v9075_v43 = vld [vmem:[#allocation6 + $0x290] sm:$0xf]  ;;  %v17709_v22 = vld [vmem:[#allocation83_spill] sm:$0xff] }
 0x102   :  { %17562 = vst [vmem:[#allocation119_spill] sm:$0xff] %v11383_v58  ;;  %v11407_v18 = vadd.f32 %v2938_v39, %v17568_v9  ;;  %v11410_v56 = vadd.f32 %v2939_v32, %v17570_v11  ;;  %3265 = vperm.xlu1 %10166, %v10198_v8   ;;  %2256 = vmatpush.bf16.msrb.mxu2 %v9212_v3  ;;  %v10200_v3 = vld [vmem:[%s17033_s1 + $0xc0] sm:$0xff]  ;;  %v9983_v39 = vld [vmem:[#allocation6 + $0x2cc] sm:$0xf0]  ;;  %v9975_v32 = vld [vmem:[#allocation6 + $0x294] sm:$0xf] }
 0x103   :  { %17563 = vst [vmem:[#allocation120_spill] sm:$0xff] %v11386_v54  ;;  %v9144_v48 = vor.u32 %v9991_v36, %v9141_v15  ;;  %v9148_v21 = vor.u32 %v10000_v62, %v9147_v4  ;;  %v9152_v59 = vor.u32 %v11395_v49, %v9149_v24  ;;  %v2948_v27 = vmul.f32 %v10955_v51, %v2810_v53  ;;  %v17572_v62 = vld [vmem:[#allocation15_spill] sm:$0xff]  ;;  %v17574_v24 = vld [vmem:[#allocation16_spill] sm:$0xff]  ;;  %v17576_v9 = vld [vmem:[#allocation17_spill] sm:$0xff] }
 0x104   :  { %17564 = vst [vmem:[#allocation121_spill] sm:$0xff] %v11389_v23  ;;  %2269 = vmatpush.bf16.msrb.mxu3 %v9216_v35  ;;  %v2949_v2 = vmul.f32 %v10957_v31, %v2810_v53  ;;  %v2950_v25 = vmul.f32 %v10959_v50, %v2810_v53  ;;  %v2951_v45 = vmul.f32 %v10971_v14, %v2810_v53  ;;  %v17578_v8 = vld [vmem:[#allocation18_spill] sm:$0xff] }
 0x105   :  { %17565 = vst [vmem:[#allocation122_spill] sm:$0xff] %v11398_v47  ;;  %3269 = vperm.xlu2 %10164, %v10199_v63   ;;  %3285 = vperm.xlu0 %10165, %v10200_v3   ;;  %v2956_v36 = vmul.f32 %v10955_v51, %v2818_v40  ;;  %v2957_v15 = vmul.f32 %v10957_v31, %v2818_v40  ;;  %v2850_v63 = vpop.permute.xlu2 %2849  ;;  %v9077_v3 = vld [vmem:[#allocation6 + $0x2d0] sm:$0xf0]  ;;  %v9083_v47 = vld [vmem:[#allocation6 + $0x298] sm:$0xf] }
 0x106   :  { %17566 = vst [vmem:[#allocation123_spill] sm:$0xff] %v11401_v13  ;;  %v2958_v4 = vmul.f32 %v10959_v50, %v2818_v40  ;;  %v11430_v49 = vadd.f32 %v2948_v27, %v17572_v62  ;;  %v11433_v35 = vadd.f32 %v2949_v2, %v17574_v24  ;;  %v11436_v11 = vadd.f32 %v2950_v25, %v17576_v9  ;;  %v9984_v23 = vld [vmem:[#allocation6 + $0x2d4] sm:$0xf0]  ;;  %v11445_v62 = vld [vmem:[#allocation6 + $0x29c] sm:$0xf] }
 0x107   :  { %17567 = vst [vmem:[#allocation124_spill] sm:$0xff] %v11404_v17  ;;  %v11439_v53 = vadd.f32 %v2951_v45, %v17578_v8  ;;  %2231 = vmatpush.bf16.msrb.mxu0 %v9140_v60  ;;  %v2988_v54 = vmul.f32 %v10955_v51, %v2850_v63  ;;  %v2989_v58 = vmul.f32 %v10957_v31, %v2850_v63  ;;  %v9085_v25 = vld [vmem:[#allocation6 + $0x2d8] sm:$0xf0]  ;;  %v11447_v24 = vld [vmem:[#allocation6 + $0x210] sm:$0xf]  ;;  %v17582_v8 = vld [vmem:[#allocation31_spill] sm:$0xff] }
 0x108   :  { %17569 = vst [vmem:[#allocation23_spill] sm:$0xff] %v11407_v18  ;;  %v2990_v27 = vmul.f32 %v10959_v50, %v2850_v63  ;;  %v2991_v2 = vmul.f32 %v10971_v14, %v2850_v63  ;;  %2244 = vmatpush.bf16.msrb.mxu1 %v9144_v48  ;;  %v2959_v45 = vmul.f32 %v10971_v14, %v2818_v40  ;;  %v17580_v60 = vld [vmem:[#allocation29_spill] sm:$0xff]  ;;  %v17588_v40 = vld [vmem:[#allocation20_spill] sm:$0xff] }
 0x109   :  { %17571 = vst [vmem:[#allocation24_spill] sm:$0xff] %v11410_v56  ;;  %v11451_v9 = vadd.f32 %v2956_v36, %v17580_v60  ;;  %v11454_v29 = vadd.f32 %v2957_v15, %v17582_v8  ;;  %v11457_v37 = vadd.f32 %v2958_v4, %v17584_v1  ;;  %2257 = vmatpush.bf16.msrb.mxu2 %v9148_v21  ;;  %v11461_v48 = vld [vmem:[#allocation6 + $0x214] sm:$0xf]  ;;  %v17592_v15 = vld [vmem:[#allocation22_spill] sm:$0xff]  ;;  %v1279_v4 = vpop.f32.mrf.mxu0 }
 0x10a   :  { %17573 = vst [vmem:[#allocation15_spill] sm:$0xff] %v11430_v49  ;;  %v11463_v63 = vld [vmem:[#allocation6 + $0x250] sm:$0xf0]  ;;  %v11475_v8 = vadd.f32 %v2991_v2, %v17592_v15  ;;  %2270 = vmatpush.bf16.msrb.mxu3 %v9152_v59  ;;  %v10201_v49 = vld [vmem:[%s17033_s1 + $0xb0] sm:$0xff]  ;;  %v9088_v2 = vor.u32 %v11445_v62, %v9085_v25  ;;  %v9012_v59 = vor.u32 %v11459_v5, %v11447_v24  ;;  %v17598_v25 = vld [vmem:[#allocation26_spill] sm:$0xff] }
 0x10b   :  { %17575 = vst [vmem:[#allocation16_spill] sm:$0xff] %v11433_v35  ;;  %v11469_v35 = vadd.f32 %v2989_v58, %v17588_v40  ;;  %v17590_v36 = vld [vmem:[#allocation21_spill] sm:$0xff]  ;;  %3277 = vperm.xlu1 %10166, %v10201_v49   ;;  %v9084_v58 = vor.u32 %v9984_v23, %v9083_v47  ;;  %v1280_v40 = vadd.f32 %v1279_v4, %v11351_v41  ;;  %v2830_v47 = vpop.permute.xlu0 %2829  ;;  %v10203_v5 = vld [vmem:[%s17033_s1 + $0xd0] sm:$0xff] }
 0x10c   :  { %17577 = vst [vmem:[#allocation17_spill] sm:$0xff] %v11436_v11  ;;  %v11472_v60 = vadd.f32 %v2990_v27, %v17590_v36  ;;  %v17594_v1 = vld [vmem:[#allocation33_spill] sm:$0xff]  ;;  %v1292_v27 = vpop.f32.mrf.mxu1  ;;  %v2822_v36 = vpop.permute.xlu1 %2821  ;;  %v2969_v49 = vmul.f32 %v10957_v31, %v2830_v47  ;;  %v17602_v4 = vld [vmem:[#allocation28_spill] sm:$0xff] }
 0x10d   :  { %17579 = vst [vmem:[#allocation18_spill] sm:$0xff] %v11439_v53  ;;  %v17586_v53 = vld [vmem:[#allocation19_spill] sm:$0xff]  ;;  %v11478_v21 = vadd.f32 %v2959_v45, %v17594_v1  ;;  %v9016_v45 = vor.u32 %v11461_v48, %v11463_v63  ;;  %v2960_v15 = vmul.f32 %v10955_v51, %v2822_v36  ;;  %v2961_v1 = vmul.f32 %v10957_v31, %v2822_v36  ;;  %v10202_v41 = vld [vmem:[%s17033_s1 + $0xb8] sm:$0xff] }
 0x10e   :  { %17581 = vst [vmem:[#allocation29_spill] sm:$0xff] %v11451_v9  ;;  %v11466_v11 = vadd.f32 %v2988_v54, %v17586_v53  ;;  %v9076_v54 = vor.u32 %v9983_v39, %v9075_v43  ;;  %v9080_v53 = vor.u32 %v9975_v32, %v9077_v3  ;;  %v2962_v43 = vmul.f32 %v10959_v50, %v2822_v36  ;;  %v17596_v3 = vld [vmem:[#allocation25_spill] sm:$0xff]  ;;  %v17600_v48 = vld [vmem:[#allocation27_spill] sm:$0xff]  ;;  %v11611_v9 = vld [vmem:[#allocation6 + $0x158] sm:$0xf0] }
 0x10f   :  { %17583 = vst [vmem:[#allocation31_spill] sm:$0xff] %v11454_v29  ;;  %v2963_v23 = vmul.f32 %v10971_v14, %v2822_v36  ;;  %3281 = vperm.xlu2 %10164, %v10202_v41   ;;  %3293 = vperm.xlu0 %10165, %v10203_v5   ;;  %v1293_v39 = vadd.f32 %v1292_v27, %v1280_v40  ;;  %v2862_v36 = vpop.permute.xlu2 %2861  ;;  %v9019_v41 = vld [vmem:[#allocation6 + $0x218] sm:$0xf] }
 0x110   :  { %17585 = vst [vmem:[#allocation32_spill] sm:$0xff] %v11457_v37  ;;  %2232 = vmatpush.bf16.msrb.mxu0 %v9076_v54  ;;  %v2968_v32 = vmul.f32 %v10955_v51, %v2830_v47  ;;  %v11502_v62 = vadd.f32 %v2960_v15, %v17596_v3  ;;  %v11505_v24 = vadd.f32 %v2961_v1, %v17598_v25  ;;  %v9968_v40 = vld [vmem:[#allocation6 + $0x254] sm:$0xf0]  ;;  %v9960_v1 = vld [vmem:[#allocation6 + $0x21c] sm:$0xf] }
 0x111   :  { %17587 = vst [vmem:[#allocation19_spill] sm:$0xff] %v11466_v11  ;;  %v11508_v63 = vadd.f32 %v2962_v43, %v17600_v48  ;;  %v11511_v54 = vadd.f32 %v2963_v23, %v17602_v4  ;;  %2245 = vmatpush.bf16.msrb.mxu1 %v9080_v53  ;;  %v3000_v27 = vmul.f32 %v10955_v51, %v2862_v36  ;;  %v9021_v25 = vld [vmem:[#allocation6 + $0x258] sm:$0xf0]  ;;  %v11517_v43 = vld [vmem:[#allocation6 + $0x190] sm:$0xf] }
 0x112   :  { %17589 = vst [vmem:[#allocation20_spill] sm:$0xff] %v11469_v35  ;;  %v3001_v5 = vmul.f32 %v10957_v31, %v2862_v36  ;;  %v3002_v15 = vmul.f32 %v10959_v50, %v2862_v36  ;;  %v3003_v3 = vmul.f32 %v10971_v14, %v2862_v36  ;;  %2258 = vmatpush.bf16.msrb.mxu2 %v9084_v58  ;;  %v17604_v53 = vld [vmem:[#allocation41_spill] sm:$0xff]  ;;  %v1305_v35 = vpop.f32.mrf.mxu2  ;;  %v17608_v36 = vld [vmem:[#allocation30_spill] sm:$0xff] }
 0x113   :  { %17591 = vst [vmem:[#allocation21_spill] sm:$0xff] %v11472_v60  ;;  %v2970_v23 = vmul.f32 %v10959_v50, %v2830_v47  ;;  %v2971_v48 = vmul.f32 %v10971_v14, %v2830_v47  ;;  %v11522_v4 = vadd.f32 %v2968_v32, %v17604_v53  ;;  %2271 = vmatpush.bf16.msrb.mxu3 %v9088_v2  ;;  %v9951_v11 = vld [vmem:[#allocation6 + $0x1cc] sm:$0xf0]  ;;  %v11529_v58 = vld [vmem:[#allocation6 + $0x1d0] sm:$0xf0]  ;;  %v17612_v47 = vld [vmem:[#allocation35_spill] sm:$0xff] }
 0x114   :  { %17593 = vst [vmem:[#allocation22_spill] sm:$0xff] %v11475_v8  ;;  %v17606_v8 = vld [vmem:[#allocation42_spill] sm:$0xff]  ;;  %v17614_v32 = vld [vmem:[#allocation36_spill] sm:$0xff]  ;;  %2233 = vmatpush.bf16.msrb.mxu0 %v9012_v59  ;;  %v17616_v2 = vld [vmem:[#allocation43_spill] sm:$0xff]  ;;  %v1306_v37 = vadd.f32 %v1305_v35, %v1293_v39  ;;  %v8948_v59 = vor.u32 %v9951_v11, %v11517_v43 }
 0x115   :  { %17595 = vst [vmem:[#allocation33_spill] sm:$0xff] %v11478_v21  ;;  %v11525_v60 = vadd.f32 %v2969_v49, %v17606_v8  ;;  %v11538_v21 = vadd.f32 %v3002_v15, %v17612_v47  ;;  %v11541_v53 = vadd.f32 %v3003_v3, %v17614_v32  ;;  %v1318_v8 = vpop.f32.mrf.mxu3  ;;  %v11544_v49 = vadd.f32 %v2970_v23, %v17616_v2  ;;  %v1294_v15 = vpop.f32.mrf.mxu1  ;;  %v10206_v11 = vld [vmem:[%s17033_s1 + $0x60] sm:$0xff]  ;;  %v17620_v43 = vld [vmem:[#allocation37_spill] sm:$0xff]  ;;  %v17624_v2 = vld [vmem:[#allocation39_spill] sm:$0xff] }
 0x116   :  { %17597 = vst [vmem:[#allocation25_spill] sm:$0xff] %v11502_v62  ;;  %2246 = vmatpush.bf16.msrb.mxu1 %v9016_v45  ;;  %v9020_v3 = vor.u32 %v9968_v40, %v9019_v41  ;;  %v11555_v47 = vadd.f32 %v1318_v8, %v1306_v37  ;;  %v10205_v45 = vld [vmem:[%s17033_s1 + $0x50] sm:$0xff]  ;;  %v8955_v40 = vld [vmem:[#allocation6 + $0x198] sm:$0xf]  ;;  %v11581_v15 = vld [vmem:[#allocation6 + $0x1d8] sm:$0xf0] }
 0x117   :  { %17599 = vst [vmem:[#allocation26_spill] sm:$0xff] %v11505_v24  ;;  %v17610_v24 = vld [vmem:[#allocation34_spill] sm:$0xff]  ;;  %3229 = vperm.xlu2 %10164, %v10205_v45   ;;  %3237 = vperm.xlu0 %10165, %v10206_v11   ;;  %v11583_v45 = vld [vmem:[#allocation6 + $0x110] sm:$0xf] }
 0x118   :  { %17601 = vst [vmem:[#allocation27_spill] sm:$0xff] %v11508_v63  ;;  %v11532_v63 = vadd.f32 %v3000_v27, %v17608_v36  ;;  %v11535_v62 = vadd.f32 %v3001_v5, %v17610_v24  ;;  %v10204_v24 = vld [vmem:[%s17033_s1 + $0xc8] sm:$0xff]  ;;  %v1281_v27 = vpop.f32.mrf.mxu0  ;;  %v2834_v5 = vpop.permute.xlu1 %2833  ;;  %v9024_v36 = vor.u32 %v9960_v1, %v9021_v25  ;;  %v9952_v1 = vld [vmem:[#allocation6 + $0x1d4] sm:$0xf0]  ;;  %v11569_v25 = vld [vmem:[#allocation6 + $0x19c] sm:$0xf]  ;;  %2259 = vmatpush.bf16.msrb.mxu2 %v9020_v3 }
 0x119   :  { %17603 = vst [vmem:[#allocation28_spill] sm:$0xff] %v11511_v54  ;;  %v11527_v54 = vld [vmem:[#allocation6 + $0x194] sm:$0xf]  ;;  %3289 = vperm.xlu1 %10166, %v10204_v24   ;;  %v2972_v35 = vmul.f32 %v10955_v51, %v2834_v5  ;;  %v2974_v39 = vmul.f32 %v10959_v50, %v2834_v5  ;;  %v2975_v37 = vmul.f32 %v10971_v14, %v2834_v5  ;;  %v17622_v32 = vld [vmem:[#allocation38_spill] sm:$0xff]  ;;  %v2874_v27 = vpop.permute.xlu2 %2873  ;;  %v11585_v11 = vld [vmem:[#allocation6 + $0x14c] sm:$0xf0] }
 0x11a   :  { %17605 = vst [vmem:[#allocation41_spill] sm:$0xff] %v11522_v4  ;;  %v8952_v23 = vor.u32 %v11527_v54, %v11529_v58  ;;  %2272 = vmatpush.bf16.msrb.mxu3 %v9024_v36  ;;  %v11597_v3 = vld [vmem:[#allocation6 + $0x118] sm:$0xf]  ;;  %2234 = vmatpush.bf16.msrb.mxu0 %v8948_v59  ;;  %v11609_v36 = vld [vmem:[#allocation6 + $0x11c] sm:$0xf] }
 0x11b   :  { %17607 = vst [vmem:[#allocation42_spill] sm:$0xff] %v11525_v60  ;;  %v17618_v60 = vld [vmem:[#allocation44_spill] sm:$0xff]  ;;  %v11572_v58 = vadd.f32 %v2972_v35, %v17620_v43  ;;  %v11578_v24 = vadd.f32 %v2974_v39, %v17624_v2  ;;  %v3012_v35 = vmul.f32 %v10955_v51, %v2874_v27  ;;  %v3014_v39 = vmul.f32 %v10959_v50, %v2874_v27  ;;  %v11593_v43 = vld [vmem:[#allocation6 + $0x114] sm:$0xf]  ;;  %v11607_v29 = vld [vmem:[#allocation6 + $0x154] sm:$0xf0] }
 0x11c   :  { %17609 = vst [vmem:[#allocation30_spill] sm:$0xff] %v11532_v63  ;;  %v11547_v4 = vadd.f32 %v2971_v48, %v17618_v60  ;;  %v2973_v60 = vmul.f32 %v10957_v31, %v2834_v5  ;;  %v2842_v48 = vpop.permute.xlu0 %2841  ;;  %v3015_v2 = vmul.f32 %v10971_v14, %v2874_v27  ;;  %2247 = vmatpush.bf16.msrb.mxu1 %v8952_v23  ;;  %v11625_v59 = vld [vmem:[#allocation6 + $0x90] sm:$0xf]  ;;  %v10211_v63 = vld [vmem:[%s17033_s1 + $0xe0] sm:$0xff] }
 0x11d   :  { %17611 = vst [vmem:[#allocation34_spill] sm:$0xff] %v11535_v62  ;;  %v2980_v54 = vmul.f32 %v10955_v51, %v2842_v48  ;;  %v2981_v41 = vmul.f32 %v10957_v31, %v2842_v48  ;;  %v2982_v5 = vmul.f32 %v10959_v50, %v2842_v48  ;;  %v8960_v23 = vor.u32 %v11569_v25, %v11581_v15 }
 0x11e   :  { %17613 = vst [vmem:[#allocation35_spill] sm:$0xff] %v11538_v21  ;;  %v11575_v8 = vadd.f32 %v2973_v60, %v17622_v32  ;;  %v3013_v60 = vmul.f32 %v10957_v31, %v2874_v27  ;;  %v11595_v32 = vld [vmem:[#allocation6 + $0x150] sm:$0xf0]  ;;  %v17634_v27 = vld [vmem:[#allocation46_spill] sm:$0xff] }
 0x11f   :  { %17615 = vst [vmem:[#allocation36_spill] sm:$0xff] %v11541_v53  ;;  %v17632_v53 = vld [vmem:[#allocation45_spill] sm:$0xff]  ;;  %2273 = vmatpush.bf16.msrb.mxu3 %v8960_v23  ;;  %v11702_v23 = vld [vmem:[#allocation6 + $0x54] sm:$0xf0] }
 0x120   :  { %17617 = vst [vmem:[#allocation43_spill] sm:$0xff] %v11544_v49  ;;  %v11614_v21 = vadd.f32 %v3012_v35, %v17632_v53  ;;  %v11617_v62 = vadd.f32 %v3013_v60, %v17634_v27  ;;  %v17642_v35 = vld [vmem:[#allocation60_spill] sm:$0xff]  ;;  %v11642_v27 = vld [vmem:[#allocation6 + $0xd0] sm:$0xf0] }
 0x121   :  { %17619 = vst [vmem:[#allocation44_spill] sm:$0xff] %v11547_v4  ;;  %v17626_v4 = vld [vmem:[#allocation40_spill] sm:$0xff] }
 0x122   :  { %17621 = vst [vmem:[#allocation37_spill] sm:$0xff] %v11572_v58  ;;  %v11588_v49 = vadd.f32 %v2975_v37, %v17626_v4  ;;  %v17630_v37 = vld [vmem:[#allocation58_spill] sm:$0xff]  ;;  %v1307_v58 = vpop.f32.mrf.mxu2 }
 0x123   :  { %17623 = vst [vmem:[#allocation38_spill] sm:$0xff] %v11575_v8  ;;  %v17628_v8 = vld [vmem:[#allocation57_spill] sm:$0xff]  ;;  %v1320_v58 = vpop.f32.mrf.mxu3 }
 0x124   :  { %17625 = vst [vmem:[#allocation39_spill] sm:$0xff] %v11578_v24  ;;  %v2983_v24 = vmul.f32 %v10971_v14, %v2842_v48  ;;  %v11602_v4 = vadd.f32 %v2980_v54, %v17628_v8  ;;  %v17636_v48 = vld [vmem:[#allocation47_spill] sm:$0xff]  ;;  %v8892_v58 = vor.u32 %v11607_v29, %v11597_v3  ;;  %v11674_v3 = vld [vmem:[#allocation6 + $0xd8] sm:$0xf0] }
 0x125   :  { %17627 = vst [vmem:[#allocation40_spill] sm:$0xff] %v11588_v49  ;;  %v11605_v49 = vadd.f32 %v2981_v41, %v17630_v37  ;;  %v11620_v54 = vadd.f32 %v3014_v39, %v17636_v48  ;;  %v17638_v8 = vld [vmem:[#allocation59_spill] sm:$0xff]  ;;  %v11627_v37 = vld [vmem:[#allocation6 + $0xcc] sm:$0xf0]  ;;  %v11644_v48 = vld [vmem:[#allocation6 + $0x98] sm:$0xf] }
 0x126   :  { %17629 = vst [vmem:[#allocation57_spill] sm:$0xff] %v11602_v4  ;;  %v11623_v41 = vadd.f32 %v2982_v5, %v17638_v8  ;;  %v17640_v4 = vld [vmem:[#allocation48_spill] sm:$0xff]  ;;  %v11635_v60 = vadd.f32 %v2983_v24, %v17642_v35  ;;  %v10207_v39 = vld [vmem:[%s17033_s1 + $0x58] sm:$0xff]  ;;  %v8956_v5 = vor.u32 %v9952_v1, %v8955_v40  ;;  %v11646_v8 = vld [vmem:[#allocation6 + $0xd4] sm:$0xf0]  ;;  %v8884_v24 = vor.u32 %v11585_v11, %v11583_v45 }
 0x127   :  { %17631 = vst [vmem:[#allocation58_spill] sm:$0xff] %v11605_v49  ;;  %v11629_v49 = vld [vmem:[#allocation6 + $0x94] sm:$0xf]  ;;  %v11632_v53 = vadd.f32 %v3015_v2, %v17640_v4  ;;  %3233 = vperm.xlu1 %10166, %v10207_v39   ;;  %v2846_v2 = vpop.permute.xlu1 %2845  ;;  %v8888_v4 = vor.u32 %v11593_v43, %v11595_v32  ;;  %v8896_v40 = vor.u32 %v11609_v36, %v11611_v9  ;;  %v10209_v29 = vld [vmem:[%s17033_s1 + $0xe8] sm:$0xff]  ;;  %v11672_v32 = vld [vmem:[#allocation6 + $0x9c] sm:$0xf] }
 0x128   :  { %17633 = vst [vmem:[#allocation45_spill] sm:$0xff] %v11614_v21  ;;  %v2984_v1 = vmul.f32 %v10955_v51, %v2846_v2  ;;  %v2985_v25 = vmul.f32 %v10957_v31, %v2846_v2  ;;  %v2986_v15 = vmul.f32 %v10959_v50, %v2846_v2  ;;  %v2987_v35 = vmul.f32 %v10971_v14, %v2846_v2  ;;  %v10208_v45 = vld [vmem:[%s17033_s1 + $0xd8] sm:$0xff] }
 0x129   :  { %17635 = vst [vmem:[#allocation46_spill] sm:$0xff] %v11617_v62  ;;  %2260 = vmatpush.bf16.msrb.mxu2 %v8956_v5  ;;  %3297 = vperm.xlu2 %10164, %v10208_v45   ;;  %v8820_v9 = vor.u32 %v11627_v37, %v11625_v59  ;;  %v8824_v11 = vor.u32 %v11629_v49, %v11642_v27  ;;  %v17644_v36 = vld [vmem:[#allocation53_spill] sm:$0xff]  ;;  %v17646_v5 = vld [vmem:[#allocation54_spill] sm:$0xff]  ;;  %v17648_v45 = vld [vmem:[#allocation55_spill] sm:$0xff]  ;;  %v2886_v49 = vpop.permute.xlu2 %2885  ;;  %v2854_v27 = vpop.permute.xlu0 %2853 }
 0x12a   :  { %17637 = vst [vmem:[#allocation47_spill] sm:$0xff] %v11620_v54  ;;  %3305 = vperm.xlu0 %10165, %v10209_v29   ;;  %v11677_v39 = vadd.f32 %v2984_v1, %v17644_v36  ;;  %v11680_v2 = vadd.f32 %v2985_v25, %v17646_v5  ;;  %v11683_v29 = vadd.f32 %v2986_v15, %v17648_v45  ;;  %v17650_v59 = vld [vmem:[#allocation56_spill] sm:$0xff]  ;;  %v11688_v43 = vld [vmem:[#allocation6 + $0x10] sm:$0xf]  ;;  %v11700_v5 = vld [vmem:[#allocation6 + $0x18] sm:$0xf] }
 0x12b   :  { %17639 = vst [vmem:[#allocation59_spill] sm:$0xff] %v11623_v41  ;;  %v11686_v37 = vadd.f32 %v2987_v35, %v17650_v59  ;;  %v11692_v41 = vld [vmem:[#allocation6 + $0x14] sm:$0xf]  ;;  %v3024_v1 = vmul.f32 %v10955_v51, %v2886_v49  ;;  %v3025_v25 = vmul.f32 %v10957_v31, %v2886_v49  ;;  %v3026_v36 = vmul.f32 %v10959_v50, %v2886_v49 }
 0x12c   :  { %17641 = vst [vmem:[#allocation48_spill] sm:$0xff] %v11632_v53  ;;  %v3027_v15 = vmul.f32 %v10971_v14, %v2886_v49  ;;  %2235 = vmatpush.bf16.msrb.mxu0 %v8884_v24  ;;  %v11698_v35 = vld [vmem:[#allocation6 + $0x50] sm:$0xf0]  ;;  %v11705_v45 = vmul.f32 %v10955_v51, %v2854_v27  ;;  %v11708_v59 = vmul.f32 %v10957_v31, %v2854_v27  ;;  %v11715_v49 = vld [vmem:[#allocation6 + $0x58] sm:$0xf0] }
 0x12d   :  { %17643 = vst [vmem:[#allocation60_spill] sm:$0xff] %v11635_v60  ;;  %v11690_v60 = vld [vmem:[#allocation6 + $0x4c] sm:$0xf0]  ;;  %2248 = vmatpush.bf16.msrb.mxu1 %v8888_v4  ;;  %v10210_v24 = vld [vmem:[%s17036_s4] sm:$0x77]  ;;  %2261 = vmatpush.bf16.msrb.mxu2 %v8892_v58  ;;  %v11733_v21 = vmul.f32 %v10971_v14, %v2854_v27  ;;  %v8760_v58 = vor.u32 %v11692_v41, %v11698_v35  ;;  %v10213_v41 = vld [vmem:[%s17033_s1 + $0x68] sm:$0xff] }
 0x12e   :  { %17645 = vst [vmem:[#allocation53_spill] sm:$0xff] %v11677_v39  ;;  %v17655_v39 = vld [vmem:[#allocation49_spill] sm:$0xff]  ;;  %2274 = vmatpush.bf16.msrb.mxu3 %v8896_v40 }
 0x12f   :  { %17647 = vst [vmem:[#allocation54_spill] sm:$0xff] %v11680_v2  ;;  %v3316_v2 = vperm.slane %v10210_v24, 2  ;;  %v11721_v53 = vadd.f32 %v3024_v1, %v17655_v39  ;;  %3301 = vperm.xlu1 %10166, %v10211_v63   ;;  %v8832_v39 = vor.u32 %v11672_v32, %v11674_v3  ;;  %v8756_v1 = vor.u32 %v11690_v60, %v11688_v43  ;;  %v10212_v63 = vld [vmem:[%s17036_s4 + $0x8] sm:$0x77]  ;;  %v10214_v3 = vld [vmem:[%s17033_s1 + $0x78] sm:$0xff] }
 0x130   :  { %17649 = vst [vmem:[#allocation55_spill] sm:$0xff] %v11683_v29  ;;  %v11713_v29 = vld [vmem:[#allocation6 + $0x1c] sm:$0xf]  ;;  %2236 = vmatpush.bf16.msrb.mxu0 %v8820_v9  ;;  %v3318_v40 = vperm.slane %v10212_v63, 2 }
 0x131   :  { %17651 = vst [vmem:[#allocation56_spill] sm:$0xff] %v11686_v37  ;;  %v11711_v37 = vmul.f32 %v10959_v50, %v2854_v27  ;;  %v8768_v27 = vor.u32 %v11713_v29, %v11715_v49  ;;  %2249 = vmatpush.bf16.msrb.mxu1 %v8824_v11  ;;  %3241 = vperm.xlu2 %10164, %v10213_v41   ;;  %v3319_v29 = vperm.slane %v10212_v63, 6  ;;  %v17666_v11 = vld [vmem:[#allocation66_spill] sm:$0xff]  ;;  %v17668_v49 = vld [vmem:[#allocation67_spill] sm:$0xff]  ;;  %v2866_v63 = vpop.permute.xlu0 %2865 }
 0x132   :  { %17652 = vst [vmem:[#allocation125_spill] sm:$0xff] %v11705_v45  ;;  %v17657_v45 = vld [vmem:[#allocation50_spill] sm:$0xff]  ;;  %3249 = vperm.xlu0 %10165, %v10214_v3   ;;  %v2898_v3 = vpop.permute.xlu2 %2897  ;;  %2275 = vmatpush.bf16.msrb.mxu3 %v8832_v39 }
 0x133   :  { %17653 = vst [vmem:[#allocation126_spill] sm:$0xff] %v11708_v59  ;;  %v11724_v54 = vadd.f32 %v3025_v25, %v17657_v45  ;;  %v17659_v59 = vld [vmem:[#allocation51_spill] sm:$0xff]  ;;  %v3317_v25 = vperm.slane %v10210_v24, 6  ;;  %v17675_v39 = vld [vmem:[#allocation62_spill] sm:$0xff] }
 0x134   :  { %17654 = vst [vmem:[#allocation127_spill] sm:$0xff] %v11711_v37  ;;  %v11727_v62 = vadd.f32 %v3026_v36, %v17659_v59  ;;  %v17661_v37 = vld [vmem:[#allocation52_spill] sm:$0xff]  ;;  %v2858_v36 = vpop.permute.xlu1 %2857  ;;  %2237 = vmatpush.bf16.msrb.mxu0 %v8756_v1 }
 0x135   :  { %17656 = vst [vmem:[#allocation49_spill] sm:$0xff] %v11721_v53  ;;  %v11730_v4 = vadd.f32 %v3027_v15, %v17661_v37  ;;  %v8764_v37 = vor.u32 %v11702_v23, %v11700_v5  ;;  %v2996_v32 = vmul.f32 %v10955_v51, %v2858_v36  ;;  %v2997_v60 = vmul.f32 %v10957_v31, %v2858_v36  ;;  %v17664_v23 = vld [vmem:[#allocation65_spill] sm:$0xff]  ;;  %v11810_v1 = vld [vmem:[#allocation6 + $0x3a8] sm:$0xf] }
 0x136   :  { %17658 = vst [vmem:[#allocation50_spill] sm:$0xff] %v11724_v54  ;;  %v2998_v9 = vmul.f32 %v10959_v50, %v2858_v36  ;;  %v2999_v43 = vmul.f32 %v10971_v14, %v2858_v36  ;;  %v11761_v15 = vperm.slane %v3316_v2, 2  ;;  %v11763_v35 = vperm.slane %v3317_v25, 2  ;;  %v17670_v36 = vld [vmem:[#allocation68_spill] sm:$0xff]  ;;  %2250 = vmatpush.bf16.msrb.mxu1 %v8760_v58  ;;  %2276 = vmatpush.bf16.msrb.mxu3 %v8768_v27 }
 0x137   :  { %17660 = vst [vmem:[#allocation51_spill] sm:$0xff] %v11727_v62  ;;  %v11765_v5 = vperm.slane %v3318_v40, 2  ;;  %v11768_v45 = vadd.f32 %v2996_v32, %v17664_v23  ;;  %v11771_v59 = vadd.f32 %v2997_v60, %v17666_v11  ;;  %v17672_v2 = vor.u32 %v11646_v8, %v11644_v48  ;;  %v1331_v23 = vpop.f32.mrf.mxu0  ;;  %v11786_v11 = vld [vmem:[#allocation6 + $0x3a0] sm:$0xf]  ;;  %v11814_v54 = vld [vmem:[#allocation6 + $0x3ac] sm:$0xf] }
 0x138   :  { %17662 = vst [vmem:[#allocation52_spill] sm:$0xff] %v11730_v4  ;;  %v11774_v24 = vadd.f32 %v2998_v9, %v17668_v49  ;;  %v11777_v41 = vadd.f32 %v2999_v43, %v17670_v36  ;;  %v3036_v25 = vmul.f32 %v10955_v51, %v2898_v3  ;;  %v3037_v40 = vmul.f32 %v10957_v31, %v2898_v3  ;;  %v1344_v9 = vpop.f32.mrf.mxu1  ;;  %v11792_v36 = vld [vmem:[#allocation6 + $0x3dc] sm:$0xf0]  ;;  %v17679_v4 = vld [vmem:[#allocation64_spill] sm:$0xff] }
 0x139   :  { %17663 = vst [vmem:[#allocation128_spill] sm:$0xff] %v11733_v21  ;;  %2262 = vmatpush.bf16.msrb.mxu2 %v17672_v2  ;;  %v3038_v32 = vmul.f32 %v10959_v50, %v2898_v3  ;;  %v3039_v60 = vmul.f32 %v10971_v14, %v2898_v3  ;;  %v3004_v43 = vmul.f32 %v10955_v51, %v2866_v63  ;;  %v11794_v2 = vld [vmem:[#allocation6 + $0x3a4] sm:$0xf]  ;;  %v17673_v3 = vld [vmem:[#allocation61_spill] sm:$0xff]  ;;  %v11831_v58 = vld [vmem:[#allocation6 + $0x3e8] sm:$0xf0] }
 0x13a   :  { %17665 = vst [vmem:[#allocation65_spill] sm:$0xff] %v11768_v45  ;;  %v3005_v49 = vmul.f32 %v10957_v31, %v2866_v63  ;;  %v3006_v48 = vmul.f32 %v10959_v50, %v2866_v63  ;;  %v3007_v8 = vmul.f32 %v10971_v14, %v2866_v63  ;;  %v11796_v21 = vld [vmem:[#allocation6 + $0x3e0] sm:$0xf0]  ;;  %v11812_v63 = vld [vmem:[#allocation6 + $0x3e4] sm:$0xf0] }
 0x13b   :  { %17667 = vst [vmem:[#allocation66_spill] sm:$0xff] %v11771_v59  ;;  %v17677_v59 = vld [vmem:[#allocation63_spill] sm:$0xff]  ;;  %v11808_v62 = vadd.f32 %v3039_v60, %v17679_v4  ;;  %v11817_v53 = vadd.f32 %v3004_v43, %v11126_v52  ;;  %v10215_v4 = vld [vmem:[%s17033_s1 + $0x70] sm:$0xff]  ;;  %v1370_v43 = vpop.f32.mrf.mxu3 }
 0x13c   :  { %17669 = vst [vmem:[#allocation67_spill] sm:$0xff] %v11774_v24  ;;  %v11802_v24 = vadd.f32 %v3037_v40, %v17675_v39  ;;  %v11805_v45 = vadd.f32 %v3038_v32, %v17677_v59  ;;  %v11823_v40 = vadd.f32 %v3006_v48, %v11136_v19  ;;  %v11826_v59 = vadd.f32 %v3007_v8, %v11140_v0  ;;  %v11833_v32 = vld [vmem:[#allocation6 + $0x320] sm:$0xf]  ;;  %v2870_v60 = vpop.permute.xlu1 %2869 }
 0x13d   :  { %17671 = vst [vmem:[#allocation68_spill] sm:$0xff] %v11777_v41  ;;  %v11799_v41 = vadd.f32 %v3036_v25, %v17673_v3  ;;  %v11820_v25 = vadd.f32 %v3005_v49, %v11130_v46  ;;  %3245 = vperm.xlu1 %10166, %v10215_v4   ;;  %v11835_v52 = vld [vmem:[#allocation6 + $0x35c] sm:$0xf0]  ;;  %v1332_v46 = vadd.f32 %v1331_v23, %v11555_v47  ;;  %v11838_v19 = vperm.slane %v3319_v29, 2 }
 0x13e   :  { %17676 = vst [vmem:[#allocation62_spill] sm:$0xff] %v11802_v24  ;;  %2263 = vmatpush.bf16.msrb.mxu2 %v8764_v37  ;;  %v3008_v49 = vmul.f32 %v10955_v51, %v2870_v60  ;;  %v3009_v48 = vmul.f32 %v10957_v31, %v2870_v60  ;;  %v3010_v8 = vmul.f32 %v10959_v50, %v2870_v60  ;;  %v10216_v37 = vld [vmem:[%s17033_s1 + $0xf0] sm:$0xff] }
 0x13f   :  { %17674 = vst [vmem:[#allocation61_spill] sm:$0xff] %v11799_v41  ;;  %v3011_v3 = vmul.f32 %v10971_v14, %v2870_v60  ;;  %v1345_v47 = vadd.f32 %v1344_v9, %v1332_v46  ;;  %3309 = vperm.xlu2 %10164, %v10216_v37   ;;  %v2910_v60 = vpop.permute.xlu2 %2909  ;;  %v2878_v37 = vpop.permute.xlu0 %2877  ;;  %v11883_v24 = vld [vmem:[#allocation6 + $0x364] sm:$0xf0]  ;;  %v11887_v41 = vld [vmem:[#allocation6 + $0x368] sm:$0xf0] }
 0x140   :  { %17678 = vst [vmem:[#allocation63_spill] sm:$0xff] %v11805_v45  ;;  %v11858_v39 = vadd.f32 %v3008_v49, %v11108_v10  ;;  %v11861_v4 = vadd.f32 %v3009_v48, %v11112_v30  ;;  %v11864_v9 = vadd.f32 %v3010_v8, %v11118_v33  ;;  %v3048_v27 = vmul.f32 %v10955_v51, %v2910_v60  ;;  %v1357_v49 = vpop.f32.mrf.mxu2  ;;  %v11873_v30 = vld [vmem:[#allocation6 + $0x324] sm:$0xf]  ;;  %v11877_v33 = vld [vmem:[#allocation6 + $0x328] sm:$0xf]  ;;  %v1346_v45 = vpop.f32.mrf.mxu1 }
 0x141   :  { %17680 = vst [vmem:[#allocation64_spill] sm:$0xff] %v11808_v62  ;;  %v11867_v46 = vadd.f32 %v3011_v3, %v11122_v38  ;;  %v3049_v29 = vmul.f32 %v10957_v31, %v2910_v60  ;;  %v3050_v23 = vmul.f32 %v10959_v50, %v2910_v60  ;;  %v3051_v10 = vmul.f32 %v10971_v14, %v2910_v60  ;;  %v11875_v48 = vld [vmem:[#allocation6 + $0x360] sm:$0xf0]  ;;  %v1333_v62 = vpop.f32.mrf.mxu0  ;;  %v11885_v60 = vld [vmem:[#allocation6 + $0x32c] sm:$0xf] }
 0x142   :  { %17681 = vst [vmem:[#allocation129_spill] sm:$0xff] %v11817_v53  ;;  %v3016_v38 = vmul.f32 %v10955_v51, %v2878_v37  ;;  %v3017_v8 = vmul.f32 %v10957_v31, %v2878_v37  ;;  %v3018_v3 = vmul.f32 %v10959_v50, %v2878_v37  ;;  %v3019_v0 = vmul.f32 %v10971_v14, %v2878_v37  ;;  %v11901_v62 = vld [vmem:[#allocation6 + $0x2a0] sm:$0xf]  ;;  %v11905_v37 = vld [vmem:[#allocation6 + $0x2a4] sm:$0xf]  ;;  %v17696_v53 = vld [vmem:[#allocation84_spill] sm:$0xff] }
 0x143   :  { %17682 = vst [vmem:[#allocation130_spill] sm:$0xff] %v11820_v25  ;;  %v11899_v25 = vadd.f32 %v3051_v10, %v11101_v26  ;;  %v11903_v45 = vld [vmem:[#allocation6 + $0x2dc] sm:$0xf0]  ;;  %v10217_v26 = vld [vmem:[%s17033_s1 + $0xf8] sm:$0xff]  ;;  %v11924_v10 = vld [vmem:[#allocation6 + $0x2a8] sm:$0xf] }
 0x144   :  { %17683 = vst [vmem:[#allocation131_spill] sm:$0xff] %v11823_v40  ;;  %v11908_v12 = vadd.f32 %v3016_v38, %v17696_v53  ;;  %v11926_v53 = vld [vmem:[#allocation6 + $0x2e4] sm:$0xf0]  ;;  %v1358_v38 = vadd.f32 %v1357_v49, %v1345_v47  ;;  %v11940_v47 = vld [vmem:[#allocation6 + $0x2e8] sm:$0xf0] }
 0x145   :  { %17684 = vst [vmem:[#allocation132_spill] sm:$0xff] %v11826_v59  ;;  %v17693_v59 = vld [vmem:[#allocation75_spill] sm:$0xff]  ;;  %3313 = vperm.xlu1 %10166, %v10217_v26  }
 0x146   :  { %17685 = vst [vmem:[#allocation133_spill] sm:$0xff] %v11858_v39  ;;  %v11896_v40 = vadd.f32 %v3050_v23, %v17693_v59  ;;  %v11917_v59 = vadd.f32 %v3019_v0, %v11199_v20  ;;  %v11922_v23 = vld [vmem:[#allocation6 + $0x2e0] sm:$0xf0]  ;;  %v11942_v49 = vld [vmem:[#allocation6 + $0x220] sm:$0xf] }
 0x147   :  { %17686 = vst [vmem:[#allocation134_spill] sm:$0xff] %v11861_v4  ;;  %v17691_v4 = vld [vmem:[#allocation74_spill] sm:$0xff]  ;;  %v2890_v61 = vpop.permute.xlu0 %2889 }
 0x148   :  { %17687 = vst [vmem:[#allocation135_spill] sm:$0xff] %v11864_v9  ;;  %v11893_v39 = vadd.f32 %v3049_v29, %v17691_v4  ;;  %v17700_v29 = vld [vmem:[#allocation86_spill] sm:$0xff]  ;;  %v3028_v16 = vmul.f32 %v10955_v51, %v2890_v61  ;;  %v3029_v56 = vmul.f32 %v10957_v31, %v2890_v61  ;;  %v3030_v18 = vmul.f32 %v10959_v50, %v2890_v61  ;;  %v1359_v17 = vpop.f32.mrf.mxu2 }
 0x149   :  { %17688 = vst [vmem:[#allocation136_spill] sm:$0xff] %v11867_v46  ;;  %v17689_v46 = vld [vmem:[#allocation73_spill] sm:$0xff]  ;;  %v11914_v4 = vadd.f32 %v3018_v3, %v17700_v29  ;;  %v1371_v3 = vadd.f32 %v1370_v43, %v1358_v38  ;;  %v17707_v38 = vld [vmem:[#allocation82_spill] sm:$0xff]  ;;  %v11984_v17 = vld [vmem:[#allocation6 + $0x268] sm:$0xf0] }
 0x14a   :  { %v11890_v9 = vadd.f32 %v3048_v27, %v17689_v46  ;;  %17692 = vst [vmem:[#allocation74_spill] sm:$0xff] %v11893_v39  ;;  %v17698_v27 = vld [vmem:[#allocation85_spill] sm:$0xff] }
 0x14b   :  { %17694 = vst [vmem:[#allocation75_spill] sm:$0xff] %v11896_v40  ;;  %v11911_v46 = vadd.f32 %v3017_v8, %v17698_v27  ;;  %v2882_v8 = vpop.permute.xlu1 %2881  ;;  %v11938_v40 = vld [vmem:[#allocation6 + $0x2ac] sm:$0xf]  ;;  %v1374_v39 = vmax.f32 %v1371_v3, 0.0  ;;  %v11980_v3 = vld [vmem:[#allocation6 + $0x264] sm:$0xf0] }
 0x14c   :  { %17690 = vst [vmem:[#allocation73_spill] sm:$0xff] %v11890_v9  ;;  %v3020_v27 = vmul.f32 %v10955_v51, %v2882_v8  ;;  %v3021_v29 = vmul.f32 %v10957_v31, %v2882_v8  ;;  %v3022_v26 = vmul.f32 %v10959_v50, %v2882_v8  ;;  %v11950_v9 = vld [vmem:[#allocation6 + $0x25c] sm:$0xf0] }
 0x14d   :  { %17695 = vst [vmem:[#allocation137_spill] sm:$0xff] %v11899_v25  ;;  %v3023_v25 = vmul.f32 %v10971_v14, %v2882_v8  ;;  %v11954_v8 = vld [vmem:[#allocation6 + $0x260] sm:$0xf0] }
 0x14e   :  { %17697 = vst [vmem:[#allocation84_spill] sm:$0xff] %v11908_v12  ;;  %v17705_v12 = vld [vmem:[#allocation81_spill] sm:$0xff]  ;;  %v11963_v20 = vadd.f32 %v3022_v26, %v17707_v38  ;;  %v11982_v38 = vld [vmem:[#allocation6 + $0x22c] sm:$0xf] }
 0x14f   :  { %17699 = vst [vmem:[#allocation85_spill] sm:$0xff] %v11911_v46  ;;  %v11960_v43 = vadd.f32 %v3021_v29, %v17705_v12  ;;  %v11966_v0 = vadd.f32 %v3023_v25, %v17709_v22  ;;  %v3031_v12 = vmul.f32 %v10971_v14, %v2890_v61  ;;  %v3190_v29 = vpop.permute.xlu2 %3189  ;;  %v11989_v61 = vadd.f32 %v3028_v16, %v11221_v44  ;;  %v17715_v26 = vld [vmem:[#allocation96_spill] sm:$0xff] }
 0x150   :  { %17701 = vst [vmem:[#allocation86_spill] sm:$0xff] %v11914_v4  ;;  %v17703_v4 = vld [vmem:[#allocation80_spill] sm:$0xff]  ;;  %v3328_v25 = vmul.f32 %v11761_v15, %v3190_v29  ;;  %v3330_v13 = vmul.f32 %v11765_v5, %v3190_v29  ;;  %v17726_v16 = vor.u32 %v11792_v36, %v11786_v11  ;;  %v17729_v36 = vor.u32 %v11814_v54, %v11831_v58 }
 0x151   :  { %17702 = vst [vmem:[#allocation138_spill] sm:$0xff] %v11917_v59  ;;  %v11952_v59 = vld [vmem:[#allocation6 + $0x224] sm:$0xf]  ;;  %v11957_v46 = vadd.f32 %v3020_v27, %v17703_v4  ;;  %v1372_v4 = vpop.f32.mrf.mxu3  ;;  %v11971_v27 = vld [vmem:[#allocation6 + $0x228] sm:$0xf]  ;;  %v11998_v22 = vadd.f32 %v3031_v12, %v11237_v34 }
 0x152   :  { %17706 = vst [vmem:[#allocation81_spill] sm:$0xff] %v11960_v43  ;;  %v11986_v4 = vpack.c.bf16 %v1374_v39, %v1374_v39  ;;  %v11995_v43 = vadd.f32 %v3030_v18, %v17715_v26  ;;  %v3331_v39 = vmul.f32 %v11838_v19, %v3190_v29  ;;  %v17718_v18 = vld [vmem:[#allocation76_spill] sm:$0xff]  ;;  %v17722_v26 = vld [vmem:[#allocation78_spill] sm:$0xff] }
 0x153   :  { %17704 = vst [vmem:[#allocation80_spill] sm:$0xff] %v11957_v46  ;;  %v3329_v46 = vmul.f32 %v11763_v35, %v3190_v29  ;;  %v2894_v44 = vpop.permute.xlu1 %2893  ;;  %v17724_v29 = vld [vmem:[#allocation79_spill] sm:$0xff]  ;;  %v17732_v34 = vld [vmem:[#allocation92_spill] sm:$0xff] }
 0x154   :  { %17708 = vst [vmem:[#allocation82_spill] sm:$0xff] %v11963_v20  ;;  %2186 = vmatmul.bf16.vlgmr.msra.gmra.mxu0 %v11986_v4  ;;  %2199 = vmatmul.bf16.vlgmr.msra.gmra.mxu1 %v11986_v4 }
 0x155   :  { %17710 = vst [vmem:[#allocation83_spill] sm:$0xff] %v11966_v0  ;;  %v17713_v0 = vld [vmem:[#allocation95_spill] sm:$0xff]  ;;  %2212 = vmatmul.bf16.vlgmr.msra.gmra.mxu2 %v11986_v4  ;;  %2225 = vmatmul.bf16.vlgmr.msra.gmra.mxu3 %v11986_v4 }
 0x156   :  { %17711 = vst [vmem:[#allocation139_spill] sm:$0xff] %v11986_v4  ;;  %v11992_v20 = vadd.f32 %v3029_v56, %v17713_v0  ;;  %v12011_v56 = vadd.f32 %v3328_v25, %v17718_v18  ;;  %v17720_v0 = vld [vmem:[#allocation77_spill] sm:$0xff]  ;;  %2282 = vmatpush.bf16.msra.mxu0 %v17726_v16  ;;  %v17727_v25 = vor.u32 %v11794_v2, %v11796_v21  ;;  %v2902_v2 = vpop.permute.xlu0 %2901 }
 0x157   :  { %17712 = vst [vmem:[#allocation140_spill] sm:$0xff] %v11989_v61  ;;  %v12014_v12 = vadd.f32 %v3329_v46, %v17720_v0  ;;  %v3032_v46 = vmul.f32 %v10955_v51, %v2894_v44  ;;  %v17728_v21 = vor.u32 %v11812_v63, %v11810_v1  ;;  %2321 = vmatpush.bf16.msra.mxu3 %v17729_v36  ;;  %v3202_v58 = vpop.permute.xlu2 %3201 }
 0x158   :  { %17714 = vst [vmem:[#allocation95_spill] sm:$0xff] %v11992_v20  ;;  %2295 = vmatpush.bf16.msra.mxu1 %v17727_v25  ;;  %v12034_v18 = vmul.f32 %v12011_v56, %v12011_v56  ;;  %v3034_v0 = vmul.f32 %v10959_v50, %v2894_v44  ;;  %v3040_v1 = vmul.f32 %v10955_v51, %v2902_v2 }
 0x159   :  { %17716 = vst [vmem:[#allocation96_spill] sm:$0xff] %v11995_v43  ;;  %v12022_v43 = vadd.f32 %v3331_v39, %v17724_v29  ;;  %v12038_v39 = vmul.f32 %v12014_v12, %v12014_v12  ;;  %2308 = vmatpush.bf16.msra.mxu2 %v17728_v21  ;;  %v17730_v29 = vld [vmem:[#allocation91_spill] sm:$0xff]  ;;  %v3041_v54 = vmul.f32 %v10957_v31, %v2902_v2 }
 0x15a   :  { %17717 = vst [vmem:[#allocation141_spill] sm:$0xff] %v11998_v22  ;;  %v12017_v22 = vadd.f32 %v3330_v13, %v17722_v26  ;;  %v3033_v13 = vmul.f32 %v10957_v31, %v2894_v44  ;;  %v3035_v26 = vmul.f32 %v10971_v14, %v2894_v44  ;;  %v12057_v25 = vadd.f32 %v3032_v46, %v17730_v29  ;;  %v17736_v46 = vld [vmem:[#allocation93_spill] sm:$0xff] }
 0x15b   :  { %17719 = vst [vmem:[#allocation76_spill] sm:$0xff] %v12011_v56  ;;  %v12052_v16 = vmul.f32 %v12022_v43, %v12022_v43  ;;  %v3042_v63 = vmul.f32 %v10959_v50, %v2902_v2  ;;  %v17734_v21 = vor.u32 %v11835_v52, %v11833_v32  ;;  %v17735_v44 = vor.u32 %v11873_v30, %v11875_v48  ;;  %v17744_v48 = vld [vmem:[#allocation105_spill] sm:$0xff] }
 0x15c   :  { %17721 = vst [vmem:[#allocation77_spill] sm:$0xff] %v12014_v12  ;;  %v12042_v11 = vmul.f32 %v12017_v22, %v12017_v22  ;;  %v12060_v20 = vadd.f32 %v3033_v13, %v17732_v34  ;;  %v12072_v36 = vadd.f32 %v3034_v0, %v17736_v46  ;;  %v17738_v34 = vld [vmem:[#allocation94_spill] sm:$0xff]  ;;  %v3043_v29 = vmul.f32 %v10971_v14, %v2902_v2  ;;  %v17752_v46 = vld [vmem:[#allocation89_spill] sm:$0xff] }
 0x15d   :  { %17723 = vst [vmem:[#allocation78_spill] sm:$0xff] %v12017_v22  ;;  %2283 = vmatpush.bf16.msra.mxu0 %v17734_v21  ;;  %2296 = vmatpush.bf16.msra.mxu1 %v17735_v44  ;;  %v12075_v13 = vadd.f32 %v3035_v26, %v17738_v34  ;;  %v17741_v32 = vor.u32 %v11885_v60, %v11887_v41  ;;  %v17746_v26 = vld [vmem:[#allocation106_spill] sm:$0xff]  ;;  %v2906_v41 = vpop.permute.xlu1 %2905 }
 0x15e   :  { %17725 = vst [vmem:[#allocation79_spill] sm:$0xff] %v12022_v43  ;;  %v12085_v52 = vadd.f32 %v3040_v1, %v11283_v57  ;;  %v12088_v30 = vadd.f32 %v3041_v54, %v11287_v42  ;;  %v12091_v0 = vadd.f32 %v3042_v63, %v17744_v48  ;;  %v12094_v21 = vadd.f32 %v3043_v29, %v17746_v26  ;;  %v17748_v1 = vld [vmem:[#allocation87_spill] sm:$0xff]  ;;  %v17750_v63 = vld [vmem:[#allocation88_spill] sm:$0xff] }
 0x15f   :  { %17731 = vst [vmem:[#allocation91_spill] sm:$0xff] %v12057_v25  ;;  %2322 = vmatpush.bf16.msra.mxu3 %v17741_v32  ;;  %v3340_v2 = vmul.f32 %v11761_v15, %v3202_v58  ;;  %v3343_v60 = vmul.f32 %v11838_v19, %v3202_v58  ;;  %v3044_v57 = vmul.f32 %v10955_v51, %v2906_v41  ;;  %v17756_v32 = vld [vmem:[#allocation90_spill] sm:$0xff]  ;;  %v9898_v25 = vld [vmem:[#allocation6 + $0x2c] sm:$0xf] }
 0x160   :  { %17733 = vst [vmem:[#allocation92_spill] sm:$0xff] %v12060_v20  ;;  %v17740_v20 = vor.u32 %v11883_v24, %v11877_v33  ;;  %v3341_v24 = vmul.f32 %v11763_v35, %v3202_v58  ;;  %v3342_v33 = vmul.f32 %v11765_v5, %v3202_v58  ;;  %v3045_v42 = vmul.f32 %v10957_v31, %v2906_v41 }
 0x161   :  { %17737 = vst [vmem:[#allocation93_spill] sm:$0xff] %v12072_v36  ;;  %v12104_v54 = vadd.f32 %v3340_v2, %v17748_v1  ;;  %v17754_v29 = vor.u32 %v11903_v45, %v11901_v62  ;;  %v17755_v58 = vor.u32 %v11905_v37, %v11922_v23  ;;  %v12119_v48 = vadd.f32 %v3343_v60, %v17756_v32  ;;  %v2914_v45 = vpop.permute.xlu0 %2913  ;;  %v17764_v60 = vld [vmem:[#allocation103_spill] sm:$0xff]  ;;  %v17766_v1 = vld [vmem:[#allocation104_spill] sm:$0xff] }
 0x162   :  { %17739 = vst [vmem:[#allocation94_spill] sm:$0xff] %v12075_v13  ;;  %2309 = vmatpush.bf16.msra.mxu2 %v17740_v20  ;;  %v3046_v20 = vmul.f32 %v10959_v50, %v2906_v41  ;;  %v12107_v44 = vadd.f32 %v3341_v24, %v17750_v63  ;;  %v12110_v34 = vadd.f32 %v3342_v33, %v17752_v46  ;;  %v17760_v33 = vld [vmem:[#allocation97_spill] sm:$0xff]  ;;  %v9945_v32 = vld [vmem:[#allocation6 + $0x1a4] sm:$0xf]  ;;  %v9906_v36 = vld [vmem:[#allocation6 + $0x64] sm:$0xf0] }
 0x163   :  { %17742 = vst [vmem:[#allocation142_spill] sm:$0xff] %v12085_v52  ;;  %2284 = vmatpush.bf16.msra.mxu0 %v17754_v29  ;;  %2297 = vmatpush.bf16.msra.mxu1 %v17755_v58  ;;  %v17758_v26 = vor.u32 %v11926_v53, %v11924_v10  ;;  %v17759_v2 = vor.u32 %v11938_v40, %v11940_v47  ;;  %v17762_v40 = vld [vmem:[#allocation101_spill] sm:$0xff]  ;;  %v8963_v47 = vld [vmem:[#allocation6 + $0x1a0] sm:$0xf]  ;;  %v3210_v29 = vpop.permute.xlu2 %3209 }
 0x164   :  { %17743 = vst [vmem:[#allocation143_spill] sm:$0xff] %v12088_v30  ;;  %v3047_v24 = vmul.f32 %v10971_v14, %v2906_v41  ;;  %v12129_v62 = vadd.f32 %v3044_v57, %v17760_v33  ;;  %v12133_v37 = vmul.f32 %v12104_v54, %v12104_v54  ;;  %v12137_v23 = vmul.f32 %v12107_v44, %v12107_v44  ;;  %v9953_v58 = vld [vmem:[#allocation6 + $0x1dc] sm:$0xf0]  ;;  %v10019_v30 = vld [vmem:[#allocation6 + $0x3ec] sm:$0xf0] }
 0x165   :  { %17745 = vst [vmem:[#allocation105_spill] sm:$0xff] %v12091_v0  ;;  %2323 = vmatpush.bf16.msra.mxu3 %v17759_v2  ;;  %v12141_v10 = vmul.f32 %v12110_v34, %v12110_v34  ;;  %v12144_v53 = vadd.f32 %v3045_v42, %v17762_v40  ;;  %v12148_v41 = vmul.f32 %v12119_v48, %v12119_v48  ;;  %v8971_v40 = vld [vmem:[#allocation6 + $0x1a8] sm:$0xf] }
 0x166   :  { %17747 = vst [vmem:[#allocation106_spill] sm:$0xff] %v12094_v21  ;;  %2310 = vmatpush.bf16.msra.mxu2 %v17758_v26  ;;  %v12151_v57 = vadd.f32 %v3046_v20, %v17764_v60  ;;  %v12154_v63 = vadd.f32 %v3047_v24, %v17766_v1  ;;  %v12157_v46 = vmul.f32 %v10955_v51, %v2914_v45  ;;  %v8965_v26 = vld [vmem:[#allocation6 + $0x1e0] sm:$0xf0]  ;;  %v9954_v1 = vld [vmem:[#allocation6 + $0x1e4] sm:$0xf0] }
 0x167   :  { %17749 = vst [vmem:[#allocation87_spill] sm:$0xff] %v12104_v54  ;;  %v17769_v42 = vor.u32 %v11950_v9, %v11942_v49  ;;  %v17770_v2 = vor.u32 %v11952_v59, %v11954_v8  ;;  %v12166_v20 = vmul.f32 %v10957_v31, %v2914_v45  ;;  %v12169_v24 = vmul.f32 %v10959_v50, %v2914_v45 }
 0x168   :  { %17751 = vst [vmem:[#allocation88_spill] sm:$0xff] %v12107_v44  ;;  %v12172_v33 = vmul.f32 %v10971_v14, %v2914_v45  ;;  %v17774_v60 = vor.u32 %v11980_v3, %v11971_v27  ;;  %v17775_v9 = vor.u32 %v11982_v38, %v11984_v17  ;;  %v3348_v59 = vmul.f32 %v11761_v15, %v3210_v29  ;;  %v9937_v38 = vld [vmem:[#allocation6 + $0x15c] sm:$0xf0]  ;;  %v9929_v17 = vld [vmem:[#allocation6 + $0x124] sm:$0xf] }
 0x169   :  { %17753 = vst [vmem:[#allocation89_spill] sm:$0xff] %v12110_v34  ;;  %2285 = vmatpush.bf16.msra.mxu0 %v17769_v42  ;;  %2298 = vmatpush.bf16.msra.mxu1 %v17770_v2  ;;  %v3349_v49 = vmul.f32 %v11763_v35, %v3210_v29  ;;  %v3350_v8 = vmul.f32 %v11765_v5, %v3210_v29  ;;  %v9946_v42 = vld [vmem:[#allocation6 + $0x1ac] sm:$0xf] }
 0x16a   :  { %17757 = vst [vmem:[#allocation90_spill] sm:$0xff] %v12119_v48  ;;  %2311 = vmatpush.bf16.msra.mxu2 %v17774_v60  ;;  %2324 = vmatpush.bf16.msra.mxu3 %v17775_v9  ;;  %v8973_v2 = vld [vmem:[#allocation6 + $0x1e8] sm:$0xf0]  ;;  %v3351_v45 = vmul.f32 %v11838_v19, %v3210_v29  ;;  %v8964_v27 = vor.u32 %v9953_v58, %v8963_v47  ;;  %v8899_v60 = vld [vmem:[#allocation6 + $0x120] sm:$0xf]  ;;  %v17776_v9 = vld [vmem:[#allocation98_spill] sm:$0xff] }
 0x16b   :  { %17761 = vst [vmem:[#allocation97_spill] sm:$0xff] %v12129_v62  ;;  %2238 = vmatmul.bf16.vlgmr.msrb.gmra.mxu0 %v11986_v4  ;;  %2251 = vmatmul.bf16.vlgmr.msrb.gmra.mxu1 %v11986_v4  ;;  %v8968_v3 = vor.u32 %v9945_v32, %v8965_v26  ;;  %v17780_v62 = vld [vmem:[#allocation100_spill] sm:$0xff]  ;;  %v8901_v29 = vld [vmem:[#allocation6 + $0x160] sm:$0xf0]  ;;  %v17782_v58 = vld [vmem:[#allocation102_spill] sm:$0xff]  ;;  %v8972_v26 = vor.u32 %v9954_v1, %v8971_v40 }
 0x16c   :  { %17763 = vst [vmem:[#allocation101_spill] sm:$0xff] %v12144_v53  ;;  %2264 = vmatmul.bf16.vlgmr.msrb.gmra.mxu2 %v11986_v4  ;;  %2277 = vmatmul.bf16.vlgmr.msrb.gmra.mxu3 %v11986_v4  ;;  %v9938_v47 = vld [vmem:[#allocation6 + $0x164] sm:$0xf0]  ;;  %v12198_v32 = vadd.f32 %v3351_v45, %v17782_v58  ;;  %v8900_v45 = vor.u32 %v9937_v38, %v8899_v60  ;;  %v3222_v60 = vpop.permute.xlu2 %3221 }
 0x16d   :  { %17765 = vst [vmem:[#allocation103_spill] sm:$0xff] %v12151_v57  ;;  %v17778_v57 = vld [vmem:[#allocation99_spill] sm:$0xff]  ;;  %2286 = vmatpush.bf16.msra.mxu0 %v8964_v27  ;;  %2299 = vmatpush.bf16.msra.mxu1 %v8968_v3  ;;  %v8904_v1 = vor.u32 %v9929_v17, %v8901_v29  ;;  %v3360_v17 = vmul.f32 %v11761_v15, %v3222_v60 }
 0x16e   :  { %17767 = vst [vmem:[#allocation104_spill] sm:$0xff] %v12154_v63  ;;  %v12187_v63 = vadd.f32 %v3348_v59, %v17776_v9  ;;  %v12190_v53 = vadd.f32 %v3349_v49, %v17778_v57  ;;  %v8976_v59 = vor.u32 %v9946_v42, %v8973_v2  ;;  %v9930_v9 = vld [vmem:[#allocation6 + $0x12c] sm:$0xf]  ;;  %v2918_v49 = vpop.permute.xlu1 %2917  ;;  %v12214_v40 = vmul.f32 %v12198_v32, %v12198_v32  ;;  %v3194_v2 = vpop.permute.xlu0 %3193 }
 0x16f   :  { %17768 = vst [vmem:[#allocation144_spill] sm:$0xff] %v12157_v46  ;;  %v8909_v57 = vld [vmem:[#allocation6 + $0x168] sm:$0xf0]  ;;  %2312 = vmatpush.bf16.msra.mxu2 %v8972_v26  ;;  %v12217_v3 = vmul.f32 %v10955_v51, %v2918_v49  ;;  %v12220_v58 = vmul.f32 %v10957_v31, %v2918_v49  ;;  %v12223_v46 = vmul.f32 %v10959_v50, %v2918_v49 }
 0x170   :  { %17771 = vst [vmem:[#allocation145_spill] sm:$0xff] %v12166_v20  ;;  %2325 = vmatpush.bf16.msra.mxu3 %v8976_v59  ;;  %v8912_v27 = vor.u32 %v9930_v9, %v8909_v57  ;;  %v12226_v38 = vmul.f32 %v10971_v14, %v2918_v49  ;;  %v3362_v29 = vmul.f32 %v11765_v5, %v3222_v60  ;;  %v8835_v59 = vld [vmem:[#allocation6 + $0xa0] sm:$0xf] }
 0x171   :  { %17772 = vst [vmem:[#allocation146_spill] sm:$0xff] %v12169_v24  ;;  %v8907_v24 = vld [vmem:[#allocation6 + $0x128] sm:$0xf]  ;;  %2287 = vmatpush.bf16.msra.mxu0 %v8900_v45  ;;  %2300 = vmatpush.bf16.msra.mxu1 %v8904_v1  ;;  %v3363_v51 = vmul.f32 %v11838_v19, %v3222_v60  ;;  %v3332_v31 = vmul.f32 %v11761_v15, %v3194_v2  ;;  %v9921_v9 = vld [vmem:[#allocation6 + $0xdc] sm:$0xf0] }
 0x172   :  { %17773 = vst [vmem:[#allocation147_spill] sm:$0xff] %v12172_v33  ;;  %v12193_v33 = vadd.f32 %v3350_v8, %v17780_v62  ;;  %v12202_v62 = vmul.f32 %v12187_v63, %v12187_v63  ;;  %v12206_v8 = vmul.f32 %v12190_v53, %v12190_v53  ;;  %v8908_v42 = vor.u32 %v9938_v47, %v8907_v24  ;;  %v17793_v1 = vld [vmem:[#allocation123_spill] sm:$0xff] }
 0x173   :  { %17777 = vst [vmem:[#allocation98_spill] sm:$0xff] %v12187_v63  ;;  %v3361_v24 = vmul.f32 %v11763_v35, %v3222_v60  ;;  %v3333_v47 = vmul.f32 %v11763_v35, %v3194_v2  ;;  %v12235_v50 = vadd.f32 %v3360_v17, %v11323_v6  ;;  %v3334_v26 = vmul.f32 %v11765_v5, %v3194_v2  ;;  %v9913_v6 = vld [vmem:[#allocation6 + $0xa4] sm:$0xf]  ;;  %v8843_v60 = vld [vmem:[#allocation6 + $0xa8] sm:$0xf] }
 0x174   :  { %17779 = vst [vmem:[#allocation99_spill] sm:$0xff] %v12190_v53  ;;  %v12210_v20 = vmul.f32 %v12193_v33, %v12193_v33  ;;  %2313 = vmatpush.bf16.msra.mxu2 %v8908_v42  ;;  %2326 = vmatpush.bf16.msra.mxu3 %v8912_v27  ;;  %v12242_v57 = vadd.f32 %v3362_v29, %v11329_v55  ;;  %v8837_v27 = vld [vmem:[#allocation6 + $0xe0] sm:$0xf0] }
 0x175   :  { %17781 = vst [vmem:[#allocation100_spill] sm:$0xff] %v12193_v33  ;;  %v12238_v14 = vadd.f32 %v3361_v24, %v11326_v28  ;;  %v12245_v49 = vadd.f32 %v3363_v51, %v11339_v7  ;;  %v3335_v45 = vmul.f32 %v11838_v19, %v3194_v2  ;;  %v12249_v42 = vadd.f32 %v3332_v31, %v17793_v1  ;;  %v9922_v28 = vld [vmem:[#allocation6 + $0xe4] sm:$0xf0]  ;;  %v17799_v29 = vld [vmem:[#allocation23_spill] sm:$0xff]  ;;  %v9914_v51 = vld [vmem:[#allocation6 + $0xac] sm:$0xf] }
 0x176   :  { %17783 = vst [vmem:[#allocation102_spill] sm:$0xff] %v12198_v32  ;;  %v12253_v17 = vmul.f32 %v12235_v50, %v12235_v50  ;;  %v17797_v24 = vld [vmem:[#allocation124_spill] sm:$0xff]  ;;  %v12263_v2 = vadd.f32 %v3334_v26, %v17799_v29  ;;  %v8771_v1 = vld [vmem:[#allocation6 + $0x20] sm:$0xf]  ;;  %v9897_v26 = vld [vmem:[#allocation6 + $0x24] sm:$0xf] }
 0x177   :  { %17784 = vst [vmem:[#allocation148_spill] sm:$0xff] %v12214_v40  ;;  %v12257_v55 = vmul.f32 %v12238_v14, %v12238_v14  ;;  %v12260_v7 = vadd.f32 %v3333_v47, %v17797_v24  ;;  %v8845_v31 = vld [vmem:[#allocation6 + $0xe8] sm:$0xf0]  ;;  %v12278_v47 = vadd.f32 %v12249_v42, %v12011_v56  ;;  %v8773_v24 = vld [vmem:[#allocation6 + $0x60] sm:$0xf0]  ;;  %v3756_v0 = vmul.f32 %v12249_v42, %v12249_v42 }
 0x178   :  { %17785 = vst [vmem:[#allocation149_spill] sm:$0xff] %v12217_v3  ;;  %v17803_v3 = vld [vmem:[#allocation24_spill] sm:$0xff]  ;;  %v3626_v21 = vadd.f32 %v12263_v2, %v12017_v22  ;;  %v9235_v56 = vld [vmem:[#allocation6 + $0x3b0] sm:$0xf]  ;;  %v10011_v22 = vld [vmem:[#allocation6 + $0x3b4] sm:$0xf] }
 0x179   :  { %17786 = vst [vmem:[#allocation150_spill] sm:$0xff] %v12220_v58  ;;  %v12271_v58 = vmul.f32 %v12245_v49, %v12245_v49  ;;  %v12274_v13 = vadd.f32 %v3335_v45, %v17803_v3  ;;  %v8779_v29 = vld [vmem:[#allocation6 + $0x28] sm:$0xf]  ;;  %v3605_v61 = vadd.f32 %v12260_v7, %v12014_v12  ;;  %v3757_v3 = vmul.f32 %v12260_v7, %v12260_v7  ;;  %v8781_v45 = vld [vmem:[#allocation6 + $0x68] sm:$0xf0] }
 0x17a   :  { %17787 = vst [vmem:[#allocation151_spill] sm:$0xff] %v12223_v46  ;;  %v12267_v46 = vmul.f32 %v12242_v57, %v12242_v57 }
 0x17b   :  { %17788 = vst [vmem:[#allocation152_spill] sm:$0xff] %v12226_v38  ;;  %v9905_v38 = vld [vmem:[#allocation6 + $0x5c] sm:$0xf0]  ;;  %v3647_v52 = vadd.f32 %v12274_v13, %v12022_v43  ;;  %v3759_v12 = vmul.f32 %v12274_v13, %v12274_v13  ;;  %v10012_v43 = vld [vmem:[#allocation6 + $0x3bc] sm:$0xf] }
 0x17c   :  { %17789 = vst [vmem:[#allocation153_spill] sm:$0xff] %v12235_v50  ;;  %v9245_v50 = vld [vmem:[#allocation6 + $0x3f8] sm:$0xf0] }
 0x17d   :  { %17790 = vst [vmem:[#allocation154_spill] sm:$0xff] %v12238_v14  ;;  %v10020_v14 = vld [vmem:[#allocation6 + $0x3f4] sm:$0xf0]  ;;  %v12302_v40 = vadd.f32 %v3759_v12, %v12052_v16 }
 0x17e   :  { %17791 = vst [vmem:[#allocation155_spill] sm:$0xff] %v12242_v57  ;;  %v8844_v57 = vor.u32 %v9922_v28, %v8843_v60  ;;  %v9248_v28 = vor.u32 %v10012_v43, %v9245_v50  ;;  %v17805_v43 = vld [vmem:[#allocation115_spill] sm:$0xff]  ;;  %v17809_v50 = vld [vmem:[#allocation117_spill] sm:$0xff] }
 0x17f   :  { %17792 = vst [vmem:[#allocation156_spill] sm:$0xff] %v12245_v49  ;;  %v8840_v49 = vor.u32 %v9913_v6, %v8837_v27  ;;  %v9236_v6 = vor.u32 %v10019_v30, %v9235_v56  ;;  %v17807_v30 = vld [vmem:[#allocation116_spill] sm:$0xff] }
 0x180   :  { %17794 = vst [vmem:[#allocation123_spill] sm:$0xff] %v12249_v42  ;;  %v12295_v42 = vadd.f32 %v3756_v0, %v12034_v18  ;;  %2314 = vmatpush.bf16.msra.mxu2 %v8844_v57  ;;  %v8776_v18 = vor.u32 %v9897_v26, %v8773_v24  ;;  %v8780_v0 = vor.u32 %v9906_v36, %v8779_v29 }
 0x181   :  { %17795 = vst [vmem:[#allocation157_spill] sm:$0xff] %v12253_v17  ;;  %v9243_v17 = vld [vmem:[#allocation6 + $0x3b8] sm:$0xf]  ;;  %2301 = vmatpush.bf16.msra.mxu1 %v8840_v49 }
 0x182   :  { %17796 = vst [vmem:[#allocation158_spill] sm:$0xff] %v12257_v55  ;;  %v9237_v55 = vld [vmem:[#allocation6 + $0x3f0] sm:$0xf0]  ;;  %v9244_v60 = vor.u32 %v10020_v14, %v9243_v17  ;;  %v17813_v49 = vld [vmem:[#allocation30_spill] sm:$0xff] }
 0x183   :  { %17798 = vst [vmem:[#allocation124_spill] sm:$0xff] %v12260_v7  ;;  %v12298_v7 = vadd.f32 %v3757_v3, %v12038_v39  ;;  %v8784_v39 = vor.u32 %v9898_v25, %v8781_v45  ;;  %v3258_v3 = vpop.permute.xlu2 %3257  ;;  %v9240_v27 = vor.u32 %v10011_v22, %v9237_v55  ;;  %v17815_v55 = vld [vmem:[#allocation34_spill] sm:$0xff] }
 0x184   :  { %17800 = vst [vmem:[#allocation23_spill] sm:$0xff] %v12263_v2  ;;  %v3397_v36 = vmul.f32 %v11763_v35, %v3258_v3  ;;  %v3398_v25 = vmul.f32 %v11765_v5, %v3258_v3  ;;  %v3399_v56 = vmul.f32 %v11838_v19, %v3258_v3  ;;  %2315 = vmatpush.bf16.msra.mxu2 %v8780_v0 }
 0x185   :  { %17801 = vst [vmem:[#allocation159_spill] sm:$0xff] %v12267_v46  ;;  %v8836_v46 = vor.u32 %v9921_v9, %v8835_v59  ;;  %v8848_v59 = vor.u32 %v9914_v51, %v8845_v31  ;;  %v8772_v9 = vor.u32 %v9905_v38, %v8771_v1  ;;  %2302 = vmatpush.bf16.msra.mxu1 %v8776_v18  ;;  %v17817_v18 = vld [vmem:[#allocation35_spill] sm:$0xff] }
 0x186   :  { %17802 = vst [vmem:[#allocation160_spill] sm:$0xff] %v12271_v58  ;;  %v3758_v58 = vmul.f32 %v12263_v2, %v12263_v2  ;;  %v12328_v51 = vadd.f32 %v3397_v36, %v17815_v55  ;;  %v12352_v0 = vadd.f32 %v3398_v25, %v17817_v18  ;;  %v9181_v36 = vld [vmem:[#allocation6 + $0x378] sm:$0xf0]  ;;  %v9109_v55 = vld [vmem:[#allocation6 + $0x2f0] sm:$0xf0] }
 0x187   :  { %17804 = vst [vmem:[#allocation24_spill] sm:$0xff] %v12274_v13  ;;  %2288 = vmatpush.bf16.msra.mxu0 %v8836_v46  ;;  %v3198_v13 = vpop.permute.xlu1 %3197  ;;  %2327 = vmatpush.bf16.msra.mxu3 %v8848_v59  ;;  %v3214_v59 = vpop.permute.xlu0 %3213 }
 0x188   :  { %v3922_v2 = vadd.f32 %v3758_v58, %v12042_v11  ;;  %v3336_v11 = vmul.f32 %v11761_v15, %v3198_v13  ;;  %v3337_v12 = vmul.f32 %v11763_v35, %v3198_v13  ;;  %v3338_v16 = vmul.f32 %v11765_v5, %v3198_v13  ;;  %17816 = vst [vmem:[#allocation34_spill] sm:$0xff] %v12328_v51 }
 0x189   :  { %v3339_v46 = vmul.f32 %v11838_v19, %v3198_v13  ;;  %v3396_v58 = vmul.f32 %v11761_v15, %v3258_v3  ;;  %v17811_v13 = vld [vmem:[#allocation118_spill] sm:$0xff]  ;;  %2347 = vmatpush.bf16.msrb.mxu1 %v9240_v27  ;;  %2360 = vmatpush.bf16.msrb.mxu2 %v9244_v60  ;;  %17818 = vst [vmem:[#allocation35_spill] sm:$0xff] %v12352_v0  ;;  %v9173_v27 = vld [vmem:[#allocation6 + $0x370] sm:$0xf0] }
 0x18a   :  { %v12313_v22 = vadd.f32 %v3336_v11, %v17805_v43  ;;  %v12316_v38 = vadd.f32 %v3337_v12, %v17807_v30  ;;  %v12319_v14 = vadd.f32 %v3338_v16, %v17809_v50  ;;  %v9179_v60 = vld [vmem:[#allocation6 + $0x338] sm:$0xf]  ;;  %v12366_v16 = vmul.f32 %v12328_v51, %v12328_v51  ;;  %2303 = vmatmul.bf16.vlgmr.msra.gmra.mxu1 %v11986_v4  ;;  %v9987_v43 = vld [vmem:[#allocation6 + $0x2ec] sm:$0xf0]  ;;  %v9979_v30 = vld [vmem:[#allocation6 + $0x2b4] sm:$0xf] }
 0x18b   :  { %2289 = vmatpush.bf16.msra.mxu0 %v8772_v9  ;;  %2328 = vmatpush.bf16.msra.mxu3 %v8784_v39  ;;  %v12322_v57 = vadd.f32 %v3339_v46, %v17811_v13  ;;  %v12325_v17 = vadd.f32 %v3396_v58, %v17813_v49  ;;  %v9171_v9 = vld [vmem:[#allocation6 + $0x330] sm:$0xf]  ;;  %v10004_v46 = vld [vmem:[#allocation6 + $0x374] sm:$0xf0]  ;;  %v9996_v58 = vld [vmem:[#allocation6 + $0x33c] sm:$0xf]  ;;  %v3353_v50 = vmul.f32 %v11763_v35, %v3214_v59 }
 0x18c   :  { %17806 = vst [vmem:[#allocation115_spill] sm:$0xff] %v12313_v22  ;;  %v12332_v31 = vadd.f32 %v12278_v47, %v12313_v22  ;;  %v12335_v1 = vadd.f32 %v3605_v61, %v12316_v38  ;;  %v12338_v26 = vadd.f32 %v3626_v21, %v12319_v14  ;;  %v3760_v29 = vmul.f32 %v12313_v22, %v12313_v22  ;;  %v10003_v61 = vld [vmem:[#allocation6 + $0x36c] sm:$0xf0]  ;;  %v17826_v22 = vld [vmem:[#allocation31_spill] sm:$0xff] }
 0x18d   :  { %17808 = vst [vmem:[#allocation116_spill] sm:$0xff] %v12316_v38  ;;  %v12341_v24 = vadd.f32 %v3647_v52, %v12322_v57  ;;  %v3761_v45 = vmul.f32 %v12316_v38, %v12316_v38  ;;  %v3762_v47 = vmul.f32 %v12319_v14, %v12319_v14  ;;  %v3763_v21 = vmul.f32 %v12322_v57, %v12322_v57  ;;  %v17819_v52 = vld [vmem:[#allocation36_spill] sm:$0xff]  ;;  %v9117_v38 = vld [vmem:[#allocation6 + $0x2f8] sm:$0xf0] }
 0x18e   :  { %17810 = vst [vmem:[#allocation117_spill] sm:$0xff] %v12319_v14  ;;  %v12355_v39 = vadd.f32 %v3399_v56, %v17819_v52  ;;  %v12359_v3 = vmul.f32 %v12325_v17, %v12325_v17  ;;  %2290 = vmatmul.bf16.vlgmr.msra.gmra.mxu0 %v11986_v4  ;;  %v12374_v56 = vmul.f32 %v12352_v0, %v12352_v0  ;;  %v9980_v14 = vld [vmem:[#allocation6 + $0x2bc] sm:$0xf] }
 0x18f   :  { %2334 = vmatpush.bf16.msrb.mxu0 %v9236_v6  ;;  %17812 = vst [vmem:[#allocation118_spill] sm:$0xff] %v12322_v57  ;;  %2373 = vmatpush.bf16.msrb.mxu3 %v9248_v28  ;;  %v9995_v6 = vld [vmem:[#allocation6 + $0x334] sm:$0xf]  ;;  %v3881_v28 = vadd.f32 %v12295_v42, %v3760_v29  ;;  %v3902_v11 = vadd.f32 %v12298_v7, %v3761_v45  ;;  %v9115_v29 = vld [vmem:[#allocation6 + $0x2b8] sm:$0xf] }
 0x190   :  { %17814 = vst [vmem:[#allocation30_spill] sm:$0xff] %v12325_v17  ;;  %v3923_v12 = vadd.f32 %v3922_v2, %v3762_v47  ;;  %v12370_v25 = vadd.f32 %v12302_v40, %v3763_v21  ;;  %v12378_v42 = vmul.f32 %v12355_v39, %v12355_v39  ;;  %v3352_v7 = vmul.f32 %v11761_v15, %v3214_v59  ;;  %v9107_v2 = vld [vmem:[#allocation6 + $0x2b0] sm:$0xf]  ;;  %v9988_v45 = vld [vmem:[#allocation6 + $0x2f4] sm:$0xf0] }
 0x191   :  { %17820 = vst [vmem:[#allocation36_spill] sm:$0xff] %v12355_v39  ;;  %2316 = vmatmul.bf16.vlgmr.msra.gmra.mxu2 %v11986_v4  ;;  %v3354_v40 = vmul.f32 %v11765_v5, %v3214_v59  ;;  %v3355_v13 = vmul.f32 %v11838_v19, %v3214_v59  ;;  %2329 = vmatmul.bf16.vlgmr.msra.gmra.mxu3 %v11986_v4  ;;  %v17824_v47 = vld [vmem:[#allocation29_spill] sm:$0xff] }
 0x192   :  { %17821 = vst [vmem:[#allocation161_spill] sm:$0xff] %v12366_v16  ;;  %v9172_v49 = vor.u32 %v10003_v61, %v9171_v9  ;;  %v12387_v21 = vadd.f32 %v3352_v7, %v17824_v47  ;;  %v9176_v18 = vor.u32 %v9995_v6, %v9173_v27  ;;  %v9180_v52 = vor.u32 %v10004_v46, %v9179_v60  ;;  %v17830_v59 = vld [vmem:[#allocation33_spill] sm:$0xff]  ;;  %v3206_v61 = vpop.permute.xlu1 %3205 }
 0x193   :  { %17822 = vst [vmem:[#allocation162_spill] sm:$0xff] %v12374_v56  ;;  %v9184_v57 = vor.u32 %v9996_v58, %v9181_v36  ;;  %v17828_v56 = vld [vmem:[#allocation32_spill] sm:$0xff]  ;;  %v12396_v4 = vadd.f32 %v3355_v13, %v17830_v59  ;;  %v9108_v9 = vor.u32 %v9987_v43, %v9107_v2  ;;  %v9112_v6 = vor.u32 %v9979_v30, %v9109_v55  ;;  %v17836_v55 = vld [vmem:[#allocation17_spill] sm:$0xff] }
 0x194   :  { %17823 = vst [vmem:[#allocation163_spill] sm:$0xff] %v12378_v42  ;;  %v12390_v42 = vadd.f32 %v3353_v50, %v17826_v22  ;;  %v12393_v16 = vadd.f32 %v3354_v40, %v17828_v56  ;;  %2335 = vmatpush.bf16.msrb.mxu0 %v9172_v49  ;;  %v12400_v7 = vmul.f32 %v12387_v21, %v12387_v21  ;;  %v17834_v13 = vld [vmem:[#allocation16_spill] sm:$0xff] }
 0x195   :  { %17825 = vst [vmem:[#allocation29_spill] sm:$0xff] %v12387_v21  ;;  %2348 = vmatpush.bf16.msrb.mxu1 %v9176_v18  ;;  %2361 = vmatpush.bf16.msrb.mxu2 %v9180_v52  ;;  %v9116_v27 = vor.u32 %v9988_v45, %v9115_v29  ;;  %v12412_v46 = vmul.f32 %v12396_v4, %v12396_v4 }
 0x196   :  { %17827 = vst [vmem:[#allocation31_spill] sm:$0xff] %v12390_v42  ;;  %v12404_v22 = vmul.f32 %v12390_v42, %v12390_v42  ;;  %v12408_v60 = vmul.f32 %v12393_v16, %v12393_v16  ;;  %2374 = vmatpush.bf16.msrb.mxu3 %v9184_v57  ;;  %v9120_v58 = vor.u32 %v9980_v14, %v9117_v38  ;;  %v17832_v14 = vld [vmem:[#allocation15_spill] sm:$0xff] }
 0x197   :  { %17829 = vst [vmem:[#allocation32_spill] sm:$0xff] %v12393_v16  ;;  %v3344_v36 = vmul.f32 %v11761_v15, %v3206_v61  ;;  %v3345_v56 = vmul.f32 %v11763_v35, %v3206_v61  ;;  %v3346_v2 = vmul.f32 %v11765_v5, %v3206_v61  ;;  %v3347_v43 = vmul.f32 %v11838_v19, %v3206_v61 }
 0x198   :  { %17831 = vst [vmem:[#allocation33_spill] sm:$0xff] %v12396_v4  ;;  %2336 = vmatpush.bf16.msrb.mxu0 %v9108_v9  ;;  %v3586_v30 = vadd.f32 %v12332_v31, %v12104_v54  ;;  %v3607_v50 = vadd.f32 %v12335_v1, %v12107_v44  ;;  %v3628_v40 = vadd.f32 %v12338_v26, %v12110_v34  ;;  %v17838_v31 = vld [vmem:[#allocation18_spill] sm:$0xff] }
 0x199   :  { %v3649_v38 = vadd.f32 %v12341_v24, %v12119_v48  ;;  %2349 = vmatpush.bf16.msrb.mxu1 %v9112_v6  ;;  %2362 = vmatpush.bf16.msrb.mxu2 %v9116_v27  ;;  %v12427_v57 = vadd.f32 %v3344_v36, %v17832_v14  ;;  %v12430_v49 = vadd.f32 %v3345_v56, %v17834_v13  ;;  %v9956_v34 = vld [vmem:[#allocation6 + $0x1f4] sm:$0xf0]  ;;  %v9948_v44 = vld [vmem:[#allocation6 + $0x1bc] sm:$0xf] }
 0x19a   :  { %v12433_v29 = vadd.f32 %v3346_v2, %v17836_v55  ;;  %2375 = vmatpush.bf16.msrb.mxu3 %v9120_v58  ;;  %v12436_v1 = vadd.f32 %v3347_v43, %v17838_v31  ;;  %v3882_v26 = vadd.f32 %v3881_v28, %v12133_v37  ;;  %v3903_v45 = vadd.f32 %v3902_v11, %v12137_v23  ;;  %v3226_v2 = vpop.permute.xlu0 %3225  ;;  %v8989_v54 = vld [vmem:[#allocation6 + $0x1f8] sm:$0xf0] }
 0x19b   :  { %17833 = vst [vmem:[#allocation15_spill] sm:$0xff] %v12427_v57  ;;  %v3924_v24 = vadd.f32 %v3923_v12, %v12141_v10  ;;  %v3587_v47 = vadd.f32 %v3586_v30, %v12427_v57  ;;  %v3608_v18 = vadd.f32 %v3607_v50, %v12430_v49  ;;  %v3768_v59 = vmul.f32 %v12427_v57, %v12427_v57  ;;  %v3270_v10 = vpop.permute.xlu2 %3269 }
 0x19c   :  { %17835 = vst [vmem:[#allocation16_spill] sm:$0xff] %v12430_v49  ;;  %v3629_v52 = vadd.f32 %v3628_v40, %v12433_v29  ;;  %v3650_v9 = vadd.f32 %v3649_v38, %v12436_v1  ;;  %v3769_v61 = vmul.f32 %v12430_v49, %v12430_v49  ;;  %v3770_v37 = vmul.f32 %v12433_v29, %v12433_v29 }
 0x19d   :  { %17837 = vst [vmem:[#allocation17_spill] sm:$0xff] %v12433_v29  ;;  %v3771_v23 = vmul.f32 %v12436_v1, %v12436_v1  ;;  %v12454_v28 = vadd.f32 %v3587_v47, %v12187_v63  ;;  %v12457_v11 = vadd.f32 %v3608_v18, %v12190_v53  ;;  %v3883_v6 = vadd.f32 %v3882_v26, %v3768_v59  ;;  %v9963_v18 = vld [vmem:[#allocation6 + $0x234] sm:$0xf] }
 0x19e   :  { %17839 = vst [vmem:[#allocation18_spill] sm:$0xff] %v12436_v1  ;;  %v12460_v12 = vadd.f32 %v3629_v52, %v12193_v33  ;;  %v12463_v27 = vadd.f32 %v3650_v9, %v12198_v32  ;;  %v3904_v58 = vadd.f32 %v3903_v45, %v3769_v61  ;;  %v3925_v36 = vadd.f32 %v3924_v24, %v3770_v37  ;;  %v17844_v45 = vld [vmem:[#allocation47_spill] sm:$0xff]  ;;  %v9045_v52 = vld [vmem:[#allocation6 + $0x270] sm:$0xf0]  ;;  %v17847_v9 = vld [vmem:[#allocation48_spill] sm:$0xff] }
 0x19f   :  { %v3945_v56 = vadd.f32 %v12370_v25, %v12148_v41  ;;  %v12468_v43 = vadd.f32 %v3883_v6, %v12202_v62  ;;  %v3408_v30 = vmul.f32 %v11761_v15, %v3270_v10  ;;  %v3409_v50 = vmul.f32 %v11763_v35, %v3270_v10  ;;  %v9043_v41 = vld [vmem:[#allocation6 + $0x230] sm:$0xf]  ;;  %v17842_v62 = vld [vmem:[#allocation46_spill] sm:$0xff]  ;;  %v17855_v32 = vld [vmem:[#allocation43_spill] sm:$0xff] }
 0x1a0   :  { %v3410_v40 = vmul.f32 %v11765_v5, %v3270_v10  ;;  %v12474_v38 = vadd.f32 %v3904_v58, %v12206_v8  ;;  %v12477_v14 = vadd.f32 %v3925_v36, %v12210_v20  ;;  %v3411_v55 = vmul.f32 %v11838_v19, %v3270_v10  ;;  %v17840_v25 = vld [vmem:[#allocation45_spill] sm:$0xff]  ;;  %v17846_v20 = vld [vmem:[#allocation148_spill] sm:$0xff]  ;;  %v9051_v10 = vld [vmem:[#allocation6 + $0x238] sm:$0xf] }
 0x1a1   :  { %v3946_v13 = vadd.f32 %v3945_v56, %v3771_v23  ;;  %v12481_v31 = vadd.f32 %v3408_v30, %v17840_v25  ;;  %v12484_v26 = vadd.f32 %v3409_v50, %v17842_v62  ;;  %v3364_v47 = vmul.f32 %v11761_v15, %v3226_v2  ;;  %v9971_v8 = vld [vmem:[#allocation6 + $0x26c] sm:$0xf0]  ;;  %v9972_v6 = vld [vmem:[#allocation6 + $0x274] sm:$0xf0]  ;;  %v9964_v58 = vld [vmem:[#allocation6 + $0x23c] sm:$0xf] }
 0x1a2   :  { %v12487_v24 = vadd.f32 %v3410_v40, %v17844_v45  ;;  %v12494_v61 = vadd.f32 %v3411_v55, %v17847_v9  ;;  %v3365_v37 = vmul.f32 %v11763_v35, %v3226_v2  ;;  %v3366_v23 = vmul.f32 %v11765_v5, %v3226_v2  ;;  %v9053_v40 = vld [vmem:[#allocation6 + $0x278] sm:$0xf0]  ;;  %v9955_v55 = vld [vmem:[#allocation6 + $0x1ec] sm:$0xf0]  ;;  %v9947_v53 = vld [vmem:[#allocation6 + $0x1b4] sm:$0xf] }
 0x1a3   :  { %17841 = vst [vmem:[#allocation45_spill] sm:$0xff] %v12481_v31  ;;  %v12491_v59 = vadd.f32 %v3946_v13, %v17846_v20  ;;  %v12500_v36 = vmul.f32 %v12481_v31, %v12481_v31  ;;  %v12504_v56 = vmul.f32 %v12484_v26, %v12484_v26  ;;  %v3367_v50 = vmul.f32 %v11838_v19, %v3226_v2  ;;  %v8979_v13 = vld [vmem:[#allocation6 + $0x1b0] sm:$0xf]  ;;  %v17853_v20 = vld [vmem:[#allocation42_spill] sm:$0xff]  ;;  %v8981_v63 = vld [vmem:[#allocation6 + $0x1f0] sm:$0xf0] }
 0x1a4   :  { %17843 = vst [vmem:[#allocation46_spill] sm:$0xff] %v12484_v26  ;;  %v12508_v30 = vmul.f32 %v12487_v24, %v12487_v24  ;;  %v12513_v25 = vmul.f32 %v12494_v61, %v12494_v61  ;;  %v17851_v62 = vld [vmem:[#allocation41_spill] sm:$0xff]  ;;  %v12519_v9 = vadd.f32 %v3365_v37, %v17853_v20  ;;  %v12522_v33 = vadd.f32 %v3366_v23, %v17855_v32  ;;  %v8987_v1 = vld [vmem:[#allocation6 + $0x1b8] sm:$0xf]  ;;  %v17857_v2 = vld [vmem:[#allocation44_spill] sm:$0xff] }
 0x1a5   :  { %17845 = vst [vmem:[#allocation47_spill] sm:$0xff] %v12487_v24  ;;  %v12516_v45 = vadd.f32 %v3364_v47, %v17851_v62  ;;  %v12525_v29 = vadd.f32 %v3367_v50, %v17857_v2  ;;  %v9044_v49 = vor.u32 %v9971_v8, %v9043_v41  ;;  %v9048_v57 = vor.u32 %v9963_v18, %v9045_v52  ;;  %v3218_v47 = vpop.permute.xlu1 %3217  ;;  %v17859_v2 = vld [vmem:[#allocation25_spill] sm:$0xff] }
 0x1a6   :  { %17848 = vst [vmem:[#allocation148_spill] sm:$0xff] %v12494_v61  ;;  %v9052_v48 = vor.u32 %v9972_v6, %v9051_v10  ;;  %v12533_v32 = vmul.f32 %v12519_v9, %v12519_v9  ;;  %v12537_v23 = vmul.f32 %v12522_v33, %v12522_v33  ;;  %v9056_v50 = vor.u32 %v9964_v58, %v9053_v40 }
 0x1a7   :  { %17849 = vst [vmem:[#allocation48_spill] sm:$0xff] %v12508_v30  ;;  %v12529_v37 = vmul.f32 %v12516_v45, %v12516_v45  ;;  %v12541_v41 = vmul.f32 %v12525_v29, %v12525_v29  ;;  %2337 = vmatpush.bf16.msrb.mxu0 %v9044_v49  ;;  %2350 = vmatpush.bf16.msrb.mxu1 %v9048_v57 }
 0x1a8   :  { %17850 = vst [vmem:[#allocation164_spill] sm:$0xff] %v12513_v25  ;;  %v8980_v8 = vor.u32 %v9955_v55, %v8979_v13  ;;  %v8984_v18 = vor.u32 %v9947_v53, %v8981_v63  ;;  %2363 = vmatpush.bf16.msrb.mxu2 %v9052_v48  ;;  %2376 = vmatpush.bf16.msrb.mxu3 %v9056_v50  ;;  %v17863_v63 = vld [vmem:[#allocation27_spill] sm:$0xff] }
 0x1a9   :  { %17852 = vst [vmem:[#allocation41_spill] sm:$0xff] %v12516_v45  ;;  %v8988_v52 = vor.u32 %v9956_v34, %v8987_v1  ;;  %v8992_v10 = vor.u32 %v9948_v44, %v8989_v54  ;;  %v3356_v6 = vmul.f32 %v11761_v15, %v3218_v47  ;;  %v3357_v62 = vmul.f32 %v11763_v35, %v3218_v47  ;;  %v17861_v34 = vld [vmem:[#allocation26_spill] sm:$0xff]  ;;  %v17865_v1 = vld [vmem:[#allocation28_spill] sm:$0xff] }
 0x1aa   :  { %17854 = vst [vmem:[#allocation42_spill] sm:$0xff] %v12519_v9  ;;  %v3358_v20 = vmul.f32 %v11765_v5, %v3218_v47  ;;  %v3359_v58 = vmul.f32 %v11838_v19, %v3218_v47  ;;  %v3589_v40 = vadd.f32 %v12454_v28, %v12387_v21  ;;  %v3610_v48 = vadd.f32 %v12457_v11, %v12390_v42  ;;  %v8853_v42 = vld [vmem:[#allocation6 + $0xf0] sm:$0xf0]  ;;  %v8859_v21 = vld [vmem:[#allocation6 + $0xb8] sm:$0xf] }
 0x1ab   :  { %17856 = vst [vmem:[#allocation43_spill] sm:$0xff] %v12522_v33  ;;  %v12550_v49 = vadd.f32 %v3356_v6, %v17859_v2  ;;  %v3631_v54 = vadd.f32 %v12460_v12, %v12393_v16  ;;  %v3652_v44 = vadd.f32 %v12463_v27, %v12396_v4  ;;  %2338 = vmatpush.bf16.msrb.mxu0 %v8980_v8  ;;  %v3282_v8 = vpop.permute.xlu2 %3281 }
 0x1ac   :  { %17858 = vst [vmem:[#allocation44_spill] sm:$0xff] %v12525_v29  ;;  %2351 = vmatpush.bf16.msrb.mxu1 %v8984_v18  ;;  %v12559_v53 = vadd.f32 %v3357_v62, %v17861_v34  ;;  %v12562_v57 = vadd.f32 %v3358_v20, %v17863_v63  ;;  %v12565_v28 = vadd.f32 %v3359_v58, %v17865_v1  ;;  %v17867_v18 = vld [vmem:[#allocation153_spill] sm:$0xff]  ;;  %v17869_v20 = vld [vmem:[#allocation155_spill] sm:$0xff] }
 0x1ad   :  { %17860 = vst [vmem:[#allocation25_spill] sm:$0xff] %v12550_v49  ;;  %2364 = vmatpush.bf16.msrb.mxu2 %v8988_v52  ;;  %2377 = vmatpush.bf16.msrb.mxu3 %v8992_v10  ;;  %v3590_v11 = vadd.f32 %v3589_v40, %v12550_v49  ;;  %v3780_v12 = vmul.f32 %v12550_v49, %v12550_v49  ;;  %v17870_v40 = vld [vmem:[#allocation156_spill] sm:$0xff]  ;;  %v17889_v49 = vld [vmem:[#allocation130_spill] sm:$0xff]  ;;  %v3254_v25 = vpop.permute.xlu1 %3253 }
 0x1ae   :  { %17862 = vst [vmem:[#allocation26_spill] sm:$0xff] %v12559_v53  ;;  %v3885_v27 = vadd.f32 %v12468_v43, %v12400_v7  ;;  %v3611_v13 = vadd.f32 %v3610_v48, %v12559_v53  ;;  %v3632_v55 = vadd.f32 %v3631_v54, %v12562_v57  ;;  %v3653_v47 = vadd.f32 %v3652_v44, %v12565_v28  ;;  %v17868_v43 = vld [vmem:[#allocation154_spill] sm:$0xff]  ;;  %v3262_v54 = vpop.permute.xlu0 %3261  ;;  %v17871_v44 = vld [vmem:[#allocation157_spill] sm:$0xff] }
 0x1af   :  { %17864 = vst [vmem:[#allocation27_spill] sm:$0xff] %v12562_v57  ;;  %v3781_v50 = vmul.f32 %v12559_v53, %v12559_v53  ;;  %v12578_v52 = vadd.f32 %v3590_v11, %v17867_v18  ;;  %v3782_v10 = vmul.f32 %v12562_v57, %v12562_v57  ;;  %v3783_v6 = vmul.f32 %v12565_v28, %v12565_v28  ;;  %v17887_v57 = vld [vmem:[#allocation129_spill] sm:$0xff] }
 0x1b0   :  { %17866 = vst [vmem:[#allocation28_spill] sm:$0xff] %v12565_v28  ;;  %v3886_v7 = vadd.f32 %v3885_v27, %v3780_v12  ;;  %v12585_v62 = vadd.f32 %v3611_v13, %v17868_v43  ;;  %v12588_v58 = vadd.f32 %v3632_v55, %v17869_v20  ;;  %v12591_v2 = vadd.f32 %v3653_v47, %v17870_v40  ;;  %v17872_v47 = vld [vmem:[#allocation49_spill] sm:$0xff]  ;;  %v17874_v40 = vld [vmem:[#allocation158_spill] sm:$0xff]  ;;  %v17879_v43 = vld [vmem:[#allocation52_spill] sm:$0xff] }
 0x1b1   :  { %v3906_v48 = vadd.f32 %v12474_v38, %v12404_v22  ;;  %v3927_v63 = vadd.f32 %v12477_v14, %v12408_v60  ;;  %v3948_v1 = vadd.f32 %v12491_v59, %v12412_v46  ;;  %v3420_v11 = vmul.f32 %v11761_v15, %v3282_v8  ;;  %v8915_v60 = vld [vmem:[#allocation6 + $0x130] sm:$0xf]  ;;  %v17875_v59 = vld [vmem:[#allocation50_spill] sm:$0xff] }
 0x1b2   :  { %v12596_v34 = vadd.f32 %v3886_v7, %v17871_v44  ;;  %v3421_v27 = vmul.f32 %v11763_v35, %v3282_v8  ;;  %v3422_v13 = vmul.f32 %v11765_v5, %v3282_v8  ;;  %v3423_v55 = vmul.f32 %v11838_v19, %v3282_v8  ;;  %v9939_v14 = vld [vmem:[#allocation6 + $0x16c] sm:$0xf0] }
 0x1b3   :  { %v3907_v12 = vadd.f32 %v3906_v48, %v3781_v50  ;;  %v3928_v22 = vadd.f32 %v3927_v63, %v3782_v10  ;;  %v3949_v38 = vadd.f32 %v3948_v1, %v3783_v6  ;;  %v12607_v7 = vadd.f32 %v3420_v11, %v17872_v47  ;;  %v17877_v48 = vld [vmem:[#allocation51_spill] sm:$0xff]  ;;  %v9931_v10 = vld [vmem:[#allocation6 + $0x134] sm:$0xf]  ;;  %v8923_v63 = vld [vmem:[#allocation6 + $0x138] sm:$0xf] }
 0x1b4   :  { %v3400_v44 = vmul.f32 %v11761_v15, %v3262_v54  ;;  %v12614_v50 = vadd.f32 %v3421_v27, %v17875_v59  ;;  %v12617_v20 = vadd.f32 %v3422_v13, %v17877_v48  ;;  %v12620_v8 = vadd.f32 %v3423_v55, %v17879_v43  ;;  %v8917_v6 = vld [vmem:[#allocation6 + $0x170] sm:$0xf0]  ;;  %v17881_v1 = vld [vmem:[#allocation159_spill] sm:$0xff]  ;;  %v17882_v47 = vld [vmem:[#allocation160_spill] sm:$0xff] }
 0x1b5   :  { %17873 = vst [vmem:[#allocation157_spill] sm:$0xff] %v12607_v7  ;;  %v12611_v46 = vadd.f32 %v3907_v12, %v17874_v40  ;;  %v12623_v11 = vadd.f32 %v3928_v22, %v17881_v1  ;;  %v12626_v18 = vadd.f32 %v3949_v38, %v17882_v47  ;;  %v12630_v40 = vmul.f32 %v12607_v7, %v12607_v7  ;;  %v9940_v27 = vld [vmem:[#allocation6 + $0x174] sm:$0xf0]  ;;  %v9932_v13 = vld [vmem:[#allocation6 + $0x13c] sm:$0xf] }
 0x1b6   :  { %17876 = vst [vmem:[#allocation49_spill] sm:$0xff] %v12614_v50  ;;  %v3401_v12 = vmul.f32 %v11763_v35, %v3262_v54  ;;  %v8925_v59 = vld [vmem:[#allocation6 + $0x178] sm:$0xf0]  ;;  %v12635_v43 = vmul.f32 %v12614_v50, %v12614_v50  ;;  %v12639_v55 = vmul.f32 %v12617_v20, %v12617_v20  ;;  %v12643_v22 = vmul.f32 %v12620_v8, %v12620_v8  ;;  %v8851_v48 = vld [vmem:[#allocation6 + $0xb0] sm:$0xf] }
 0x1b7   :  { %17878 = vst [vmem:[#allocation158_spill] sm:$0xff] %v12617_v20  ;;  %v3402_v38 = vmul.f32 %v11765_v5, %v3262_v54  ;;  %v9923_v1 = vld [vmem:[#allocation6 + $0xec] sm:$0xf0]  ;;  %v9915_v47 = vld [vmem:[#allocation6 + $0xb4] sm:$0xf]  ;;  %v3403_v28 = vmul.f32 %v11838_v19, %v3262_v54  ;;  %v12648_v53 = vadd.f32 %v3400_v44, %v17887_v57  ;;  %v8916_v16 = vor.u32 %v9939_v14, %v8915_v60  ;;  %v17893_v54 = vld [vmem:[#allocation132_spill] sm:$0xff]  ;;  %v3230_v60 = vpop.permute.xlu2 %3229 }
 0x1b8   :  { %17880 = vst [vmem:[#allocation50_spill] sm:$0xff] %v12620_v8  ;;  %v12651_v4 = vadd.f32 %v3401_v12, %v17889_v49  ;;  %v8924_v8 = vor.u32 %v9940_v27, %v8923_v63  ;;  %v8928_v20 = vor.u32 %v9932_v13, %v8925_v59  ;;  %v9916_v50 = vld [vmem:[#allocation6 + $0xbc] sm:$0xf]  ;;  %v8852_v44 = vor.u32 %v9923_v1, %v8851_v48  ;;  %v17903_v48 = vld [vmem:[#allocation37_spill] sm:$0xff] }
 0x1b9   :  { %17883 = vst [vmem:[#allocation51_spill] sm:$0xff] %v12630_v40  ;;  %v8861_v7 = vld [vmem:[#allocation6 + $0xf8] sm:$0xf0]  ;;  %v12657_v30 = vadd.f32 %v3403_v28, %v17893_v54  ;;  %v12661_v49 = vmul.f32 %v12648_v53, %v12648_v53  ;;  %2339 = vmatpush.bf16.msrb.mxu0 %v8916_v16  ;;  %v3392_v12 = vmul.f32 %v11761_v15, %v3254_v25 }
 0x1ba   :  { %17884 = vst [vmem:[#allocation52_spill] sm:$0xff] %v12635_v43  ;;  %v17891_v43 = vld [vmem:[#allocation131_spill] sm:$0xff]  ;;  %v12665_v57 = vmul.f32 %v12651_v4, %v12651_v4  ;;  %2365 = vmatpush.bf16.msrb.mxu2 %v8924_v8  ;;  %2378 = vmatpush.bf16.msrb.mxu3 %v8928_v20  ;;  %v8864_v63 = vor.u32 %v9916_v50, %v8861_v7 }
 0x1bb   :  { %17885 = vst [vmem:[#allocation159_spill] sm:$0xff] %v12639_v55  ;;  %v9924_v55 = vld [vmem:[#allocation6 + $0xf4] sm:$0xf0]  ;;  %v12654_v40 = vadd.f32 %v3402_v38, %v17891_v43  ;;  %v3393_v16 = vmul.f32 %v11763_v35, %v3254_v25  ;;  %v3394_v27 = vmul.f32 %v11765_v5, %v3254_v25  ;;  %v3395_v13 = vmul.f32 %v11838_v19, %v3254_v25  ;;  %v17899_v50 = vld [vmem:[#allocation67_spill] sm:$0xff]  ;;  %v17901_v25 = vld [vmem:[#allocation68_spill] sm:$0xff] }
 0x1bc   :  { %17886 = vst [vmem:[#allocation160_spill] sm:$0xff] %v12643_v22  ;;  %v8920_v22 = vor.u32 %v9931_v10, %v8917_v6  ;;  %v8856_v10 = vor.u32 %v9915_v47, %v8853_v42  ;;  %v8860_v28 = vor.u32 %v9924_v55, %v8859_v21  ;;  %v12673_v6 = vmul.f32 %v12657_v30, %v12657_v30  ;;  %v17895_v42 = vld [vmem:[#allocation65_spill] sm:$0xff]  ;;  %v17897_v43 = vld [vmem:[#allocation66_spill] sm:$0xff] }
 0x1bd   :  { %17888 = vst [vmem:[#allocation129_spill] sm:$0xff] %v12648_v53  ;;  %v12669_v14 = vmul.f32 %v12654_v40, %v12654_v40  ;;  %v3368_v59 = vmul.f32 %v11761_v15, %v3230_v60  ;;  %v3369_v8 = vmul.f32 %v11763_v35, %v3230_v60  ;;  %2340 = vmatpush.bf16.msrb.mxu0 %v8852_v44 }
 0x1be   :  { %17890 = vst [vmem:[#allocation130_spill] sm:$0xff] %v12651_v4  ;;  %2352 = vmatpush.bf16.msrb.mxu1 %v8920_v22  ;;  %v12682_v21 = vadd.f32 %v3392_v12, %v17895_v42  ;;  %v12685_v55 = vadd.f32 %v3393_v16, %v17897_v43  ;;  %v3370_v20 = vmul.f32 %v11765_v5, %v3230_v60  ;;  %v17908_v43 = vld [vmem:[#allocation39_spill] sm:$0xff] }
 0x1bf   :  { %17892 = vst [vmem:[#allocation131_spill] sm:$0xff] %v12654_v40  ;;  %v3371_v7 = vmul.f32 %v11838_v19, %v3230_v60  ;;  %2366 = vmatpush.bf16.msrb.mxu2 %v8860_v28  ;;  %v12690_v22 = vadd.f32 %v3394_v27, %v17899_v50  ;;  %v12693_v38 = vadd.f32 %v3395_v13, %v17901_v25  ;;  %v17905_v27 = vld [vmem:[#allocation161_spill] sm:$0xff]  ;;  %v17910_v25 = vld [vmem:[#allocation162_spill] sm:$0xff] }
 0x1c0   :  { %17894 = vst [vmem:[#allocation132_spill] sm:$0xff] %v12657_v30  ;;  %v12696_v1 = vadd.f32 %v3368_v59, %v17903_v48  ;;  %2379 = vmatpush.bf16.msrb.mxu3 %v8864_v63  ;;  %v12700_v47 = vadd.f32 %v12325_v17, %v12682_v21  ;;  %v12704_v54 = vadd.f32 %v12328_v51, %v12685_v55  ;;  %v17906_v59 = vld [vmem:[#allocation38_spill] sm:$0xff]  ;;  %v17912_v51 = vld [vmem:[#allocation40_spill] sm:$0xff] }
 0x1c1   :  { %17896 = vst [vmem:[#allocation65_spill] sm:$0xff] %v12682_v21  ;;  %v3816_v44 = vmul.f32 %v12682_v21, %v12682_v21  ;;  %v3817_v60 = vmul.f32 %v12685_v55, %v12685_v55  ;;  %v12716_v28 = vadd.f32 %v12355_v39, %v12693_v38  ;;  %v3818_v63 = vmul.f32 %v12690_v22, %v12690_v22  ;;  %v17911_v39 = vld [vmem:[#allocation163_spill] sm:$0xff]  ;;  %v17991_v21 = vld [vmem:[#allocation94_spill] sm:$0xff] }
 0x1c2   :  { %17898 = vst [vmem:[#allocation66_spill] sm:$0xff] %v12685_v55  ;;  %2353 = vmatpush.bf16.msrb.mxu1 %v8856_v10  ;;  %v12712_v10 = vadd.f32 %v12352_v0, %v12690_v22  ;;  %v3819_v12 = vmul.f32 %v12693_v38, %v12693_v38  ;;  %v12729_v42 = vadd.f32 %v3369_v8, %v17906_v59  ;;  %v9907_v59 = vld [vmem:[#allocation6 + $0x6c] sm:$0xf0] }
 0x1c3   :  { %17900 = vst [vmem:[#allocation67_spill] sm:$0xff] %v12690_v22  ;;  %v12723_v16 = vadd.f32 %v12359_v3, %v3816_v44  ;;  %v12726_v13 = vadd.f32 %v17905_v27, %v3817_v60  ;;  %v12732_v50 = vadd.f32 %v3370_v20, %v17908_v43  ;;  %v12735_v48 = vadd.f32 %v17910_v25, %v3818_v63  ;;  %v8787_v27 = vld [vmem:[#allocation6 + $0x30] sm:$0xf] }
 0x1c4   :  { %17902 = vst [vmem:[#allocation68_spill] sm:$0xff] %v12693_v38  ;;  %v12738_v0 = vadd.f32 %v17911_v39, %v3819_v12  ;;  %v12741_v17 = vadd.f32 %v3371_v7, %v17912_v51  ;;  %v3592_v3 = vadd.f32 %v12578_v52, %v12516_v45  ;;  %v3613_v44 = vadd.f32 %v12585_v62, %v12519_v9  ;;  %v3274_v39 = vpop.permute.xlu0 %3273  ;;  %v8789_v38 = vld [vmem:[#allocation6 + $0x70] sm:$0xf0] }
 0x1c5   :  { %17904 = vst [vmem:[#allocation37_spill] sm:$0xff] %v12696_v1  ;;  %v3634_v8 = vadd.f32 %v12588_v58, %v12522_v33  ;;  %v3655_v20 = vadd.f32 %v12591_v2, %v12525_v29  ;;  %v3792_v60 = vmul.f32 %v12696_v1, %v12696_v1  ;;  %v3793_v51 = vmul.f32 %v12729_v42, %v12729_v42 }
 0x1c6   :  { %17907 = vst [vmem:[#allocation161_spill] sm:$0xff] %v12729_v42  ;;  %v12754_v63 = vadd.f32 %v3592_v3, %v12696_v1  ;;  %v3794_v52 = vmul.f32 %v12732_v50, %v12732_v50  ;;  %v3795_v62 = vmul.f32 %v12741_v17, %v12741_v17  ;;  %v12763_v58 = vadd.f32 %v3613_v44, %v12729_v42  ;;  %v17918_v1 = vld [vmem:[#allocation86_spill] sm:$0xff] }
 0x1c7   :  { %17909 = vst [vmem:[#allocation38_spill] sm:$0xff] %v12732_v50  ;;  %v12766_v2 = vadd.f32 %v3634_v8, %v12732_v50  ;;  %v12769_v7 = vadd.f32 %v3655_v20, %v12741_v17  ;;  %v3888_v12 = vadd.f32 %v12596_v34, %v12529_v37  ;;  %v3909_v43 = vadd.f32 %v12611_v46, %v12533_v32  ;;  %v9899_v8 = vld [vmem:[#allocation6 + $0x34] sm:$0xf]  ;;  %v8795_v20 = vld [vmem:[#allocation6 + $0x38] sm:$0xf] }
 0x1c8   :  { %17913 = vst [vmem:[#allocation39_spill] sm:$0xff] %v12741_v17  ;;  %v3930_v25 = vadd.f32 %v12623_v11, %v12537_v23  ;;  %v3951_v3 = vadd.f32 %v12626_v18, %v12541_v41  ;;  %v3412_v44 = vmul.f32 %v11761_v15, %v3274_v39  ;;  %v3413_v37 = vmul.f32 %v11763_v35, %v3274_v39  ;;  %v9908_v32 = vld [vmem:[#allocation6 + $0x74] sm:$0xf0]  ;;  %v9900_v46 = vld [vmem:[#allocation6 + $0x3c] sm:$0xf]  ;;  %v17914_v18 = vld [vmem:[#allocation84_spill] sm:$0xff] }
 0x1c9   :  { %v12780_v22 = vadd.f32 %v3888_v12, %v3792_v60  ;;  %v3414_v34 = vmul.f32 %v11765_v5, %v3274_v39  ;;  %v3415_v55 = vmul.f32 %v11838_v19, %v3274_v39  ;;  %v8797_v17 = vld [vmem:[#allocation6 + $0x78] sm:$0xf0]  ;;  %v12785_v23 = vadd.f32 %v3909_v43, %v3793_v51  ;;  %v3266_v60 = vpop.permute.xlu1 %3265  ;;  %v17916_v12 = vld [vmem:[#allocation85_spill] sm:$0xff] }
 0x1ca   :  { %v12787_v11 = vadd.f32 %v3930_v25, %v3794_v52  ;;  %v12789_v41 = vadd.f32 %v3951_v3, %v3795_v62  ;;  %v12792_v50 = vadd.f32 %v3412_v44, %v17914_v18  ;;  %v12795_v42 = vadd.f32 %v3413_v37, %v17916_v12  ;;  %v17920_v39 = vld [vmem:[#allocation138_spill] sm:$0xff]  ;;  %v17924_v37 = vld [vmem:[#allocation139_spill] sm:$0xff] }
 0x1cb   :  { %v12798_v29 = vadd.f32 %v3414_v34, %v17918_v1  ;;  %v12801_v33 = vadd.f32 %v3415_v55, %v17920_v39  ;;  %v8788_v9 = vor.u32 %v9907_v59, %v8787_v27  ;;  %v8792_v52 = vor.u32 %v9899_v8, %v8789_v38  ;;  %v17922_v59 = vld [vmem:[#allocation133_spill] sm:$0xff]  ;;  %v17925_v34 = vld [vmem:[#allocation134_spill] sm:$0xff] }
 0x1cc   :  { %17915 = vst [vmem:[#allocation162_spill] sm:$0xff] %v12792_v50  ;;  %v12805_v51 = vmul.f32 %v12792_v50, %v12792_v50  ;;  %v8796_v62 = vor.u32 %v9908_v32, %v8795_v20  ;;  %v8800_v43 = vor.u32 %v9900_v46, %v8797_v17  ;;  %v12809_v25 = vmul.f32 %v12795_v42, %v12795_v42  ;;  %v17927_v46 = vld [vmem:[#allocation135_spill] sm:$0xff] }
 0x1cd   :  { %17917 = vst [vmem:[#allocation163_spill] sm:$0xff] %v12795_v42  ;;  %v12813_v3 = vmul.f32 %v12798_v29, %v12798_v29  ;;  %v12817_v55 = vmul.f32 %v12801_v33, %v12801_v33  ;;  %2341 = vmatpush.bf16.msrb.mxu0 %v8788_v9  ;;  %v3404_v1 = vmul.f32 %v11761_v15, %v3266_v60 }
 0x1ce   :  { %17919 = vst [vmem:[#allocation40_spill] sm:$0xff] %v12798_v29  ;;  %2354 = vmatpush.bf16.msrb.mxu1 %v8792_v52  ;;  %2367 = vmatpush.bf16.msrb.mxu2 %v8796_v62  ;;  %v3405_v38 = vmul.f32 %v11763_v35, %v3266_v60  ;;  %v3406_v17 = vmul.f32 %v11765_v5, %v3266_v60 }
 0x1cf   :  { %17921 = vst [vmem:[#allocation84_spill] sm:$0xff] %v12801_v33  ;;  %v3407_v27 = vmul.f32 %v11838_v19, %v3266_v60  ;;  %2380 = vmatpush.bf16.msrb.mxu3 %v8800_v43  ;;  %v12824_v44 = vadd.f32 %v3404_v1, %v17922_v59  ;;  %v3669_v8 = vadd.f32 %v12700_v47, %v12648_v53  ;;  %v17929_v60 = vld [vmem:[#allocation136_spill] sm:$0xff]  ;;  %v3298_v1 = vpop.permute.xlu2 %3297  ;;  %v17989_v53 = vld [vmem:[#allocation93_spill] sm:$0xff] }
 0x1d0   :  { %v3690_v9 = vadd.f32 %v12704_v54, %v12651_v4  ;;  %v3711_v20 = vadd.f32 %v12712_v10, %v12654_v40  ;;  %2342 = vmatmul.bf16.vlgmr.msrb.gmra.mxu0 %v17924_v37  ;;  %v12834_v32 = vadd.f32 %v3405_v38, %v17925_v34  ;;  %v12837_v18 = vadd.f32 %v3406_v17, %v17927_v46 }
 0x1d1   :  { %17923 = vst [vmem:[#allocation85_spill] sm:$0xff] %v12824_v44  ;;  %v12840_v12 = vadd.f32 %v3407_v27, %v17929_v60  ;;  %v3732_v47 = vadd.f32 %v12716_v28, %v12657_v30  ;;  %2355 = vmatmul.bf16.vlgmr.msrb.gmra.mxu1 %v17924_v37  ;;  %2368 = vmatmul.bf16.vlgmr.msrb.gmra.mxu2 %v17924_v37  ;;  %v17958_v30 = vld [vmem:[#allocation49_spill] sm:$0xff] }
 0x1d2   :  { %17926 = vst [vmem:[#allocation86_spill] sm:$0xff] %v12834_v32  ;;  %v3670_v54 = vadd.f32 %v3669_v8, %v12824_v44  ;;  %v3828_v10 = vmul.f32 %v12824_v44, %v12824_v44  ;;  %v3965_v39 = vadd.f32 %v12723_v16, %v12661_v49  ;;  %2381 = vmatmul.bf16.vlgmr.msrb.gmra.mxu3 %v17924_v37 }
 0x1d3   :  { %17928 = vst [vmem:[#allocation138_spill] sm:$0xff] %v12837_v18  ;;  %v3691_v52 = vadd.f32 %v3690_v9, %v12834_v32  ;;  %v3712_v62 = vadd.f32 %v3711_v20, %v12837_v18  ;;  %v3733_v28 = vadd.f32 %v3732_v47, %v12840_v12  ;;  %v3829_v43 = vmul.f32 %v12834_v32, %v12834_v32  ;;  %v3286_v20 = vpop.permute.xlu0 %3285 }
 0x1d4   :  { %17930 = vst [vmem:[#allocation133_spill] sm:$0xff] %v12840_v12  ;;  %v3671_v38 = vadd.f32 %v3670_v54, %v12481_v31  ;;  %v3830_v17 = vmul.f32 %v12837_v18, %v12837_v18  ;;  %v3831_v49 = vmul.f32 %v12840_v12, %v12840_v12  ;;  %v3966_v16 = vadd.f32 %v3965_v39, %v3828_v10 }
 0x1d5   :  { %v3692_v27 = vadd.f32 %v3691_v52, %v12484_v26  ;;  %v3713_v59 = vadd.f32 %v3712_v62, %v12487_v24  ;;  %v3734_v8 = vadd.f32 %v3733_v28, %v12494_v61  ;;  %v3986_v9 = vadd.f32 %v12726_v13, %v12665_v57  ;;  %v17931_v13 = vld [vmem:[#allocation142_spill] sm:$0xff]  ;;  %v17947_v26 = vld [vmem:[#allocation141_spill] sm:$0xff] }
 0x1d6   :  { %v3967_v37 = vadd.f32 %v3966_v16, %v12500_v36  ;;  %v4007_v34 = vadd.f32 %v12735_v48, %v12669_v14  ;;  %v4028_v46 = vadd.f32 %v12738_v0, %v12673_v6  ;;  %v3436_v60 = vmul.f32 %v11761_v15, %v3298_v1  ;;  %v17933_v48 = vld [vmem:[#allocation143_spill] sm:$0xff]  ;;  %v17935_v6 = vld [vmem:[#allocation105_spill] sm:$0xff] }
 0x1d7   :  { %v3987_v47 = vadd.f32 %v3986_v9, %v3829_v43  ;;  %v3437_v54 = vmul.f32 %v11763_v35, %v3298_v1  ;;  %v3438_v10 = vmul.f32 %v11765_v5, %v3298_v1  ;;  %v3439_v39 = vmul.f32 %v11838_v19, %v3298_v1  ;;  %v17937_v43 = vld [vmem:[#allocation106_spill] sm:$0xff]  ;;  %v3278_v9 = vpop.permute.xlu1 %3277  ;;  %v17939_v1 = vld [vmem:[#allocation48_spill] sm:$0xff] }
 0x1d8   :  { %v4008_v52 = vadd.f32 %v4007_v34, %v3830_v17  ;;  %v4029_v57 = vadd.f32 %v4028_v46, %v3831_v49  ;;  %v12877_v62 = vadd.f32 %v3436_v60, %v17931_v13  ;;  %v3424_v36 = vmul.f32 %v11761_v15, %v3286_v20  ;;  %v17940_v49 = vld [vmem:[#allocation164_spill] sm:$0xff]  ;;  %v17943_v13 = vld [vmem:[#allocation95_spill] sm:$0xff] }
 0x1d9   :  { %v3988_v14 = vadd.f32 %v3987_v47, %v12504_v56  ;;  %v12882_v0 = vadd.f32 %v3437_v54, %v17933_v48  ;;  %v12885_v28 = vadd.f32 %v3438_v10, %v17935_v6  ;;  %v12888_v16 = vadd.f32 %v3439_v39, %v17937_v43  ;;  %v17945_v43 = vld [vmem:[#allocation96_spill] sm:$0xff] }
 0x1da   :  { %17932 = vst [vmem:[#allocation139_spill] sm:$0xff] %v12877_v62  ;;  %v4009_v17 = vadd.f32 %v4008_v52, %v17939_v1  ;;  %v4030_v34 = vadd.f32 %v4029_v57, %v17940_v49  ;;  %v12894_v46 = vmul.f32 %v12877_v62, %v12877_v62  ;;  %v3425_v56 = vmul.f32 %v11763_v35, %v3286_v20  ;;  %v17941_v52 = vld [vmem:[#allocation140_spill] sm:$0xff] }
 0x1db   :  { %17934 = vst [vmem:[#allocation134_spill] sm:$0xff] %v12882_v0  ;;  %v12899_v60 = vmul.f32 %v12882_v0, %v12882_v0  ;;  %v12903_v47 = vmul.f32 %v12885_v28, %v12885_v28  ;;  %v12907_v54 = vmul.f32 %v12888_v16, %v12888_v16  ;;  %v3426_v10 = vmul.f32 %v11765_v5, %v3286_v20 }
 0x1dc   :  { %17936 = vst [vmem:[#allocation135_spill] sm:$0xff] %v12885_v28  ;;  %v3427_v39 = vmul.f32 %v11838_v19, %v3286_v20  ;;  %v12912_v57 = vadd.f32 %v3424_v36, %v17941_v52  ;;  %v12915_v48 = vadd.f32 %v3425_v56, %v17943_v13  ;;  %v3416_v6 = vmul.f32 %v11761_v15, %v3278_v9  ;;  %v17949_v56 = vld [vmem:[#allocation80_spill] sm:$0xff]  ;;  %v17951_v13 = vld [vmem:[#allocation81_spill] sm:$0xff] }
 0x1dd   :  { %17938 = vst [vmem:[#allocation136_spill] sm:$0xff] %v12888_v16  ;;  %v12919_v1 = vadd.f32 %v3426_v10, %v17945_v43  ;;  %v3417_v49 = vmul.f32 %v11763_v35, %v3278_v9  ;;  %v3418_v61 = vmul.f32 %v11765_v5, %v3278_v9  ;;  %v3419_v24 = vmul.f32 %v11838_v19, %v3278_v9  ;;  %v17955_v43 = vld [vmem:[#allocation83_spill] sm:$0xff] }
 0x1de   :  { %17942 = vst [vmem:[#allocation142_spill] sm:$0xff] %v12912_v57  ;;  %v12925_v31 = vadd.f32 %v3427_v39, %v17947_v26  ;;  %v12929_v20 = vmul.f32 %v12912_v57, %v12912_v57  ;;  %v12933_v36 = vmul.f32 %v12915_v48, %v12915_v48  ;;  %v12936_v10 = vadd.f32 %v3416_v6, %v17949_v56  ;;  %v17953_v26 = vld [vmem:[#allocation82_spill] sm:$0xff] }
 0x1df   :  { %17944 = vst [vmem:[#allocation143_spill] sm:$0xff] %v12915_v48  ;;  %v12940_v52 = vmul.f32 %v12919_v1, %v12919_v1  ;;  %v12943_v9 = vadd.f32 %v3417_v49, %v17951_v13  ;;  %v12946_v39 = vadd.f32 %v3418_v61, %v17953_v26  ;;  %v12949_v12 = vadd.f32 %v3419_v24, %v17955_v43 }
 0x1e0   :  { %17946 = vst [vmem:[#allocation105_spill] sm:$0xff] %v12919_v1  ;;  %v12953_v18 = vmul.f32 %v12925_v31, %v12925_v31  ;;  %v3672_v6 = vadd.f32 %v3671_v38, %v12792_v50  ;;  %v3693_v56 = vadd.f32 %v3692_v27, %v12795_v42  ;;  %v3714_v32 = vadd.f32 %v3713_v59, %v12798_v29  ;;  %v3242_v29 = vpop.permute.xlu2 %3241  ;;  %v17957_v42 = vld [vmem:[#allocation157_spill] sm:$0xff] }
 0x1e1   :  { %17948 = vst [vmem:[#allocation106_spill] sm:$0xff] %v12925_v31  ;;  %v3735_v44 = vadd.f32 %v3734_v8, %v12801_v33  ;;  %v3840_v49 = vmul.f32 %v12936_v10, %v12936_v10  ;;  %v3841_v61 = vmul.f32 %v12943_v9, %v12943_v9  ;;  %v3842_v24 = vmul.f32 %v12946_v39, %v12946_v39 }
 0x1e2   :  { %17950 = vst [vmem:[#allocation48_spill] sm:$0xff] %v12936_v10  ;;  %v3673_v13 = vadd.f32 %v3672_v6, %v12936_v10  ;;  %v3694_v26 = vadd.f32 %v3693_v56, %v12943_v9  ;;  %v3715_v38 = vadd.f32 %v3714_v32, %v12946_v39  ;;  %v3843_v27 = vmul.f32 %v12949_v12, %v12949_v12  ;;  %v17959_v10 = vld [vmem:[#allocation158_spill] sm:$0xff] }
 0x1e3   :  { %17952 = vst [vmem:[#allocation164_spill] sm:$0xff] %v12943_v9  ;;  %v3736_v59 = vadd.f32 %v3735_v44, %v12949_v12  ;;  %v3968_v8 = vadd.f32 %v3967_v37, %v12805_v51  ;;  %v3989_v43 = vadd.f32 %v3988_v14, %v12809_v25  ;;  %v4010_v33 = vadd.f32 %v4009_v17, %v12813_v3  ;;  %v3294_v37 = vpop.permute.xlu0 %3293  ;;  %v17961_v14 = vld [vmem:[#allocation51_spill] sm:$0xff] }
 0x1e4   :  { %17954 = vst [vmem:[#allocation140_spill] sm:$0xff] %v12946_v39  ;;  %v3674_v50 = vadd.f32 %v3673_v13, %v17957_v42  ;;  %v3695_v6 = vadd.f32 %v3694_v26, %v17958_v30  ;;  %v3716_v56 = vadd.f32 %v3715_v38, %v17959_v10  ;;  %v4031_v32 = vadd.f32 %v4030_v34, %v12817_v55  ;;  %v17960_v39 = vld [vmem:[#allocation50_spill] sm:$0xff]  ;;  %v17962_v13 = vld [vmem:[#allocation52_spill] sm:$0xff]  ;;  %v17963_v38 = vld [vmem:[#allocation159_spill] sm:$0xff] }
 0x1e5   :  { %17956 = vst [vmem:[#allocation95_spill] sm:$0xff] %v12949_v12  ;;  %v3737_v9 = vadd.f32 %v3736_v59, %v17960_v39  ;;  %v3969_v40 = vadd.f32 %v3968_v8, %v3840_v49  ;;  %v3990_v4 = vadd.f32 %v3989_v43, %v3841_v61  ;;  %v4011_v44 = vadd.f32 %v4010_v33, %v3842_v24  ;;  %v17964_v34 = vld [vmem:[#allocation160_spill] sm:$0xff]  ;;  %v17965_v61 = vld [vmem:[#allocation53_spill] sm:$0xff]  ;;  %v17967_v24 = vld [vmem:[#allocation54_spill] sm:$0xff] }
 0x1e6   :  { %v4032_v12 = vadd.f32 %v4031_v32, %v3843_v27  ;;  %v3380_v51 = vmul.f32 %v11761_v15, %v3242_v29  ;;  %v3381_v25 = vmul.f32 %v11763_v35, %v3242_v29  ;;  %v3382_v3 = vmul.f32 %v11765_v5, %v3242_v29  ;;  %v17969_v59 = vld [vmem:[#allocation55_spill] sm:$0xff]  ;;  %v17971_v43 = vld [vmem:[#allocation56_spill] sm:$0xff] }
 0x1e7   :  { %v3970_v17 = vadd.f32 %v3969_v40, %v17961_v14  ;;  %v3991_v26 = vadd.f32 %v3990_v4, %v17962_v13  ;;  %v4012_v10 = vadd.f32 %v4011_v44, %v17963_v38  ;;  %v3383_v55 = vmul.f32 %v11838_v19, %v3242_v29  ;;  %v3290_v44 = vpop.permute.xlu1 %3289  ;;  %v17977_v13 = vld [vmem:[#allocation61_spill] sm:$0xff] }
 0x1e8   :  { %v4033_v49 = vadd.f32 %v4032_v12, %v17964_v34  ;;  %v12988_v33 = vadd.f32 %v3380_v51, %v17965_v61  ;;  %v12991_v27 = vadd.f32 %v3381_v25, %v17967_v24  ;;  %v12994_v8 = vadd.f32 %v3382_v3, %v17969_v59  ;;  %v17981_v61 = vld [vmem:[#allocation63_spill] sm:$0xff]  ;;  %v17983_v59 = vld [vmem:[#allocation64_spill] sm:$0xff] }
 0x1e9   :  { %v12997_v32 = vadd.f32 %v3383_v55, %v17971_v43  ;;  %v3432_v4 = vmul.f32 %v11761_v15, %v3294_v37  ;;  %v3433_v40 = vmul.f32 %v11763_v35, %v3294_v37  ;;  %v3434_v29 = vmul.f32 %v11765_v5, %v3294_v37  ;;  %v17979_v55 = vld [vmem:[#allocation62_spill] sm:$0xff] }
 0x1ea   :  { %17966 = vst [vmem:[#allocation96_spill] sm:$0xff] %v12988_v33  ;;  %v13004_v12 = vmul.f32 %v12988_v33, %v12988_v33  ;;  %v13008_v51 = vmul.f32 %v12991_v27, %v12991_v27  ;;  %v13012_v25 = vmul.f32 %v12994_v8, %v12994_v8  ;;  %v3435_v3 = vmul.f32 %v11838_v19, %v3294_v37 }
 0x1eb   :  { %17968 = vst [vmem:[#allocation141_spill] sm:$0xff] %v12991_v27  ;;  %v13017_v14 = vmul.f32 %v12997_v32, %v12997_v32  ;;  %v13020_v38 = vadd.f32 %v3432_v4, %v17977_v13  ;;  %v13023_v34 = vadd.f32 %v3433_v40, %v17979_v55  ;;  %v13026_v24 = vadd.f32 %v3434_v29, %v17981_v61  ;;  %v17985_v13 = vld [vmem:[#allocation91_spill] sm:$0xff]  ;;  %v17987_v61 = vld [vmem:[#allocation92_spill] sm:$0xff] }
 0x1ec   :  { %17970 = vst [vmem:[#allocation80_spill] sm:$0xff] %v12994_v8  ;;  %v13029_v43 = vadd.f32 %v3435_v3, %v17983_v59  ;;  %v3428_v39 = vmul.f32 %v11761_v15, %v3290_v44  ;;  %v3429_v37 = vmul.f32 %v11763_v35, %v3290_v44  ;;  %v3430_v30 = vmul.f32 %v11765_v5, %v3290_v44 }
 0x1ed   :  { %17972 = vst [vmem:[#allocation81_spill] sm:$0xff] %v12997_v32  ;;  %v3856_v42 = vmul.f32 %v13020_v38, %v13020_v38  ;;  %v3857_v4 = vmul.f32 %v13023_v34, %v13023_v34  ;;  %v3858_v40 = vmul.f32 %v13026_v24, %v13026_v24  ;;  %v3431_v29 = vmul.f32 %v11838_v19, %v3290_v44 }
 0x1ee   :  { %17973 = vst [vmem:[#allocation82_spill] sm:$0xff] %v13004_v12  ;;  %v3859_v3 = vmul.f32 %v13029_v43, %v13029_v43  ;;  %v13044_v55 = vadd.f32 %v3428_v39, %v17985_v13  ;;  %v13047_v59 = vadd.f32 %v3429_v37, %v17987_v61  ;;  %v13050_v45 = vadd.f32 %v3430_v30, %v17989_v53 }
 0x1ef   :  { %17974 = vst [vmem:[#allocation83_spill] sm:$0xff] %v13008_v51  ;;  %v3696_v51 = vadd.f32 %v3695_v6, %v12915_v48  ;;  %v3717_v44 = vadd.f32 %v3716_v56, %v12919_v1  ;;  %v3738_v12 = vadd.f32 %v3737_v9, %v12925_v31  ;;  %v3238_v56 = vpop.permute.xlu0 %3237  ;;  %v3992_v13 = vadd.f32 %v3991_v26, %v12933_v36  ;;  %v3310_v36 = vpop.permute.xlu2 %3309  ;;  %v18017_v1 = vld [vmem:[#allocation121_spill] sm:$0xff] }
 0x1f0   :  { %17975 = vst [vmem:[#allocation51_spill] sm:$0xff] %v13012_v25  ;;  %v3675_v25 = vadd.f32 %v3674_v50, %v12912_v57  ;;  %v3852_v39 = vmul.f32 %v13044_v55, %v13044_v55  ;;  %v3853_v37 = vmul.f32 %v13047_v59, %v13047_v59  ;;  %v3854_v30 = vmul.f32 %v13050_v45, %v13050_v45 }
 0x1f1   :  { %17976 = vst [vmem:[#allocation52_spill] sm:$0xff] %v13017_v14  ;;  %v13053_v14 = vadd.f32 %v3431_v29, %v17991_v21  ;;  %v3697_v21 = vadd.f32 %v3696_v51, %v13047_v59  ;;  %v3718_v50 = vadd.f32 %v3717_v44, %v13050_v45  ;;  %v3971_v29 = vadd.f32 %v3970_v17, %v12929_v20 }
 0x1f2   :  { %17978 = vst [vmem:[#allocation159_spill] sm:$0xff] %v13020_v38  ;;  %v3676_v53 = vadd.f32 %v3675_v25, %v13044_v55  ;;  %v4013_v61 = vadd.f32 %v4012_v10, %v12940_v52  ;;  %v4034_v44 = vadd.f32 %v4033_v49, %v12953_v18  ;;  %v3993_v20 = vadd.f32 %v3992_v13, %v3853_v37  ;;  %v17993_v10 = vld [vmem:[#allocation111_spill] sm:$0xff]  ;;  %v17994_v52 = vld [vmem:[#allocation144_spill] sm:$0xff] }
 0x1f3   :  { %17980 = vst [vmem:[#allocation160_spill] sm:$0xff] %v13023_v34  ;;  %v3855_v6 = vmul.f32 %v13053_v14, %v13053_v14  ;;  %v3739_v9 = vadd.f32 %v3738_v12, %v13053_v14  ;;  %v13078_v25 = vadd.f32 %v3697_v21, %v13023_v34  ;;  %v13081_v51 = vadd.f32 %v3718_v50, %v13026_v24  ;;  %v17997_v34 = vld [vmem:[#allocation113_spill] sm:$0xff]  ;;  %v18000_v37 = vld [vmem:[#allocation147_spill] sm:$0xff] }
 0x1f4   :  { %17982 = vst [vmem:[#allocation53_spill] sm:$0xff] %v13026_v24  ;;  %v13075_v31 = vadd.f32 %v3676_v53, %v13020_v38  ;;  %v3972_v12 = vadd.f32 %v3971_v29, %v3852_v39  ;;  %v4014_v17 = vadd.f32 %v4013_v61, %v3854_v30  ;;  %v3180_v53 = vadd.f32 %v17994_v52, %v17993_v10  ;;  %v17995_v38 = vld [vmem:[#allocation112_spill] sm:$0xff]  ;;  %v17999_v39 = vld [vmem:[#allocation114_spill] sm:$0xff]  ;;  %v3234_v61 = vpop.permute.xlu1 %3233 }
 0x1f5   :  { %17984 = vst [vmem:[#allocation54_spill] sm:$0xff] %v13029_v43  ;;  %v4035_v26 = vadd.f32 %v4034_v44, %v3855_v6  ;;  %v13095_v18 = vadd.f32 %v3993_v20, %v3857_v4  ;;  %v3183_v30 = vadd.f32 %v18000_v37, %v17999_v39  ;;  %v3448_v6 = vmul.f32 %v11761_v15, %v3310_v36 }
 0x1f6   :  { %17986 = vst [vmem:[#allocation55_spill] sm:$0xff] %v13044_v55  ;;  %v13093_v24 = vadd.f32 %v3972_v12, %v3856_v42  ;;  %v13097_v49 = vadd.f32 %v4014_v17, %v3858_v40  ;;  %v3449_v29 = vmul.f32 %v11763_v35, %v3310_v36  ;;  %v3376_v42 = vmul.f32 %v11761_v15, %v3238_v56  ;;  %v18004_v12 = vld [vmem:[#allocation57_spill] sm:$0xff]  ;;  %v18005_v17 = vld [vmem:[#allocation58_spill] sm:$0xff] }
 0x1f7   :  { %17988 = vst [vmem:[#allocation56_spill] sm:$0xff] %v13047_v59  ;;  %v17998_v59 = vld [vmem:[#allocation146_spill] sm:$0xff]  ;;  %v3378_v4 = vmul.f32 %v11765_v5, %v3238_v56  ;;  %v13110_v40 = vadd.f32 %v3448_v6, %v3180_v53  ;;  %v3379_v13 = vmul.f32 %v11838_v19, %v3238_v56  ;;  %v3306_v39 = vpop.permute.xlu0 %3305 }
 0x1f8   :  { %17990 = vst [vmem:[#allocation61_spill] sm:$0xff] %v13050_v45  ;;  %v13085_v45 = vadd.f32 %v3739_v9, %v13029_v43  ;;  %v3182_v50 = vadd.f32 %v17998_v59, %v17997_v34  ;;  %v13101_v9 = vadd.f32 %v4035_v26, %v3859_v3  ;;  %v3377_v34 = vmul.f32 %v11763_v35, %v3238_v56  ;;  %v18007_v26 = vld [vmem:[#allocation59_spill] sm:$0xff]  ;;  %v18016_v43 = vld [vmem:[#allocation120_spill] sm:$0xff] }
 0x1f9   :  { %17992 = vst [vmem:[#allocation62_spill] sm:$0xff] %v13053_v14  ;;  %v17996_v14 = vld [vmem:[#allocation145_spill] sm:$0xff]  ;;  %v13120_v20 = vadd.f32 %v3376_v42, %v18004_v12  ;;  %v13126_v10 = vadd.f32 %v3378_v4, %v18007_v26  ;;  %v13130_v52 = vmul.f32 %v13110_v40, %v13110_v40  ;;  %v3373_v42 = vmul.f32 %v11763_v35, %v3234_v61  ;;  %v18015_v26 = vld [vmem:[#allocation119_spill] sm:$0xff] }
 0x1fa   :  { %v3181_v21 = vadd.f32 %v17996_v14, %v17995_v38  ;;  %v3450_v14 = vmul.f32 %v11765_v5, %v3310_v36  ;;  %v3451_v38 = vmul.f32 %v11838_v19, %v3310_v36  ;;  %v13123_v36 = vadd.f32 %v3377_v34, %v18005_v17 }
 0x1fb   :  { %18008 = vst [vmem:[#allocation93_spill] sm:$0xff] %v13126_v10  ;;  %v3374_v34 = vmul.f32 %v11765_v5, %v3234_v61  ;;  %v3375_v4 = vmul.f32 %v11838_v19, %v3234_v61  ;;  %v3445_v12 = vmul.f32 %v11763_v35, %v3306_v39  ;;  %v3446_v17 = vmul.f32 %v11765_v5, %v3306_v39 }
 0x1fc   :  { %v13112_v59 = vadd.f32 %v3449_v29, %v3181_v21  ;;  %v13114_v3 = vadd.f32 %v3450_v14, %v3182_v50  ;;  %v13117_v44 = vadd.f32 %v3451_v38, %v3183_v30  ;;  %18006 = vst [vmem:[#allocation92_spill] sm:$0xff] %v13123_v36  ;;  %v18012_v21 = vld [vmem:[#allocation60_spill] sm:$0xff]  ;;  %v3800_v30 = vmul.f32 %v13120_v20, %v13120_v20 }
 0x1fd   :  { %18009 = vst [vmem:[#allocation94_spill] sm:$0xff] %v13130_v52  ;;  %v13141_v50 = vadd.f32 %v3379_v13, %v18012_v21  ;;  %v3801_v6 = vmul.f32 %v13123_v36, %v13123_v36  ;;  %v3802_v29 = vmul.f32 %v13126_v10, %v13126_v10  ;;  %v3372_v38 = vmul.f32 %v11761_v15, %v3234_v61  ;;  %v18019_v61 = vld [vmem:[#allocation73_spill] sm:$0xff]  ;;  %v18020_v52 = vld [vmem:[#allocation74_spill] sm:$0xff] }
 0x1fe   :  { %18001 = vst [vmem:[#allocation63_spill] sm:$0xff] %v13112_v59  ;;  %v13134_v53 = vmul.f32 %v13112_v59, %v13112_v59  ;;  %v13138_v56 = vmul.f32 %v13114_v3, %v13114_v3  ;;  %v13145_v37 = vmul.f32 %v13117_v44, %v13117_v44  ;;  %v3444_v13 = vmul.f32 %v11761_v15, %v3306_v39 }
 0x1ff   :  { %18002 = vst [vmem:[#allocation64_spill] sm:$0xff] %v13114_v3  ;;  %v3803_v14 = vmul.f32 %v13141_v50, %v13141_v50  ;;  %v13163_v21 = vadd.f32 %v3372_v38, %v18015_v26  ;;  %v13166_v55 = vadd.f32 %v3373_v42, %v18016_v43  ;;  %v13169_v48 = vadd.f32 %v3374_v34, %v18017_v1  ;;  %v18021_v3 = vld [vmem:[#allocation75_spill] sm:$0xff] }
 0x200   :  { %18003 = vst [vmem:[#allocation91_spill] sm:$0xff] %v13117_v44  ;;  %v3447_v57 = vmul.f32 %v11838_v19, %v3306_v39  ;;  %v13179_v44 = vadd.f32 %v3445_v12, %v18020_v52  ;;  %v13182_v38 = vadd.f32 %v3446_v17, %v18021_v3 }
 0x201   :  { %18010 = vst [vmem:[#allocation111_spill] sm:$0xff] %v13134_v53  ;;  %v13176_v53 = vadd.f32 %v3444_v13, %v18019_v61  ;;  %v3594_v43 = vadd.f32 %v12754_v63, %v13163_v21  ;;  %v3615_v1 = vadd.f32 %v12763_v58, %v13166_v55  ;;  %v3636_v39 = vadd.f32 %v12766_v2, %v13169_v48 }
 0x202   :  { %18011 = vst [vmem:[#allocation144_spill] sm:$0xff] %v13138_v56  ;;  %v3797_v52 = vmul.f32 %v13166_v55, %v13166_v55  ;;  %v3798_v3 = vmul.f32 %v13169_v48, %v13169_v48 }
 0x203   :  { %18013 = vst [vmem:[#allocation112_spill] sm:$0xff] %v13141_v50  ;;  %v13201_v58 = vadd.f32 %v3594_v43, %v13120_v20  ;;  %v13204_v2 = vadd.f32 %v3615_v1, %v13123_v36  ;;  %v13207_v34 = vadd.f32 %v3636_v39, %v13126_v10  ;;  %v18022_v43 = vld [vmem:[#allocation137_spill] sm:$0xff]  ;;  %v13223_v39 = vmul.f32 %v13176_v53, %v13176_v53 }
 0x204   :  { %18014 = vst [vmem:[#allocation145_spill] sm:$0xff] %v13145_v37  ;;  %v18018_v37 = vld [vmem:[#allocation122_spill] sm:$0xff]  ;;  %v3911_v12 = vadd.f32 %v12785_v23, %v3797_v52  ;;  %v3932_v17 = vadd.f32 %v12787_v11, %v3798_v3  ;;  %v13219_v1 = vadd.f32 %v3447_v57, %v18022_v43  ;;  %v3720_v3 = vadd.f32 %v13081_v51, %v12885_v28  ;;  %v18037_v28 = vld [vmem:[#allocation72_spill] sm:$0xff] }
 0x205   :  { %v13173_v56 = vadd.f32 %v3375_v4, %v18018_v37  ;;  %v3796_v37 = vmul.f32 %v13163_v21, %v13163_v21  ;;  %v3302_v4 = vpop.permute.xlu1 %3301  ;;  %v3995_v51 = vadd.f32 %v13095_v18, %v12899_v60  ;;  %v3250_v18 = vpop.permute.xlu0 %3249 }
 0x206   :  { %v13231_v23 = vadd.f32 %v3932_v17, %v3802_v29  ;;  %v13241_v57 = vmul.f32 %v13219_v1, %v13219_v1  ;;  %v3442_v52 = vmul.f32 %v11765_v5, %v3302_v4  ;;  %v3678_v29 = vadd.f32 %v13075_v31, %v12877_v62 }
 0x207   :  { %v3657_v42 = vadd.f32 %v12769_v7, %v13173_v56  ;;  %v3799_v63 = vmul.f32 %v13173_v56, %v13173_v56  ;;  %v3890_v7 = vadd.f32 %v12780_v22, %v3796_v37  ;;  %v13227_v22 = vmul.f32 %v13179_v44, %v13179_v44 }
 0x208   :  { %v13229_v37 = vadd.f32 %v3911_v12, %v3801_v6  ;;  %v3443_v6 = vmul.f32 %v11838_v19, %v3302_v4  ;;  %v18025_v12 = vld [vmem:[#allocation101_spill] sm:$0xff] }
 0x209   :  { %v13211_v13 = vadd.f32 %v3657_v42, %v13141_v50  ;;  %v3953_v26 = vadd.f32 %v12789_v41, %v3799_v63  ;;  %v13216_v61 = vadd.f32 %v3890_v7, %v3800_v30  ;;  %v13237_v41 = vmul.f32 %v13182_v38, %v13182_v38  ;;  %v18023_v63 = vld [vmem:[#allocation97_spill] sm:$0xff]  ;;  %v18029_v50 = vld [vmem:[#allocation104_spill] sm:$0xff] }
 0x20a   :  { %v3440_v30 = vmul.f32 %v11761_v15, %v3302_v4  ;;  %v3441_v42 = vmul.f32 %v11763_v35, %v3302_v4  ;;  %v3741_v4 = vadd.f32 %v13085_v45, %v12888_v16  ;;  %v13265_v31 = vadd.f32 %v3443_v6, %v18029_v50  ;;  %v18036_v16 = vld [vmem:[#allocation127_spill] sm:$0xff] }
 0x20b   :  { %v13233_v11 = vadd.f32 %v3953_v26, %v3803_v14  ;;  %v3699_v14 = vadd.f32 %v13078_v25, %v12882_v0  ;;  %v18027_v26 = vld [vmem:[#allocation103_spill] sm:$0xff]  ;;  %v3974_v25 = vadd.f32 %v13093_v24, %v12894_v46  ;;  %v4037_v6 = vadd.f32 %v13101_v9, %v12907_v54 }
 0x20c   :  { %v13254_v7 = vadd.f32 %v3440_v30, %v18023_v63  ;;  %v13257_v17 = vadd.f32 %v3441_v42, %v18025_v12  ;;  %v13260_v43 = vadd.f32 %v3442_v52, %v18027_v26  ;;  %18030 = vst [vmem:[#allocation147_spill] sm:$0xff] %v13265_v31  ;;  %v4016_v30 = vadd.f32 %v13097_v49, %v12903_v47  ;;  %v18033_v63 = vld [vmem:[#allocation70_spill] sm:$0xff] }
 0x20d   :  { %v13285_v46 = vadd.f32 %v3741_v4, %v13265_v31  ;;  %v3867_v24 = vmul.f32 %v13265_v31, %v13265_v31  ;;  %v18034_v12 = vld [vmem:[#allocation126_spill] sm:$0xff]  ;;  %v3246_v4 = vpop.permute.xlu1 %3245  ;;  %v3388_v54 = vmul.f32 %v11761_v15, %v3250_v18  ;;  %v3389_v9 = vmul.f32 %v11763_v35, %v3250_v18 }
 0x20e   :  { %18024 = vst [vmem:[#allocation113_spill] sm:$0xff] %v13254_v7  ;;  %v13274_v42 = vadd.f32 %v3678_v29, %v13254_v7  ;;  %v13277_v52 = vadd.f32 %v3699_v14, %v13257_v17  ;;  %v13280_v45 = vadd.f32 %v3720_v3, %v13260_v43  ;;  %v3864_v50 = vmul.f32 %v13254_v7, %v13254_v7  ;;  %v18031_v29 = vld [vmem:[#allocation69_spill] sm:$0xff] }
 0x20f   :  { %18026 = vst [vmem:[#allocation146_spill] sm:$0xff] %v13257_v17  ;;  %v3865_v60 = vmul.f32 %v13257_v17, %v13257_v17  ;;  %v3866_v47 = vmul.f32 %v13260_v43, %v13260_v43  ;;  %v18032_v14 = vld [vmem:[#allocation125_spill] sm:$0xff]  ;;  %v3121_v26 = vadd.f32 %v18034_v12, %v18033_v63  ;;  %v13309_v0 = vadd.f32 %v4037_v6, %v3867_v24  ;;  %v18042_v6 = vld [vmem:[#allocation19_spill] sm:$0xff] }
 0x210   :  { %18028 = vst [vmem:[#allocation114_spill] sm:$0xff] %v13260_v43  ;;  %v13293_v49 = vadd.f32 %v3974_v25, %v3864_v50  ;;  %v3120_v3 = vadd.f32 %v18032_v14, %v18031_v29  ;;  %v18035_v43 = vld [vmem:[#allocation71_spill] sm:$0xff]  ;;  %v18038_v25 = vld [vmem:[#allocation128_spill] sm:$0xff]  ;;  %v3390_v29 = vmul.f32 %v11765_v5, %v3250_v18  ;;  %v3391_v14 = vmul.f32 %v11838_v19, %v3250_v18 }
 0x211   :  { %v13301_v17 = vadd.f32 %v3995_v51, %v3865_v60  ;;  %v13303_v7 = vadd.f32 %v4016_v30, %v3866_v47  ;;  %v3122_v31 = vadd.f32 %v18036_v16, %v18035_v43  ;;  %v3123_v50 = vadd.f32 %v18038_v25, %v18037_v28  ;;  %v18044_v18 = vld [vmem:[#allocation20_spill] sm:$0xff]  ;;  %v18046_v25 = vld [vmem:[#allocation21_spill] sm:$0xff] }
 0x212   :  { %v3384_v51 = vmul.f32 %v11761_v15, %v3246_v4  ;;  %v3385_v30 = vmul.f32 %v11763_v35, %v3246_v4  ;;  %v3386_v60 = vmul.f32 %v11765_v5, %v3246_v4  ;;  %v13318_v16 = vadd.f32 %v3388_v54, %v3120_v3 }
 0x213   :  { %v13320_v43 = vadd.f32 %v3389_v9, %v3121_v26  ;;  %v13322_v28 = vadd.f32 %v3390_v29, %v3122_v31  ;;  %v3387_v47 = vmul.f32 %v11838_v19, %v3246_v4  ;;  %v13325_v24 = vadd.f32 %v3391_v14, %v3123_v50  ;;  %v18048_v4 = vld [vmem:[#allocation22_spill] sm:$0xff] }
 0x214   :  { %18039 = vst [vmem:[#allocation57_spill] sm:$0xff] %v13318_v16  ;;  %v13328_v63 = vadd.f32 %v3384_v51, %v18042_v6  ;;  %v13331_v12 = vadd.f32 %v3385_v30, %v18044_v18  ;;  %v13334_v62 = vadd.f32 %v3386_v60, %v18046_v25  ;;  %v3812_v3 = vmul.f32 %v13318_v16, %v13318_v16  ;;  %v18050_v18 = vld [vmem:[#allocation82_spill] sm:$0xff] }
 0x215   :  { %18040 = vst [vmem:[#allocation58_spill] sm:$0xff] %v13320_v43  ;;  %v3813_v31 = vmul.f32 %v13320_v43, %v13320_v43  ;;  %v3814_v26 = vmul.f32 %v13322_v28, %v13322_v28  ;;  %v13343_v50 = vadd.f32 %v3387_v47, %v18048_v4  ;;  %v3815_v54 = vmul.f32 %v13325_v24, %v13325_v24  ;;  %v18051_v4 = vld [vmem:[#allocation83_spill] sm:$0xff] }
 0x216   :  { %18041 = vst [vmem:[#allocation59_spill] sm:$0xff] %v13322_v28  ;;  %v3596_v9 = vadd.f32 %v13201_v58, %v12988_v33  ;;  %v3617_v29 = vadd.f32 %v13204_v2, %v12991_v27  ;;  %v3638_v14 = vadd.f32 %v13207_v34, %v12994_v8  ;;  %v3659_v51 = vadd.f32 %v13211_v13, %v12997_v32  ;;  %v18052_v8 = vld [vmem:[#allocation51_spill] sm:$0xff] }
 0x217   :  { %18043 = vst [vmem:[#allocation60_spill] sm:$0xff] %v13328_v63  ;;  %v3808_v30 = vmul.f32 %v13328_v63, %v13328_v63  ;;  %v3809_v60 = vmul.f32 %v13331_v12, %v13331_v12  ;;  %v3810_v47 = vmul.f32 %v13334_v62, %v13334_v62  ;;  %v3811_v34 = vmul.f32 %v13343_v50, %v13343_v50 }
 0x218   :  { %18045 = vst [vmem:[#allocation119_spill] sm:$0xff] %v13331_v12  ;;  %v3597_v58 = vadd.f32 %v3596_v9, %v13328_v63  ;;  %v3618_v6 = vadd.f32 %v3617_v29, %v13331_v12  ;;  %v3639_v2 = vadd.f32 %v3638_v14, %v13334_v62  ;;  %v3660_v13 = vadd.f32 %v3659_v51, %v13343_v50 }
 0x219   :  { %18047 = vst [vmem:[#allocation120_spill] sm:$0xff] %v13334_v62  ;;  %v3892_v25 = vadd.f32 %v13216_v61, %v18050_v18  ;;  %v3913_v32 = vadd.f32 %v13229_v37, %v18051_v4  ;;  %v3934_v27 = vadd.f32 %v13231_v23, %v18052_v8  ;;  %v18053_v62 = vld [vmem:[#allocation52_spill] sm:$0xff] }
 0x21a   :  { %18049 = vst [vmem:[#allocation121_spill] sm:$0xff] %v13343_v50  ;;  %v3598_v9 = vadd.f32 %v3597_v58, %v13318_v16  ;;  %v3619_v29 = vadd.f32 %v3618_v6, %v13320_v43  ;;  %v3640_v14 = vadd.f32 %v3639_v2, %v13322_v28  ;;  %v3955_v12 = vadd.f32 %v13233_v11, %v18053_v62 }
 0x21b   :  { %v3661_v51 = vadd.f32 %v3660_v13, %v13325_v24  ;;  %v3893_v50 = vadd.f32 %v3892_v25, %v3808_v30  ;;  %v3914_v63 = vadd.f32 %v3913_v32, %v3809_v60  ;;  %v3935_v61 = vadd.f32 %v3934_v27, %v3810_v47 }
 0x21c   :  { %v3599_v18 = vrot.slane %v3598_v9, 4  ;;  %v3620_v33 = vrot.slane %v3619_v29, 4  ;;  %v3641_v37 = vrot.slane %v3640_v14, 4  ;;  %v3956_v4 = vadd.f32 %v3955_v12, %v3811_v34 }
 0x21d   :  { %v3662_v10 = vrot.slane %v3661_v51, 4  ;;  %v3894_v8 = vadd.f32 %v3893_v50, %v3812_v3  ;;  %v3915_v23 = vadd.f32 %v3914_v63, %v3813_v31  ;;  %v3936_v58 = vadd.f32 %v3935_v61, %v3814_v26 }
 0x21e   :  { %v3600_v16 = vadd.f32 %v3599_v18, %v3598_v9  ;;  %v3621_v6 = vadd.f32 %v3620_v33, %v3619_v29  ;;  %v3642_v43 = vadd.f32 %v3641_v37, %v3640_v14  ;;  %v3957_v2 = vadd.f32 %v3956_v4, %v3815_v54 }
 0x21f   :  { %v3663_v28 = vadd.f32 %v3662_v10, %v3661_v51  ;;  %v3895_v36 = vrot.slane %v3894_v8, 4  ;;  %v3916_v62 = vrot.slane %v3915_v23, 4  ;;  %v3937_v11 = vrot.slane %v3936_v58, 4 }
 0x220   :  { %v3601_v13 = vrot.slane %v3600_v16, 2  ;;  %v3622_v30 = vrot.slane %v3621_v6, 2  ;;  %v3643_v32 = vrot.slane %v3642_v43, 2  ;;  %v3958_v27 = vrot.slane %v3957_v2, 4 }
 0x221   :  { %v3664_v60 = vrot.slane %v3663_v28, 2  ;;  %v3896_v47 = vadd.f32 %v3895_v36, %v3894_v8  ;;  %v3917_v25 = vadd.f32 %v3916_v62, %v3915_v23  ;;  %v3938_v12 = vadd.f32 %v3937_v11, %v3936_v58 }
 0x222   :  { %v3602_v34 = vadd.f32 %v3601_v13, %v3600_v16  ;;  %v3623_v3 = vadd.f32 %v3622_v30, %v3621_v6  ;;  %v3644_v63 = vadd.f32 %v3643_v32, %v3642_v43  ;;  %v3959_v31 = vadd.f32 %v3958_v27, %v3957_v2 }
 0x223   :  { %v3665_v26 = vadd.f32 %v3664_v60, %v3663_v28  ;;  %v3897_v33 = vrot.slane %v3896_v47, 2  ;;  %v3918_v50 = vrot.slane %v3917_v25, 2  ;;  %v3939_v54 = vrot.slane %v3938_v12, 2 }
 0x224   :  { %v3603_v10 = vrot.slane %v3602_v34, 1  ;;  %v3624_v9 = vrot.slane %v3623_v3, 1  ;;  %v3645_v29 = vrot.slane %v3644_v63, 1  ;;  %v3960_v14 = vrot.slane %v3959_v31, 2 }
 0x225   :  { %v3666_v51 = vrot.slane %v3665_v26, 1  ;;  %v3898_v61 = vadd.f32 %v3897_v33, %v3896_v47  ;;  %v3919_v18 = vadd.f32 %v3918_v50, %v3917_v25  ;;  %v3940_v37 = vadd.f32 %v3939_v54, %v3938_v12  ;;  %v18054_v50 = vld [vmem:[#allocation107_spill] sm:$0xff]  ;;  %v18055_v54 = vld [vmem:[#allocation149_spill] sm:$0xff] }
 0x226   :  { %v3604_v4 = vadd.f32 %v3603_v10, %v3602_v34  ;;  %v3625_v36 = vadd.f32 %v3624_v9, %v3623_v3  ;;  %v3646_v8 = vadd.f32 %v3645_v29, %v3644_v63  ;;  %v3961_v23 = vadd.f32 %v3960_v14, %v3959_v31  ;;  %v3314_v34 = vpop.permute.xlu1 %3313  ;;  %v18056_v9 = vld [vmem:[#allocation108_spill] sm:$0xff]  ;;  %v18057_v29 = vld [vmem:[#allocation150_spill] sm:$0xff] }
 0x227   :  { %v3667_v16 = vadd.f32 %v3666_v51, %v3665_v26  ;;  %v3899_v58 = vrot.slane %v3898_v61, 1  ;;  %v3920_v43 = vrot.slane %v3919_v18, 1  ;;  %v3941_v6 = vrot.slane %v3940_v37, 1  ;;  %v18058_v51 = vld [vmem:[#allocation109_spill] sm:$0xff] }
 0x228   :  { %v3962_v28 = vrot.slane %v3961_v23, 1  ;;  %v13379_v2 = vmul.f32 0.0078125, %v3604_v4  ;;  %v13381_v62 = vmul.f32 0.0078125, %v3625_v36  ;;  %v13383_v11 = vmul.f32 0.0078125, %v3646_v8  ;;  %v18060_v36 = vld [vmem:[#allocation110_spill] sm:$0xff]  ;;  %v18061_v8 = vld [vmem:[#allocation152_spill] sm:$0xff] }
 0x229   :  { %v3900_v13 = vadd.f32 %v3899_v58, %v3898_v61  ;;  %v3921_v30 = vadd.f32 %v3920_v43, %v3919_v18  ;;  %v3942_v32 = vadd.f32 %v3941_v6, %v3940_v37  ;;  %v13385_v27 = vmul.f32 0.0078125, %v3667_v16  ;;  %v18059_v61 = vld [vmem:[#allocation151_spill] sm:$0xff] }
 0x22a   :  { %v3963_v60 = vadd.f32 %v3962_v28, %v3961_v23  ;;  %v13389_v47 = vmul.f32 %v13379_v2, %v13379_v2  ;;  %v13393_v25 = vmul.f32 %v13381_v62, %v13381_v62  ;;  %v13397_v12 = vmul.f32 %v13383_v11, %v13383_v11 }
 0x22b   :  { %v13399_v3 = vmul.f32 0.0078125, %v3900_v13  ;;  %v13401_v63 = vmul.f32 0.0078125, %v3921_v30  ;;  %v13403_v31 = vmul.f32 0.0078125, %v3942_v32  ;;  %v13407_v26 = vmul.f32 %v13385_v27, %v13385_v27 }
 0x22c   :  { %v13409_v33 = vmul.f32 0.0078125, %v3963_v60  ;;  %v3184_v10 = vadd.f32 %v18055_v54, %v18054_v50  ;;  %v3185_v14 = vadd.f32 %v18057_v29, %v18056_v9  ;;  %v3186_v18 = vadd.f32 %v18059_v61, %v18058_v51 }
 0x22d   :  { %v3187_v23 = vadd.f32 %v18061_v8, %v18060_v36  ;;  %v3452_v16 = vmul.f32 %v11761_v15, %v3314_v34  ;;  %v3453_v43 = vmul.f32 %v11763_v35, %v3314_v34  ;;  %v3454_v6 = vmul.f32 %v11765_v5, %v3314_v34 }
 0x22e   :  { %v3455_v28 = vmul.f32 %v11838_v19, %v3314_v34  ;;  %v3680_v30 = vadd.f32 %v13274_v42, %v13176_v53  ;;  %v3701_v32 = vadd.f32 %v13277_v52, %v13179_v44  ;;  %v3722_v15 = vadd.f32 %v13280_v45, %v13182_v38  ;;  %v18066_v42 = vld [vmem:[#allocation64_spill] sm:$0xff] }
 0x22f   :  { %v13429_v13 = vadd.f32 %v3452_v16, %v3184_v10  ;;  %v13437_v60 = vadd.f32 %v3453_v43, %v3185_v14  ;;  %v13439_v50 = vadd.f32 %v3454_v6, %v3186_v18  ;;  %v3743_v5 = vadd.f32 %v13285_v46, %v13219_v1  ;;  %v18067_v10 = vld [vmem:[#allocation91_spill] sm:$0xff] }
 0x230   :  { %v13441_v35 = vadd.f32 %v3455_v28, %v3187_v23  ;;  %v3681_v19 = vadd.f32 %v3680_v30, %v13110_v40  ;;  %v3702_v34 = vadd.f32 %v3701_v32, %v13112_v59  ;;  %v3723_v54 = vadd.f32 %v3722_v15, %v18066_v42  ;;  %v18068_v30 = vld [vmem:[#allocation94_spill] sm:$0xff] }
 0x231   :  { %18062 = vst [vmem:[#allocation122_spill] sm:$0xff] %v13429_v13  ;;  %v3876_v52 = vmul.f32 %v13429_v13, %v13429_v13  ;;  %v3744_v45 = vadd.f32 %v3743_v5, %v18067_v10  ;;  %v3877_v9 = vmul.f32 %v13437_v60, %v13437_v60  ;;  %v3878_v29 = vmul.f32 %v13439_v50, %v13439_v50  ;;  %v18069_v5 = vld [vmem:[#allocation111_spill] sm:$0xff] }
 0x232   :  { %18063 = vst [vmem:[#allocation73_spill] sm:$0xff] %v13437_v60  ;;  %v3879_v46 = vmul.f32 %v13441_v35, %v13441_v35  ;;  %v3682_v14 = vadd.f32 %v3681_v19, %v13429_v13  ;;  %v3703_v51 = vadd.f32 %v3702_v34, %v13437_v60  ;;  %v3724_v61 = vadd.f32 %v3723_v54, %v13439_v50  ;;  %v18071_v34 = vld [vmem:[#allocation145_spill] sm:$0xff] }
 0x233   :  { %18064 = vst [vmem:[#allocation74_spill] sm:$0xff] %v13439_v50  ;;  %v3976_v18 = vadd.f32 %v13293_v49, %v13223_v39  ;;  %v3745_v36 = vadd.f32 %v3744_v45, %v13441_v35  ;;  %v3997_v8 = vadd.f32 %v13301_v17, %v13227_v22  ;;  %v4018_v23 = vadd.f32 %v13303_v7, %v13237_v41  ;;  %v18070_v39 = vld [vmem:[#allocation144_spill] sm:$0xff]  ;;  %v13473_v41 = vpop.f32.mrf.mxu0  ;;  %v13475_v7 = vpop.f32.mrf.mxu1 }
 0x234   :  { %18065 = vst [vmem:[#allocation75_spill] sm:$0xff] %v13441_v35  ;;  %v4039_v16 = vadd.f32 %v13309_v0, %v13241_v57  ;;  %v3683_v43 = vrot.slane %v3682_v14, 4  ;;  %v3704_v6 = vrot.slane %v3703_v51, 4  ;;  %v3725_v28 = vrot.slane %v3724_v61, 4 }
 0x235   :  { %v3977_v32 = vadd.f32 %v3976_v18, %v18068_v30  ;;  %v3746_v15 = vrot.slane %v3745_v36, 4  ;;  %v3998_v19 = vadd.f32 %v3997_v8, %v18069_v5  ;;  %v4019_v49 = vadd.f32 %v4018_v23, %v18070_v39  ;;  %v13477_v18 = vpop.f32.mrf.mxu2  ;;  %v13479_v30 = vpop.f32.mrf.mxu3 }
 0x236   :  { %v4040_v54 = vadd.f32 %v4039_v16, %v18071_v34  ;;  %v3684_v45 = vadd.f32 %v3683_v43, %v3682_v14  ;;  %v3705_v22 = vadd.f32 %v3704_v6, %v3703_v51  ;;  %v3726_v17 = vadd.f32 %v3725_v28, %v3724_v61 }
 0x237   :  { %v3978_v58 = vadd.f32 %v3977_v32, %v3876_v52  ;;  %v3747_v0 = vadd.f32 %v3746_v15, %v3745_v36  ;;  %v3999_v57 = vadd.f32 %v3998_v19, %v3877_v9  ;;  %v4020_v4 = vadd.f32 %v4019_v49, %v3878_v29 }
 0x238   :  { %v4041_v37 = vadd.f32 %v4040_v54, %v3879_v46  ;;  %v3685_v8 = vrot.slane %v3684_v45, 2  ;;  %v3706_v23 = vrot.slane %v3705_v22, 2  ;;  %v3727_v5 = vrot.slane %v3726_v17, 2 }
 0x239   :  { %v3979_v16 = vrot.slane %v3978_v58, 4  ;;  %v3748_v14 = vrot.slane %v3747_v0, 2  ;;  %v4000_v51 = vrot.slane %v3999_v57, 4  ;;  %v4021_v61 = vrot.slane %v4020_v4, 4 }
 0x23a   :  { %v4042_v52 = vrot.slane %v4041_v37, 4  ;;  %v3686_v43 = vadd.f32 %v3685_v8, %v3684_v45  ;;  %v3707_v6 = vadd.f32 %v3706_v23, %v3705_v22  ;;  %v3728_v28 = vadd.f32 %v3727_v5, %v3726_v17 }
 0x23b   :  { %v3980_v32 = vadd.f32 %v3979_v16, %v3978_v58  ;;  %v3749_v36 = vadd.f32 %v3748_v14, %v3747_v0  ;;  %v4001_v9 = vadd.f32 %v4000_v51, %v3999_v57  ;;  %v4022_v29 = vadd.f32 %v4021_v61, %v4020_v4  ;;  %v2189_v45 = vpop.f32.mrf.mxu0  ;;  %v2202_v22 = vpop.f32.mrf.mxu1 }
 0x23c   :  { %v4043_v46 = vadd.f32 %v4042_v52, %v4041_v37  ;;  %v3687_v15 = vrot.slane %v3686_v43, 1  ;;  %v3708_v19 = vrot.slane %v3707_v6, 1  ;;  %v3729_v39 = vrot.slane %v3728_v28, 1 }
 0x23d   :  { %v3981_v49 = vrot.slane %v3980_v32, 2  ;;  %v3750_v34 = vrot.slane %v3749_v36, 1  ;;  %v4002_v54 = vrot.slane %v4001_v9, 2  ;;  %v4023_v35 = vrot.slane %v4022_v29, 2  ;;  %v2215_v4 = vpop.f32.mrf.mxu2  ;;  %v2228_v37 = vpop.f32.mrf.mxu3 }
 0x23e   :  { %v4044_v50 = vrot.slane %v4043_v46, 2  ;;  %v3688_v60 = vadd.f32 %v3687_v15, %v3686_v43  ;;  %v3709_v13 = vadd.f32 %v3708_v19, %v3707_v6  ;;  %v3730_v10 = vadd.f32 %v3729_v39, %v3728_v28  ;;  %v13492_v43 = vld [vmem:[%s17035_s3 + $0x1] sm:$0xff] }
 0x23f   :  { %v3982_v42 = vadd.f32 %v3981_v49, %v3980_v32  ;;  %v3751_v17 = vadd.f32 %v3750_v34, %v3749_v36  ;;  %v4003_v58 = vadd.f32 %v4002_v54, %v4001_v9  ;;  %v4024_v0 = vadd.f32 %v4023_v35, %v4022_v29 }
 0x240   :  { %v4045_v57 = vadd.f32 %v4044_v50, %v4043_v46  ;;  %v13481_v23 = vmul.f32 0.0078125, %v3688_v60  ;;  %v13483_v5 = vmul.f32 0.0078125, %v3709_v13  ;;  %v13485_v16 = vmul.f32 0.0078125, %v3730_v10 }
 0x241   :  { %v3983_v8 = vrot.slane %v3982_v42, 1  ;;  %v4004_v14 = vrot.slane %v4003_v58, 1  ;;  %v4025_v51 = vrot.slane %v4024_v0, 1  ;;  %v13487_v52 = vmul.f32 0.0078125, %v3751_v17 }
 0x242   :  { %v4046_v61 = vrot.slane %v4045_v57, 1  ;;  %v4068_v35 = vmul.f32 %v13481_v23, %v13481_v23  ;;  %v4069_v13 = vmul.f32 %v13483_v5, %v13483_v5  ;;  %v4070_v60 = vmul.f32 %v13485_v16, %v13485_v16 }
 0x243   :  { %v3984_v50 = vadd.f32 %v3983_v8, %v3982_v42  ;;  %v4005_v10 = vadd.f32 %v4004_v14, %v4003_v58  ;;  %v4026_v6 = vadd.f32 %v4025_v51, %v4024_v0  ;;  %v4071_v32 = vmul.f32 %v13487_v52, %v13487_v52 }
 0x244   :  { %v4047_v28 = vadd.f32 %v4046_v61, %v4045_v57  ;;  %v1506_v9 = vperm.slane %v13492_v43, 0  ;;  %v1507_v42 = vperm.slane %v13492_v43, 1  ;;  %v1508_v34 = vperm.slane %v13492_v43, 2 }
 0x245   :  { %v4060_v36 = vmul.f32 0.0078125, %v3984_v50  ;;  %v4061_v29 = vmul.f32 0.0078125, %v4005_v10  ;;  %v4062_v46 = vmul.f32 0.0078125, %v4026_v6  ;;  %v1509_v17 = vperm.slane %v13492_v43, 3 }
 0x246   :  { %v4063_v15 = vmul.f32 0.0078125, %v4047_v28  ;;  %v2188_v39 = vadd.f32 %v13473_v41, %v1506_v9  ;;  %v2201_v49 = vadd.f32 %v13475_v7, %v1507_v42  ;;  %v2214_v57 = vadd.f32 %v13477_v18, %v1508_v34  ;;  %v2239_v28 = vpop.f32.mrf.mxu0  ;;  %v13535_v42 = vpop.f32.mrf.mxu2 }
 0x247   :  { %v4076_v19 = vsub.f32 %v4060_v36, %v4068_v35  ;;  %v4077_v54 = vsub.f32 %v4061_v29, %v4069_v13  ;;  %v4078_v45 = vsub.f32 %v4062_v46, %v4070_v60  ;;  %v2227_v14 = vadd.f32 %v13479_v30, %v1509_v17  ;;  %v13537_v29 = vpop.f32.mrf.mxu3 }
 0x248   :  { %v4079_v22 = vsub.f32 %v4063_v15, %v4071_v32  ;;  %v2390_v0 = vrot.slane %v2201_v49, 7  ;;  %v2391_v61 = vrot.slane %v2214_v57, 6  ;;  %v4072_v18 = vsub.f32 %v13399_v3, %v13389_v47  ;;  %v13527_v32 = vpop.f32.mrf.mxu1 }
 0x249   :  { %v4084_v58 = vmax.f32 %v4076_v19, 0.0  ;;  %v4085_v4 = vmax.f32 %v4077_v54, 0.0  ;;  %v4086_v37 = vmax.f32 %v4078_v45, 0.0  ;;  %v2392_v60 = vrot.slane %v2227_v14, 5 }
 0x24a   :  { %v4087_v8 = vmax.f32 %v4079_v22, 0.0  ;;  %v2394_v7 = vsel %vm2393_vm0, %v2188_v39, %v2390_v0  ;;  %v2400_v51 = vsel %vm17173_vm1, %v2188_v39, %v2390_v0  ;;  %v4080_v30 = vmax.f32 %v4072_v18, 0.0 }
 0x24b   :  { %v13510_v41 = vadd.f32 1e-05, %v4084_v58  ;;  %v13514_v50 = vadd.f32 1e-05, %v4085_v4  ;;  %v13516_v35 = vadd.f32 1e-05, %v4086_v37  ;;  %v18072_v10 = vsub.f32 %v13401_v63, %v13393_v25 }
 0x24c   :  { %v13518_v13 = vadd.f32 1e-05, %v4087_v8  ;;  %v2396_v47 = vsel %vm17175_vm2, %v2391_v61, %v2392_v60  ;;  %v2402_v3 = vsel %vm17172_vm4, %v2391_v61, %v2392_v60  ;;  %v18073_v36 = vsub.f32 %v13403_v31, %v13397_v12 }
 0x24d   :  { %10168 = vrsqrt.f32 %v13510_v41  ;;  %v4081_v6 = vmax.f32 %v18072_v10, 0.0  ;;  %v13541_v25 = vsel %vm17174_vm3, %v2394_v7, %v2396_v47  ;;  %v13544_v63 = vsel %vm17171_vm5, %v2400_v51, %v2402_v3 }
 0x24e   :  { %10170 = vrsqrt.f32 %v13514_v50  ;;  %v4082_v9 = vmax.f32 %v18073_v36, 0.0  ;;  %v18074_v46 = vsub.f32 %v13409_v33, %v13407_v26  ;;  %v13549_v19 = vadd.f32 1e-05, %v4080_v30  ;;  %v2241_v0 = vpop.f32.mrf.mxu0  ;;  %v2267_v14 = vpop.f32.mrf.mxu2 }
 0x24f   :  { %10172 = vrsqrt.f32 %v13516_v35  ;;  %v13551_v12 = vadd.f32 1e-05, %v4081_v6  ;;  %vm4142_vm6 = vweird.f32 %v13510_v41  ;;  %vm4152_vm8 = vweird.f32 %v13514_v50  ;;  %v2280_v7 = vpop.f32.mrf.mxu3 }
 0x250   :  { %10174 = vrsqrt.f32 %v13518_v13  ;;  %v4083_v15 = vmax.f32 %v18074_v46, 0.0  ;;  %v13553_v31 = vadd.f32 1e-05, %v4082_v9  ;;  %v2254_v57 = vpop.f32.mrf.mxu1  ;;  %v1510_v8 = vperm.slane %v13492_v43, 4 }
 0x251   :  { %10176 = vrsqrt.f32 %v13549_v19  ;;  %vm4162_vm12 = vweird.f32 %v13516_v35  ;;  %v1511_v18 = vperm.slane %v13492_v43, 5  ;;  %vm4172_vm13 = vweird.f32 %v13518_v13 }
 0x252   :  { %v13555_v39 = vadd.f32 1e-05, %v4083_v15  ;;  %10178 = vrsqrt.f32 %v13551_v12  ;;  %v13595_v47 = vadd.f32 %v2239_v28, %v1510_v8  ;;  %v1513_v3 = vperm.slane %v13492_v43, 7 }
 0x253   :  { %v13557_v49 = vpop.eup %10168  ;;  %10180 = vrsqrt.f32 %v13553_v31  ;;  %vm4102_vm14 = vweird.f32 %v13549_v19  ;;  %vm4122_vm1 = vweird.f32 %v13553_v31 }
 0x254   :  { %v13560_v34 = vpop.eup %10170  ;;  %v4137_v26 = vmul.f32 %v13557_v49, %v13510_v41  ;;  %vm4143_vm7 = vweird.f32 %v13557_v49  ;;  %10182 = vrsqrt.f32 %v13555_v39 }
 0x255   :  { %v13567_v33 = vpop.eup %10172  ;;  %v4147_v45 = vmul.f32 %v13560_v34, %v13514_v50  ;;  %vm4153_vm9 = vweird.f32 %v13560_v34  ;;  %vm13623_vm4 = vmor %vm4142_vm6, %vm4143_vm7 }
 0x256   :  { %v13575_v22 = vpop.eup %10174  ;;  %v4157_v17 = vmul.f32 %v13567_v33, %v13516_v35  ;;  %v4138_v58 = vmul.f32 %v13557_v49, %v4137_v26  ;;  %vm4163_vm10 = vweird.f32 %v13567_v33  ;;  %vm4154_vm2 = vmor %vm4152_vm8, %vm4153_vm9  ;;  %vm18080_vm8 = vweird.f32 %v13551_v12 }
 0x257   :  { %v4167_v4 = vmul.f32 %v13575_v22, %v13518_v13  ;;  %v4148_v37 = vmul.f32 %v13560_v34, %v4147_v45  ;;  %vm4173_vm11 = vweird.f32 %v13575_v22  ;;  %v13591_v30 = vpop.eup %10176 }
 0x258   :  { %v4139_v51 = vmul.f32 0.5, %v4138_v58  ;;  %v4158_v61 = vmul.f32 %v13567_v33, %v4157_v17  ;;  %v13598_v36 = vpop.eup %10178  ;;  %v4097_v9 = vmul.f32 %v13591_v30, %v13549_v19  ;;  %vm4103_vm15 = vweird.f32 %v13591_v30 }
 0x259   :  { %v4149_v10 = vmul.f32 0.5, %v4148_v37  ;;  %v4168_v6 = vmul.f32 %v13575_v22, %v4167_v4  ;;  %v13604_v26 = vpop.eup %10180  ;;  %v4107_v45 = vmul.f32 %v13598_v36, %v13551_v12  ;;  %vm13655_vm6 = vmor %vm4102_vm14, %vm4103_vm15  ;;  %vm18079_vm7 = vweird.f32 %v13598_v36 }
 0x25a   :  { %v4140_v46 = vsub.f32 1.5, %v4139_v51  ;;  %v4159_v15 = vmul.f32 0.5, %v4158_v61  ;;  %v10183_v58 = vpop.eup %10182  ;;  %v4098_v0 = vmul.f32 %v13591_v30, %v4097_v9  ;;  %v4117_v57 = vmul.f32 %v13604_v26, %v13553_v31  ;;  %vm4114_vm9 = vmor %vm18080_vm8, %vm18079_vm7 }
 0x25b   :  { %v4150_v28 = vsub.f32 1.5, %v4149_v10  ;;  %v4169_v17 = vmul.f32 0.5, %v4168_v6  ;;  %vm4123_vm3 = vweird.f32 %v13604_v26  ;;  %v4108_v37 = vmul.f32 %v13598_v36, %v4107_v45 }
 0x25c   :  { %v4141_v4 = vmul.f32 %v13557_v49, %v4140_v46  ;;  %v4127_v8 = vmul.f32 %v10183_v58, %v13555_v39  ;;  %vm4133_vm5 = vweird.f32 %v10183_v58  ;;  %v4099_v51 = vmul.f32 0.5, %v4098_v0 }
 0x25d   :  { %v4151_v7 = vmul.f32 %v13560_v34, %v4150_v28  ;;  %v4118_v61 = vmul.f32 %v13604_v26, %v4117_v57  ;;  %v4160_v6 = vsub.f32 1.5, %v4159_v15  ;;  %v4109_v41 = vmul.f32 0.5, %v4108_v37 }
 0x25e   :  { %v4145_v10 = vsel %vm13623_vm4, %v13557_v49, %v4141_v4  ;;  %v4128_v9 = vmul.f32 %v10183_v58, %v4127_v8  ;;  %v4170_v45 = vsub.f32 1.5, %v4169_v17  ;;  %v4100_v54 = vsub.f32 1.5, %v4099_v51  ;;  %vm4164_vm4 = vmor %vm4162_vm12, %vm4163_vm10 }
 0x25f   :  { %v4155_v46 = vsel %vm4154_vm2, %v13560_v34, %v4151_v7  ;;  %v4119_v28 = vmul.f32 0.5, %v4118_v61  ;;  %v4161_v0 = vmul.f32 %v13567_v33, %v4160_v6  ;;  %v4110_v60 = vsub.f32 1.5, %v4109_v41  ;;  %vm4174_vm2 = vmor %vm4172_vm13, %vm4173_vm11 }
 0x260   :  { %v4187_v57 = vrot.slane %v4155_v46, 7  ;;  %v4129_v59 = vmul.f32 0.5, %v4128_v9  ;;  %v4171_v50 = vmul.f32 %v13575_v22, %v4170_v45  ;;  %v2253_v49 = vadd.f32 %v13527_v32, %v1511_v18  ;;  %vm4124_vm10 = vmor %vm4122_vm1, %vm4123_vm3 }
 0x261   :  { %v4101_v15 = vmul.f32 %v13591_v30, %v4100_v54  ;;  %v4120_v34 = vsub.f32 1.5, %v4119_v28  ;;  %v4165_v17 = vsel %vm4164_vm4, %v13567_v33, %v4161_v0  ;;  %v4111_v32 = vmul.f32 %v13598_v36, %v4110_v60 }
 0x262   :  { %v4193_v4 = vsel %vm2393_vm0, %v4145_v10, %v4187_v57  ;;  %v4130_v54 = vsub.f32 1.5, %v4129_v59  ;;  %v4175_v33 = vsel %vm4174_vm2, %v13575_v22, %v4171_v50  ;;  %v4188_v18 = vrot.slane %v4165_v17, 6 }
 0x263   :  { %v4105_v13 = vsel %vm13655_vm6, %v13591_v30, %v4101_v15  ;;  %v4121_v19 = vmul.f32 %v13604_v26, %v4120_v34  ;;  %v4189_v37 = vrot.slane %v4175_v33, 5  ;;  %v2412_v8 = vrot.slane %v2253_v49, 7 }
 0x264   :  { %v4115_v14 = vsel %vm4114_vm9, %v13598_v36, %v4111_v32  ;;  %v4131_v59 = vmul.f32 %v10183_v58, %v4130_v54  ;;  %v18081_v22 = vperm.slane %v13492_v43, 6  ;;  %v2279_v30 = vadd.f32 %v13537_v29, %v1513_v3 }
 0x265   :  { %v4125_v12 = vsel %vm4124_vm10, %v13604_v26, %v4121_v19  ;;  %vm18082_vm11 = vweird.f32 %v13555_v39  ;;  %v4184_v7 = vrot.slane %v4115_v14, 7  ;;  %vm18083_vm13 = vcmask 1042434  }
 0x266   :  { %v2266_v60 = vadd.f32 %v13535_v42, %v18081_v22  ;;  %vm4134_vm12 = vmor %vm18082_vm11, %vm4133_vm5  ;;  %v4194_v36 = vsel %vm18083_vm13, %v4188_v18, %v4189_v37  ;;  %v2415_v31 = vsel %vm2393_vm0, %v13595_v47, %v2412_v8  ;;  %v4185_v61 = vrot.slane %v4125_v12, 6 }
 0x267   :  { %v4135_v51 = vsel %vm4134_vm12, %v10183_v58, %v4131_v59  ;;  %vm18084_vm1 = vcmask 1041408   ;;  %vm18085_vm3 = vcmask 1041409   ;;  %v4190_v3 = vsel %vm2393_vm0, %v4105_v13, %v4184_v7  ;;  %vm18087_vm5 = vmmov %vm18083_vm13  ;;  %v18093_v13 = vld [vmem:[#allocation65_spill] sm:$0xff]  ;;  %v18096_v59 = vld [vmem:[#allocation76_spill] sm:$0xff] }
 0x268   :  { %v4195_v43 = vsel %vm18084_vm1, %v4193_v4, %v4194_v36  ;;  %v2418_v42 = vsel %vm18085_vm3, %v13595_v47, %v2412_v8  ;;  %v4186_v29 = vrot.slane %v4135_v51, 5  ;;  %v18086_v26 = vrot.slane %v13544_v63, 1  ;;  %vm18088_vm14 = vmmov %vm18084_vm1  ;;  %v18099_v7 = vld [vmem:[#allocation78_spill] sm:$0xff] }
 0x269   :  { %v2413_v10 = vrot.slane %v2266_v60, 6  ;;  %v2414_v6 = vrot.slane %v2279_v30, 5  ;;  %vm18089_vm15 = vmmov %vm18087_vm5  ;;  %vm18090_vm4 = vcmask 1043459   ;;  %vm18092_vm6 = vcmask 1042433  }
 0x26a   :  { %v4199_v39 = vmul.f32 %v4195_v43, %v18086_v26  ;;  %v4191_v41 = vsel %vm18087_vm5, %v4185_v61, %v4186_v29  ;;  %vm18091_vm2 = vmmov %vm18084_vm1  ;;  %v18101_v61 = vld [vmem:[#allocation123_spill] sm:$0xff] }
 0x26b   :  { %v4192_v45 = vsel %vm18088_vm14, %v4190_v3, %v4191_v41  ;;  %v2416_v47 = vsel %vm18089_vm15, %v2413_v10, %v2414_v6  ;;  %v2419_v0 = vsel %vm18090_vm4, %v2413_v10, %v2414_v6  ;;  %vm18095_vm7 = vmmov %vm18087_vm5  ;;  %v18103_v3 = vld [vmem:[#allocation124_spill] sm:$0xff] }
 0x26c   :  { %v13692_v9 = vperm.slane %v4199_v39, 0  ;;  %v13694_v46 = vperm.slane %v4199_v39, 1  ;;  %v13696_v58 = vperm.slane %v4199_v39, 2  ;;  %v13699_v28 = vperm.slane %v4199_v39, 3  ;;  %vm18098_vm8 = vmmov %vm18084_vm1  ;;  %v18104_v39 = vld [vmem:[#allocation23_spill] sm:$0xff]  ;;  %v18106_v41 = vld [vmem:[#allocation24_spill] sm:$0xff] }
 0x26d   :  { %v4198_v63 = vmul.f32 %v4192_v45, %v13541_v25  ;;  %v2417_v57 = vsel %vm18091_vm2, %v2415_v31, %v2416_v47  ;;  %v2420_v50 = vsel %vm18092_vm6, %v2418_v42, %v2419_v0  ;;  %v18100_v31 = vld [vmem:[#allocation79_spill] sm:$0xff]  ;;  %vm18102_vm9 = vmmov %vm18087_vm5 }
 0x26e   :  { %v4222_v49 = vmul.f32 %v13692_v9, %v13481_v23  ;;  %v2421_v15 = vrot.slane %v2420_v50, 1  ;;  %v4223_v34 = vmul.f32 %v13694_v46, %v13483_v5  ;;  %v4224_v17 = vmul.f32 %v13696_v58, %v13485_v16  ;;  %vm18105_vm10 = vmmov %vm18084_vm1  ;;  %v18107_v47 = vld [vmem:[#allocation115_spill] sm:$0xff] }
 0x26f   :  { %v4225_v4 = vmul.f32 %v13699_v28, %v13487_v52  ;;  %v13714_v35 = vperm.slane %v4198_v63, 0  ;;  %v13716_v25 = vperm.slane %v4198_v63, 1  ;;  %v13718_v32 = vperm.slane %v4198_v63, 2  ;;  %vm18798_vm11 = vmmov %vm18085_vm3 }
 0x270   :  { %v13720_v54 = vperm.slane %v4198_v63, 3  ;;  %v4237_v33 = vrot.slane %v4223_v34, 7  ;;  %v4238_v23 = vrot.slane %v4224_v17, 6  ;;  %v13724_v5 = vmul.f32 %v13692_v9, %v18093_v13  ;;  %v18108_v63 = vld [vmem:[#allocation116_spill] sm:$0xff]  ;;  %v18110_v17 = vld [vmem:[#allocation118_spill] sm:$0xff]  ;;  %vm18799_vm12 = vmmov %vm18087_vm5 }
 0x271   :  { %v4239_v18 = vrot.slane %v4225_v4, 5  ;;  %v4218_v16 = vmul.f32 %v13714_v35, %v13379_v2  ;;  %v4219_v52 = vmul.f32 %v13716_v25, %v13381_v62  ;;  %v4220_v19 = vmul.f32 %v13718_v32, %v13383_v11  ;;  %v18097_v2 = vld [vmem:[#allocation77_spill] sm:$0xff]  ;;  %vm18800_vm13 = vmmov %vm18090_vm4 }
 0x272   :  { %18094 = vst [vmem:[#allocation137_spill] sm:$0xff] %v13724_v5  ;;  %v4221_v37 = vmul.f32 %v13720_v54, %v13385_v27  ;;  %v4243_v8 = vsel %vm2393_vm0, %v4222_v49, %v4237_v33  ;;  %v13741_v22 = vmul.f32 %v13714_v35, %v18096_v59  ;;  %v13745_v62 = vmul.f32 %v13716_v25, %v18097_v2  ;;  %v18111_v33 = vld [vmem:[#allocation87_spill] sm:$0xff]  ;;  %v18117_v2 = vld [vmem:[#allocation17_spill] sm:$0xff]  ;;  %v18141_v5 = vld [vmem:[#allocation42_spill] sm:$0xff] }
 0x273   :  { %v4244_v14 = vsel %vm18095_vm7, %v4238_v23, %v4239_v18  ;;  %v4234_v11 = vrot.slane %v4219_v52, 7  ;;  %v4235_v60 = vrot.slane %v4220_v19, 6  ;;  %v13752_v36 = vmul.f32 %v13718_v32, %v18099_v7  ;;  %v18112_v18 = vld [vmem:[#allocation88_spill] sm:$0xff]  ;;  %v18114_v52 = vld [vmem:[#allocation90_spill] sm:$0xff]  ;;  %vm18801_vm1 = vmmov %vm18085_vm3 }
 0x274   :  { %v4236_v30 = vrot.slane %v4221_v37, 5  ;;  %v4245_v27 = vsel %vm18098_vm8, %v4243_v8, %v4244_v14  ;;  %v13756_v51 = vmul.f32 %v13720_v54, %v18100_v31  ;;  %v13760_v43 = vmul.f32 %v13714_v35, %v18101_v61  ;;  %v18115_v37 = vld [vmem:[#allocation15_spill] sm:$0xff]  ;;  %v18116_v14 = vld [vmem:[#allocation16_spill] sm:$0xff]  ;;  %vm18802_vm3 = vmmov %vm18091_vm2 }
 0x275   :  { %v13748_v12 = vsub.f32 %v2421_v15, %v4245_v27  ;;  %v4240_v42 = vsel %vm2393_vm0, %v4218_v16, %v4234_v11  ;;  %v13766_v26 = vmul.f32 %v13716_v25, %v18103_v3  ;;  %v13770_v10 = vmul.f32 %v13718_v32, %v18104_v39  ;;  %v18109_v15 = vld [vmem:[#allocation117_spill] sm:$0xff]  ;;  %v18119_v27 = vld [vmem:[#allocation98_spill] sm:$0xff]  ;;  %v18120_v31 = vld [vmem:[#allocation99_spill] sm:$0xff] }
 0x276   :  { %v4241_v29 = vsel %vm18102_vm9, %v4235_v60, %v4236_v30  ;;  %v13775_v45 = vmul.f32 %v13720_v54, %v18106_v41  ;;  %v13779_v0 = vmul.f32 %v13714_v35, %v18107_v47  ;;  %v13783_v50 = vmul.f32 %v13716_v25, %v18108_v63  ;;  %v18113_v16 = vld [vmem:[#allocation89_spill] sm:$0xff]  ;;  %v18118_v60 = vld [vmem:[#allocation18_spill] sm:$0xff]  ;;  %v18124_v47 = vld [vmem:[#allocation31_spill] sm:$0xff] }
 0x277   :  { %v4242_v6 = vsel %vm18105_vm10, %v4240_v42, %v4241_v29  ;;  %v13789_v34 = vmul.f32 %v13718_v32, %v18109_v15  ;;  %v13793_v4 = vmul.f32 %v13720_v54, %v18110_v17  ;;  %v13797_v23 = vmul.f32 %v13714_v35, %v18111_v33  ;;  %v18121_v42 = vld [vmem:[#allocation100_spill] sm:$0xff]  ;;  %v18122_v3 = vld [vmem:[#allocation102_spill] sm:$0xff]  ;;  %v18126_v33 = vld [vmem:[#allocation33_spill] sm:$0xff] }
 0x278   :  { %v13785_v49 = vsub.f32 %v2417_v57, %v4242_v6  ;;  %v13801_v13 = vmul.f32 %v13716_v25, %v18112_v18  ;;  %v13805_v57 = vmul.f32 %v13718_v32, %v18113_v16  ;;  %v13809_v19 = vmul.f32 %v13720_v54, %v18114_v52  ;;  %v18123_v6 = vld [vmem:[#allocation29_spill] sm:$0xff]  ;;  %v18125_v15 = vld [vmem:[#allocation32_spill] sm:$0xff]  ;;  %vm18804_vm5 = vmmov %vm18092_vm6 }
 0x279   :  { %v13813_v8 = vmul.f32 %v13714_v35, %v18115_v37  ;;  %v13817_v59 = vmul.f32 %v13716_v25, %v18116_v14  ;;  %v13821_v11 = vmul.f32 %v13718_v32, %v18117_v2  ;;  %v13825_v30 = vmul.f32 %v13720_v54, %v18118_v60  ;;  %v18127_v16 = vld [vmem:[#allocation25_spill] sm:$0xff]  ;;  %v18128_v37 = vld [vmem:[#allocation26_spill] sm:$0xff]  ;;  %v18129_v2 = vld [vmem:[#allocation27_spill] sm:$0xff] }
 0x27a   :  { %v13829_v7 = vmul.f32 %v13714_v35, %v18119_v27  ;;  %v13833_v61 = vmul.f32 %v13716_v25, %v18120_v31  ;;  %v13837_v29 = vmul.f32 %v13718_v32, %v18121_v42  ;;  %v13841_v39 = vmul.f32 %v13720_v54, %v18122_v3  ;;  %v18130_v27 = vld [vmem:[#allocation28_spill] sm:$0xff]  ;;  %v18131_v42 = vld [vmem:[#allocation153_spill] sm:$0xff]  ;;  %vm18806_vm14 = vmmov %vm18095_vm7 }
 0x27b   :  { %v13845_v41 = vmul.f32 %v13714_v35, %v18123_v6  ;;  %v13849_v63 = vmul.f32 %v13716_v25, %v18124_v47  ;;  %v13853_v17 = vmul.f32 %v13718_v32, %v18125_v15  ;;  %v13857_v18 = vmul.f32 %v13720_v54, %v18126_v33  ;;  %v18133_v6 = vld [vmem:[#allocation154_spill] sm:$0xff]  ;;  %v18135_v15 = vld [vmem:[#allocation155_spill] sm:$0xff]  ;;  %vm18807_vm15 = vmmov %vm18090_vm4 }
 0x27c   :  { %v13861_v52 = vmul.f32 %v13714_v35, %v18127_v16  ;;  %v13865_v14 = vmul.f32 %v13716_v25, %v18128_v37  ;;  %v13869_v60 = vmul.f32 %v13718_v32, %v18129_v2  ;;  %v13873_v31 = vmul.f32 %v13720_v54, %v18130_v27  ;;  %v18137_v16 = vld [vmem:[#allocation156_spill] sm:$0xff]  ;;  %v18139_v2 = vld [vmem:[#allocation41_spill] sm:$0xff]  ;;  %vm18808_vm4 = vmmov %vm18091_vm2 }
 0x27d   :  { %v13877_v3 = vmul.f32 %v13714_v35, %v18131_v42  ;;  %v13881_v47 = vmul.f32 %v13716_v25, %v18133_v6  ;;  %v13885_v33 = vmul.f32 %v13718_v32, %v18135_v15  ;;  %v13889_v37 = vmul.f32 %v13720_v54, %v18137_v16  ;;  %vm18810_vm2 = vmmov %vm18804_vm5 }
 0x27e   :  { %v13893_v27 = vmul.f32 %v13714_v35, %v18139_v2  ;;  %v13897_v42 = vmul.f32 %v13716_v25, %v18141_v5 }
 0x27f   :  { %18132 = vst [vmem:[#allocation97_spill] sm:$0xff] %v13877_v3  ;;  %v18143_v3 = vld [vmem:[#allocation43_spill] sm:$0xff] }
 0x280   :  { %18134 = vst [vmem:[#allocation101_spill] sm:$0xff] %v13881_v47  ;;  %v13901_v6 = vmul.f32 %v13718_v32, %v18143_v3  ;;  %v18144_v47 = vld [vmem:[#allocation44_spill] sm:$0xff] }
 0x281   :  { %18136 = vst [vmem:[#allocation103_spill] sm:$0xff] %v13885_v33  ;;  %v13905_v15 = vmul.f32 %v13720_v54, %v18144_v47  ;;  %v18145_v33 = vld [vmem:[#allocation37_spill] sm:$0xff]  ;;  %v13925_v47 = vmul.f32 %v13714_v35, %v13163_v21 }
 0x282   :  { %18138 = vst [vmem:[#allocation104_spill] sm:$0xff] %v13889_v37  ;;  %v13909_v16 = vmul.f32 %v13714_v35, %v18145_v33  ;;  %v18146_v37 = vld [vmem:[#allocation161_spill] sm:$0xff]  ;;  %v13929_v33 = vmul.f32 %v13716_v25, %v13166_v55 }
 0x283   :  { %18140 = vst [vmem:[#allocation69_spill] sm:$0xff] %v13893_v27  ;;  %v13913_v2 = vmul.f32 %v13716_v25, %v18146_v37  ;;  %v18147_v27 = vld [vmem:[#allocation38_spill] sm:$0xff]  ;;  %v13933_v37 = vmul.f32 %v13718_v32, %v13169_v48 }
 0x284   :  { %18142 = vst [vmem:[#allocation125_spill] sm:$0xff] %v13897_v42  ;;  %v13917_v5 = vmul.f32 %v13718_v32, %v18147_v27  ;;  %v18148_v42 = vld [vmem:[#allocation39_spill] sm:$0xff]  ;;  %v13937_v27 = vmul.f32 %v13720_v54, %v13173_v56 }
 0x285   :  { %v13921_v3 = vmul.f32 %v13720_v54, %v18148_v42  ;;  %18150 = vst [vmem:[#allocation126_spill] sm:$0xff] %v13925_v47  ;;  %v13941_v42 = vmul.f32 %v13714_v35, %v13120_v20  ;;  %v18157_v47 = vld [vmem:[#allocation93_spill] sm:$0xff] }
 0x286   :  { %18151 = vst [vmem:[#allocation71_spill] sm:$0xff] %v13929_v33  ;;  %v13949_v55 = vmul.f32 %v13718_v32, %v18157_v47  ;;  %v18159_v33 = vld [vmem:[#allocation112_spill] sm:$0xff] }
 0x287   :  { %18149 = vst [vmem:[#allocation70_spill] sm:$0xff] %v13921_v3  ;;  %v18155_v3 = vld [vmem:[#allocation92_spill] sm:$0xff]  ;;  %v13953_v48 = vmul.f32 %v13720_v54, %v18159_v33 }
 0x288   :  { %18152 = vst [vmem:[#allocation127_spill] sm:$0xff] %v13933_v37  ;;  %v13945_v21 = vmul.f32 %v13716_v25, %v18155_v3  ;;  %v18161_v37 = vld [vmem:[#allocation96_spill] sm:$0xff] }
 0x289   :  { %18153 = vst [vmem:[#allocation72_spill] sm:$0xff] %v13937_v27  ;;  %v13957_v56 = vmul.f32 %v13714_v35, %v18161_v37  ;;  %v18163_v27 = vld [vmem:[#allocation141_spill] sm:$0xff] }
 0x28a   :  { %18154 = vst [vmem:[#allocation128_spill] sm:$0xff] %v13941_v42  ;;  %v13961_v20 = vmul.f32 %v13716_v25, %v18163_v27  ;;  %v18165_v42 = vld [vmem:[#allocation80_spill] sm:$0xff] }
 0x28b   :  { %18156 = vst [vmem:[#allocation19_spill] sm:$0xff] %v13945_v21  ;;  %v13965_v3 = vmul.f32 %v13718_v32, %v18165_v42  ;;  %v18167_v21 = vld [vmem:[#allocation81_spill] sm:$0xff] }
 0x28c   :  { %18158 = vst [vmem:[#allocation20_spill] sm:$0xff] %v13949_v55  ;;  %v13969_v47 = vmul.f32 %v13720_v54, %v18167_v21  ;;  %v18169_v55 = vld [vmem:[#allocation60_spill] sm:$0xff] }
 0x28d   :  { %18160 = vst [vmem:[#allocation21_spill] sm:$0xff] %v13953_v48  ;;  %v13973_v33 = vmul.f32 %v13714_v35, %v18169_v55  ;;  %v18171_v48 = vld [vmem:[#allocation119_spill] sm:$0xff] }
 0x28e   :  { %18162 = vst [vmem:[#allocation22_spill] sm:$0xff] %v13957_v56  ;;  %v13977_v37 = vmul.f32 %v13716_v25, %v18171_v48  ;;  %v18172_v56 = vld [vmem:[#allocation120_spill] sm:$0xff] }
 0x28f   :  { %18164 = vst [vmem:[#allocation82_spill] sm:$0xff] %v13961_v20  ;;  %v13981_v27 = vmul.f32 %v13718_v32, %v18172_v56  ;;  %v18174_v20 = vld [vmem:[#allocation121_spill] sm:$0xff]  ;;  %v14001_v56 = vmul.f32 %v13720_v54, %v13325_v24 }
 0x290   :  { %18166 = vst [vmem:[#allocation83_spill] sm:$0xff] %v13965_v3  ;;  %v13985_v42 = vmul.f32 %v13720_v54, %v18174_v20  ;;  %v18176_v3 = vld [vmem:[#allocation57_spill] sm:$0xff]  ;;  %v18189_v54 = vld [vmem:[#allocation35_spill] sm:$0xff] }
 0x291   :  { %18168 = vst [vmem:[#allocation51_spill] sm:$0xff] %v13969_v47  ;;  %v13989_v21 = vmul.f32 %v13714_v35, %v18176_v3  ;;  %v18177_v47 = vld [vmem:[#allocation58_spill] sm:$0xff]  ;;  %v18183_v3 = vld [vmem:[#allocation68_spill] sm:$0xff] }
 0x292   :  { %18170 = vst [vmem:[#allocation52_spill] sm:$0xff] %v13973_v33  ;;  %v13993_v55 = vmul.f32 %v13716_v25, %v18177_v47  ;;  %v18178_v33 = vld [vmem:[#allocation59_spill] sm:$0xff]  ;;  %v14013_v25 = vmul.f32 %v13699_v28, %v18183_v3  ;;  %v18185_v47 = vld [vmem:[#allocation30_spill] sm:$0xff] }
 0x293   :  { %18173 = vst [vmem:[#allocation107_spill] sm:$0xff] %v13981_v27  ;;  %v13997_v48 = vmul.f32 %v13718_v32, %v18178_v33  ;;  %v18179_v27 = vld [vmem:[#allocation66_spill] sm:$0xff]  ;;  %v14017_v32 = vmul.f32 %v13692_v9, %v18185_v47 }
 0x294   :  { %18175 = vst [vmem:[#allocation149_spill] sm:$0xff] %v13985_v42  ;;  %v14005_v20 = vmul.f32 %v13694_v46, %v18179_v27  ;;  %v18181_v42 = vld [vmem:[#allocation67_spill] sm:$0xff]  ;;  %v18187_v33 = vld [vmem:[#allocation34_spill] sm:$0xff]  ;;  %v14025_v27 = vmul.f32 %v13696_v58, %v18189_v54 }
 0x295   :  { %v14009_v35 = vmul.f32 %v13696_v58, %v18181_v42  ;;  %18184 = vst [vmem:[#allocation109_spill] sm:$0xff] %v14013_v25  ;;  %v14021_v24 = vmul.f32 %v13694_v46, %v18187_v33  ;;  %v18195_v25 = vld [vmem:[#allocation130_spill] sm:$0xff] }
 0x296   :  { %18180 = vst [vmem:[#allocation108_spill] sm:$0xff] %v14005_v20  ;;  %v18191_v20 = vld [vmem:[#allocation36_spill] sm:$0xff]  ;;  %v14037_v47 = vmul.f32 %v13694_v46, %v18195_v25 }
 0x297   :  { %18182 = vst [vmem:[#allocation150_spill] sm:$0xff] %v14009_v35  ;;  %v14029_v42 = vmul.f32 %v13699_v28, %v18191_v20  ;;  %v18193_v35 = vld [vmem:[#allocation129_spill] sm:$0xff] }
 0x298   :  { %18186 = vst [vmem:[#allocation151_spill] sm:$0xff] %v14017_v32  ;;  %v14033_v3 = vmul.f32 %v13692_v9, %v18193_v35  ;;  %v18197_v32 = vld [vmem:[#allocation131_spill] sm:$0xff] }
 0x299   :  { %18188 = vst [vmem:[#allocation110_spill] sm:$0xff] %v14021_v24  ;;  %v14041_v33 = vmul.f32 %v13696_v58, %v18197_v32  ;;  %v18199_v24 = vld [vmem:[#allocation132_spill] sm:$0xff] }
 0x29a   :  { %18190 = vst [vmem:[#allocation152_spill] sm:$0xff] %v14025_v27  ;;  %v14045_v54 = vmul.f32 %v13699_v28, %v18199_v24  ;;  %v18201_v27 = vld [vmem:[#allocation85_spill] sm:$0xff] }
 0x29b   :  { %18192 = vst [vmem:[#allocation94_spill] sm:$0xff] %v14029_v42  ;;  %v14049_v20 = vmul.f32 %v13692_v9, %v18201_v27  ;;  %v18203_v42 = vld [vmem:[#allocation86_spill] sm:$0xff] }
 0x29c   :  { %18194 = vst [vmem:[#allocation111_spill] sm:$0xff] %v14033_v3  ;;  %v14053_v35 = vmul.f32 %v13694_v46, %v18203_v42  ;;  %v18205_v3 = vld [vmem:[#allocation138_spill] sm:$0xff] }
 0x29d   :  { %18196 = vst [vmem:[#allocation144_spill] sm:$0xff] %v14037_v47  ;;  %v14057_v25 = vmul.f32 %v13696_v58, %v18205_v3  ;;  %v18207_v47 = vld [vmem:[#allocation133_spill] sm:$0xff] }
 0x29e   :  { %18198 = vst [vmem:[#allocation145_spill] sm:$0xff] %v14041_v33  ;;  %v14061_v32 = vmul.f32 %v13699_v28, %v18207_v47  ;;  %v18209_v33 = vld [vmem:[#allocation45_spill] sm:$0xff] }
 0x29f   :  { %18200 = vst [vmem:[#allocation65_spill] sm:$0xff] %v14045_v54  ;;  %v14065_v24 = vmul.f32 %v13692_v9, %v18209_v33  ;;  %v18211_v54 = vld [vmem:[#allocation46_spill] sm:$0xff] }
 0x2a0   :  { %18202 = vst [vmem:[#allocation76_spill] sm:$0xff] %v14049_v20  ;;  %v14069_v27 = vmul.f32 %v13694_v46, %v18211_v54  ;;  %v18213_v20 = vld [vmem:[#allocation47_spill] sm:$0xff] }
 0x2a1   :  { %18204 = vst [vmem:[#allocation77_spill] sm:$0xff] %v14053_v35  ;;  %v14073_v42 = vmul.f32 %v13696_v58, %v18213_v20  ;;  %v18215_v35 = vld [vmem:[#allocation148_spill] sm:$0xff] }
 0x2a2   :  { %18206 = vst [vmem:[#allocation78_spill] sm:$0xff] %v14057_v25  ;;  %v14077_v3 = vmul.f32 %v13699_v28, %v18215_v35  ;;  %v18217_v25 = vld [vmem:[#allocation162_spill] sm:$0xff] }
 0x2a3   :  { %18208 = vst [vmem:[#allocation79_spill] sm:$0xff] %v14061_v32  ;;  %v14081_v47 = vmul.f32 %v13692_v9, %v18217_v25  ;;  %v18219_v32 = vld [vmem:[#allocation163_spill] sm:$0xff] }
 0x2a4   :  { %18210 = vst [vmem:[#allocation123_spill] sm:$0xff] %v14065_v24  ;;  %v14085_v33 = vmul.f32 %v13694_v46, %v18219_v32  ;;  %v18221_v24 = vld [vmem:[#allocation40_spill] sm:$0xff] }
 0x2a5   :  { %18212 = vst [vmem:[#allocation124_spill] sm:$0xff] %v14069_v27  ;;  %v14089_v54 = vmul.f32 %v13696_v58, %v18221_v24  ;;  %v18223_v27 = vld [vmem:[#allocation84_spill] sm:$0xff] }
 0x2a6   :  { %18214 = vst [vmem:[#allocation23_spill] sm:$0xff] %v14073_v42  ;;  %v14093_v20 = vmul.f32 %v13699_v28, %v18223_v27  ;;  %v18225_v42 = vld [vmem:[#allocation48_spill] sm:$0xff] }
 0x2a7   :  { %18216 = vst [vmem:[#allocation24_spill] sm:$0xff] %v14077_v3  ;;  %v14097_v35 = vmul.f32 %v13692_v9, %v18225_v42  ;;  %v18227_v3 = vld [vmem:[#allocation164_spill] sm:$0xff] }
 0x2a8   :  { %18218 = vst [vmem:[#allocation115_spill] sm:$0xff] %v14081_v47  ;;  %v14101_v25 = vmul.f32 %v13694_v46, %v18227_v3  ;;  %v18229_v47 = vld [vmem:[#allocation140_spill] sm:$0xff] }
 0x2a9   :  { %18220 = vst [vmem:[#allocation116_spill] sm:$0xff] %v14085_v33  ;;  %v14105_v32 = vmul.f32 %v13696_v58, %v18229_v47  ;;  %v18231_v33 = vld [vmem:[#allocation95_spill] sm:$0xff] }
 0x2aa   :  { %18222 = vst [vmem:[#allocation117_spill] sm:$0xff] %v14089_v54  ;;  %v14109_v24 = vmul.f32 %v13699_v28, %v18231_v33  ;;  %v18233_v54 = vld [vmem:[#allocation157_spill] sm:$0xff] }
 0x2ab   :  { %18224 = vst [vmem:[#allocation118_spill] sm:$0xff] %v14093_v20  ;;  %v14113_v27 = vmul.f32 %v13692_v9, %v18233_v54  ;;  %v18235_v20 = vld [vmem:[#allocation49_spill] sm:$0xff] }
 0x2ac   :  { %18226 = vst [vmem:[#allocation87_spill] sm:$0xff] %v14097_v35  ;;  %v14117_v42 = vmul.f32 %v13694_v46, %v18235_v20  ;;  %v18237_v35 = vld [vmem:[#allocation158_spill] sm:$0xff] }
 0x2ad   :  { %18228 = vst [vmem:[#allocation88_spill] sm:$0xff] %v14101_v25  ;;  %v14121_v3 = vmul.f32 %v13696_v58, %v18237_v35  ;;  %v18239_v25 = vld [vmem:[#allocation50_spill] sm:$0xff] }
 0x2ae   :  { %18230 = vst [vmem:[#allocation89_spill] sm:$0xff] %v14105_v32  ;;  %v14125_v47 = vmul.f32 %v13699_v28, %v18239_v25  ;;  %v18241_v32 = vld [vmem:[#allocation142_spill] sm:$0xff] }
 0x2af   :  { %18232 = vst [vmem:[#allocation90_spill] sm:$0xff] %v14109_v24  ;;  %v14129_v33 = vmul.f32 %v13692_v9, %v18241_v32  ;;  %v18243_v24 = vld [vmem:[#allocation143_spill] sm:$0xff] }
 0x2b0   :  { %18234 = vst [vmem:[#allocation15_spill] sm:$0xff] %v14113_v27  ;;  %v14133_v54 = vmul.f32 %v13694_v46, %v18243_v24  ;;  %v18245_v27 = vld [vmem:[#allocation105_spill] sm:$0xff] }
 0x2b1   :  { %18236 = vst [vmem:[#allocation16_spill] sm:$0xff] %v14117_v42  ;;  %v14137_v20 = vmul.f32 %v13696_v58, %v18245_v27  ;;  %v18247_v42 = vld [vmem:[#allocation106_spill] sm:$0xff] }
 0x2b2   :  { %18238 = vst [vmem:[#allocation17_spill] sm:$0xff] %v14121_v3  ;;  %v14141_v35 = vmul.f32 %v13699_v28, %v18247_v42  ;;  %v18249_v3 = vld [vmem:[#allocation55_spill] sm:$0xff] }
 0x2b3   :  { %18240 = vst [vmem:[#allocation18_spill] sm:$0xff] %v14125_v47  ;;  %v14145_v25 = vmul.f32 %v13692_v9, %v18249_v3  ;;  %v18251_v47 = vld [vmem:[#allocation56_spill] sm:$0xff] }
 0x2b4   :  { %18242 = vst [vmem:[#allocation98_spill] sm:$0xff] %v14129_v33  ;;  %v14149_v32 = vmul.f32 %v13694_v46, %v18251_v47  ;;  %v18253_v33 = vld [vmem:[#allocation61_spill] sm:$0xff] }
 0x2b5   :  { %18244 = vst [vmem:[#allocation99_spill] sm:$0xff] %v14133_v54  ;;  %v14153_v24 = vmul.f32 %v13696_v58, %v18253_v33  ;;  %v18255_v54 = vld [vmem:[#allocation62_spill] sm:$0xff] }
 0x2b6   :  { %18246 = vst [vmem:[#allocation100_spill] sm:$0xff] %v14137_v20  ;;  %v14157_v27 = vmul.f32 %v13699_v28, %v18255_v54  ;;  %v18257_v20 = vld [vmem:[#allocation159_spill] sm:$0xff] }
 0x2b7   :  { %18248 = vst [vmem:[#allocation102_spill] sm:$0xff] %v14141_v35  ;;  %v14161_v42 = vmul.f32 %v13692_v9, %v18257_v20  ;;  %v18259_v35 = vld [vmem:[#allocation160_spill] sm:$0xff] }
 0x2b8   :  { %18250 = vst [vmem:[#allocation29_spill] sm:$0xff] %v14145_v25  ;;  %v14165_v3 = vmul.f32 %v13694_v46, %v18259_v35  ;;  %v18261_v25 = vld [vmem:[#allocation53_spill] sm:$0xff] }
 0x2b9   :  { %18252 = vst [vmem:[#allocation31_spill] sm:$0xff] %v14149_v32  ;;  %v14169_v47 = vmul.f32 %v13696_v58, %v18261_v25  ;;  %v18263_v32 = vld [vmem:[#allocation54_spill] sm:$0xff] }
 0x2ba   :  { %18254 = vst [vmem:[#allocation32_spill] sm:$0xff] %v14153_v24  ;;  %v14173_v33 = vmul.f32 %v13699_v28, %v18263_v32  ;;  %v18265_v24 = vld [vmem:[#allocation139_spill] sm:$0xff] }
 0x2bb   :  { %18256 = vst [vmem:[#allocation33_spill] sm:$0xff] %v14157_v27  ;;  %v14177_v54 = vmul.f32 %v13692_v9, %v18265_v24  ;;  %v18267_v27 = vld [vmem:[#allocation134_spill] sm:$0xff] }
 0x2bc   :  { %18258 = vst [vmem:[#allocation25_spill] sm:$0xff] %v14161_v42  ;;  %v14181_v20 = vmul.f32 %v13694_v46, %v18267_v27  ;;  %v18269_v42 = vld [vmem:[#allocation135_spill] sm:$0xff] }
 0x2bd   :  { %18260 = vst [vmem:[#allocation26_spill] sm:$0xff] %v14165_v3  ;;  %v14185_v35 = vmul.f32 %v13696_v58, %v18269_v42  ;;  %v18270_v3 = vld [vmem:[#allocation136_spill] sm:$0xff] }
 0x2be   :  { %18262 = vst [vmem:[#allocation27_spill] sm:$0xff] %v14169_v47  ;;  %v14189_v25 = vmul.f32 %v13699_v28, %v18270_v3  ;;  %v18271_v47 = vld [vmem:[#allocation113_spill] sm:$0xff]  ;;  %v14209_v3 = vmul.f32 %v13692_v9, %v13176_v53 }
 0x2bf   :  { %18264 = vst [vmem:[#allocation28_spill] sm:$0xff] %v14173_v33  ;;  %v14193_v32 = vmul.f32 %v13692_v9, %v18271_v47  ;;  %v18272_v33 = vld [vmem:[#allocation146_spill] sm:$0xff]  ;;  %v14213_v47 = vmul.f32 %v13694_v46, %v13179_v44 }
 0x2c0   :  { %18266 = vst [vmem:[#allocation153_spill] sm:$0xff] %v14177_v54  ;;  %v14197_v24 = vmul.f32 %v13694_v46, %v18272_v33  ;;  %v18273_v54 = vld [vmem:[#allocation114_spill] sm:$0xff]  ;;  %v14217_v33 = vmul.f32 %v13696_v58, %v13182_v38 }
 0x2c1   :  { %18268 = vst [vmem:[#allocation154_spill] sm:$0xff] %v14181_v20  ;;  %v14201_v27 = vmul.f32 %v13696_v58, %v18273_v54  ;;  %v18274_v20 = vld [vmem:[#allocation147_spill] sm:$0xff]  ;;  %v14221_v54 = vmul.f32 %v13699_v28, %v13219_v1 }
 0x2c2   :  { %v14205_v42 = vmul.f32 %v13699_v28, %v18274_v20  ;;  %18276 = vst [vmem:[#allocation156_spill] sm:$0xff] %v14209_v3  ;;  %v14225_v20 = vmul.f32 %v13692_v9, %v13110_v40  ;;  %v18283_v3 = vld [vmem:[#allocation64_spill] sm:$0xff] }
 0x2c3   :  { %18277 = vst [vmem:[#allocation41_spill] sm:$0xff] %v14213_v47  ;;  %v14233_v44 = vmul.f32 %v13696_v58, %v18283_v3  ;;  %v18285_v47 = vld [vmem:[#allocation91_spill] sm:$0xff] }
 0x2c4   :  { %18275 = vst [vmem:[#allocation155_spill] sm:$0xff] %v14205_v42  ;;  %v18281_v42 = vld [vmem:[#allocation63_spill] sm:$0xff]  ;;  %v14237_v38 = vmul.f32 %v13699_v28, %v18285_v47  ;;  %v14259_v47 = vperm.slane %v13785_v49, 1 }
 0x2c5   :  { %18278 = vst [vmem:[#allocation42_spill] sm:$0xff] %v14217_v33  ;;  %v14229_v53 = vmul.f32 %v13694_v46, %v18281_v42  ;;  %v18286_v33 = vld [vmem:[#allocation122_spill] sm:$0xff] }
 0x2c6   :  { %18279 = vst [vmem:[#allocation43_spill] sm:$0xff] %v14221_v54  ;;  %v14241_v1 = vmul.f32 %v13692_v9, %v18286_v33  ;;  %v18287_v54 = vld [vmem:[#allocation73_spill] sm:$0xff]  ;;  %v14262_v9 = vperm.slane %v13785_v49, 2  ;;  %v14268_v33 = vperm.slane %v13748_v12, 0 }
 0x2c7   :  { %18280 = vst [vmem:[#allocation44_spill] sm:$0xff] %v14225_v20  ;;  %v14245_v40 = vmul.f32 %v13694_v46, %v18287_v54  ;;  %v18288_v20 = vld [vmem:[#allocation74_spill] sm:$0xff]  ;;  %v14265_v46 = vperm.slane %v13785_v49, 3  ;;  %v14277_v54 = vperm.slane %v13748_v12, 3 }
 0x2c8   :  { %18282 = vst [vmem:[#allocation37_spill] sm:$0xff] %v14229_v53  ;;  %v14249_v42 = vmul.f32 %v13696_v58, %v18288_v20  ;;  %v18289_v53 = vld [vmem:[#allocation75_spill] sm:$0xff]  ;;  %v14271_v58 = vperm.slane %v13748_v12, 1 }
 0x2c9   :  { %18284 = vst [vmem:[#allocation161_spill] sm:$0xff] %v14233_v44  ;;  %v14253_v3 = vmul.f32 %v13699_v28, %v18289_v53  ;;  %v14256_v44 = vperm.slane %v13785_v49, 0  ;;  %v14274_v28 = vperm.slane %v13748_v12, 2  ;;  %v14285_v49 = vadd.f32 %v14259_v47, %v13745_v62 }
 0x2ca   :  { %v14289_v53 = vadd.f32 %v14262_v9, %v13752_v36  ;;  %v14305_v62 = vadd.f32 %v14262_v9, %v13770_v10  ;;  %v14309_v36 = vadd.f32 %v14265_v46, %v13775_v45  ;;  %v14325_v10 = vadd.f32 %v14265_v46, %v13793_v4 }
 0x2cb   :  { %18290 = vst [vmem:[#allocation38_spill] sm:$0xff] %v14253_v3  ;;  %v14281_v20 = vadd.f32 %v14256_v44, %v13741_v22  ;;  %v14293_v3 = vadd.f32 %v14265_v46, %v13756_v51  ;;  %v14297_v12 = vadd.f32 %v14256_v44, %v13760_v43  ;;  %v14301_v22 = vadd.f32 %v14259_v47, %v13766_v26 }
 0x2cc   :  { %v14313_v51 = vadd.f32 %v14256_v44, %v13779_v0  ;;  %v14317_v43 = vadd.f32 %v14259_v47, %v13783_v50  ;;  %v14321_v26 = vadd.f32 %v14262_v9, %v13789_v34  ;;  %v14329_v45 = vadd.f32 %v14256_v44, %v13797_v23 }
 0x2cd   :  { %v14333_v0 = vadd.f32 %v14259_v47, %v13801_v13  ;;  %v14337_v50 = vadd.f32 %v14262_v9, %v13805_v57  ;;  %v14341_v34 = vadd.f32 %v14265_v46, %v13809_v19  ;;  %v14345_v4 = vadd.f32 %v14256_v44, %v13813_v8 }
 0x2ce   :  { %v14349_v23 = vadd.f32 %v14259_v47, %v13817_v59  ;;  %v14353_v13 = vadd.f32 %v14262_v9, %v13821_v11  ;;  %v14357_v57 = vadd.f32 %v14265_v46, %v13825_v30  ;;  %v14361_v19 = vadd.f32 %v14256_v44, %v13829_v7 }
 0x2cf   :  { %18291 = vst [vmem:[#allocation39_spill] sm:$0xff] %v14345_v4  ;;  %v14365_v8 = vadd.f32 %v14259_v47, %v13833_v61  ;;  %v14369_v59 = vadd.f32 %v14262_v9, %v13837_v29  ;;  %v14373_v11 = vadd.f32 %v14265_v46, %v13841_v39  ;;  %v14377_v30 = vadd.f32 %v14256_v44, %v13845_v41 }
 0x2d0   :  { %18292 = vst [vmem:[#allocation92_spill] sm:$0xff] %v14349_v23  ;;  %v14381_v7 = vadd.f32 %v14259_v47, %v13849_v63  ;;  %v14385_v61 = vadd.f32 %v14262_v9, %v13853_v17  ;;  %v14389_v29 = vadd.f32 %v14265_v46, %v13857_v18  ;;  %v14393_v39 = vadd.f32 %v14256_v44, %v13861_v52 }
 0x2d1   :  { %18293 = vst [vmem:[#allocation93_spill] sm:$0xff] %v14353_v13  ;;  %v14397_v41 = vadd.f32 %v14259_v47, %v13865_v14  ;;  %v14401_v63 = vadd.f32 %v14262_v9, %v13869_v60  ;;  %v14405_v17 = vadd.f32 %v14265_v46, %v13873_v31 }
 0x2d2   :  { %18294 = vst [vmem:[#allocation112_spill] sm:$0xff] %v14357_v57 }
 0x2d3   :  { %18295 = vst [vmem:[#allocation96_spill] sm:$0xff] %v14361_v19 }
 0x2d4   :  { %18296 = vst [vmem:[#allocation141_spill] sm:$0xff] %v14381_v7 }
 0x2d5   :  { %18297 = vst [vmem:[#allocation80_spill] sm:$0xff] %v14385_v61  ;;  %v18303_v61 = vld [vmem:[#allocation97_spill] sm:$0xff] }
 0x2d6   :  { %18298 = vst [vmem:[#allocation81_spill] sm:$0xff] %v14389_v29  ;;  %v14409_v18 = vadd.f32 %v14256_v44, %v18303_v61  ;;  %v18305_v29 = vld [vmem:[#allocation101_spill] sm:$0xff] }
 0x2d7   :  { %18299 = vst [vmem:[#allocation60_spill] sm:$0xff] %v14393_v39  ;;  %v14413_v52 = vadd.f32 %v14259_v47, %v18305_v29  ;;  %v18307_v39 = vld [vmem:[#allocation103_spill] sm:$0xff]  ;;  %v14433_v29 = vadd.f32 %v14262_v9, %v13901_v6 }
 0x2d8   :  { %18300 = vst [vmem:[#allocation119_spill] sm:$0xff] %v14397_v41  ;;  %v14417_v14 = vadd.f32 %v14262_v9, %v18307_v39  ;;  %v18309_v41 = vld [vmem:[#allocation104_spill] sm:$0xff]  ;;  %v14437_v39 = vadd.f32 %v14265_v46, %v13905_v15 }
 0x2d9   :  { %18301 = vst [vmem:[#allocation120_spill] sm:$0xff] %v14401_v63  ;;  %v14421_v60 = vadd.f32 %v14265_v46, %v18309_v41  ;;  %v18311_v63 = vld [vmem:[#allocation69_spill] sm:$0xff]  ;;  %v14441_v41 = vadd.f32 %v14256_v44, %v13909_v16 }
 0x2da   :  { %18302 = vst [vmem:[#allocation121_spill] sm:$0xff] %v14405_v17  ;;  %v14425_v31 = vadd.f32 %v14256_v44, %v18311_v63  ;;  %v18313_v17 = vld [vmem:[#allocation125_spill] sm:$0xff]  ;;  %v14445_v63 = vadd.f32 %v14259_v47, %v13913_v2 }
 0x2db   :  { %18304 = vst [vmem:[#allocation57_spill] sm:$0xff] %v14409_v18  ;;  %v14429_v61 = vadd.f32 %v14259_v47, %v18313_v17  ;;  %v14449_v17 = vadd.f32 %v14262_v9, %v13917_v5 }
 0x2dc   :  { %18306 = vst [vmem:[#allocation58_spill] sm:$0xff] %v14413_v52 }
 0x2dd   :  { %18308 = vst [vmem:[#allocation59_spill] sm:$0xff] %v14417_v14 }
 0x2de   :  { %18310 = vst [vmem:[#allocation66_spill] sm:$0xff] %v14421_v60  ;;  %v18469_v23 = vld [vmem:[#allocation60_spill] sm:$0xff] }
 0x2df   :  { %18312 = vst [vmem:[#allocation67_spill] sm:$0xff] %v14425_v31 }
 0x2e0   :  { %18314 = vst [vmem:[#allocation68_spill] sm:$0xff] %v14429_v61  ;;  %v18320_v61 = vld [vmem:[#allocation70_spill] sm:$0xff] }
 0x2e1   :  { %18315 = vst [vmem:[#allocation30_spill] sm:$0xff] %v14433_v29  ;;  %v14453_v6 = vadd.f32 %v14265_v46, %v18320_v61  ;;  %v18322_v29 = vld [vmem:[#allocation126_spill] sm:$0xff] }
 0x2e2   :  { %18316 = vst [vmem:[#allocation34_spill] sm:$0xff] %v14437_v39  ;;  %v14457_v15 = vadd.f32 %v14256_v44, %v18322_v29  ;;  %v18324_v39 = vld [vmem:[#allocation71_spill] sm:$0xff] }
 0x2e3   :  { %18317 = vst [vmem:[#allocation35_spill] sm:$0xff] %v14441_v41  ;;  %v14461_v16 = vadd.f32 %v14259_v47, %v18324_v39  ;;  %v18326_v41 = vld [vmem:[#allocation127_spill] sm:$0xff] }
 0x2e4   :  { %18318 = vst [vmem:[#allocation36_spill] sm:$0xff] %v14445_v63  ;;  %v14465_v2 = vadd.f32 %v14262_v9, %v18326_v41  ;;  %v18328_v63 = vld [vmem:[#allocation72_spill] sm:$0xff] }
 0x2e5   :  { %18319 = vst [vmem:[#allocation129_spill] sm:$0xff] %v14449_v17  ;;  %v14469_v5 = vadd.f32 %v14265_v46, %v18328_v63  ;;  %v18330_v17 = vld [vmem:[#allocation128_spill] sm:$0xff] }
 0x2e6   :  { %18321 = vst [vmem:[#allocation130_spill] sm:$0xff] %v14453_v6  ;;  %v14473_v61 = vadd.f32 %v14256_v44, %v18330_v17  ;;  %v18332_v6 = vld [vmem:[#allocation19_spill] sm:$0xff] }
 0x2e7   :  { %18323 = vst [vmem:[#allocation131_spill] sm:$0xff] %v14457_v15  ;;  %v14477_v29 = vadd.f32 %v14259_v47, %v18332_v6  ;;  %v18334_v15 = vld [vmem:[#allocation20_spill] sm:$0xff] }
 0x2e8   :  { %18325 = vst [vmem:[#allocation132_spill] sm:$0xff] %v14461_v16  ;;  %v14481_v39 = vadd.f32 %v14262_v9, %v18334_v15  ;;  %v18336_v16 = vld [vmem:[#allocation21_spill] sm:$0xff] }
 0x2e9   :  { %18327 = vst [vmem:[#allocation85_spill] sm:$0xff] %v14465_v2  ;;  %v14485_v41 = vadd.f32 %v14265_v46, %v18336_v16  ;;  %v18338_v2 = vld [vmem:[#allocation22_spill] sm:$0xff] }
 0x2ea   :  { %18329 = vst [vmem:[#allocation86_spill] sm:$0xff] %v14469_v5  ;;  %v14489_v63 = vadd.f32 %v14256_v44, %v18338_v2  ;;  %v18340_v5 = vld [vmem:[#allocation82_spill] sm:$0xff]  ;;  %v14509_v2 = vadd.f32 %v14259_v47, %v13977_v37  ;;  %v14529_v37 = vadd.f32 %v14262_v9, %v13997_v48  ;;  %v18476_v13 = vld [vmem:[#allocation35_spill] sm:$0xff] }
 0x2eb   :  { %18331 = vst [vmem:[#allocation138_spill] sm:$0xff] %v14473_v61  ;;  %v14493_v17 = vadd.f32 %v14259_v47, %v18340_v5  ;;  %v18342_v61 = vld [vmem:[#allocation83_spill] sm:$0xff] }
 0x2ec   :  { %18333 = vst [vmem:[#allocation133_spill] sm:$0xff] %v14477_v29  ;;  %v14497_v6 = vadd.f32 %v14262_v9, %v18342_v61  ;;  %v18344_v29 = vld [vmem:[#allocation51_spill] sm:$0xff] }
 0x2ed   :  { %18335 = vst [vmem:[#allocation45_spill] sm:$0xff] %v14481_v39  ;;  %v14501_v15 = vadd.f32 %v14265_v46, %v18344_v29  ;;  %v18346_v39 = vld [vmem:[#allocation52_spill] sm:$0xff]  ;;  %v14521_v29 = vadd.f32 %v14256_v44, %v13989_v21  ;;  %v18479_v18 = vld [vmem:[#allocation130_spill] sm:$0xff] }
 0x2ee   :  { %18337 = vst [vmem:[#allocation46_spill] sm:$0xff] %v14485_v41  ;;  %v14505_v16 = vadd.f32 %v14256_v44, %v18346_v39  ;;  %v14525_v39 = vadd.f32 %v14259_v47, %v13993_v55  ;;  %v18361_v44 = vld [vmem:[#allocation150_spill] sm:$0xff]  ;;  %v18363_v47 = vld [vmem:[#allocation109_spill] sm:$0xff]  ;;  %v18480_v52 = vld [vmem:[#allocation131_spill] sm:$0xff] }
 0x2ef   :  { %18339 = vst [vmem:[#allocation47_spill] sm:$0xff] %v14489_v63  ;;  %v18349_v63 = vld [vmem:[#allocation107_spill] sm:$0xff]  ;;  %v14545_v55 = vadd.f32 %v14274_v28, %v18361_v44  ;;  %v14549_v48 = vadd.f32 %v14277_v54, %v18363_v47  ;;  %v18481_v14 = vld [vmem:[#allocation132_spill] sm:$0xff] }
 0x2f0   :  { %18341 = vst [vmem:[#allocation148_spill] sm:$0xff] %v14493_v17  ;;  %v14513_v5 = vadd.f32 %v14262_v9, %v18349_v63  ;;  %v18351_v17 = vld [vmem:[#allocation149_spill] sm:$0xff]  ;;  %v14533_v63 = vadd.f32 %v14265_v46, %v14001_v56  ;;  %v18365_v9 = vld [vmem:[#allocation151_spill] sm:$0xff] }
 0x2f1   :  { %18343 = vst [vmem:[#allocation162_spill] sm:$0xff] %v14497_v6  ;;  %v14517_v61 = vadd.f32 %v14265_v46, %v18351_v17  ;;  %v14553_v56 = vadd.f32 %v14268_v33, %v18365_v9  ;;  %v18367_v46 = vld [vmem:[#allocation110_spill] sm:$0xff]  ;;  %v18482_v60 = vld [vmem:[#allocation85_spill] sm:$0xff] }
 0x2f2   :  { %18345 = vst [vmem:[#allocation163_spill] sm:$0xff] %v14501_v15  ;;  %v14857_v15 = vpop.f32.mrf.mxu0 }
 0x2f3   :  { %18347 = vst [vmem:[#allocation40_spill] sm:$0xff] %v14505_v16  ;;  %v18485_v4 = vld [vmem:[#allocation133_spill] sm:$0xff] }
 0x2f4   :  { %18348 = vst [vmem:[#allocation84_spill] sm:$0xff] %v14509_v2  ;;  %v18486_v7 = vld [vmem:[#allocation45_spill] sm:$0xff] }
 0x2f5   :  { %18350 = vst [vmem:[#allocation48_spill] sm:$0xff] %v14513_v5  ;;  %v18357_v5 = vld [vmem:[#allocation137_spill] sm:$0xff] }
 0x2f6   :  { %18352 = vst [vmem:[#allocation164_spill] sm:$0xff] %v14517_v61  ;;  %v14537_v17 = vadd.f32 %v14268_v33, %v18357_v5  ;;  %v18359_v61 = vld [vmem:[#allocation108_spill] sm:$0xff]  ;;  %v14557_v5 = vadd.f32 %v14271_v58, %v18367_v46  ;;  %v18487_v57 = vld [vmem:[#allocation47_spill] sm:$0xff] }
 0x2f7   :  { %18353 = vst [vmem:[#allocation140_spill] sm:$0xff] %v14521_v29  ;;  %v14541_v21 = vadd.f32 %v14271_v58, %v18359_v61  ;;  %v18488_v19 = vld [vmem:[#allocation148_spill] sm:$0xff]  ;;  %v14863_v29 = vpop.f32.mrf.mxu1 }
 0x2f8   :  { %18354 = vst [vmem:[#allocation95_spill] sm:$0xff] %v14525_v39 }
 0x2f9   :  { %18355 = vst [vmem:[#allocation157_spill] sm:$0xff] %v14529_v37 }
 0x2fa   :  { %18356 = vst [vmem:[#allocation49_spill] sm:$0xff] %v14533_v63  ;;  %v2293_v31 = vpop.f32.mrf.mxu0 }
 0x2fb   :  { %18358 = vst [vmem:[#allocation158_spill] sm:$0xff] %v14537_v17  ;;  %v18369_v17 = vld [vmem:[#allocation152_spill] sm:$0xff]  ;;  %v18551_v31 = vmax.f32 %v14305_v62, 0.0 }
 0x2fc   :  { %18360 = vst [vmem:[#allocation50_spill] sm:$0xff] %v14541_v21  ;;  %v14561_v61 = vadd.f32 %v14274_v28, %v18369_v17  ;;  %v18371_v21 = vld [vmem:[#allocation94_spill] sm:$0xff] }
 0x2fd   :  { %18362 = vst [vmem:[#allocation142_spill] sm:$0xff] %v14545_v55  ;;  %v14565_v44 = vadd.f32 %v14277_v54, %v18371_v21  ;;  %v18373_v55 = vld [vmem:[#allocation111_spill] sm:$0xff] }
 0x2fe   :  { %18364 = vst [vmem:[#allocation143_spill] sm:$0xff] %v14549_v48  ;;  %v14569_v47 = vadd.f32 %v14268_v33, %v18373_v55  ;;  %v18375_v48 = vld [vmem:[#allocation144_spill] sm:$0xff] }
 0x2ff   :  { %18366 = vst [vmem:[#allocation105_spill] sm:$0xff] %v14553_v56  ;;  %v14573_v9 = vadd.f32 %v14271_v58, %v18375_v48  ;;  %v18377_v56 = vld [vmem:[#allocation145_spill] sm:$0xff] }
 0x300   :  { %18368 = vst [vmem:[#allocation106_spill] sm:$0xff] %v14557_v5  ;;  %v14577_v46 = vadd.f32 %v14274_v28, %v18377_v56  ;;  %v18379_v5 = vld [vmem:[#allocation65_spill] sm:$0xff] }
 0x301   :  { %18370 = vst [vmem:[#allocation55_spill] sm:$0xff] %v14561_v61  ;;  %v14581_v17 = vadd.f32 %v14277_v54, %v18379_v5  ;;  %v18381_v61 = vld [vmem:[#allocation76_spill] sm:$0xff] }
 0x302   :  { %18372 = vst [vmem:[#allocation56_spill] sm:$0xff] %v14565_v44  ;;  %v14585_v21 = vadd.f32 %v14268_v33, %v18381_v61  ;;  %v18383_v44 = vld [vmem:[#allocation77_spill] sm:$0xff] }
 0x303   :  { %18374 = vst [vmem:[#allocation61_spill] sm:$0xff] %v14569_v47  ;;  %v14589_v55 = vadd.f32 %v14271_v58, %v18383_v44  ;;  %v18385_v47 = vld [vmem:[#allocation78_spill] sm:$0xff] }
 0x304   :  { %18376 = vst [vmem:[#allocation62_spill] sm:$0xff] %v14573_v9  ;;  %v14593_v48 = vadd.f32 %v14274_v28, %v18385_v47  ;;  %v18387_v9 = vld [vmem:[#allocation79_spill] sm:$0xff] }
 0x305   :  { %18378 = vst [vmem:[#allocation159_spill] sm:$0xff] %v14577_v46  ;;  %v14597_v56 = vadd.f32 %v14277_v54, %v18387_v9  ;;  %v18389_v46 = vld [vmem:[#allocation123_spill] sm:$0xff] }
 0x306   :  { %18380 = vst [vmem:[#allocation160_spill] sm:$0xff] %v14581_v17  ;;  %v14601_v5 = vadd.f32 %v14268_v33, %v18389_v46  ;;  %v18391_v17 = vld [vmem:[#allocation124_spill] sm:$0xff] }
 0x307   :  { %18382 = vst [vmem:[#allocation53_spill] sm:$0xff] %v14585_v21  ;;  %v14605_v61 = vadd.f32 %v14271_v58, %v18391_v17  ;;  %v18393_v21 = vld [vmem:[#allocation23_spill] sm:$0xff] }
 0x308   :  { %18384 = vst [vmem:[#allocation54_spill] sm:$0xff] %v14589_v55  ;;  %v14609_v44 = vadd.f32 %v14274_v28, %v18393_v21  ;;  %v18395_v55 = vld [vmem:[#allocation24_spill] sm:$0xff] }
 0x309   :  { %18386 = vst [vmem:[#allocation139_spill] sm:$0xff] %v14593_v48  ;;  %v14613_v47 = vadd.f32 %v14277_v54, %v18395_v55  ;;  %v18397_v48 = vld [vmem:[#allocation115_spill] sm:$0xff] }
 0x30a   :  { %18388 = vst [vmem:[#allocation134_spill] sm:$0xff] %v14597_v56  ;;  %v14617_v9 = vadd.f32 %v14268_v33, %v18397_v48  ;;  %v18399_v56 = vld [vmem:[#allocation116_spill] sm:$0xff] }
 0x30b   :  { %18390 = vst [vmem:[#allocation135_spill] sm:$0xff] %v14601_v5  ;;  %v14621_v46 = vadd.f32 %v14271_v58, %v18399_v56  ;;  %v18401_v5 = vld [vmem:[#allocation117_spill] sm:$0xff] }
 0x30c   :  { %18392 = vst [vmem:[#allocation136_spill] sm:$0xff] %v14605_v61  ;;  %v14625_v17 = vadd.f32 %v14274_v28, %v18401_v5  ;;  %v18403_v61 = vld [vmem:[#allocation118_spill] sm:$0xff] }
 0x30d   :  { %18394 = vst [vmem:[#allocation113_spill] sm:$0xff] %v14609_v44  ;;  %v14629_v21 = vadd.f32 %v14277_v54, %v18403_v61  ;;  %v18405_v44 = vld [vmem:[#allocation87_spill] sm:$0xff] }
 0x30e   :  { %18396 = vst [vmem:[#allocation146_spill] sm:$0xff] %v14613_v47  ;;  %v14633_v55 = vadd.f32 %v14268_v33, %v18405_v44  ;;  %v18407_v47 = vld [vmem:[#allocation88_spill] sm:$0xff] }
 0x30f   :  { %18398 = vst [vmem:[#allocation114_spill] sm:$0xff] %v14617_v9  ;;  %v14637_v48 = vadd.f32 %v14271_v58, %v18407_v47  ;;  %v18409_v9 = vld [vmem:[#allocation89_spill] sm:$0xff] }
 0x310   :  { %18400 = vst [vmem:[#allocation147_spill] sm:$0xff] %v14621_v46  ;;  %v14641_v56 = vadd.f32 %v14274_v28, %v18409_v9  ;;  %v18411_v46 = vld [vmem:[#allocation90_spill] sm:$0xff] }
 0x311   :  { %18402 = vst [vmem:[#allocation63_spill] sm:$0xff] %v14625_v17  ;;  %v14645_v5 = vadd.f32 %v14277_v54, %v18411_v46  ;;  %v18413_v17 = vld [vmem:[#allocation15_spill] sm:$0xff] }
 0x312   :  { %18404 = vst [vmem:[#allocation64_spill] sm:$0xff] %v14629_v21  ;;  %v14649_v61 = vadd.f32 %v14268_v33, %v18413_v17  ;;  %v18415_v21 = vld [vmem:[#allocation16_spill] sm:$0xff] }
 0x313   :  { %18406 = vst [vmem:[#allocation91_spill] sm:$0xff] %v14633_v55  ;;  %v14653_v44 = vadd.f32 %v14271_v58, %v18415_v21  ;;  %v18417_v55 = vld [vmem:[#allocation17_spill] sm:$0xff] }
 0x314   :  { %18408 = vst [vmem:[#allocation122_spill] sm:$0xff] %v14637_v48  ;;  %v14657_v47 = vadd.f32 %v14274_v28, %v18417_v55  ;;  %v18419_v48 = vld [vmem:[#allocation18_spill] sm:$0xff] }
 0x315   :  { %18410 = vst [vmem:[#allocation73_spill] sm:$0xff] %v14641_v56  ;;  %v14661_v9 = vadd.f32 %v14277_v54, %v18419_v48  ;;  %v18421_v56 = vld [vmem:[#allocation98_spill] sm:$0xff] }
 0x316   :  { %18412 = vst [vmem:[#allocation74_spill] sm:$0xff] %v14645_v5  ;;  %v14665_v46 = vadd.f32 %v14268_v33, %v18421_v56  ;;  %v18423_v5 = vld [vmem:[#allocation99_spill] sm:$0xff] }
 0x317   :  { %18414 = vst [vmem:[#allocation75_spill] sm:$0xff] %v14649_v61  ;;  %v14669_v17 = vadd.f32 %v14271_v58, %v18423_v5  ;;  %v18425_v61 = vld [vmem:[#allocation100_spill] sm:$0xff] }
 0x318   :  { %18416 = vst [vmem:[#allocation97_spill] sm:$0xff] %v14653_v44  ;;  %v14673_v21 = vadd.f32 %v14274_v28, %v18425_v61  ;;  %v18427_v44 = vld [vmem:[#allocation102_spill] sm:$0xff] }
 0x319   :  { %18418 = vst [vmem:[#allocation101_spill] sm:$0xff] %v14657_v47  ;;  %v14677_v55 = vadd.f32 %v14277_v54, %v18427_v44  ;;  %v18429_v47 = vld [vmem:[#allocation29_spill] sm:$0xff] }
 0x31a   :  { %18420 = vst [vmem:[#allocation103_spill] sm:$0xff] %v14661_v9  ;;  %v14681_v48 = vadd.f32 %v14268_v33, %v18429_v47  ;;  %v18431_v9 = vld [vmem:[#allocation31_spill] sm:$0xff] }
 0x31b   :  { %18422 = vst [vmem:[#allocation104_spill] sm:$0xff] %v14665_v46  ;;  %v14685_v56 = vadd.f32 %v14271_v58, %v18431_v9  ;;  %v18433_v46 = vld [vmem:[#allocation32_spill] sm:$0xff] }
 0x31c   :  { %18424 = vst [vmem:[#allocation69_spill] sm:$0xff] %v14669_v17  ;;  %v14689_v5 = vadd.f32 %v14274_v28, %v18433_v46  ;;  %v18435_v17 = vld [vmem:[#allocation33_spill] sm:$0xff] }
 0x31d   :  { %18426 = vst [vmem:[#allocation125_spill] sm:$0xff] %v14673_v21  ;;  %v14693_v61 = vadd.f32 %v14277_v54, %v18435_v17  ;;  %v18437_v21 = vld [vmem:[#allocation25_spill] sm:$0xff] }
 0x31e   :  { %18428 = vst [vmem:[#allocation70_spill] sm:$0xff] %v14677_v55  ;;  %v14697_v44 = vadd.f32 %v14268_v33, %v18437_v21  ;;  %v18439_v55 = vld [vmem:[#allocation26_spill] sm:$0xff] }
 0x31f   :  { %18430 = vst [vmem:[#allocation126_spill] sm:$0xff] %v14681_v48  ;;  %v14701_v47 = vadd.f32 %v14271_v58, %v18439_v55  ;;  %v18441_v48 = vld [vmem:[#allocation27_spill] sm:$0xff]  ;;  %v14721_v55 = vadd.f32 %v14274_v28, %v14185_v35 }
 0x320   :  { %18432 = vst [vmem:[#allocation71_spill] sm:$0xff] %v14685_v56  ;;  %v14705_v9 = vadd.f32 %v14274_v28, %v18441_v48  ;;  %v18442_v56 = vld [vmem:[#allocation28_spill] sm:$0xff]  ;;  %v14725_v48 = vadd.f32 %v14277_v54, %v14189_v25  ;;  %v18525_v6 = vld [vmem:[#allocation101_spill] sm:$0xff] }
 0x321   :  { %18434 = vst [vmem:[#allocation127_spill] sm:$0xff] %v14689_v5  ;;  %v14709_v46 = vadd.f32 %v14277_v54, %v18442_v56  ;;  %v18444_v5 = vld [vmem:[#allocation153_spill] sm:$0xff]  ;;  %v14729_v56 = vadd.f32 %v14268_v33, %v14193_v32  ;;  %v18526_v39 = vld [vmem:[#allocation103_spill] sm:$0xff] }
 0x322   :  { %18436 = vst [vmem:[#allocation72_spill] sm:$0xff] %v14693_v61  ;;  %v14713_v17 = vadd.f32 %v14268_v33, %v18444_v5  ;;  %v18445_v61 = vld [vmem:[#allocation154_spill] sm:$0xff]  ;;  %v14733_v5 = vadd.f32 %v14271_v58, %v14197_v24 }
 0x323   :  { %18438 = vst [vmem:[#allocation128_spill] sm:$0xff] %v14697_v44  ;;  %v14717_v21 = vadd.f32 %v14271_v58, %v18445_v61  ;;  %v14737_v61 = vadd.f32 %v14274_v28, %v14201_v27  ;;  %v18528_v2 = vld [vmem:[#allocation69_spill] sm:$0xff] }
 0x324   :  { %18440 = vst [vmem:[#allocation19_spill] sm:$0xff] %v14701_v47 }
 0x325   :  { %18443 = vst [vmem:[#allocation20_spill] sm:$0xff] %v14709_v46 }
 0x326   :  { %18446 = vst [vmem:[#allocation21_spill] sm:$0xff] %v14717_v21  ;;  %v18452_v21 = vld [vmem:[#allocation155_spill] sm:$0xff] }
 0x327   :  { %18447 = vst [vmem:[#allocation22_spill] sm:$0xff] %v14721_v55  ;;  %v14741_v35 = vadd.f32 %v14277_v54, %v18452_v21  ;;  %v18454_v55 = vld [vmem:[#allocation156_spill] sm:$0xff] }
 0x328   :  { %18448 = vst [vmem:[#allocation82_spill] sm:$0xff] %v14725_v48  ;;  %v14745_v25 = vadd.f32 %v14268_v33, %v18454_v55  ;;  %v18456_v48 = vld [vmem:[#allocation41_spill] sm:$0xff] }
 0x329   :  { %18449 = vst [vmem:[#allocation83_spill] sm:$0xff] %v14729_v56  ;;  %v14749_v32 = vadd.f32 %v14271_v58, %v18456_v48  ;;  %v18457_v56 = vld [vmem:[#allocation42_spill] sm:$0xff] }
 0x32a   :  { %18450 = vst [vmem:[#allocation51_spill] sm:$0xff] %v14733_v5  ;;  %v14753_v24 = vadd.f32 %v14274_v28, %v18457_v56  ;;  %v18458_v5 = vld [vmem:[#allocation43_spill] sm:$0xff]  ;;  %v14773_v56 = vadd.f32 %v14277_v54, %v14237_v38 }
 0x32b   :  { %18451 = vst [vmem:[#allocation52_spill] sm:$0xff] %v14737_v61  ;;  %v14757_v27 = vadd.f32 %v14277_v54, %v18458_v5  ;;  %v18459_v61 = vld [vmem:[#allocation44_spill] sm:$0xff]  ;;  %v14777_v5 = vadd.f32 %v14268_v33, %v14241_v1 }
 0x32c   :  { %18453 = vst [vmem:[#allocation107_spill] sm:$0xff] %v14741_v35  ;;  %v14761_v21 = vadd.f32 %v14268_v33, %v18459_v61  ;;  %v18461_v35 = vld [vmem:[#allocation37_spill] sm:$0xff]  ;;  %v14781_v61 = vadd.f32 %v14271_v58, %v14245_v40  ;;  %v18531_v33 = vld [vmem:[#allocation126_spill] sm:$0xff] }
 0x32d   :  { %18455 = vst [vmem:[#allocation149_spill] sm:$0xff] %v14745_v25  ;;  %v14765_v55 = vadd.f32 %v14271_v58, %v18461_v35  ;;  %v18463_v25 = vld [vmem:[#allocation161_spill] sm:$0xff]  ;;  %v14785_v35 = vadd.f32 %v14274_v28, %v14249_v42  ;;  %v18527_v58 = vld [vmem:[#allocation104_spill] sm:$0xff] }
 0x32e   :  { %18460 = vst [vmem:[#allocation137_spill] sm:$0xff] %v14761_v21  ;;  %v14769_v48 = vadd.f32 %v14274_v28, %v18463_v25  ;;  %v18535_v16 = vld [vmem:[#allocation21_spill] sm:$0xff]  ;;  %v18536_v1 = vld [vmem:[#allocation22_spill] sm:$0xff] }
 0x32f   :  { %18462 = vst [vmem:[#allocation108_spill] sm:$0xff] %v14765_v55  ;;  %v18466_v55 = vld [vmem:[#allocation38_spill] sm:$0xff] }
 0x330   :  { %18464 = vst [vmem:[#allocation150_spill] sm:$0xff] %v14769_v48  ;;  %v14789_v25 = vadd.f32 %v14277_v54, %v18466_v55  ;;  %v14885_v48 = vpop.f32.mrf.mxu2  ;;  %v14939_v54 = vpop.f32.mrf.mxu0 }
 0x331   :  { %18465 = vst [vmem:[#allocation109_spill] sm:$0xff] %v14773_v56  ;;  %v14887_v56 = vpop.f32.mrf.mxu3 }
 0x332   :  { %18493 = vst [vmem:[#allocation151_spill] sm:$0xff] %v14857_v15  ;;  %v2306_v15 = vpop.f32.mrf.mxu1  ;;  %v18540_v38 = vld [vmem:[#allocation52_spill] sm:$0xff] }
 0x333   :  { %18498 = vst [vmem:[#allocation110_spill] sm:$0xff] %v14863_v29  ;;  %v18541_v44 = vld [vmem:[#allocation107_spill] sm:$0xff]  ;;  %v18550_v29 = vmax.f32 %v14289_v53, 0.0  ;;  %v18557_v53 = vmax.f32 %v14333_v0, 0.0 }
 0x334   :  { %18519 = vst [vmem:[#allocation152_spill] sm:$0xff] %v14885_v48  ;;  %v18542_v47 = vld [vmem:[#allocation149_spill] sm:$0xff]  ;;  %v18547_v48 = vmax.f32 %v14297_v12, 0.0  ;;  %v18553_v12 = vmax.f32 %v14309_v36, 0.0  ;;  %v18559_v36 = vmax.f32 %v14337_v50, 0.0 }
 0x335   :  { %18520 = vst [vmem:[#allocation94_spill] sm:$0xff] %v14887_v56  ;;  %v18546_v56 = vmax.f32 %v14281_v20, 0.0  ;;  %v14945_v15 = vpack.c.bf16 %v18551_v31, %v18550_v29  ;;  %v18552_v20 = vmax.f32 %v14293_v3, 0.0  ;;  %v18558_v3 = vmax.f32 %v14321_v26, 0.0  ;;  %v18569_v50 = vld [vmem:[#allocation93_spill] sm:$0xff] }
 0x336   :  { %v18543_v46 = vld [vmem:[#allocation108_spill] sm:$0xff]  ;;  %v18568_v26 = vmax.f32 %v14365_v8, 0.0  ;;  %v18578_v8 = vld [vmem:[#allocation141_spill] sm:$0xff] }
 0x337   :  { %v18544_v40 = vld [vmem:[#allocation150_spill] sm:$0xff]  ;;  %v14931_v21 = vpack.c.bf16 %v18547_v48, %v18546_v56  ;;  %v14951_v48 = vpack.c.bf16 %v18553_v12, %v18552_v20  ;;  %v14971_v29 = vpack.c.bf16 %v18559_v36, %v18558_v3  ;;  %v18562_v20 = vld [vmem:[#allocation39_spill] sm:$0xff]  ;;  %v18564_v12 = vld [vmem:[#allocation96_spill] sm:$0xff]  ;;  %v18570_v3 = vmax.f32 %v18569_v50, 0.0 }
 0x338   :  { %v2319_v37 = vpop.f32.mrf.mxu2  ;;  %v18545_v63 = vld [vmem:[#allocation109_spill] sm:$0xff]  ;;  %v18565_v0 = vmax.f32 %v18564_v12, 0.0  ;;  %v18576_v12 = vmax.f32 %v18469_v23, 0.0 }
 0x339   :  { %v2332_v42 = vpop.f32.mrf.mxu3  ;;  %v18548_v37 = vmax.f32 %v14285_v49, 0.0  ;;  %v18554_v49 = vmax.f32 %v14313_v51, 0.0  ;;  %v18560_v51 = vmax.f32 %v14325_v10, 0.0  ;;  %v18571_v10 = vmax.f32 %v14369_v59, 0.0  ;;  %v18583_v59 = vld [vmem:[#allocation80_spill] sm:$0xff]  ;;  %v18593_v23 = vld [vmem:[#allocation57_spill] sm:$0xff] }
 0x33a   :  { %v18549_v42 = vmax.f32 %v14301_v22, 0.0  ;;  %v18555_v22 = vmax.f32 %v14329_v45, 0.0  ;;  %v14965_v62 = vpop.f32.mrf.mxu1  ;;  %v18561_v45 = vmax.f32 %v14341_v34, 0.0  ;;  %v18572_v34 = vld [vmem:[#allocation112_spill] sm:$0xff] }
 0x33b   :  { %v14995_v36 = vpack.c.bf16 %v18571_v10, %v18570_v3  ;;  %v18584_v3 = vmax.f32 %v18583_v59, 0.0  ;;  %v18585_v10 = vld [vmem:[#allocation120_spill] sm:$0xff] }
 0x33c   :  { %v14937_v28 = vpack.c.bf16 %v18549_v42, %v18548_v37  ;;  %v14957_v56 = vpack.c.bf16 %v18555_v22, %v18554_v49  ;;  %v18556_v37 = vmax.f32 %v14317_v43, 0.0  ;;  %v14977_v31 = vpack.c.bf16 %v18561_v45, %v18560_v51  ;;  %v18566_v22 = vld [vmem:[#allocation92_spill] sm:$0xff] }
 0x33d   :  { %v18563_v43 = vmax.f32 %v18562_v20, 0.0  ;;  %v18573_v51 = vmax.f32 %v18572_v34, 0.0  ;;  %v18574_v45 = vmax.f32 %v14373_v11, 0.0  ;;  %v18586_v34 = vmax.f32 %v18585_v10, 0.0  ;;  %v18588_v11 = vld [vmem:[#allocation81_spill] sm:$0xff] }
 0x33e   :  { %v14963_v42 = vpack.c.bf16 %v18557_v53, %v18556_v37  ;;  %v18567_v37 = vmax.f32 %v18566_v22, 0.0  ;;  %v18579_v22 = vmax.f32 %v18578_v8, 0.0 }
 0x33f   :  { %v14983_v49 = vpack.c.bf16 %v18565_v0, %v18563_v43  ;;  %v15001_v20 = vpack.c.bf16 %v18574_v45, %v18573_v51  ;;  %v18575_v43 = vmax.f32 %v14377_v30, 0.0  ;;  %v15019_v41 = vpack.c.bf16 %v18586_v34, %v18584_v3  ;;  %v18590_v45 = vld [vmem:[#allocation121_spill] sm:$0xff]  ;;  %v18601_v3 = vld [vmem:[#allocation59_spill] sm:$0xff]  ;;  %v18603_v34 = vld [vmem:[#allocation30_spill] sm:$0xff] }
 0x340   :  { %v14989_v53 = vpack.c.bf16 %v18568_v26, %v18567_v37  ;;  %v18580_v37 = vld [vmem:[#allocation119_spill] sm:$0xff]  ;;  %v18589_v51 = vmax.f32 %v18588_v11, 0.0  ;;  %v18591_v30 = vmax.f32 %v18590_v45, 0.0  ;;  %v18602_v10 = vmax.f32 %v18601_v3, 0.0  ;;  %v18616_v3 = vld [vmem:[#allocation129_spill] sm:$0xff] }
 0x341   :  { %v15007_v0 = vpack.c.bf16 %v18576_v12, %v18575_v43  ;;  %v18581_v26 = vmax.f32 %v18580_v37, 0.0  ;;  %18587 = vst [vmem:[#allocation145_spill] sm:$0xff] %v15019_v41  ;;  %v18594_v43 = vmax.f32 %v18593_v23, 0.0  ;;  %v18595_v12 = vld [vmem:[#allocation67_spill] sm:$0xff]  ;;  %v18604_v11 = vmax.f32 %v18603_v34, 0.0 }
 0x342   :  { %v15025_v55 = vpack.c.bf16 %v18591_v30, %v18589_v51  ;;  %v18596_v8 = vmax.f32 %v18595_v12, 0.0  ;;  %v18605_v51 = vld [vmem:[#allocation66_spill] sm:$0xff]  ;;  %v18610_v12 = vmax.f32 %v18480_v52, 0.0  ;;  %v18618_v34 = vmax.f32 %v18482_v60, 0.0  ;;  %v2369_v60 = vpop.f32.mrf.mxu2 }
 0x343   :  { %18577 = vst [vmem:[#allocation111_spill] sm:$0xff] %v15007_v0  ;;  %v15013_v50 = vpack.c.bf16 %v18581_v26, %v18579_v22  ;;  %v18597_v22 = vld [vmem:[#allocation58_spill] sm:$0xff]  ;;  %v18599_v26 = vld [vmem:[#allocation68_spill] sm:$0xff]  ;;  %v15043_v41 = vpack.c.bf16 %v18604_v11, %v18602_v10  ;;  %v18606_v45 = vmax.f32 %v18605_v51, 0.0  ;;  %v18617_v10 = vmax.f32 %v18616_v3, 0.0 }
 0x344   :  { %18592 = vst [vmem:[#allocation65_spill] sm:$0xff] %v15025_v55  ;;  %v15031_v0 = vpack.c.bf16 %v18596_v8, %v18594_v43  ;;  %v18598_v37 = vmax.f32 %v18597_v22, 0.0  ;;  %v18600_v59 = vmax.f32 %v18599_v26, 0.0  ;;  %v18607_v30 = vld [vmem:[#allocation34_spill] sm:$0xff]  ;;  %v18609_v43 = vmax.f32 %v18476_v13, 0.0  ;;  %v18612_v22 = vld [vmem:[#allocation36_spill] sm:$0xff] }
 0x345   :  { %18582 = vst [vmem:[#allocation144_spill] sm:$0xff] %v15013_v50  ;;  %v18608_v23 = vmax.f32 %v18607_v30, 0.0  ;;  %v18614_v26 = vmax.f32 %v18481_v14, 0.0  ;;  %v15067_v11 = vpack.c.bf16 %v18618_v34, %v18617_v10  ;;  %v18620_v51 = vmax.f32 %v18479_v18, 0.0  ;;  %v18624_v52 = vld [vmem:[#allocation138_spill] sm:$0xff] }
 0x346   :  { %v15037_v50 = vpack.c.bf16 %v18600_v59, %v18598_v37  ;;  %v15055_v8 = vpack.c.bf16 %v18610_v12, %v18609_v43  ;;  %v18613_v37 = vmax.f32 %v18612_v22, 0.0  ;;  %v18626_v43 = vmax.f32 %v18487_v57, 0.0  ;;  %v18632_v3 = vld [vmem:[#allocation162_spill] sm:$0xff] }
 0x347   :  { %v15049_v55 = vpack.c.bf16 %v18608_v23, %v18606_v45  ;;  %18619 = vst [vmem:[#allocation78_spill] sm:$0xff] %v15067_v11  ;;  %v18621_v45 = vld [vmem:[#allocation86_spill] sm:$0xff]  ;;  %v18625_v23 = vmax.f32 %v18624_v52, 0.0  ;;  %v18628_v14 = vmax.f32 %v18485_v4, 0.0  ;;  %v18629_v22 = vmax.f32 %v18488_v19, 0.0 }
 0x348   :  { %18611 = vst [vmem:[#allocation76_spill] sm:$0xff] %v15055_v8  ;;  %v15061_v59 = vpack.c.bf16 %v18614_v26, %v18613_v37  ;;  %v18622_v13 = vmax.f32 %v18621_v45, 0.0  ;;  %v2382_v26 = vpop.f32.mrf.mxu3  ;;  %v18631_v18 = vmax.f32 %v18486_v7, 0.0  ;;  %v18633_v10 = vmax.f32 %v18632_v3, 0.0 }
 0x349   :  { %v15079_v12 = vpack.c.bf16 %v18626_v43, %v18625_v23  ;;  %v15085_v37 = vpack.c.bf16 %v18629_v22, %v18628_v14  ;;  %v18640_v23 = vld [vmem:[#allocation40_spill] sm:$0xff] }
 0x34a   :  { %18615 = vst [vmem:[#allocation77_spill] sm:$0xff] %v15061_v59  ;;  %v15073_v30 = vpack.c.bf16 %v18622_v13, %v18620_v51  ;;  %v15091_v34 = vpack.c.bf16 %v18633_v10, %v18631_v18  ;;  %v18635_v51 = vld [vmem:[#allocation46_spill] sm:$0xff]  ;;  %v18637_v13 = vld [vmem:[#allocation163_spill] sm:$0xff]  ;;  %v18641_v4 = vmax.f32 %v18640_v23, 0.0  ;;  %v18642_v43 = vld [vmem:[#allocation140_spill] sm:$0xff] }
 0x34b   :  { %18627 = vst [vmem:[#allocation123_spill] sm:$0xff] %v15079_v12  ;;  %v18636_v45 = vmax.f32 %v18635_v51, 0.0  ;;  %v18638_v57 = vmax.f32 %v18637_v13, 0.0  ;;  %v18643_v19 = vmax.f32 %v18642_v43, 0.0  ;;  %v18645_v22 = vld [vmem:[#allocation84_spill] sm:$0xff]  ;;  %v18647_v12 = vld [vmem:[#allocation95_spill] sm:$0xff] }
 0x34c   :  { %18623 = vst [vmem:[#allocation79_spill] sm:$0xff] %v15073_v30  ;;  %v18648_v7 = vmax.f32 %v18647_v12, 0.0  ;;  %v18650_v18 = vld [vmem:[#allocation48_spill] sm:$0xff]  ;;  %v18652_v10 = vld [vmem:[#allocation157_spill] sm:$0xff]  ;;  %v18665_v12 = vld [vmem:[#allocation50_spill] sm:$0xff] }
 0x34d   :  { %18630 = vst [vmem:[#allocation124_spill] sm:$0xff] %v15085_v37  ;;  %v15097_v52 = vpack.c.bf16 %v18638_v57, %v18636_v45  ;;  %v15103_v14 = vpack.c.bf16 %v18643_v19, %v18641_v4  ;;  %v18646_v37 = vmax.f32 %v18645_v22, 0.0  ;;  %v18651_v3 = vmax.f32 %v18650_v18, 0.0  ;;  %v18655_v45 = vld [vmem:[#allocation164_spill] sm:$0xff]  ;;  %v18657_v57 = vld [vmem:[#allocation49_spill] sm:$0xff]  ;;  %v18660_v4 = vld [vmem:[#allocation158_spill] sm:$0xff] }
 0x34e   :  { %18634 = vst [vmem:[#allocation23_spill] sm:$0xff] %v15091_v34  ;;  %v18653_v51 = vmax.f32 %v18652_v10, 0.0  ;;  %v18656_v13 = vmax.f32 %v18655_v45, 0.0  ;;  %v18658_v23 = vmax.f32 %v18657_v57, 0.0  ;;  %v18661_v43 = vmax.f32 %v18660_v4, 0.0  ;;  %v18662_v19 = vld [vmem:[#allocation105_spill] sm:$0xff] }
 0x34f   :  { %18639 = vst [vmem:[#allocation24_spill] sm:$0xff] %v15097_v52  ;;  %v15109_v30 = vpack.c.bf16 %v18648_v7, %v18646_v37  ;;  %v18663_v22 = vmax.f32 %v18662_v19, 0.0  ;;  %v18666_v37 = vmax.f32 %v18665_v12, 0.0  ;;  %v18667_v7 = vld [vmem:[#allocation106_spill] sm:$0xff]  ;;  %v18672_v45 = vld [vmem:[#allocation55_spill] sm:$0xff]  ;;  %v18677_v4 = vld [vmem:[#allocation56_spill] sm:$0xff] }
 0x350   :  { %18644 = vst [vmem:[#allocation115_spill] sm:$0xff] %v15103_v14  ;;  %v15115_v34 = vpack.c.bf16 %v18653_v51, %v18651_v3  ;;  %v15121_v52 = vpack.c.bf16 %v18658_v23, %v18656_v13  ;;  %v18668_v18 = vmax.f32 %v18667_v7, 0.0  ;;  %v2345_v3 = vpop.f32.mrf.mxu0  ;;  %v18670_v10 = vld [vmem:[#allocation142_spill] sm:$0xff]  ;;  %v18675_v13 = vld [vmem:[#allocation143_spill] sm:$0xff]  ;;  %v18682_v12 = vld [vmem:[#allocation53_spill] sm:$0xff] }
 0x351   :  { %18649 = vst [vmem:[#allocation116_spill] sm:$0xff] %v15109_v30  ;;  %v15127_v14 = vpack.c.bf16 %v18663_v22, %v18661_v43  ;;  %v18671_v51 = vmax.f32 %v18670_v10, 0.0  ;;  %v18676_v23 = vmax.f32 %v18675_v13, 0.0  ;;  %v18680_v43 = vld [vmem:[#allocation61_spill] sm:$0xff]  ;;  %v18687_v3 = vld [vmem:[#allocation54_spill] sm:$0xff]  ;;  %v18692_v13 = vld [vmem:[#allocation139_spill] sm:$0xff] }
 0x352   :  { %18654 = vst [vmem:[#allocation117_spill] sm:$0xff] %v15115_v34  ;;  %v15133_v30 = vpack.c.bf16 %v18668_v18, %v18666_v37  ;;  %v18673_v34 = vmax.f32 %v18672_v45, 0.0  ;;  %v18681_v22 = vmax.f32 %v18680_v43, 0.0  ;;  %v18685_v37 = vld [vmem:[#allocation62_spill] sm:$0xff]  ;;  %v18688_v10 = vmax.f32 %v18687_v3, 0.0 }
 0x353   :  { %18659 = vst [vmem:[#allocation118_spill] sm:$0xff] %v15121_v52  ;;  %v18678_v52 = vmax.f32 %v18677_v4, 0.0  ;;  %v18686_v18 = vmax.f32 %v18685_v37, 0.0  ;;  %v18697_v43 = vld [vmem:[#allocation134_spill] sm:$0xff] }
 0x354   :  { %18664 = vst [vmem:[#allocation87_spill] sm:$0xff] %v15127_v14  ;;  %v15139_v57 = vpack.c.bf16 %v18673_v34, %v18671_v51  ;;  %v18683_v14 = vmax.f32 %v18682_v12, 0.0  ;;  %v2358_v34 = vpop.f32.mrf.mxu1  ;;  %v18690_v51 = vld [vmem:[#allocation159_spill] sm:$0xff]  ;;  %v18702_v37 = vld [vmem:[#allocation114_spill] sm:$0xff] }
 0x355   :  { %18669 = vst [vmem:[#allocation88_spill] sm:$0xff] %v15133_v30  ;;  %v15145_v19 = vpack.c.bf16 %v18678_v52, %v18676_v23  ;;  %v15157_v30 = vpack.c.bf16 %v18688_v10, %v18686_v18  ;;  %v18691_v45 = vmax.f32 %v18690_v51, 0.0  ;;  %v18695_v52 = vld [vmem:[#allocation160_spill] sm:$0xff]  ;;  %v18707_v34 = vld [vmem:[#allocation147_spill] sm:$0xff] }
 0x356   :  { %18674 = vst [vmem:[#allocation89_spill] sm:$0xff] %v15139_v57  ;;  %v15151_v7 = vpack.c.bf16 %v18683_v14, %v18681_v22  ;;  %v18693_v57 = vmax.f32 %v18692_v13, 0.0  ;;  %v18696_v23 = vmax.f32 %v18695_v52, 0.0  ;;  %v18700_v14 = vld [vmem:[#allocation135_spill] sm:$0xff]  ;;  %v18705_v18 = vld [vmem:[#allocation136_spill] sm:$0xff]  ;;  %v18708_v51 = vmax.f32 %v18707_v34, 0.0 }
 0x357   :  { %18679 = vst [vmem:[#allocation90_spill] sm:$0xff] %v15145_v19  ;;  %v18698_v19 = vmax.f32 %v18697_v43, 0.0  ;;  %v18701_v22 = vmax.f32 %v18700_v14, 0.0  ;;  %v18706_v10 = vmax.f32 %v18705_v18, 0.0  ;;  %v18712_v13 = vld [vmem:[#allocation63_spill] sm:$0xff]  ;;  %v18717_v43 = vld [vmem:[#allocation64_spill] sm:$0xff] }
 0x358   :  { %18684 = vst [vmem:[#allocation15_spill] sm:$0xff] %v15151_v7  ;;  %v15163_v4 = vpack.c.bf16 %v18693_v57, %v18691_v45  ;;  %v18703_v7 = vmax.f32 %v18702_v37, 0.0  ;;  %v18710_v57 = vld [vmem:[#allocation113_spill] sm:$0xff]  ;;  %v18713_v52 = vmax.f32 %v18712_v13, 0.0  ;;  %v18718_v14 = vmax.f32 %v18717_v43, 0.0  ;;  %v18722_v37 = vld [vmem:[#allocation75_spill] sm:$0xff] }
 0x359   :  { %18689 = vst [vmem:[#allocation16_spill] sm:$0xff] %v15157_v30  ;;  %v15169_v12 = vpack.c.bf16 %v18698_v19, %v18696_v23  ;;  %v15181_v30 = vpack.c.bf16 %v18708_v51, %v18706_v10  ;;  %v18711_v45 = vmax.f32 %v18710_v57, 0.0  ;;  %v18715_v19 = vld [vmem:[#allocation146_spill] sm:$0xff]  ;;  %v18723_v18 = vmax.f32 %v18722_v37, 0.0  ;;  %v18727_v51 = vld [vmem:[#allocation97_spill] sm:$0xff] }
 0x35a   :  { %18694 = vst [vmem:[#allocation17_spill] sm:$0xff] %v15163_v4  ;;  %v15175_v3 = vpack.c.bf16 %v18703_v7, %v18701_v22  ;;  %v18716_v23 = vmax.f32 %v18715_v19, 0.0  ;;  %v18720_v7 = vld [vmem:[#allocation91_spill] sm:$0xff]  ;;  %v18725_v10 = vld [vmem:[#allocation122_spill] sm:$0xff]  ;;  %v18728_v57 = vmax.f32 %v18727_v51, 0.0  ;;  %v18739_v37 = vmax.f32 %v18531_v33, 0.0 }
 0x35b   :  { %18699 = vst [vmem:[#allocation18_spill] sm:$0xff] %v15169_v12  ;;  %v15187_v4 = vpack.c.bf16 %v18713_v52, %v18711_v45  ;;  %v18721_v22 = vmax.f32 %v18720_v7, 0.0  ;;  %v18726_v34 = vmax.f32 %v18725_v10, 0.0  ;;  %v18730_v45 = vld [vmem:[#allocation73_spill] sm:$0xff]  ;;  %v18732_v52 = vmax.f32 %v18525_v6, 0.0  ;;  %v18755_v33 = vld [vmem:[#allocation128_spill] sm:$0xff] }
 0x35c   :  { %18704 = vst [vmem:[#allocation98_spill] sm:$0xff] %v15175_v3  ;;  %v15193_v12 = vpack.c.bf16 %v18718_v14, %v18716_v23  ;;  %v18731_v13 = vmax.f32 %v18730_v45, 0.0  ;;  %v18734_v23 = vld [vmem:[#allocation74_spill] sm:$0xff]  ;;  %v18736_v14 = vmax.f32 %v18526_v39, 0.0  ;;  %v18741_v10 = vmax.f32 %v18528_v2, 0.0  ;;  %v18745_v6 = vld [vmem:[#allocation125_spill] sm:$0xff] }
 0x35d   :  { %18709 = vst [vmem:[#allocation99_spill] sm:$0xff] %v15181_v30  ;;  %v15199_v3 = vpack.c.bf16 %v18723_v18, %v18721_v22  ;;  %v15205_v30 = vpack.c.bf16 %v18728_v57, %v18726_v34  ;;  %v18735_v43 = vmax.f32 %v18734_v23, 0.0  ;;  %v18738_v22 = vmax.f32 %v18527_v58, 0.0  ;;  %v18742_v34 = vld [vmem:[#allocation71_spill] sm:$0xff]  ;;  %v18750_v39 = vld [vmem:[#allocation70_spill] sm:$0xff] }
 0x35e   :  { %18714 = vst [vmem:[#allocation100_spill] sm:$0xff] %v15187_v4  ;;  %v15211_v19 = vpack.c.bf16 %v18732_v52, %v18731_v13  ;;  %v18743_v51 = vmax.f32 %v18742_v34, 0.0  ;;  %v18746_v45 = vmax.f32 %v18745_v6, 0.0  ;;  %v18747_v13 = vld [vmem:[#allocation127_spill] sm:$0xff]  ;;  %v18757_v2 = vmax.f32 %v14713_v17, 0.0 }
 0x35f   :  { %18719 = vst [vmem:[#allocation102_spill] sm:$0xff] %v15193_v12  ;;  %v15217_v7 = vpack.c.bf16 %v18736_v14, %v18735_v43  ;;  %v15223_v18 = vpack.c.bf16 %v18739_v37, %v18738_v22  ;;  %v18748_v52 = vmax.f32 %v18747_v13, 0.0  ;;  %v18751_v43 = vmax.f32 %v18750_v39, 0.0  ;;  %v18752_v14 = vld [vmem:[#allocation72_spill] sm:$0xff] }
 0x360   :  { %18724 = vst [vmem:[#allocation29_spill] sm:$0xff] %v15199_v3  ;;  %v15229_v57 = vpack.c.bf16 %v18743_v51, %v18741_v10  ;;  %v18753_v58 = vmax.f32 %v18752_v14, 0.0  ;;  %v18756_v22 = vmax.f32 %v18755_v33, 0.0  ;;  %v18759_v10 = vld [vmem:[#allocation19_spill] sm:$0xff]  ;;  %v18761_v51 = vmax.f32 %v18535_v16, 0.0  ;;  %v18768_v14 = vld [vmem:[#allocation82_spill] sm:$0xff] }
 0x361   :  { %18729 = vst [vmem:[#allocation31_spill] sm:$0xff] %v15205_v30  ;;  %v15235_v23 = vpack.c.bf16 %v18748_v52, %v18746_v45  ;;  %v18760_v34 = vmax.f32 %v18759_v10, 0.0  ;;  %v77_v45 = vld [vmem:[%s17035_s3 + $0x9] sm:$0xff]  ;;  %v18763_v13 = vmax.f32 %v14705_v9, 0.0  ;;  %v18764_v52 = vmax.f32 %v18536_v1, 0.0  ;;  %v2371_v1 = vpop.f32.mrf.mxu2 }
 0x362   :  { %18733 = vst [vmem:[#allocation32_spill] sm:$0xff] %v15211_v19  ;;  %v15247_v37 = vpack.c.bf16 %v18757_v2, %v18756_v22  ;;  %v18771_v22 = vld [vmem:[#allocation83_spill] sm:$0xff]  ;;  %v18773_v2 = vmax.f32 %v18542_v47, 0.0  ;;  %v18776_v9 = vmax.f32 %v14749_v32, 0.0  ;;  %v18780_v47 = vmax.f32 %v14757_v27, 0.0 }
 0x363   :  { %18737 = vst [vmem:[#allocation33_spill] sm:$0xff] %v15217_v7  ;;  %v15241_v7 = vpack.c.bf16 %v18753_v58, %v18751_v43  ;;  %v15253_v6 = vpack.c.bf16 %v18761_v51, %v18760_v34  ;;  %v15262_v39 = vpack.c.bf16 %v18764_v52, %v18763_v13  ;;  %v18766_v43 = vld [vmem:[#allocation20_spill] sm:$0xff]  ;;  %v18769_v58 = vmax.f32 %v18768_v14, 0.0  ;;  %v18774_v34 = vld [vmem:[#allocation51_spill] sm:$0xff]  ;;  %v2384_v13 = vpop.f32.mrf.mxu3 }
 0x364   :  { %18740 = vst [vmem:[#allocation25_spill] sm:$0xff] %v15223_v18  ;;  %v18767_v17 = vmax.f32 %v18766_v43, 0.0  ;;  %v18772_v16 = vmax.f32 %v18771_v22, 0.0  ;;  %v18775_v51 = vmax.f32 %v18774_v34, 0.0  ;;  %v18777_v52 = vmax.f32 %v18540_v38, 0.0  ;;  %v18781_v22 = vld [vmem:[#allocation137_spill] sm:$0xff] }
 0x365   :  { %18744 = vst [vmem:[#allocation26_spill] sm:$0xff] %v15229_v57  ;;  %v18778_v43 = vmax.f32 %v14753_v24, 0.0  ;;  %v18779_v14 = vmax.f32 %v18541_v44, 0.0  ;;  %v18783_v32 = vmax.f32 %v14777_v5, 0.0  ;;  %v18785_v34 = vmax.f32 %v18543_v46, 0.0 }
 0x366   :  { %18749 = vst [vmem:[#allocation27_spill] sm:$0xff] %v15235_v23  ;;  %v15268_v33 = vpack.c.bf16 %v18769_v58, %v18767_v17  ;;  %v15274_v10 = vpack.c.bf16 %v18773_v2, %v18772_v16  ;;  %v18782_v16 = vmax.f32 %v18781_v22, 0.0  ;;  %v18786_v38 = vmax.f32 %v14781_v61, 0.0 }
 0x367   :  { %18754 = vst [vmem:[#allocation28_spill] sm:$0xff] %v15241_v7  ;;  %v15286_v17 = vpack.c.bf16 %v18778_v43, %v18777_v52  ;;  %v15292_v58 = vpack.c.bf16 %v18780_v47, %v18779_v14  ;;  %v18788_v24 = vmax.f32 %v18544_v40, 0.0  ;;  %v18789_v44 = vmax.f32 %v14785_v35, 0.0  ;;  %v18794_v47 = vld [vmem:[#allocation110_spill] sm:$0xff] }
 0x368   :  { %18758 = vst [vmem:[#allocation153_spill] sm:$0xff] %v15247_v37  ;;  %v15298_v2 = vpack.c.bf16 %v18783_v32, %v18782_v16  ;;  %v18791_v27 = vmax.f32 %v18545_v63, 0.0  ;;  %v18792_v1 = vmax.f32 %v14789_v25, 0.0  ;;  %v1514_v5 = vperm.slane %v77_v45, 0  ;;  %v18795_v32 = vld [vmem:[#allocation152_spill] sm:$0xff] }
 0x369   :  { %18762 = vst [vmem:[#allocation154_spill] sm:$0xff] %v15253_v6  ;;  %v15280_v6 = vpack.c.bf16 %v18776_v9, %v18775_v51  ;;  %v15304_v51 = vpack.c.bf16 %v18786_v38, %v18785_v34  ;;  %v15310_v9 = vpack.c.bf16 %v18789_v44, %v18788_v24  ;;  %v1515_v52 = vperm.slane %v77_v45, 1  ;;  %v18796_v34 = vld [vmem:[#allocation94_spill] sm:$0xff]  ;;  %v18797_v24 = vld [vmem:[#allocation151_spill] sm:$0xff] }
 0x36a   :  { %18765 = vst [vmem:[#allocation155_spill] sm:$0xff] %v15262_v39  ;;  %v15316_v13 = vpack.c.bf16 %v18792_v1, %v18791_v27  ;;  %v1516_v43 = vperm.slane %v77_v45, 2  ;;  %v1517_v46 = vperm.slane %v77_v45, 3  ;;  %v1518_v14 = vperm.slane %v77_v45, 4 }
 0x36b   :  { %18770 = vst [vmem:[#allocation156_spill] sm:$0xff] %v15268_v33  ;;  %v1519_v61 = vperm.slane %v77_v45, 5  ;;  %v2305_v22 = vadd.f32 %v18794_v47, %v1515_v52  ;;  %v1520_v16 = vperm.slane %v77_v45, 6  ;;  %v1521_v40 = vperm.slane %v77_v45, 7 }
 0x36c   :  { %18784 = vst [vmem:[#allocation41_spill] sm:$0xff] %v15298_v2  ;;  %v2318_v35 = vadd.f32 %v18795_v32, %v1516_v43  ;;  %v2331_v38 = vadd.f32 %v18796_v34, %v1517_v46  ;;  %v2292_v25 = vadd.f32 %v18797_v24, %v1514_v5 }
 0x36d   :  { %18787 = vst [vmem:[#allocation42_spill] sm:$0xff] %v15304_v51  ;;  %v2357_v63 = vadd.f32 %v14965_v62, %v1519_v61  ;;  %v2428_v44 = vrot.slane %v2305_v22, 7  ;;  %v2370_v27 = vadd.f32 %v2369_v60, %v1520_v16  ;;  %v2383_v1 = vadd.f32 %v2382_v26, %v1521_v40 }
 0x36e   :  { %18790 = vst [vmem:[#allocation43_spill] sm:$0xff] %v15310_v9  ;;  %v2430_v9 = vrot.slane %v2331_v38, 5  ;;  %v2344_v51 = vadd.f32 %v14939_v54, %v1518_v14 }
 0x36f   :  { %18793 = vst [vmem:[#allocation44_spill] sm:$0xff] %v15316_v13  ;;  %v2429_v13 = vrot.slane %v2318_v35, 6  ;;  %v2444_v2 = vrot.slane %v2357_v63, 7  ;;  %v2431_v52 = vsel %vm2393_vm0, %v2292_v25, %v2428_v44  ;;  %v2434_v45 = vsel %vm18798_vm11, %v2292_v25, %v2428_v44 }
 0x370   :  { %v2445_v47 = vrot.slane %v2370_v27, 6  ;;  %v2446_v43 = vrot.slane %v2383_v1, 5 }
 0x371   :  { %v2432_v46 = vsel %vm18799_vm12, %v2429_v13, %v2430_v9  ;;  %v2435_v62 = vsel %vm18800_vm13, %v2429_v13, %v2430_v9  ;;  %v2447_v5 = vsel %vm2393_vm0, %v2344_v51, %v2444_v2  ;;  %v2450_v60 = vsel %vm18801_vm1, %v2344_v51, %v2444_v2 }
 0x372   :  { %v15331_v26 = vsel %vm18802_vm3, %v2431_v52, %v2432_v46  ;;  %v15334_v54 = vsel %vm18804_vm5, %v2434_v45, %v2435_v62  ;;  %v2448_v14 = vsel %vm18806_vm14, %v2445_v47, %v2446_v43  ;;  %v2451_v61 = vsel %vm18807_vm15, %v2445_v47, %v2446_v43 }
 0x373   :  { %18803 = vst [vmem:[#allocation37_spill] sm:$0xff] %v15331_v26  ;;  %v15340_v16 = vsel %vm18808_vm4, %v2447_v5, %v2448_v14  ;;  %v15343_v9 = vsel %vm18810_vm2, %v2450_v60, %v2451_v61 }
 0x374   :  { %18805 = vst [vmem:[#allocation161_spill] sm:$0xff] %v15334_v54 }
 0x375   :  { %18809 = vst [vmem:[#allocation38_spill] sm:$0xff] %v15340_v16 }
 0x376   :  { %18811 = vst [vmem:[#allocation60_spill] sm:$0xff] %v15343_v9 }
 0x377   :  { %10319 = dma.done.wait [#allocation3], 16384 }
 0x378   :  { %10320 = vsyncadd [#allocation3], 4294950912  ;;  %v18812_v51 = vmov 0   ;;  %v9363_v13 = vld [vmem:[#allocation2 + $0xe0] sm:$0xf]  ;;  %v18827_v54 = vld [vmem:[#allocation88_spill] sm:$0xff] }
 0x379   :  { %10218 = vset.pattern.permute.xlu0 %v18812_v51  ;;  %v10051_v40 = vld [vmem:[#allocation2 + $0xec] sm:$0xf0]  ;;  %v9491_v32 = vld [vmem:[#allocation2 + $0x1e0] sm:$0xf]  ;;  %v18829_v26 = vld [vmem:[#allocation90_spill] sm:$0xff] }
 0x37a   :  { %v9364_v35 = vor.u32 %v10051_v40, %v9363_v13  ;;  %v10083_v34 = vld [vmem:[#allocation2 + $0x1ec] sm:$0xf0]  ;;  %v9619_v38 = vld [vmem:[#allocation2 + $0x2e0] sm:$0xf] }
 0x37b   :  { %v10115_v63 = vld [vmem:[#allocation2 + $0x2ec] sm:$0xf0]  ;;  %v9492_v24 = vor.u32 %v10083_v34, %v9491_v32  ;;  %v9747_v44 = vld [vmem:[#allocation2 + $0x3e0] sm:$0xf] }
 0x37c   :  { %v9620_v25 = vor.u32 %v10115_v63, %v9619_v38  ;;  %v10147_v27 = vld [vmem:[#allocation2 + $0x3ec] sm:$0xf0]  ;;  %v9347_v1 = vld [vmem:[#allocation2 + $0xc0] sm:$0xf]  ;;  %5488 = vmatpush.bf16.msra.mxu0 %v9364_v35 }
 0x37d   :  { %v9748_v52 = vor.u32 %v10147_v27, %v9747_v44  ;;  %v10047_v45 = vld [vmem:[#allocation2 + $0xcc] sm:$0xf0]  ;;  %v9475_v47 = vld [vmem:[#allocation2 + $0x1c0] sm:$0xf]  ;;  %5577 = vmatpush.bf16.msra.mxu1 %v9492_v24 }
 0x37e   :  { %v10079_v43 = vld [vmem:[#allocation2 + $0x1cc] sm:$0xf0]  ;;  %5666 = vmatpush.bf16.msra.mxu2 %v9620_v25  ;;  %v9348_v46 = vor.u32 %v10047_v45, %v9347_v1  ;;  %v9603_v5 = vld [vmem:[#allocation2 + $0x2c0] sm:$0xf] }
 0x37f   :  { %v9476_v62 = vor.u32 %v10079_v43, %v9475_v47  ;;  %v10111_v60 = vld [vmem:[#allocation2 + $0x2cc] sm:$0xf0]  ;;  %v9731_v14 = vld [vmem:[#allocation2 + $0x3c0] sm:$0xf]  ;;  %5755 = vmatpush.bf16.msra.mxu3 %v9748_v52 }
 0x380   :  { %v9604_v61 = vor.u32 %v10111_v60, %v9603_v5  ;;  %v10143_v51 = vld [vmem:[#allocation2 + $0x3cc] sm:$0xf0]  ;;  %v9331_v13 = vld [vmem:[#allocation2 + $0xa0] sm:$0xf]  ;;  %5489 = vmatpush.bf16.msra.mxu0 %v9348_v46 }
 0x381   :  { %v10043_v40 = vld [vmem:[#allocation2 + $0xac] sm:$0xf0]  ;;  %v9732_v32 = vor.u32 %v10143_v51, %v9731_v14  ;;  %v9459_v34 = vld [vmem:[#allocation2 + $0x1a0] sm:$0xf]  ;;  %5578 = vmatpush.bf16.msra.mxu1 %v9476_v62 }
 0x382   :  { %v10075_v38 = vld [vmem:[#allocation2 + $0x1ac] sm:$0xf0]  ;;  %v9587_v35 = vld [vmem:[#allocation2 + $0x2a0] sm:$0xf]  ;;  %v9332_v63 = vor.u32 %v10043_v40, %v9331_v13  ;;  %5667 = vmatpush.bf16.msra.mxu2 %v9604_v61 }
 0x383   :  { %v10107_v44 = vld [vmem:[#allocation2 + $0x2ac] sm:$0xf0]  ;;  %v9715_v27 = vld [vmem:[#allocation2 + $0x3a0] sm:$0xf]  ;;  %v9460_v25 = vor.u32 %v10075_v38, %v9459_v34  ;;  %5756 = vmatpush.bf16.msra.mxu3 %v9732_v32 }
 0x384   :  { %v10139_v24 = vld [vmem:[#allocation2 + $0x3ac] sm:$0xf0]  ;;  %v9588_v1 = vor.u32 %v10107_v44, %v9587_v35  ;;  %v9315_v45 = vld [vmem:[#allocation2 + $0x80] sm:$0xf]  ;;  %5490 = vmatpush.bf16.msra.mxu0 %v9332_v63 }
 0x385   :  { %v10039_v47 = vld [vmem:[#allocation2 + $0x8c] sm:$0xf0]  ;;  %v9443_v52 = vld [vmem:[#allocation2 + $0x180] sm:$0xf]  ;;  %v9716_v43 = vor.u32 %v10139_v24, %v9715_v27  ;;  %5579 = vmatpush.bf16.msra.mxu1 %v9460_v25 }
 0x386   :  { %v10071_v5 = vld [vmem:[#allocation2 + $0x18c] sm:$0xf0]  ;;  %v9571_v60 = vld [vmem:[#allocation2 + $0x280] sm:$0xf]  ;;  %v9316_v46 = vor.u32 %v10039_v47, %v9315_v45  ;;  %5668 = vmatpush.bf16.msra.mxu2 %v9588_v1 }
 0x387   :  { %v10103_v14 = vld [vmem:[#allocation2 + $0x28c] sm:$0xf0]  ;;  %v9699_v51 = vld [vmem:[#allocation2 + $0x380] sm:$0xf]  ;;  %v9444_v13 = vor.u32 %v10071_v5, %v9443_v52  ;;  %5757 = vmatpush.bf16.msra.mxu3 %v9716_v43 }
 0x388   :  { %v10135_v2 = vld [vmem:[#allocation2 + $0x38c] sm:$0xf0]  ;;  %v9572_v40 = vor.u32 %v10103_v14, %v9571_v60  ;;  %v9299_v62 = vld [vmem:[#allocation2 + $0x60] sm:$0xf]  ;;  %5491 = vmatpush.bf16.msra.mxu0 %v9316_v46 }
 0x389   :  { %v10035_v61 = vld [vmem:[#allocation2 + $0x6c] sm:$0xf0]  ;;  %v9427_v34 = vld [vmem:[#allocation2 + $0x160] sm:$0xf]  ;;  %v9700_v38 = vor.u32 %v10135_v2, %v9699_v51  ;;  %5580 = vmatpush.bf16.msra.mxu1 %v9444_v13 }
 0x38a   :  { %v10067_v35 = vld [vmem:[#allocation2 + $0x16c] sm:$0xf0]  ;;  %v9555_v44 = vld [vmem:[#allocation2 + $0x260] sm:$0xf]  ;;  %v9300_v22 = vor.u32 %v10035_v61, %v9299_v62  ;;  %5669 = vmatpush.bf16.msra.mxu2 %v9572_v40 }
 0x38b   :  { %v10099_v32 = vld [vmem:[#allocation2 + $0x26c] sm:$0xf0]  ;;  %v9683_v27 = vld [vmem:[#allocation2 + $0x360] sm:$0xf]  ;;  %v9428_v63 = vor.u32 %v10067_v35, %v9427_v34  ;;  %5758 = vmatpush.bf16.msra.mxu3 %v9700_v38 }
 0x38c   :  { %v10131_v24 = vld [vmem:[#allocation2 + $0x36c] sm:$0xf0]  ;;  %v9556_v45 = vor.u32 %v10099_v32, %v9555_v44  ;;  %v9283_v25 = vld [vmem:[#allocation2 + $0x40] sm:$0xf]  ;;  %5492 = vmatpush.bf16.msra.mxu0 %v9300_v22 }
 0x38d   :  { %v10031_v1 = vld [vmem:[#allocation2 + $0x4c] sm:$0xf0]  ;;  %v9411_v47 = vld [vmem:[#allocation2 + $0x140] sm:$0xf]  ;;  %v9684_v52 = vor.u32 %v10131_v24, %v9683_v27  ;;  %5581 = vmatpush.bf16.msra.mxu1 %v9428_v63 }
 0x38e   :  { %v10063_v5 = vld [vmem:[#allocation2 + $0x14c] sm:$0xf0]  ;;  %v9539_v60 = vld [vmem:[#allocation2 + $0x240] sm:$0xf]  ;;  %v9284_v51 = vor.u32 %v10031_v1, %v9283_v25  ;;  %5670 = vmatpush.bf16.msra.mxu2 %v9556_v45 }
 0x38f   :  { %v10095_v43 = vld [vmem:[#allocation2 + $0x24c] sm:$0xf0]  ;;  %v9667_v2 = vld [vmem:[#allocation2 + $0x340] sm:$0xf]  ;;  %v9412_v46 = vor.u32 %v10063_v5, %v9411_v47  ;;  %5759 = vmatpush.bf16.msra.mxu3 %v9684_v52 }
 0x390   :  { %v10127_v14 = vld [vmem:[#allocation2 + $0x34c] sm:$0xf0]  ;;  %v9540_v62 = vor.u32 %v10095_v43, %v9539_v60  ;;  %v9267_v13 = vld [vmem:[#allocation2 + $0x20] sm:$0xf]  ;;  %5493 = vmatpush.bf16.msra.mxu0 %v9284_v51 }
 0x391   :  { %v10027_v40 = vld [vmem:[#allocation2 + $0x2c] sm:$0xf0]  ;;  %v9395_v61 = vld [vmem:[#allocation2 + $0x120] sm:$0xf]  ;;  %v9668_v34 = vor.u32 %v10127_v14, %v9667_v2  ;;  %5582 = vmatpush.bf16.msra.mxu1 %v9412_v46 }
 0x392   :  { %v10059_v35 = vld [vmem:[#allocation2 + $0x12c] sm:$0xf0]  ;;  %v9523_v44 = vld [vmem:[#allocation2 + $0x220] sm:$0xf]  ;;  %v9268_v24 = vor.u32 %v10027_v40, %v9267_v13  ;;  %5671 = vmatpush.bf16.msra.mxu2 %v9540_v62  ;;  %v10113_v62 = vld [vmem:[#allocation2 + $0x2e4] sm:$0xf] }
 0x393   :  { %v10091_v38 = vld [vmem:[#allocation2 + $0x22c] sm:$0xf0]  ;;  %v9651_v32 = vld [vmem:[#allocation2 + $0x320] sm:$0xf]  ;;  %v9396_v22 = vor.u32 %v10059_v35, %v9395_v61  ;;  %5760 = vmatpush.bf16.msra.mxu3 %v9668_v34  ;;  %v9621_v40 = vld [vmem:[#allocation2 + $0x2f0] sm:$0xf0] }
 0x394   :  { %v10123_v27 = vld [vmem:[#allocation2 + $0x32c] sm:$0xf0]  ;;  %v9524_v25 = vor.u32 %v10091_v38, %v9523_v44  ;;  %v9251_v63 = vld [vmem:[#allocation2] sm:$0xf]  ;;  %5494 = vmatpush.bf16.msra.mxu0 %v9268_v24  ;;  %v10145_v61 = vld [vmem:[#allocation2 + $0x3e4] sm:$0xf]  ;;  %v9624_v34 = vor.u32 %v10113_v62, %v9621_v40 }
 0x395   :  { %v10023_v45 = vld [vmem:[#allocation2 + $0xc] sm:$0xf0]  ;;  %v9379_v1 = vld [vmem:[#allocation2 + $0x100] sm:$0xf]  ;;  %v9652_v47 = vor.u32 %v10123_v27, %v9651_v32  ;;  %5583 = vmatpush.bf16.msra.mxu1 %v9396_v22  ;;  %v9749_v35 = vld [vmem:[#allocation2 + $0x3f0] sm:$0xf0] }
 0x396   :  { %v10055_v5 = vld [vmem:[#allocation2 + $0x10c] sm:$0xf0]  ;;  %v9507_v60 = vld [vmem:[#allocation2 + $0x200] sm:$0xf]  ;;  %v9252_v14 = vor.u32 %v10023_v45, %v9251_v63  ;;  %5672 = vmatpush.bf16.msra.mxu2 %v9524_v25  ;;  %v10049_v44 = vld [vmem:[#allocation2 + $0xe4] sm:$0xf]  ;;  %v9752_v32 = vor.u32 %v10145_v61, %v9749_v35 }
 0x397   :  { %v10087_v52 = vld [vmem:[#allocation2 + $0x20c] sm:$0xf0]  ;;  %v9635_v43 = vld [vmem:[#allocation2 + $0x300] sm:$0xf]  ;;  %v9380_v51 = vor.u32 %v10055_v5, %v9379_v1  ;;  %5761 = vmatpush.bf16.msra.mxu3 %v9652_v47  ;;  %v9365_v38 = vld [vmem:[#allocation2 + $0xf0] sm:$0xf0] }
 0x398   :  { %v10119_v2 = vld [vmem:[#allocation2 + $0x30c] sm:$0xf0]  ;;  %v9508_v13 = vor.u32 %v10087_v52, %v9507_v60  ;;  %5495 = vmatpush.bf16.msra.mxu0 %v9252_v14  ;;  %v9368_v27 = vor.u32 %v10049_v44, %v9365_v38  ;;  %v10081_v24 = vld [vmem:[#allocation2 + $0x1e4] sm:$0xf]  ;;  %v9493_v22 = vld [vmem:[#allocation2 + $0x1f0] sm:$0xf0] }
 0x399   :  { %v9636_v46 = vor.u32 %v10119_v2, %v9635_v43  ;;  %5584 = vmatpush.bf16.msra.mxu1 %v9380_v51  ;;  %v9496_v25 = vor.u32 %v10081_v24, %v9493_v22  ;;  %v18813_v63 = vld [vmem:[#allocation111_spill] sm:$0xff]  ;;  %v18814_v45 = vld [vmem:[#allocation144_spill] sm:$0xff]  ;;  %v18815_v1 = vld [vmem:[#allocation145_spill] sm:$0xff] }
 0x39a   :  { %5673 = vmatpush.bf16.msra.mxu2 %v9508_v13  ;;  %v18816_v47 = vld [vmem:[#allocation65_spill] sm:$0xff]  ;;  %v10109_v5 = vld [vmem:[#allocation2 + $0x2c4] sm:$0xf]  ;;  %v18819_v44 = vld [vmem:[#allocation124_spill] sm:$0xff] }
 0x39b   :  { %5762 = vmatpush.bf16.msra.mxu3 %v9636_v46  ;;  %5496 = vmatmul.bf16.vlgmr.msra.gmra.mxu0 %v14931_v21  ;;  %v9605_v60 = vld [vmem:[#allocation2 + $0x2d0] sm:$0xf0]  ;;  %v10141_v52 = vld [vmem:[#allocation2 + $0x3c4] sm:$0xf] }
 0x39c   :  { %5585 = vmatmul.bf16.vlgmr.msra.gmra.mxu1 %v14937_v28  ;;  %5844 = vmatpush.bf16.msrb.mxu0 %v9368_v27  ;;  %v9608_v43 = vor.u32 %v10109_v5, %v9605_v60  ;;  %v9733_v2 = vld [vmem:[#allocation2 + $0x3d0] sm:$0xf0]  ;;  %v10045_v14 = vld [vmem:[#allocation2 + $0xc4] sm:$0xf]  ;;  %v18823_v5 = vld [vmem:[#allocation116_spill] sm:$0xff] }
 0x39d   :  { %5674 = vmatmul.bf16.vlgmr.msra.gmra.mxu2 %v14945_v15  ;;  %5933 = vmatpush.bf16.msrb.mxu1 %v9496_v25  ;;  %v9349_v51 = vld [vmem:[#allocation2 + $0xd0] sm:$0xf0]  ;;  %v9736_v13 = vor.u32 %v10141_v52, %v9733_v2  ;;  %v10077_v62 = vld [vmem:[#allocation2 + $0x1c4] sm:$0xf]  ;;  %v18825_v52 = vld [vmem:[#allocation118_spill] sm:$0xff] }
 0x39e   :  { %5763 = vmatmul.bf16.vlgmr.msra.gmra.mxu3 %v14951_v48  ;;  %6022 = vmatpush.bf16.msrb.mxu2 %v9624_v34  ;;  %v9352_v46 = vor.u32 %v10045_v14, %v9349_v51  ;;  %v9477_v40 = vld [vmem:[#allocation2 + $0x1d0] sm:$0xf0]  ;;  %v18817_v34 = vld [vmem:[#allocation79_spill] sm:$0xff] }
 0x39f   :  { %6111 = vmatpush.bf16.msrb.mxu3 %v9752_v32  ;;  %v9480_v61 = vor.u32 %v10077_v62, %v9477_v40  ;;  %v18818_v35 = vld [vmem:[#allocation123_spill] sm:$0xff]  ;;  %v18821_v32 = vld [vmem:[#allocation24_spill] sm:$0xff]  ;;  %v9589_v24 = vld [vmem:[#allocation2 + $0x2b0] sm:$0xf0] }
 0x3a0   :  { %5845 = vmatpush.bf16.msrb.mxu0 %v9352_v46  ;;  %v18820_v38 = vld [vmem:[#allocation23_spill] sm:$0xff]  ;;  %v18824_v60 = vld [vmem:[#allocation117_spill] sm:$0xff] }
 0x3a1   :  { %5934 = vmatpush.bf16.msrb.mxu1 %v9480_v61  ;;  %v10105_v27 = vld [vmem:[#allocation2 + $0x2a4] sm:$0xf]  ;;  %v9717_v2 = vld [vmem:[#allocation2 + $0x3b0] sm:$0xf0] }
 0x3a2   :  { %6023 = vmatpush.bf16.msrb.mxu2 %v9608_v43  ;;  %v9592_v22 = vor.u32 %v10105_v27, %v9589_v24  ;;  %v18822_v25 = vld [vmem:[#allocation115_spill] sm:$0xff]  ;;  %v9461_v62 = vld [vmem:[#allocation2 + $0x1b0] sm:$0xf0] }
 0x3a3   :  { %6112 = vmatpush.bf16.msrb.mxu3 %v9736_v13  ;;  %v10137_v43 = vld [vmem:[#allocation2 + $0x3a4] sm:$0xf]  ;;  %v9333_v13 = vld [vmem:[#allocation2 + $0xb0] sm:$0xf0] }
 0x3a4   :  { %v10041_v14 = vld [vmem:[#allocation2 + $0xa4] sm:$0xf]  ;;  %v9720_v51 = vor.u32 %v10137_v43, %v9717_v2  ;;  %v18828_v16 = vld [vmem:[#allocation89_spill] sm:$0xff] }
 0x3a5   :  { %v10073_v46 = vld [vmem:[#allocation2 + $0x1a4] sm:$0xf]  ;;  %v9336_v40 = vor.u32 %v10041_v14, %v9333_v13 }
 0x3a6   :  { %6024 = vmatpush.bf16.msrb.mxu2 %v9592_v22  ;;  %v9464_v61 = vor.u32 %v10073_v46, %v9461_v62  ;;  %v18826_v9 = vld [vmem:[#allocation87_spill] sm:$0xff]  ;;  %v9573_v62 = vld [vmem:[#allocation2 + $0x290] sm:$0xf0] }
 0x3a7   :  { %6113 = vmatpush.bf16.msrb.mxu3 %v9720_v51  ;;  %5846 = vmatpush.bf16.msrb.mxu0 %v9336_v40  ;;  %v10101_v46 = vld [vmem:[#allocation2 + $0x284] sm:$0xf] }
 0x3a8   :  { %5935 = vmatpush.bf16.msrb.mxu1 %v9464_v61  ;;  %v9576_v61 = vor.u32 %v10101_v46, %v9573_v62  ;;  %v9317_v62 = vld [vmem:[#allocation2 + $0x90] sm:$0xf0] }
 0x3aa   :  { %6025 = vmatpush.bf16.msrb.mxu2 %v9576_v61 }
 0x3ab   :  { %5501 = vmatmul.bf16.gmra.mxu0 %v14957_v56 }
 0x3ac   :  { %5590 = vmatmul.bf16.gmra.mxu1 %v14963_v42 }
 0x3ad   :  { %5679 = vmatmul.bf16.gmra.mxu2 %v14971_v29 }
 0x3ae   :  { %5768 = vmatmul.bf16.gmra.mxu3 %v14977_v31 }
 0x3bb   :  { %5506 = vmatmul.bf16.gmra.mxu0 %v14983_v49 }
 0x3bc   :  { %5595 = vmatmul.bf16.gmra.mxu1 %v14989_v53 }
 0x3bd   :  { %5684 = vmatmul.bf16.gmra.mxu2 %v14995_v36 }
 0x3be   :  { %5773 = vmatmul.bf16.gmra.mxu3 %v15001_v20 }
 0x3cb   :  { %5511 = vmatmul.bf16.gmra.mxu0 %v18813_v63 }
 0x3cc   :  { %5600 = vmatmul.bf16.gmra.mxu1 %v18814_v45 }
 0x3cd   :  { %5689 = vmatmul.bf16.gmra.mxu2 %v18815_v1 }
 0x3ce   :  { %5778 = vmatmul.bf16.gmra.mxu3 %v18816_v47 }
 0x3db   :  { %5516 = vmatmul.bf16.gmra.mxu0 %v15031_v0 }
 0x3dc   :  { %5605 = vmatmul.bf16.gmra.mxu1 %v15037_v50 }
 0x3dd   :  { %5694 = vmatmul.bf16.gmra.mxu2 %v15043_v41 }
 0x3de   :  { %5783 = vmatmul.bf16.gmra.mxu3 %v15049_v55 }
 0x3eb   :  { %5521 = vmatmul.bf16.gmra.mxu0 %v15055_v8 }
 0x3ec   :  { %5610 = vmatmul.bf16.gmra.mxu1 %v15061_v59 }
 0x3ed   :  { %5699 = vmatmul.bf16.gmra.mxu2 %v15067_v11 }
 0x3ee   :  { %5788 = vmatmul.bf16.gmra.mxu3 %v18817_v34 }
 0x3fb   :  { %5526 = vmatmul.bf16.gmra.mxu0 %v18818_v35 }
 0x3fc   :  { %5615 = vmatmul.bf16.gmra.mxu1 %v18819_v44 }
 0x3fd   :  { %5704 = vmatmul.bf16.gmra.mxu2 %v18820_v38 }
 0x3fe   :  { %5793 = vmatmul.bf16.gmra.mxu3 %v18821_v32 }
 0x40b   :  { %5531 = vmatmul.bf16.gmra.mxu0 %v18822_v25  ;;  %v9445_v25 = vld [vmem:[#allocation2 + $0x190] sm:$0xf0] }
 0x40c   :  { %5620 = vmatmul.bf16.gmra.mxu1 %v18823_v5  ;;  %v18832_v5 = vld [vmem:[#allocation15_spill] sm:$0xff] }
 0x40d   :  { %5709 = vmatmul.bf16.gmra.mxu2 %v18824_v60 }
 0x40e   :  { %5798 = vmatmul.bf16.gmra.mxu3 %v18825_v52 }
 0x418   :  { %v5497_v27 = vpop.f32.mrf.mxu0 }
 0x419   :  { %v5586_v24 = vpop.f32.mrf.mxu1 }
 0x41a   :  { %v5587_v22 = vadd.f32 %v5586_v24, %v5497_v27 }
 0x41b   :  { %5536 = vmatmul.bf16.gmra.mxu0 %v18826_v9 }
 0x41c   :  { %5625 = vmatmul.bf16.gmra.mxu1 %v18827_v54 }
 0x41d   :  { %5714 = vmatmul.bf16.gmra.mxu2 %v18828_v16 }
 0x41e   :  { %5803 = vmatmul.bf16.gmra.mxu3 %v18829_v26 }
 0x420   :  { %v5675_v43 = vpop.f32.mrf.mxu2  ;;  %v5499_v60 = vpop.f32.mrf.mxu0 }
 0x421   :  { %v5676_v2 = vadd.f32 %v5675_v43, %v5587_v22  ;;  %v5764_v52 = vpop.f32.mrf.mxu3  ;;  %v5588_v14 = vpop.f32.mrf.mxu1  ;;  %v18833_v22 = vld [vmem:[#allocation16_spill] sm:$0xff]  ;;  %v18834_v43 = vld [vmem:[#allocation17_spill] sm:$0xff] }
 0x422   :  { %v5589_v51 = vadd.f32 %v5588_v14, %v5499_v60  ;;  %v10133_v60 = vld [vmem:[#allocation2 + $0x384] sm:$0xf] }
 0x423   :  { %v15383_v13 = vadd.f32 %v5764_v52, %v5676_v2  ;;  %v18835_v52 = vld [vmem:[#allocation18_spill] sm:$0xff]  ;;  %v9701_v2 = vld [vmem:[#allocation2 + $0x390] sm:$0xf0]  ;;  %v10037_v14 = vld [vmem:[#allocation2 + $0x84] sm:$0xf] }
 0x425   :  { %18830 = vst [vmem:[#allocation35_spill] sm:$0xff] %v15383_v13 }
 0x428   :  { %v5677_v40 = vpop.f32.mrf.mxu2  ;;  %v5502_v9 = vpop.f32.mrf.mxu0 }
 0x429   :  { %v5678_v27 = vadd.f32 %v5677_v40, %v5589_v51  ;;  %v5766_v24 = vpop.f32.mrf.mxu3  ;;  %v5591_v54 = vpop.f32.mrf.mxu1  ;;  %v9704_v51 = vor.u32 %v10133_v60, %v9701_v2  ;;  %v10069_v40 = vld [vmem:[#allocation2 + $0x184] sm:$0xf] }
 0x42a   :  { %v5592_v26 = vadd.f32 %v5591_v54, %v5502_v9  ;;  %v9320_v54 = vor.u32 %v10037_v14, %v9317_v62  ;;  %v9448_v9 = vor.u32 %v10069_v40, %v9445_v25  ;;  %v10097_v40 = vld [vmem:[#allocation2 + $0x264] sm:$0xf] }
 0x42b   :  { %v15385_v16 = vadd.f32 %v5766_v24, %v5678_v27  ;;  %5541 = vmatmul.bf16.gmra.mxu0 %v18832_v5  ;;  %6114 = vmatpush.bf16.msrb.mxu3 %v9704_v51 }
 0x42c   :  { %5630 = vmatmul.bf16.gmra.mxu1 %v18833_v22  ;;  %5847 = vmatpush.bf16.msrb.mxu0 %v9320_v54 }
 0x42d   :  { %18831 = vst [vmem:[#allocation130_spill] sm:$0xff] %v15385_v16  ;;  %5719 = vmatmul.bf16.gmra.mxu2 %v18834_v43  ;;  %5936 = vmatpush.bf16.msrb.mxu1 %v9448_v9 }
 0x42e   :  { %5808 = vmatmul.bf16.gmra.mxu3 %v18835_v52 }
 0x430   :  { %v5680_v46 = vpop.f32.mrf.mxu2  ;;  %v5504_v24 = vpop.f32.mrf.mxu0 }
 0x431   :  { %v5681_v61 = vadd.f32 %v5680_v46, %v5592_v26  ;;  %v5769_v27 = vpop.f32.mrf.mxu3  ;;  %v5593_v5 = vpop.f32.mrf.mxu1  ;;  %v18838_v26 = vld [vmem:[#allocation98_spill] sm:$0xff]  ;;  %v18839_v46 = vld [vmem:[#allocation99_spill] sm:$0xff] }
 0x432   :  { %v5594_v43 = vadd.f32 %v5593_v5, %v5504_v24 }
 0x433   :  { %v15391_v22 = vadd.f32 %v5769_v27, %v5681_v61 }
 0x435   :  { %18836 = vst [vmem:[#allocation131_spill] sm:$0xff] %v15391_v22 }
 0x438   :  { %v5682_v52 = vpop.f32.mrf.mxu2  ;;  %v5507_v44 = vpop.f32.mrf.mxu0 }
 0x439   :  { %v5683_v32 = vadd.f32 %v5682_v52, %v5594_v43  ;;  %v5771_v38 = vpop.f32.mrf.mxu3  ;;  %v5596_v60 = vpop.f32.mrf.mxu1 }
 0x43a   :  { %v5597_v35 = vadd.f32 %v5596_v60, %v5507_v44 }
 0x43b   :  { %v15393_v2 = vadd.f32 %v5771_v38, %v5683_v32  ;;  %5546 = vmatmul.bf16.gmra.mxu0 %v18838_v26  ;;  %v9557_v38 = vld [vmem:[#allocation2 + $0x270] sm:$0xf0] }
 0x43c   :  { %5635 = vmatmul.bf16.gmra.mxu1 %v18839_v46  ;;  %v9560_v44 = vor.u32 %v10097_v40, %v9557_v38  ;;  %v10065_v40 = vld [vmem:[#allocation2 + $0x164] sm:$0xf]  ;;  %v9429_v38 = vld [vmem:[#allocation2 + $0x170] sm:$0xf0] }
 0x43d   :  { %18837 = vst [vmem:[#allocation132_spill] sm:$0xff] %v15393_v2  ;;  %5724 = vmatmul.bf16.gmra.mxu2 %v15187_v4 }
 0x43e   :  { %5813 = vmatmul.bf16.gmra.mxu3 %v15193_v12  ;;  %6026 = vmatpush.bf16.msrb.mxu2 %v9560_v44 }
 0x440   :  { %v5685_v25 = vpop.f32.mrf.mxu2  ;;  %v5509_v51 = vpop.f32.mrf.mxu0 }
 0x441   :  { %v5686_v5 = vadd.f32 %v5685_v25, %v5597_v35  ;;  %v5774_v14 = vpop.f32.mrf.mxu3  ;;  %v5598_v62 = vpop.f32.mrf.mxu1  ;;  %v18842_v35 = vld [vmem:[#allocation33_spill] sm:$0xff]  ;;  %v10129_v25 = vld [vmem:[#allocation2 + $0x364] sm:$0xf] }
 0x442   :  { %v5599_v52 = vadd.f32 %v5598_v62, %v5509_v51 }
 0x443   :  { %v15399_v43 = vadd.f32 %v5774_v14, %v5686_v5  ;;  %v9685_v5 = vld [vmem:[#allocation2 + $0x370] sm:$0xf0]  ;;  %v10033_v14 = vld [vmem:[#allocation2 + $0x64] sm:$0xf] }
 0x444   :  { %v9688_v62 = vor.u32 %v10129_v25, %v9685_v5 }
 0x445   :  { %18840 = vst [vmem:[#allocation85_spill] sm:$0xff] %v15399_v43 }
 0x446   :  { %6115 = vmatpush.bf16.msrb.mxu3 %v9688_v62 }
 0x448   :  { %v5687_v32 = vpop.f32.mrf.mxu2  ;;  %v5512_v24 = vpop.f32.mrf.mxu0 }
 0x449   :  { %v5688_v61 = vadd.f32 %v5687_v32, %v5599_v52  ;;  %v5776_v27 = vpop.f32.mrf.mxu3  ;;  %v5601_v54 = vpop.f32.mrf.mxu1  ;;  %v9301_v52 = vld [vmem:[#allocation2 + $0x70] sm:$0xf0] }
 0x44a   :  { %v5602_v60 = vadd.f32 %v5601_v54, %v5512_v24  ;;  %v9432_v24 = vor.u32 %v10065_v40, %v9429_v38  ;;  %v10093_v40 = vld [vmem:[#allocation2 + $0x244] sm:$0xf] }
 0x44b   :  { %v15401_v9 = vadd.f32 %v5776_v27, %v5688_v61  ;;  %5551 = vmatmul.bf16.gmra.mxu0 %v15199_v3  ;;  %v9304_v27 = vor.u32 %v10033_v14, %v9301_v52 }
 0x44c   :  { %5640 = vmatmul.bf16.gmra.mxu1 %v15205_v30 }
 0x44d   :  { %18841 = vst [vmem:[#allocation133_spill] sm:$0xff] %v15401_v9  ;;  %5729 = vmatmul.bf16.gmra.mxu2 %v15211_v19  ;;  %5848 = vmatpush.bf16.msrb.mxu0 %v9304_v27 }
 0x44e   :  { %5818 = vmatmul.bf16.gmra.mxu3 %v18842_v35  ;;  %5937 = vmatpush.bf16.msrb.mxu1 %v9432_v24 }
 0x450   :  { %v5690_v51 = vpop.f32.mrf.mxu2  ;;  %v5514_v61 = vpop.f32.mrf.mxu0 }
 0x451   :  { %v5691_v32 = vadd.f32 %v5690_v51, %v5602_v60  ;;  %v5779_v44 = vpop.f32.mrf.mxu3  ;;  %v5603_v54 = vpop.f32.mrf.mxu1 }
 0x452   :  { %v5604_v19 = vadd.f32 %v5603_v54, %v5514_v61  ;;  %v10125_v54 = vld [vmem:[#allocation2 + $0x344] sm:$0xf] }
 0x453   :  { %v15407_v30 = vadd.f32 %v5779_v44, %v5691_v32 }
 0x455   :  { %18843 = vst [vmem:[#allocation45_spill] sm:$0xff] %v15407_v30 }
 0x458   :  { %v5692_v35 = vpop.f32.mrf.mxu2  ;;  %v5517_v4 = vpop.f32.mrf.mxu0 }
 0x459   :  { %v5693_v3 = vadd.f32 %v5692_v35, %v5604_v19  ;;  %v5781_v12 = vpop.f32.mrf.mxu3  ;;  %v5606_v25 = vpop.f32.mrf.mxu1 }
 0x45a   :  { %v5607_v46 = vadd.f32 %v5606_v25, %v5517_v4  ;;  %v9669_v25 = vld [vmem:[#allocation2 + $0x350] sm:$0xf0] }
 0x45b   :  { %v15409_v5 = vadd.f32 %v5781_v12, %v5693_v3  ;;  %5556 = vmatmul.bf16.gmra.mxu0 %v15223_v18  ;;  %v9541_v12 = vld [vmem:[#allocation2 + $0x250] sm:$0xf0] }
 0x45c   :  { %5645 = vmatmul.bf16.gmra.mxu1 %v15229_v57  ;;  %v9544_v4 = vor.u32 %v10093_v40, %v9541_v12  ;;  %v9653_v57 = vld [vmem:[#allocation2 + $0x330] sm:$0xf0] }
 0x45d   :  { %18844 = vst [vmem:[#allocation47_spill] sm:$0xff] %v15409_v5  ;;  %5734 = vmatmul.bf16.gmra.mxu2 %v15235_v23 }
 0x45e   :  { %5823 = vmatmul.bf16.gmra.mxu3 %v15241_v7  ;;  %6027 = vmatpush.bf16.msrb.mxu2 %v9544_v4  ;;  %v9525_v7 = vld [vmem:[#allocation2 + $0x230] sm:$0xf0] }
 0x460   :  { %v5695_v60 = vpop.f32.mrf.mxu2  ;;  %v5519_v62 = vpop.f32.mrf.mxu0 }
 0x461   :  { %v5696_v14 = vadd.f32 %v5695_v60, %v5607_v46  ;;  %v5784_v51 = vpop.f32.mrf.mxu3  ;;  %v5608_v52 = vpop.f32.mrf.mxu1  ;;  %v18847_v46 = vld [vmem:[#allocation154_spill] sm:$0xff]  ;;  %v10029_v60 = vld [vmem:[#allocation2 + $0x44] sm:$0xf] }
 0x462   :  { %v5609_v35 = vadd.f32 %v5608_v52, %v5519_v62  ;;  %v9285_v62 = vld [vmem:[#allocation2 + $0x50] sm:$0xf0]  ;;  %v10061_v52 = vld [vmem:[#allocation2 + $0x144] sm:$0xf] }
 0x463   :  { %v15415_v19 = vadd.f32 %v5784_v51, %v5696_v14  ;;  %v9672_v51 = vor.u32 %v10125_v54, %v9669_v25  ;;  %v9288_v4 = vor.u32 %v10029_v60, %v9285_v62  ;;  %v9397_v54 = vld [vmem:[#allocation2 + $0x130] sm:$0xf0]  ;;  %v10089_v25 = vld [vmem:[#allocation2 + $0x224] sm:$0xf] }
 0x465   :  { %18845 = vst [vmem:[#allocation148_spill] sm:$0xff] %v15415_v19  ;;  %6116 = vmatpush.bf16.msrb.mxu3 %v9672_v51  ;;  %5849 = vmatpush.bf16.msrb.mxu0 %v9288_v4  ;;  %v10021_v51 = vld [vmem:[#allocation2 + $0x4] sm:$0xf] }
 0x466   :  { %v10085_v4 = vld [vmem:[#allocation2 + $0x204] sm:$0xf] }
 0x468   :  { %v5697_v3 = vpop.f32.mrf.mxu2  ;;  %v5522_v44 = vpop.f32.mrf.mxu0 }
 0x469   :  { %v5698_v38 = vadd.f32 %v5697_v3, %v5609_v35  ;;  %v5786_v32 = vpop.f32.mrf.mxu3  ;;  %v5611_v61 = vpop.f32.mrf.mxu1  ;;  %v9413_v35 = vld [vmem:[#allocation2 + $0x150] sm:$0xf0] }
 0x46a   :  { %v5612_v24 = vadd.f32 %v5611_v61, %v5522_v44 }
 0x46b   :  { %v15417_v27 = vadd.f32 %v5786_v32, %v5698_v38  ;;  %5561 = vmatmul.bf16.gmra.mxu0 %v15247_v37  ;;  %v9416_v38 = vor.u32 %v10061_v52, %v9413_v35  ;;  %v9253_v52 = vld [vmem:[#allocation2 + $0x10] sm:$0xf0]  ;;  %v10053_v35 = vld [vmem:[#allocation2 + $0x104] sm:$0xf] }
 0x46c   :  { %5650 = vmatmul.bf16.gmra.mxu1 %v18847_v46  ;;  %v10057_v46 = vld [vmem:[#allocation2 + $0x124] sm:$0xf] }
 0x46d   :  { %18846 = vst [vmem:[#allocation101_spill] sm:$0xff] %v15417_v27  ;;  %5739 = vmatmul.bf16.gmra.mxu2 %v15262_v39  ;;  %5938 = vmatpush.bf16.msrb.mxu1 %v9416_v38  ;;  %v9269_v39 = vld [vmem:[#allocation2 + $0x30] sm:$0xf0]  ;;  %v9400_v23 = vor.u32 %v10057_v46, %v9397_v54  ;;  %v10117_v54 = vld [vmem:[#allocation2 + $0x304] sm:$0xf] }
 0x46e   :  { %5828 = vmatmul.bf16.gmra.mxu3 %v15268_v33  ;;  %v10025_v33 = vld [vmem:[#allocation2 + $0x24] sm:$0xf]  ;;  %v9509_v38 = vld [vmem:[#allocation2 + $0x210] sm:$0xf0] }
 0x46f   :  { %v9272_v37 = vor.u32 %v10025_v33, %v9269_v39  ;;  %v9256_v39 = vor.u32 %v10021_v51, %v9253_v52  ;;  %v9381_v33 = vld [vmem:[#allocation2 + $0x110] sm:$0xf0] }
 0x470   :  { %v5700_v14 = vpop.f32.mrf.mxu2  ;;  %v5524_v3 = vpop.f32.mrf.mxu0 }
 0x471   :  { %v5701_v40 = vadd.f32 %v5700_v14, %v5612_v24  ;;  %v5789_v12 = vpop.f32.mrf.mxu3  ;;  %v5613_v32 = vpop.f32.mrf.mxu1  ;;  %v9528_v24 = vor.u32 %v10089_v25, %v9525_v7  ;;  %v10121_v14 = vld [vmem:[#allocation2 + $0x324] sm:$0xf]  ;;  %5850 = vmatpush.bf16.msrb.mxu0 %v9272_v37  ;;  %5939 = vmatpush.bf16.msrb.mxu1 %v9400_v23  ;;  %v9384_v7 = vor.u32 %v10053_v35, %v9381_v33  ;;  %v9637_v37 = vld [vmem:[#allocation2 + $0x310] sm:$0xf0] }
 0x472   :  { %v5614_v61 = vadd.f32 %v5613_v32, %v5524_v3  ;;  %v9656_v60 = vor.u32 %v10121_v14, %v9653_v57  ;;  %v9512_v32 = vor.u32 %v10085_v4, %v9509_v38  ;;  %v9640_v25 = vor.u32 %v10117_v54, %v9637_v37 }
 0x473   :  { %v15423_v44 = vadd.f32 %v5789_v12, %v5701_v40  ;;  %6028 = vmatpush.bf16.msrb.mxu2 %v9528_v24  ;;  %v7080_v24 = vmul.f32 %v15383_v13, %v15383_v13  ;;  %v7088_v14 = vmul.f32 %v15391_v22, %v15391_v22  ;;  %v7100_v54 = vmul.f32 %v15401_v9, %v15401_v9 }
 0x474   :  { %6117 = vmatpush.bf16.msrb.mxu3 %v9656_v60 }
 0x475   :  { %18848 = vst [vmem:[#allocation103_spill] sm:$0xff] %v15423_v44  ;;  %5851 = vmatpush.bf16.msrb.mxu0 %v9256_v39  ;;  %5940 = vmatpush.bf16.msrb.mxu1 %v9384_v7 }
 0x477   :  { %6029 = vmatpush.bf16.msrb.mxu2 %v9512_v32 }
 0x478   :  { %v5702_v62 = vpop.f32.mrf.mxu2  ;;  %v5527_v3 = vpop.f32.mrf.mxu0  ;;  %6118 = vmatpush.bf16.msrb.mxu3 %v9640_v25  ;;  %v7104_v25 = vmul.f32 %v15407_v30, %v15407_v30 }
 0x479   :  { %v5703_v40 = vadd.f32 %v5702_v62, %v5614_v61  ;;  %v5791_v12 = vpop.f32.mrf.mxu3  ;;  %v5616_v46 = vpop.f32.mrf.mxu1  ;;  %v7084_v61 = vmul.f32 %v15385_v16, %v15385_v16  ;;  %v6912_v62 = vadd.f32 %v15385_v16, %v15383_v13 }
 0x47a   :  { %v5617_v23 = vadd.f32 %v5616_v46, %v5527_v3  ;;  %v7096_v46 = vmul.f32 %v15399_v43, %v15399_v43 }
 0x47b   :  { %v15425_v57 = vadd.f32 %v5791_v12, %v5703_v40  ;;  %5566 = vmatmul.bf16.gmra.mxu0 %v15274_v10  ;;  %v7208_v40 = vadd.f32 %v7084_v61, %v7080_v24  ;;  %v7092_v12 = vmul.f32 %v15393_v2, %v15393_v2  ;;  %v6913_v39 = vadd.f32 %v6912_v62, %v15391_v22 }
 0x47c   :  { %5655 = vmatmul.bf16.gmra.mxu1 %v15280_v6 }
 0x47d   :  { %18849 = vst [vmem:[#allocation104_spill] sm:$0xff] %v15425_v57  ;;  %5744 = vmatmul.bf16.gmra.mxu2 %v15286_v17  ;;  %v7209_v38 = vadd.f32 %v7208_v40, %v7088_v14  ;;  %v6914_v7 = vadd.f32 %v6913_v39, %v15393_v2 }
 0x47e   :  { %5833 = vmatmul.bf16.gmra.mxu3 %v15292_v58 }
 0x47f   :  { %v7210_v32 = vadd.f32 %v7209_v38, %v7092_v12  ;;  %v6915_v37 = vadd.f32 %v6914_v7, %v15399_v43  ;;  %v7112_v38 = vmul.f32 %v15415_v19, %v15415_v19  ;;  %v18853_v7 = vld [vmem:[#allocation42_spill] sm:$0xff] }
 0x480   :  { %v5705_v60 = vpop.f32.mrf.mxu2  ;;  %v5529_v35 = vpop.f32.mrf.mxu0 }
 0x481   :  { %v5706_v51 = vadd.f32 %v5705_v60, %v5617_v23  ;;  %v5794_v52 = vpop.f32.mrf.mxu3  ;;  %v5618_v3 = vpop.f32.mrf.mxu1  ;;  %v7211_v23 = vadd.f32 %v7210_v32, %v7096_v46  ;;  %v6916_v24 = vadd.f32 %v6915_v37, %v15401_v9  ;;  %v18852_v46 = vld [vmem:[#allocation41_spill] sm:$0xff]  ;;  %v18854_v32 = vld [vmem:[#allocation43_spill] sm:$0xff]  ;;  %v7116_v37 = vmul.f32 %v15417_v27, %v15417_v27 }
 0x482   :  { %v5619_v4 = vadd.f32 %v5618_v3, %v5529_v35 }
 0x483   :  { %v15442_v33 = vadd.f32 %v5794_v52, %v5706_v51  ;;  %v7212_v51 = vadd.f32 %v7211_v23, %v7100_v54  ;;  %v7108_v52 = vmul.f32 %v15409_v5, %v15409_v5  ;;  %v6917_v40 = vadd.f32 %v6916_v24, %v15407_v30  ;;  %v18855_v23 = vld [vmem:[#allocation44_spill] sm:$0xff] }
 0x485   :  { %18850 = vst [vmem:[#allocation69_spill] sm:$0xff] %v15442_v33  ;;  %v7213_v39 = vadd.f32 %v7212_v51, %v7104_v25 }
 0x487   :  { %v7214_v54 = vadd.f32 %v7213_v39, %v7108_v52  ;;  %v7124_v39 = vmul.f32 %v15425_v57, %v15425_v57 }
 0x488   :  { %v5707_v61 = vpop.f32.mrf.mxu2  ;;  %v5532_v62 = vpop.f32.mrf.mxu0 }
 0x489   :  { %v5708_v60 = vadd.f32 %v5707_v61, %v5619_v4  ;;  %v5796_v14 = vpop.f32.mrf.mxu3  ;;  %v5621_v35 = vpop.f32.mrf.mxu1  ;;  %v6918_v4 = vadd.f32 %v6917_v40, %v15409_v5  ;;  %v7215_v25 = vadd.f32 %v7214_v54, %v7112_v38 }
 0x48a   :  { %v5622_v3 = vadd.f32 %v5621_v35, %v5532_v62 }
 0x48b   :  { %v15456_v12 = vadd.f32 %v5796_v14, %v5708_v60  ;;  %5571 = vmatmul.bf16.gmra.mxu0 %v18852_v46  ;;  %v6919_v61 = vadd.f32 %v6918_v4, %v15415_v19  ;;  %v7120_v14 = vmul.f32 %v15423_v44, %v15423_v44  ;;  %v7216_v40 = vadd.f32 %v7215_v25, %v7116_v37 }
 0x48c   :  { %5660 = vmatmul.bf16.gmra.mxu1 %v18853_v7 }
 0x48d   :  { %18851 = vst [vmem:[#allocation126_spill] sm:$0xff] %v15456_v12  ;;  %5749 = vmatmul.bf16.gmra.mxu2 %v18854_v32  ;;  %v6920_v60 = vadd.f32 %v6919_v61, %v15417_v27  ;;  %v7217_v38 = vadd.f32 %v7216_v40, %v7120_v14  ;;  %v7128_v61 = vmul.f32 %v15442_v33, %v15442_v33 }
 0x48e   :  { %5838 = vmatmul.bf16.gmra.mxu3 %v18855_v23  ;;  %v7132_v37 = vmul.f32 %v15456_v12, %v15456_v12 }
 0x48f   :  { %v6921_v52 = vadd.f32 %v6920_v60, %v15423_v44  ;;  %v7218_v22 = vadd.f32 %v7217_v38, %v7124_v39 }
 0x490   :  { %v5710_v24 = vpop.f32.mrf.mxu2  ;;  %v5534_v35 = vpop.f32.mrf.mxu0 }
 0x491   :  { %v5711_v62 = vadd.f32 %v5710_v24, %v5622_v3  ;;  %v5799_v51 = vpop.f32.mrf.mxu3  ;;  %v5623_v13 = vpop.f32.mrf.mxu1  ;;  %v6922_v54 = vadd.f32 %v6921_v52, %v15425_v57  ;;  %v7219_v24 = vadd.f32 %v7218_v22, %v7128_v61 }
 0x492   :  { %v5624_v4 = vadd.f32 %v5623_v13, %v5534_v35 }
 0x493   :  { %v15474_v16 = vadd.f32 %v5799_v51, %v5711_v62  ;;  %v6923_v3 = vadd.f32 %v6922_v54, %v15442_v33  ;;  %v7220_v40 = vadd.f32 %v7219_v24, %v7132_v37 }
 0x495   :  { %18856 = vst [vmem:[#allocation21_spill] sm:$0xff] %v15474_v16  ;;  %v6924_v60 = vadd.f32 %v6923_v3, %v15456_v12  ;;  %v7136_v62 = vmul.f32 %v15474_v16, %v15474_v16 }
 0x497   :  { %v6925_v52 = vadd.f32 %v6924_v60, %v15474_v16  ;;  %v7221_v54 = vadd.f32 %v7220_v40, %v7136_v62 }
 0x498   :  { %v5712_v25 = vpop.f32.mrf.mxu2  ;;  %v5537_v51 = vpop.f32.mrf.mxu0 }
 0x499   :  { %v5713_v13 = vadd.f32 %v5712_v25, %v5624_v4  ;;  %v5801_v14 = vpop.f32.mrf.mxu3  ;;  %v5626_v35 = vpop.f32.mrf.mxu1 }
 0x49a   :  { %v5627_v38 = vadd.f32 %v5626_v35, %v5537_v51 }
 0x49b   :  { %v15486_v39 = vadd.f32 %v5801_v14, %v5713_v13  ;;  %5852 = vmatmul.bf16.vlgmr.msrb.gmra.mxu0 %v14931_v21 }
 0x49c   :  { %5941 = vmatmul.bf16.vlgmr.msrb.gmra.mxu1 %v14937_v28 }
 0x49d   :  { %18857 = vst [vmem:[#allocation22_spill] sm:$0xff] %v15486_v39  ;;  %v6926_v22 = vadd.f32 %v6925_v52, %v15486_v39  ;;  %v7140_v61 = vmul.f32 %v15486_v39, %v15486_v39  ;;  %6030 = vmatmul.bf16.vlgmr.msrb.gmra.mxu2 %v14945_v15 }
 0x49e   :  { %6119 = vmatmul.bf16.vlgmr.msrb.gmra.mxu3 %v14951_v48 }
 0x49f   :  { %v6927_v4 = vrot.slane %v6926_v22, 4  ;;  %v7222_v3 = vadd.f32 %v7221_v54, %v7140_v61 }
 0x4a0   :  { %v5715_v37 = vpop.f32.mrf.mxu2  ;;  %v5539_v14 = vpop.f32.mrf.mxu0 }
 0x4a1   :  { %v6928_v25 = vadd.f32 %v6927_v4, %v6926_v22  ;;  %v7223_v24 = vrot.slane %v7222_v3, 4  ;;  %v5716_v60 = vadd.f32 %v5715_v37, %v5627_v38  ;;  %v5804_v13 = vpop.f32.mrf.mxu3  ;;  %v5628_v62 = vpop.f32.mrf.mxu1 }
 0x4a2   :  { %v5629_v52 = vadd.f32 %v5628_v62, %v5539_v14 }
 0x4a3   :  { %v6929_v51 = vrot.slane %v6928_v25, 2  ;;  %v7224_v35 = vadd.f32 %v7223_v24, %v7222_v3  ;;  %v15495_v40 = vadd.f32 %v5804_v13, %v5716_v60 }
 0x4a5   :  { %18858 = vst [vmem:[#allocation52_spill] sm:$0xff] %v15495_v40  ;;  %v6930_v2 = vadd.f32 %v6929_v51, %v6928_v25  ;;  %v7225_v43 = vrot.slane %v7224_v35, 2 }
 0x4a7   :  { %v6931_v9 = vrot.slane %v6930_v2, 1  ;;  %v7226_v30 = vadd.f32 %v7225_v43, %v7224_v35 }
 0x4a8   :  { %v5717_v5 = vpop.f32.mrf.mxu2  ;;  %v5542_v22 = vpop.f32.mrf.mxu0 }
 0x4a9   :  { %v6932_v19 = vadd.f32 %v6931_v9, %v6930_v2  ;;  %v7227_v27 = vrot.slane %v7226_v30, 1  ;;  %v5718_v54 = vadd.f32 %v5717_v5, %v5629_v52  ;;  %v5806_v61 = vpop.f32.mrf.mxu3  ;;  %v5631_v4 = vpop.f32.mrf.mxu1 }
 0x4aa   :  { %v5632_v3 = vadd.f32 %v5631_v4, %v5542_v22 }
 0x4ab   :  { %v7228_v38 = vadd.f32 %v7227_v27, %v7226_v30  ;;  %v15497_v37 = vmul.f32 0.0078125, %v6932_v19  ;;  %v15499_v44 = vadd.f32 %v5806_v61, %v5718_v54  ;;  %5857 = vmatmul.bf16.gmra.mxu0 %v14957_v56 }
 0x4ac   :  { %5946 = vmatmul.bf16.gmra.mxu1 %v14963_v42 }
 0x4ad   :  { %18859 = vst [vmem:[#allocation107_spill] sm:$0xff] %v15497_v37  ;;  %v15502_v24 = vmul.f32 0.0078125, %v7228_v38  ;;  %v15506_v43 = vmul.f32 %v15497_v37, %v15497_v37  ;;  %6035 = vmatmul.bf16.gmra.mxu2 %v14971_v29 }
 0x4ae   :  { %18860 = vst [vmem:[#allocation149_spill] sm:$0xff] %v15499_v44  ;;  %6124 = vmatmul.bf16.gmra.mxu3 %v14977_v31 }
 0x4b0   :  { %v5720_v2 = vpop.f32.mrf.mxu2  ;;  %v5544_v19 = vpop.f32.mrf.mxu0 }
 0x4b1   :  { %v5721_v9 = vadd.f32 %v5720_v2, %v5632_v3  ;;  %v5809_v5 = vpop.f32.mrf.mxu3  ;;  %v5633_v27 = vpop.f32.mrf.mxu1 }
 0x4b2   :  { %v5634_v60 = vadd.f32 %v5633_v27, %v5544_v19  ;;  %v10116_v19 = vld [vmem:[#allocation2 + $0x2f4] sm:$0xf0] }
 0x4b3   :  { %v15513_v25 = vadd.f32 %v5809_v5, %v5721_v9  ;;  %v9627_v5 = vld [vmem:[#allocation2 + $0x2e8] sm:$0xf] }
 0x4b5   :  { %18861 = vst [vmem:[#allocation108_spill] sm:$0xff] %v15513_v25 }
 0x4b8   :  { %v5722_v13 = vpop.f32.mrf.mxu2  ;;  %v5547_v51 = vpop.f32.mrf.mxu0 }
 0x4b9   :  { %v5723_v14 = vadd.f32 %v5722_v13, %v5634_v60  ;;  %v5811_v62 = vpop.f32.mrf.mxu3  ;;  %v5636_v35 = vpop.f32.mrf.mxu1  ;;  %v9628_v60 = vor.u32 %v10116_v19, %v9627_v5  ;;  %v10084_v5 = vld [vmem:[#allocation2 + $0x1f4] sm:$0xf0] }
 0x4ba   :  { %v5637_v54 = vadd.f32 %v5636_v35, %v5547_v51 }
 0x4bb   :  { %v15515_v52 = vadd.f32 %v5811_v62, %v5723_v14  ;;  %5862 = vmatmul.bf16.gmra.mxu0 %v14983_v49  ;;  %6378 = vmatpush.bf16.msra.mxu2 %v9628_v60 }
 0x4bc   :  { %5951 = vmatmul.bf16.gmra.mxu1 %v14989_v53 }
 0x4bd   :  { %18862 = vst [vmem:[#allocation150_spill] sm:$0xff] %v15515_v52  ;;  %6040 = vmatmul.bf16.gmra.mxu2 %v14995_v36 }
 0x4be   :  { %6129 = vmatmul.bf16.gmra.mxu3 %v15001_v20 }
 0x4c0   :  { %v5725_v61 = vpop.f32.mrf.mxu2  ;;  %v5549_v38 = vpop.f32.mrf.mxu0 }
 0x4c1   :  { %v5726_v22 = vadd.f32 %v5725_v61, %v5637_v54  ;;  %v5814_v4 = vpop.f32.mrf.mxu3  ;;  %v5638_v3 = vpop.f32.mrf.mxu1  ;;  %v9755_v54 = vld [vmem:[#allocation2 + $0x3e8] sm:$0xf]  ;;  %v10148_v61 = vld [vmem:[#allocation2 + $0x3f4] sm:$0xf0] }
 0x4c2   :  { %v5639_v9 = vadd.f32 %v5638_v3, %v5549_v38  ;;  %v9756_v38 = vor.u32 %v10148_v61, %v9755_v54  ;;  %v10052_v3 = vld [vmem:[#allocation2 + $0xf4] sm:$0xf0] }
 0x4c3   :  { %v15521_v2 = vadd.f32 %v5814_v4, %v5726_v22  ;;  %v9371_v22 = vld [vmem:[#allocation2 + $0xe8] sm:$0xf] }
 0x4c4   :  { %6467 = vmatpush.bf16.msra.mxu3 %v9756_v38 }
 0x4c5   :  { %18863 = vst [vmem:[#allocation109_spill] sm:$0xff] %v15521_v2 }
 0x4c8   :  { %v5727_v27 = vpop.f32.mrf.mxu2  ;;  %v5552_v62 = vpop.f32.mrf.mxu0 }
 0x4c9   :  { %v5728_v13 = vadd.f32 %v5727_v27, %v5639_v9  ;;  %v5816_v14 = vpop.f32.mrf.mxu3  ;;  %v5641_v51 = vpop.f32.mrf.mxu1  ;;  %v9499_v9 = vld [vmem:[#allocation2 + $0x1e8] sm:$0xf] }
 0x4ca   :  { %v5642_v30 = vadd.f32 %v5641_v51, %v5552_v62 }
 0x4cb   :  { %v15523_v35 = vadd.f32 %v5816_v14, %v5728_v13  ;;  %5867 = vmatmul.bf16.gmra.mxu0 %v18813_v63  ;;  %v9372_v13 = vor.u32 %v10052_v3, %v9371_v22  ;;  %v9500_v14 = vor.u32 %v10084_v5, %v9499_v9  ;;  %v9611_v9 = vld [vmem:[#allocation2 + $0x2c8] sm:$0xf] }
 0x4cc   :  { %5956 = vmatmul.bf16.gmra.mxu1 %v18814_v45 }
 0x4cd   :  { %18864 = vst [vmem:[#allocation39_spill] sm:$0xff] %v15523_v35  ;;  %6045 = vmatmul.bf16.gmra.mxu2 %v18815_v1  ;;  %6200 = vmatpush.bf16.msra.mxu0 %v9372_v13 }
 0x4ce   :  { %6134 = vmatmul.bf16.gmra.mxu3 %v18816_v47  ;;  %6289 = vmatpush.bf16.msra.mxu1 %v9500_v14 }
 0x4d0   :  { %v5730_v4 = vpop.f32.mrf.mxu2  ;;  %v5554_v60 = vpop.f32.mrf.mxu0 }
 0x4d1   :  { %v5731_v19 = vadd.f32 %v5730_v4, %v5642_v30  ;;  %v5819_v27 = vpop.f32.mrf.mxu3  ;;  %v5643_v62 = vpop.f32.mrf.mxu1 }
 0x4d2   :  { %v5644_v57 = vadd.f32 %v5643_v62, %v5554_v60  ;;  %v10144_v62 = vld [vmem:[#allocation2 + $0x3d4] sm:$0xf0] }
 0x4d3   :  { %v15529_v51 = vadd.f32 %v5819_v27, %v5731_v19 }
 0x4d5   :  { %18865 = vst [vmem:[#allocation96_spill] sm:$0xff] %v15529_v51 }
 0x4d8   :  { %v5732_v33 = vpop.f32.mrf.mxu2  ;;  %v5557_v39 = vpop.f32.mrf.mxu0 }
 0x4d9   :  { %v5733_v12 = vadd.f32 %v5732_v33, %v5644_v57  ;;  %v5821_v16 = vpop.f32.mrf.mxu3  ;;  %v5646_v54 = vpop.f32.mrf.mxu1 }
 0x4da   :  { %v5647_v37 = vadd.f32 %v5646_v54, %v5557_v39  ;;  %v9355_v54 = vld [vmem:[#allocation2 + $0xc8] sm:$0xf] }
 0x4db   :  { %v15531_v61 = vadd.f32 %v5821_v16, %v5733_v12  ;;  %5872 = vmatmul.bf16.gmra.mxu0 %v15031_v0  ;;  %v10112_v16 = vld [vmem:[#allocation2 + $0x2d4] sm:$0xf0] }
 0x4dc   :  { %5961 = vmatmul.bf16.gmra.mxu1 %v15037_v50  ;;  %v9612_v39 = vor.u32 %v10112_v16, %v9611_v9 }
 0x4dd   :  { %18866 = vst [vmem:[#allocation92_spill] sm:$0xff] %v15531_v61  ;;  %6050 = vmatmul.bf16.gmra.mxu2 %v15043_v41 }
 0x4de   :  { %6139 = vmatmul.bf16.gmra.mxu3 %v15049_v55  ;;  %6379 = vmatpush.bf16.msra.mxu2 %v9612_v39 }
 0x4e0   :  { %v5735_v30 = vpop.f32.mrf.mxu2  ;;  %v5559_v38 = vpop.f32.mrf.mxu0 }
 0x4e1   :  { %v5736_v22 = vadd.f32 %v5735_v30, %v5647_v37  ;;  %v5824_v4 = vpop.f32.mrf.mxu3  ;;  %v5648_v3 = vpop.f32.mrf.mxu1  ;;  %v9739_v37 = vld [vmem:[#allocation2 + $0x3c8] sm:$0xf] }
 0x4e2   :  { %v5649_v33 = vadd.f32 %v5648_v3, %v5559_v38  ;;  %v9483_v38 = vld [vmem:[#allocation2 + $0x1c8] sm:$0xf]  ;;  %v10080_v3 = vld [vmem:[#allocation2 + $0x1d4] sm:$0xf0] }
 0x4e3   :  { %v15537_v57 = vadd.f32 %v5824_v4, %v5736_v22  ;;  %v9740_v22 = vor.u32 %v10144_v62, %v9739_v37  ;;  %v10048_v4 = vld [vmem:[#allocation2 + $0xd4] sm:$0xf0]  ;;  %v9484_v39 = vor.u32 %v10080_v3, %v9483_v38  ;;  %v7144_v38 = vmul.f32 %v15495_v40, %v15495_v40 }
 0x4e4   :  { %v7152_v3 = vmul.f32 %v15513_v25, %v15513_v25 }
 0x4e5   :  { %18867 = vst [vmem:[#allocation93_spill] sm:$0xff] %v15537_v57  ;;  %6468 = vmatpush.bf16.msra.mxu3 %v9740_v22  ;;  %6290 = vmatpush.bf16.msra.mxu1 %v9484_v39  ;;  %v7148_v22 = vmul.f32 %v15499_v44, %v15499_v44 }
 0x4e8   :  { %v5737_v12 = vpop.f32.mrf.mxu2  ;;  %v5562_v27 = vpop.f32.mrf.mxu0 }
 0x4e9   :  { %v5738_v5 = vadd.f32 %v5737_v12, %v5649_v33  ;;  %v5826_v19 = vpop.f32.mrf.mxu3  ;;  %v5651_v60 = vpop.f32.mrf.mxu1  ;;  %v9356_v12 = vor.u32 %v10048_v4, %v9355_v54  ;;  %v18873_v54 = vld [vmem:[#allocation23_spill] sm:$0xff]  ;;  %v18874_v4 = vld [vmem:[#allocation24_spill] sm:$0xff] }
 0x4ea   :  { %v5652_v14 = vadd.f32 %v5651_v60, %v5562_v27 }
 0x4eb   :  { %v15539_v13 = vadd.f32 %v5826_v19, %v5738_v5  ;;  %5877 = vmatmul.bf16.gmra.mxu0 %v15055_v8 }
 0x4ec   :  { %5966 = vmatmul.bf16.gmra.mxu1 %v15061_v59  ;;  %6201 = vmatpush.bf16.msra.mxu0 %v9356_v12  ;;  %v7156_v12 = vmul.f32 %v15515_v52, %v15515_v52 }
 0x4ed   :  { %18868 = vst [vmem:[#allocation112_spill] sm:$0xff] %v15539_v13  ;;  %6055 = vmatmul.bf16.gmra.mxu2 %v15067_v11 }
 0x4ee   :  { %6144 = vmatmul.bf16.gmra.mxu3 %v18817_v34 }
 0x4f0   :  { %v5740_v30 = vpop.f32.mrf.mxu2  ;;  %v5564_v16 = vpop.f32.mrf.mxu0 }
 0x4f1   :  { %v5741_v33 = vadd.f32 %v5740_v30, %v5652_v14  ;;  %v5829_v9 = vpop.f32.mrf.mxu3  ;;  %v5653_v5 = vpop.f32.mrf.mxu1  ;;  %v18871_v14 = vld [vmem:[#allocation123_spill] sm:$0xff]  ;;  %v18872_v30 = vld [vmem:[#allocation124_spill] sm:$0xff] }
 0x4f2   :  { %v5654_v27 = vadd.f32 %v5653_v5, %v5564_v16  ;;  %v7292_v16 = vadd.f32 %v7148_v22, %v7144_v38 }
 0x4f3   :  { %v15545_v19 = vadd.f32 %v5829_v9, %v5741_v33 }
 0x4f5   :  { %18869 = vst [vmem:[#allocation141_spill] sm:$0xff] %v15545_v19 }
 0x4f8   :  { %v5742_v60 = vpop.f32.mrf.mxu2  ;;  %v5567_v59 = vpop.f32.mrf.mxu0 }
 0x4f9   :  { %v5743_v34 = vadd.f32 %v5742_v60, %v5654_v27  ;;  %v5831_v11 = vpop.f32.mrf.mxu3  ;;  %v5656_v37 = vpop.f32.mrf.mxu1 }
 0x4fa   :  { %v5657_v8 = vadd.f32 %v5656_v37, %v5567_v59  ;;  %v6996_v59 = vadd.f32 %v15499_v44, %v15495_v40  ;;  %v7293_v37 = vadd.f32 %v7292_v16, %v7152_v3  ;;  %v18877_v44 = vld [vmem:[#allocation115_spill] sm:$0xff] }
 0x4fb   :  { %v15547_v62 = vadd.f32 %v5831_v11, %v5743_v34  ;;  %5882 = vmatmul.bf16.gmra.mxu0 %v18871_v14  ;;  %v10124_v14 = vld [vmem:[#allocation2 + $0x334] sm:$0xf0] }
 0x4fc   :  { %5971 = vmatmul.bf16.gmra.mxu1 %v18872_v30  ;;  %v6997_v5 = vadd.f32 %v6996_v59, %v15513_v25  ;;  %v7294_v40 = vadd.f32 %v7293_v37, %v7156_v12 }
 0x4fd   :  { %18870 = vst [vmem:[#allocation119_spill] sm:$0xff] %v15547_v62  ;;  %6060 = vmatmul.bf16.gmra.mxu2 %v18873_v54 }
 0x4fe   :  { %6149 = vmatmul.bf16.gmra.mxu3 %v18874_v4  ;;  %v7160_v4 = vmul.f32 %v15521_v2, %v15521_v2  ;;  %v6998_v54 = vadd.f32 %v6997_v5, %v15515_v52 }
 0x500   :  { %v5745_v11 = vpop.f32.mrf.mxu2  ;;  %v5569_v9 = vpop.f32.mrf.mxu0  ;;  %v6999_v22 = vadd.f32 %v6998_v54, %v15521_v2  ;;  %v7295_v38 = vadd.f32 %v7294_v40, %v7160_v4  ;;  %v7176_v4 = vmul.f32 %v15537_v57, %v15537_v57 }
 0x501   :  { %v5746_v34 = vadd.f32 %v5745_v11, %v5657_v8  ;;  %v5834_v33 = vpop.f32.mrf.mxu3  ;;  %v5658_v39 = vpop.f32.mrf.mxu1  ;;  %v7164_v8 = vmul.f32 %v15523_v35, %v15523_v35  ;;  %v7168_v11 = vmul.f32 %v15529_v51, %v15529_v51 }
 0x502   :  { %v5659_v60 = vadd.f32 %v5658_v39, %v5569_v9  ;;  %v7172_v39 = vmul.f32 %v15531_v61, %v15531_v61 }
 0x503   :  { %v15564_v27 = vadd.f32 %v5834_v33, %v5746_v34  ;;  %v7000_v34 = vadd.f32 %v6999_v22, %v15523_v35  ;;  %v7296_v16 = vadd.f32 %v7295_v38, %v7164_v8  ;;  %v18878_v22 = vld [vmem:[#allocation116_spill] sm:$0xff]  ;;  %v18879_v8 = vld [vmem:[#allocation117_spill] sm:$0xff] }
 0x505   :  { %18875 = vst [vmem:[#allocation80_spill] sm:$0xff] %v15564_v27  ;;  %v7001_v5 = vadd.f32 %v7000_v34, %v15529_v51  ;;  %v7297_v40 = vadd.f32 %v7296_v16, %v7168_v11  ;;  %v18880_v34 = vld [vmem:[#allocation118_spill] sm:$0xff]  ;;  %v7184_v16 = vmul.f32 %v15545_v19, %v15545_v19 }
 0x507   :  { %v7298_v38 = vadd.f32 %v7297_v40, %v7172_v39  ;;  %v7188_v40 = vmul.f32 %v15547_v62, %v15547_v62 }
 0x508   :  { %v5747_v59 = vpop.f32.mrf.mxu2  ;;  %v5572_v9 = vpop.f32.mrf.mxu0 }
 0x509   :  { %v5748_v33 = vadd.f32 %v5747_v59, %v5659_v60  ;;  %v5836_v3 = vpop.f32.mrf.mxu3  ;;  %v5661_v12 = vpop.f32.mrf.mxu1  ;;  %v7002_v60 = vadd.f32 %v7001_v5, %v15531_v61  ;;  %v7180_v59 = vmul.f32 %v15539_v13, %v15539_v13  ;;  %v7299_v11 = vadd.f32 %v7298_v38, %v7176_v4 }
 0x50a   :  { %v5662_v54 = vadd.f32 %v5661_v12, %v5572_v9 }
 0x50b   :  { %v15578_v37 = vadd.f32 %v5836_v3, %v5748_v33  ;;  %5887 = vmatmul.bf16.gmra.mxu0 %v18877_v44  ;;  %v7003_v33 = vadd.f32 %v7002_v60, %v15537_v57  ;;  %v7300_v52 = vadd.f32 %v7299_v11, %v7180_v59  ;;  %v10092_v44 = vld [vmem:[#allocation2 + $0x234] sm:$0xf0] }
 0x50c   :  { %5976 = vmatmul.bf16.gmra.mxu1 %v18878_v22 }
 0x50d   :  { %18876 = vst [vmem:[#allocation120_spill] sm:$0xff] %v15578_v37  ;;  %6065 = vmatmul.bf16.gmra.mxu2 %v18879_v8  ;;  %v7004_v9 = vadd.f32 %v7003_v33, %v15539_v13  ;;  %v7301_v4 = vadd.f32 %v7300_v52, %v7184_v16  ;;  %v7192_v33 = vmul.f32 %v15564_v27, %v15564_v27  ;;  %v9403_v8 = vld [vmem:[#allocation2 + $0x128] sm:$0xf] }
 0x50e   :  { %6154 = vmatmul.bf16.gmra.mxu3 %v18880_v34  ;;  %v7196_v59 = vmul.f32 %v15578_v37, %v15578_v37 }
 0x50f   :  { %v7005_v39 = vadd.f32 %v7004_v9, %v15545_v19  ;;  %v7302_v51 = vadd.f32 %v7301_v4, %v7188_v40 }
 0x510   :  { %v5750_v3 = vpop.f32.mrf.mxu2  ;;  %v5574_v25 = vpop.f32.mrf.mxu0 }
 0x511   :  { %v5751_v12 = vadd.f32 %v5750_v3, %v5662_v54  ;;  %v5839_v5 = vpop.f32.mrf.mxu3  ;;  %v5663_v2 = vpop.f32.mrf.mxu1  ;;  %v7006_v38 = vadd.f32 %v7005_v39, %v15547_v62  ;;  %v7303_v3 = vadd.f32 %v7302_v51, %v7192_v33 }
 0x512   :  { %v5664_v60 = vadd.f32 %v5663_v2, %v5574_v25 }
 0x513   :  { %v15596_v35 = vadd.f32 %v5839_v5, %v5751_v12  ;;  %v7007_v54 = vadd.f32 %v7006_v38, %v15564_v27  ;;  %v7304_v5 = vadd.f32 %v7303_v3, %v7196_v59  ;;  %v18883_v38 = vld [vmem:[#allocation87_spill] sm:$0xff] }
 0x515   :  { %18881 = vst [vmem:[#allocation81_spill] sm:$0xff] %v15596_v35  ;;  %v7008_v9 = vadd.f32 %v7007_v54, %v15578_v37  ;;  %v7200_v12 = vmul.f32 %v15596_v35, %v15596_v35  ;;  %v18884_v54 = vld [vmem:[#allocation88_spill] sm:$0xff] }
 0x516   :  { %v9595_v37 = vld [vmem:[#allocation2 + $0x2a8] sm:$0xf] }
 0x517   :  { %v7009_v39 = vadd.f32 %v7008_v9, %v15596_v35  ;;  %v7305_v61 = vadd.f32 %v7304_v5, %v7200_v12  ;;  %v10108_v35 = vld [vmem:[#allocation2 + $0x2b4] sm:$0xf0] }
 0x518   :  { %v5752_v11 = vpop.f32.mrf.mxu2  ;;  %v5853_v2 = vpop.f32.mrf.mxu0 }
 0x519   :  { %v5753_v25 = vadd.f32 %v5752_v11, %v5664_v60  ;;  %v5841_v52 = vpop.f32.mrf.mxu3  ;;  %v5942_v16 = vpop.f32.mrf.mxu1  ;;  %v18885_v60 = vld [vmem:[#allocation89_spill] sm:$0xff]  ;;  %v18886_v11 = vld [vmem:[#allocation90_spill] sm:$0xff] }
 0x51a   :  { %v5943_v4 = vadd.f32 %v5942_v16, %v5853_v2 }
 0x51b   :  { %v15608_v40 = vadd.f32 %v5841_v52, %v5753_v25  ;;  %5892 = vmatmul.bf16.gmra.mxu0 %v18883_v38  ;;  %v10076_v38 = vld [vmem:[#allocation2 + $0x1b4] sm:$0xf0] }
 0x51c   :  { %5981 = vmatmul.bf16.gmra.mxu1 %v18884_v54  ;;  %v9467_v54 = vld [vmem:[#allocation2 + $0x1a8] sm:$0xf] }
 0x51d   :  { %18882 = vst [vmem:[#allocation121_spill] sm:$0xff] %v15608_v40  ;;  %v7010_v51 = vadd.f32 %v7009_v39, %v15608_v40  ;;  %v7204_v33 = vmul.f32 %v15608_v40, %v15608_v40  ;;  %6070 = vmatmul.bf16.gmra.mxu2 %v18885_v60  ;;  %v9723_v40 = vld [vmem:[#allocation2 + $0x3a8] sm:$0xf] }
 0x51e   :  { %6159 = vmatmul.bf16.gmra.mxu3 %v18886_v11 }
 0x51f   :  { %v7011_v59 = vrot.slane %v7010_v51, 4  ;;  %v7306_v3 = vadd.f32 %v7305_v61, %v7204_v33  ;;  %v9596_v61 = vor.u32 %v10108_v35, %v9595_v37  ;;  %v10140_v33 = vld [vmem:[#allocation2 + $0x3b4] sm:$0xf0] }
 0x520   :  { %v6031_v9 = vpop.f32.mrf.mxu2  ;;  %v5855_v57 = vpop.f32.mrf.mxu0 }
 0x521   :  { %v7012_v25 = vadd.f32 %v7011_v59, %v7010_v51  ;;  %v7307_v52 = vrot.slane %v7306_v3, 4  ;;  %v6032_v2 = vadd.f32 %v6031_v9, %v5943_v4  ;;  %v6120_v16 = vpop.f32.mrf.mxu3  ;;  %v5944_v12 = vpop.f32.mrf.mxu1  ;;  %v9339_v51 = vld [vmem:[#allocation2 + $0xa8] sm:$0xf]  ;;  %v9724_v4 = vor.u32 %v10140_v33, %v9723_v40  ;;  %v10044_v9 = vld [vmem:[#allocation2 + $0xb4] sm:$0xf0]  ;;  %6380 = vmatpush.bf16.msra.mxu2 %v9596_v61 }
 0x522   :  { %v5945_v19 = vadd.f32 %v5944_v12, %v5855_v57  ;;  %v10104_v12 = vld [vmem:[#allocation2 + $0x294] sm:$0xf0]  ;;  %v18893_v61 = vld [vmem:[#allocation16_spill] sm:$0xff] }
 0x523   :  { %v7013_v5 = vrot.slane %v7012_v25, 2  ;;  %v7308_v39 = vadd.f32 %v7307_v52, %v7306_v3  ;;  %v15617_v13 = vadd.f32 %v6120_v16, %v6032_v2  ;;  %v9340_v2 = vor.u32 %v10044_v9, %v9339_v51  ;;  %v9579_v16 = vld [vmem:[#allocation2 + $0x288] sm:$0xf]  ;;  %6469 = vmatpush.bf16.msra.mxu3 %v9724_v4  ;;  %v10136_v51 = vld [vmem:[#allocation2 + $0x394] sm:$0xf0] }
 0x524   :  { %v9580_v35 = vor.u32 %v10104_v12, %v9579_v16 }
 0x525   :  { %18887 = vst [vmem:[#allocation57_spill] sm:$0xff] %v15617_v13  ;;  %v7014_v62 = vadd.f32 %v7013_v5, %v7012_v25  ;;  %v7309_v27 = vrot.slane %v7308_v39, 2  ;;  %6202 = vmatpush.bf16.msra.mxu0 %v9340_v2 }
 0x526   :  { %6381 = vmatpush.bf16.msra.mxu2 %v9580_v35 }
 0x527   :  { %v7015_v11 = vrot.slane %v7014_v62, 1  ;;  %v7310_v60 = vadd.f32 %v7309_v27, %v7308_v39  ;;  %v9468_v27 = vor.u32 %v10076_v38, %v9467_v54  ;;  %v18894_v38 = vld [vmem:[#allocation17_spill] sm:$0xff]  ;;  %v18895_v54 = vld [vmem:[#allocation18_spill] sm:$0xff] }
 0x528   :  { %v6033_v59 = vpop.f32.mrf.mxu2  ;;  %v5858_v25 = vpop.f32.mrf.mxu0 }
 0x529   :  { %v7016_v34 = vadd.f32 %v7015_v11, %v7014_v62  ;;  %v7311_v3 = vrot.slane %v7310_v60, 1  ;;  %v6034_v52 = vadd.f32 %v6033_v59, %v5945_v19  ;;  %v6122_v57 = vpop.f32.mrf.mxu3  ;;  %v5947_v5 = vpop.f32.mrf.mxu1  ;;  %6291 = vmatpush.bf16.msra.mxu1 %v9468_v27  ;;  %v18890_v62 = vld [vmem:[#allocation15_spill] sm:$0xff]  ;;  %v9323_v59 = vld [vmem:[#allocation2 + $0x88] sm:$0xf] }
 0x52a   :  { %v5948_v33 = vadd.f32 %v5947_v5, %v5858_v25 }
 0x52b   :  { %v7312_v37 = vadd.f32 %v7311_v3, %v7310_v60  ;;  %v15619_v39 = vmul.f32 0.0078125, %v7016_v34  ;;  %v15621_v40 = vadd.f32 %v6122_v57, %v6034_v52  ;;  %5897 = vmatmul.bf16.gmra.mxu0 %v18890_v62  ;;  %v9707_v60 = vld [vmem:[#allocation2 + $0x388] sm:$0xf]  ;;  %v10040_v3 = vld [vmem:[#allocation2 + $0x94] sm:$0xf0] }
 0x52c   :  { %5986 = vmatmul.bf16.gmra.mxu1 %v18893_v61  ;;  %v9708_v9 = vor.u32 %v10136_v51, %v9707_v60  ;;  %v9451_v52 = vld [vmem:[#allocation2 + $0x188] sm:$0xf]  ;;  %v10072_v57 = vld [vmem:[#allocation2 + $0x194] sm:$0xf0]  ;;  %v9324_v12 = vor.u32 %v10040_v3, %v9323_v59 }
 0x52d   :  { %18888 = vst [vmem:[#allocation67_spill] sm:$0xff] %v15619_v39  ;;  %v15624_v19 = vmul.f32 0.0078125, %v7312_v37  ;;  %v15628_v11 = vmul.f32 %v15619_v39, %v15619_v39  ;;  %6075 = vmatmul.bf16.gmra.mxu2 %v18894_v38  ;;  %v9452_v5 = vor.u32 %v10072_v57, %v9451_v52  ;;  %v18899_v59 = vld [vmem:[#allocation100_spill] sm:$0xff] }
 0x52e   :  { %18889 = vst [vmem:[#allocation58_spill] sm:$0xff] %v15621_v40  ;;  %6164 = vmatmul.bf16.gmra.mxu3 %v18895_v54  ;;  %6203 = vmatpush.bf16.msra.mxu0 %v9324_v12 }
 0x52f   :  { %18891 = vst [vmem:[#allocation68_spill] sm:$0xff] %v15624_v19  ;;  %6470 = vmatpush.bf16.msra.mxu3 %v9708_v9  ;;  %6292 = vmatpush.bf16.msra.mxu1 %v9452_v5 }
 0x530   :  { %18892 = vst [vmem:[#allocation59_spill] sm:$0xff] %v15628_v11  ;;  %v6036_v4 = vpop.f32.mrf.mxu2  ;;  %v5860_v16 = vpop.f32.mrf.mxu0 }
 0x531   :  { %v6037_v25 = vadd.f32 %v6036_v4, %v5948_v33  ;;  %v6125_v2 = vpop.f32.mrf.mxu3  ;;  %v5949_v27 = vpop.f32.mrf.mxu1  ;;  %v18898_v33 = vld [vmem:[#allocation99_spill] sm:$0xff]  ;;  %v18900_v4 = vld [vmem:[#allocation102_spill] sm:$0xff] }
 0x532   :  { %v5950_v35 = vadd.f32 %v5949_v27, %v5860_v16  ;;  %v9563_v16 = vld [vmem:[#allocation2 + $0x268] sm:$0xf] }
 0x533   :  { %v15635_v37 = vadd.f32 %v6125_v2, %v6037_v25 }
 0x535   :  { %18896 = vst [vmem:[#allocation30_spill] sm:$0xff] %v15635_v37 }
 0x538   :  { %v6038_v34 = vpop.f32.mrf.mxu2  ;;  %v5863_v38 = vpop.f32.mrf.mxu0 }
 0x539   :  { %v6039_v39 = vadd.f32 %v6038_v34, %v5950_v35  ;;  %v6127_v54 = vpop.f32.mrf.mxu3  ;;  %v5952_v60 = vpop.f32.mrf.mxu1 }
 0x53a   :  { %v5953_v61 = vadd.f32 %v5952_v60, %v5863_v38 }
 0x53b   :  { %v15637_v51 = vadd.f32 %v6127_v54, %v6039_v39  ;;  %5902 = vmatmul.bf16.gmra.mxu0 %v18838_v26  ;;  %v10100_v39 = vld [vmem:[#allocation2 + $0x274] sm:$0xf0] }
 0x53c   :  { %5991 = vmatmul.bf16.gmra.mxu1 %v18898_v33  ;;  %v9564_v38 = vor.u32 %v10100_v39, %v9563_v16  ;;  %v10036_v39 = vld [vmem:[#allocation2 + $0x74] sm:$0xf0] }
 0x53d   :  { %18897 = vst [vmem:[#allocation66_spill] sm:$0xff] %v15637_v51  ;;  %6080 = vmatmul.bf16.gmra.mxu2 %v18899_v59  ;;  %v18903_v59 = vld [vmem:[#allocation29_spill] sm:$0xff]  ;;  %v10068_v33 = vld [vmem:[#allocation2 + $0x174] sm:$0xf0] }
 0x53e   :  { %6169 = vmatmul.bf16.gmra.mxu3 %v18900_v4  ;;  %6382 = vmatpush.bf16.msra.mxu2 %v9564_v38 }
 0x540   :  { %v6041_v9 = vpop.f32.mrf.mxu2  ;;  %v5865_v57 = vpop.f32.mrf.mxu0 }
 0x541   :  { %v6042_v3 = vadd.f32 %v6041_v9, %v5953_v61  ;;  %v6130_v52 = vpop.f32.mrf.mxu3  ;;  %v5954_v25 = vpop.f32.mrf.mxu1  ;;  %v18904_v61 = vld [vmem:[#allocation31_spill] sm:$0xff]  ;;  %v18905_v9 = vld [vmem:[#allocation32_spill] sm:$0xff] }
 0x542   :  { %v5955_v2 = vadd.f32 %v5954_v25, %v5865_v57  ;;  %v10132_v57 = vld [vmem:[#allocation2 + $0x374] sm:$0xf0]  ;;  %v9307_v25 = vld [vmem:[#allocation2 + $0x68] sm:$0xf] }
 0x543   :  { %v15643_v34 = vadd.f32 %v6130_v52, %v6042_v3  ;;  %v18906_v3 = vld [vmem:[#allocation33_spill] sm:$0xff]  ;;  %v9691_v52 = vld [vmem:[#allocation2 + $0x368] sm:$0xf] }
 0x545   :  { %18901 = vst [vmem:[#allocation34_spill] sm:$0xff] %v15643_v34 }
 0x548   :  { %v6043_v54 = vpop.f32.mrf.mxu2  ;;  %v5868_v27 = vpop.f32.mrf.mxu0 }
 0x549   :  { %v6044_v12 = vadd.f32 %v6043_v54, %v5955_v2  ;;  %v6132_v5 = vpop.f32.mrf.mxu3  ;;  %v5957_v35 = vpop.f32.mrf.mxu1  ;;  %v9692_v2 = vor.u32 %v10132_v57, %v9691_v52  ;;  %v9435_v54 = vld [vmem:[#allocation2 + $0x168] sm:$0xf] }
 0x54a   :  { %v5958_v4 = vadd.f32 %v5957_v35, %v5868_v27  ;;  %v9308_v27 = vor.u32 %v10036_v39, %v9307_v25  ;;  %v9436_v35 = vor.u32 %v10068_v33, %v9435_v54  ;;  %v18910_v33 = vld [vmem:[#allocation27_spill] sm:$0xff]  ;;  %v18911_v25 = vld [vmem:[#allocation28_spill] sm:$0xff] }
 0x54b   :  { %v15645_v60 = vadd.f32 %v6132_v5, %v6044_v12  ;;  %5907 = vmatmul.bf16.gmra.mxu0 %v18903_v59  ;;  %6471 = vmatpush.bf16.msra.mxu3 %v9692_v2 }
 0x54c   :  { %5996 = vmatmul.bf16.gmra.mxu1 %v18904_v61  ;;  %6204 = vmatpush.bf16.msra.mxu0 %v9308_v27 }
 0x54d   :  { %18902 = vst [vmem:[#allocation36_spill] sm:$0xff] %v15645_v60  ;;  %6085 = vmatmul.bf16.gmra.mxu2 %v18905_v9  ;;  %6293 = vmatpush.bf16.msra.mxu1 %v9436_v35 }
 0x54e   :  { %6174 = vmatmul.bf16.gmra.mxu3 %v18906_v3 }
 0x550   :  { %v6046_v16 = vpop.f32.mrf.mxu2  ;;  %v5870_v5 = vpop.f32.mrf.mxu0 }
 0x551   :  { %v6047_v38 = vadd.f32 %v6046_v16, %v5958_v4  ;;  %v6135_v12 = vpop.f32.mrf.mxu3  ;;  %v5959_v59 = vpop.f32.mrf.mxu1  ;;  %v18909_v4 = vld [vmem:[#allocation26_spill] sm:$0xff] }
 0x552   :  { %v5960_v9 = vadd.f32 %v5959_v59, %v5870_v5 }
 0x553   :  { %v15651_v61 = vadd.f32 %v6135_v12, %v6047_v38  ;;  %v9547_v38 = vld [vmem:[#allocation2 + $0x248] sm:$0xf] }
 0x555   :  { %18907 = vst [vmem:[#allocation129_spill] sm:$0xff] %v15651_v61 }
 0x558   :  { %v6048_v3 = vpop.f32.mrf.mxu2  ;;  %v5873_v11 = vpop.f32.mrf.mxu0 }
 0x559   :  { %v6049_v26 = vadd.f32 %v6048_v3, %v5960_v9  ;;  %v6137_v62 = vpop.f32.mrf.mxu3  ;;  %v5962_v52 = vpop.f32.mrf.mxu1 }
 0x55a   :  { %v5963_v19 = vadd.f32 %v5962_v52, %v5873_v11 }
 0x55b   :  { %v15653_v57 = vadd.f32 %v6137_v62, %v6049_v26  ;;  %5912 = vmatmul.bf16.gmra.mxu0 %v15223_v18  ;;  %v10096_v26 = vld [vmem:[#allocation2 + $0x254] sm:$0xf0] }
 0x55c   :  { %6001 = vmatmul.bf16.gmra.mxu1 %v18909_v4  ;;  %v9548_v11 = vor.u32 %v10096_v26, %v9547_v38  ;;  %v10032_v26 = vld [vmem:[#allocation2 + $0x54] sm:$0xf0] }
 0x55d   :  { %18908 = vst [vmem:[#allocation86_spill] sm:$0xff] %v15653_v57  ;;  %6090 = vmatmul.bf16.gmra.mxu2 %v18910_v33  ;;  %v18914_v33 = vld [vmem:[#allocation153_spill] sm:$0xff]  ;;  %v10064_v4 = vld [vmem:[#allocation2 + $0x154] sm:$0xf0] }
 0x55e   :  { %6179 = vmatmul.bf16.gmra.mxu3 %v18911_v25  ;;  %6383 = vmatpush.bf16.msra.mxu2 %v9548_v11  ;;  %v10028_v18 = vld [vmem:[#allocation2 + $0x34] sm:$0xf0] }
 0x560   :  { %v6051_v16 = vpop.f32.mrf.mxu2  ;;  %v5875_v39 = vpop.f32.mrf.mxu0 }
 0x561   :  { %v6052_v59 = vadd.f32 %v6051_v16, %v5963_v19  ;;  %v6140_v2 = vpop.f32.mrf.mxu3  ;;  %v5964_v54 = vpop.f32.mrf.mxu1  ;;  %v18915_v19 = vld [vmem:[#allocation154_spill] sm:$0xff]  ;;  %v18916_v16 = vld [vmem:[#allocation155_spill] sm:$0xff] }
 0x562   :  { %v5965_v3 = vadd.f32 %v5964_v54, %v5875_v39  ;;  %v10128_v39 = vld [vmem:[#allocation2 + $0x354] sm:$0xf0]  ;;  %v9291_v54 = vld [vmem:[#allocation2 + $0x48] sm:$0xf] }
 0x563   :  { %v15659_v9 = vadd.f32 %v6140_v2, %v6052_v59  ;;  %v18917_v59 = vld [vmem:[#allocation156_spill] sm:$0xff] }
 0x564   :  { %v9675_v2 = vld [vmem:[#allocation2 + $0x348] sm:$0xf] }
 0x565   :  { %18912 = vst [vmem:[#allocation138_spill] sm:$0xff] %v15659_v9 }
 0x568   :  { %v6053_v62 = vpop.f32.mrf.mxu2  ;;  %v5878_v27 = vpop.f32.mrf.mxu0 }
 0x569   :  { %v6054_v12 = vadd.f32 %v6053_v62, %v5965_v3  ;;  %v6142_v5 = vpop.f32.mrf.mxu3  ;;  %v5967_v35 = vpop.f32.mrf.mxu1  ;;  %v9676_v3 = vor.u32 %v10128_v39, %v9675_v2  ;;  %v9419_v62 = vld [vmem:[#allocation2 + $0x148] sm:$0xf]  ;;  %v10060_v2 = vld [vmem:[#allocation2 + $0x134] sm:$0xf0] }
 0x56a   :  { %v5968_v25 = vadd.f32 %v5967_v35, %v5878_v27  ;;  %v9292_v27 = vor.u32 %v10032_v26, %v9291_v54  ;;  %v9420_v35 = vor.u32 %v10064_v4, %v9419_v62  ;;  %v9531_v39 = vld [vmem:[#allocation2 + $0x228] sm:$0xf]  ;;  %v9404_v30 = vor.u32 %v10060_v2, %v9403_v8 }
 0x56b   :  { %v15661_v52 = vadd.f32 %v6142_v5, %v6054_v12  ;;  %5917 = vmatmul.bf16.gmra.mxu0 %v18914_v33  ;;  %6472 = vmatpush.bf16.msra.mxu3 %v9676_v3  ;;  %v9259_v3 = vld [vmem:[#allocation2 + $0x8] sm:$0xf] }
 0x56c   :  { %6006 = vmatmul.bf16.gmra.mxu1 %v18915_v19  ;;  %6205 = vmatpush.bf16.msra.mxu0 %v9292_v27  ;;  %v9387_v26 = vld [vmem:[#allocation2 + $0x108] sm:$0xf]  ;;  %v10088_v27 = vld [vmem:[#allocation2 + $0x214] sm:$0xf0] }
 0x56d   :  { %18913 = vst [vmem:[#allocation162_spill] sm:$0xff] %v15661_v52  ;;  %6095 = vmatmul.bf16.gmra.mxu2 %v18916_v16  ;;  %6294 = vmatpush.bf16.msra.mxu1 %v9420_v35  ;;  %v9643_v2 = vld [vmem:[#allocation2 + $0x308] sm:$0xf] }
 0x56e   :  { %6184 = vmatmul.bf16.gmra.mxu3 %v18917_v59  ;;  %v9275_v59 = vld [vmem:[#allocation2 + $0x28] sm:$0xf] }
 0x56f   :  { %v9276_v22 = vor.u32 %v10028_v18, %v9275_v59  ;;  %v10056_v59 = vld [vmem:[#allocation2 + $0x114] sm:$0xf0] }
 0x570   :  { %v6056_v38 = vpop.f32.mrf.mxu2  ;;  %v5880_v5 = vpop.f32.mrf.mxu0 }
 0x571   :  { %v6057_v11 = vadd.f32 %v6056_v38, %v5968_v25  ;;  %v6145_v12 = vpop.f32.mrf.mxu3  ;;  %v5969_v33 = vpop.f32.mrf.mxu1  ;;  %v9532_v25 = vor.u32 %v10092_v44, %v9531_v39  ;;  %v9659_v38 = vld [vmem:[#allocation2 + $0x328] sm:$0xf]  ;;  %6206 = vmatpush.bf16.msra.mxu0 %v9276_v22  ;;  %6295 = vmatpush.bf16.msra.mxu1 %v9404_v30  ;;  %v9388_v44 = vor.u32 %v10056_v59, %v9387_v26  ;;  %v10120_v22 = vld [vmem:[#allocation2 + $0x314] sm:$0xf0] }
 0x572   :  { %v5970_v16 = vadd.f32 %v5969_v33, %v5880_v5  ;;  %v9660_v4 = vor.u32 %v10124_v14, %v9659_v38  ;;  %v10024_v33 = vld [vmem:[#allocation2 + $0x14] sm:$0xf0]  ;;  %v9515_v5 = vld [vmem:[#allocation2 + $0x208] sm:$0xf]  ;;  %v9644_v39 = vor.u32 %v10120_v22, %v9643_v2  ;;  %v7089_v38 = vmul.f32 %v15635_v37, %v15635_v37 }
 0x573   :  { %v15667_v19 = vadd.f32 %v6145_v12, %v6057_v11  ;;  %6384 = vmatpush.bf16.msra.mxu2 %v9532_v25  ;;  %v9260_v18 = vor.u32 %v10024_v33, %v9259_v3  ;;  %v9516_v35 = vor.u32 %v10088_v27, %v9515_v5  ;;  %v7081_v25 = vmul.f32 %v15617_v13, %v15617_v13 }
 0x574   :  { %6473 = vmatpush.bf16.msra.mxu3 %v9660_v4  ;;  %v7101_v2 = vmul.f32 %v15645_v60, %v15645_v60 }
 0x575   :  { %18918 = vst [vmem:[#allocation46_spill] sm:$0xff] %v15667_v19  ;;  %6207 = vmatpush.bf16.msra.mxu0 %v9260_v18  ;;  %6296 = vmatpush.bf16.msra.mxu1 %v9388_v44 }
 0x577   :  { %6385 = vmatpush.bf16.msra.mxu2 %v9516_v35 }
 0x578   :  { %v6058_v54 = vpop.f32.mrf.mxu2  ;;  %v5883_v12 = vpop.f32.mrf.mxu0  ;;  %6474 = vmatpush.bf16.msra.mxu3 %v9644_v39  ;;  %v7105_v39 = vmul.f32 %v15651_v61, %v15651_v61 }
 0x579   :  { %v6059_v62 = vadd.f32 %v6058_v54, %v5970_v16  ;;  %v6147_v11 = vpop.f32.mrf.mxu3  ;;  %v5972_v8 = vpop.f32.mrf.mxu1  ;;  %v7085_v16 = vmul.f32 %v15621_v40, %v15621_v40  ;;  %v6933_v54 = vadd.f32 %v15621_v40, %v15617_v13 }
 0x57a   :  { %v5973_v30 = vadd.f32 %v5972_v8, %v5883_v12  ;;  %v7097_v8 = vmul.f32 %v15643_v34, %v15643_v34 }
 0x57b   :  { %v15669_v14 = vadd.f32 %v6147_v11, %v6059_v62  ;;  %5922 = vmatmul.bf16.gmra.mxu0 %v15274_v10  ;;  %v7229_v62 = vadd.f32 %v7085_v16, %v7081_v25  ;;  %v7093_v11 = vmul.f32 %v15637_v51, %v15637_v51  ;;  %v6934_v18 = vadd.f32 %v6933_v54, %v15635_v37 }
 0x57c   :  { %6011 = vmatmul.bf16.gmra.mxu1 %v15280_v6 }
 0x57d   :  { %18919 = vst [vmem:[#allocation163_spill] sm:$0xff] %v15669_v14  ;;  %6100 = vmatmul.bf16.gmra.mxu2 %v15286_v17  ;;  %v7230_v27 = vadd.f32 %v7229_v62, %v7089_v38  ;;  %v6935_v44 = vadd.f32 %v6934_v18, %v15637_v51 }
 0x57e   :  { %6189 = vmatmul.bf16.gmra.mxu3 %v15292_v58 }
 0x57f   :  { %v7231_v35 = vadd.f32 %v7230_v27, %v7093_v11  ;;  %v6936_v22 = vadd.f32 %v6935_v44, %v15643_v34  ;;  %v7113_v27 = vmul.f32 %v15659_v9, %v15659_v9  ;;  %v7117_v44 = vmul.f32 %v15661_v52, %v15661_v52 }
 0x580   :  { %v6061_v4 = vpop.f32.mrf.mxu2  ;;  %v5885_v26 = vpop.f32.mrf.mxu0 }
 0x581   :  { %v6062_v3 = vadd.f32 %v6061_v4, %v5973_v30  ;;  %v6150_v33 = vpop.f32.mrf.mxu3  ;;  %v5974_v12 = vpop.f32.mrf.mxu1  ;;  %v7232_v30 = vadd.f32 %v7231_v35, %v7097_v8  ;;  %v6937_v25 = vadd.f32 %v6936_v22, %v15645_v60 }
 0x582   :  { %v5975_v5 = vadd.f32 %v5974_v12, %v5885_v26 }
 0x583   :  { %v15686_v59 = vadd.f32 %v6150_v33, %v6062_v3  ;;  %v7233_v3 = vadd.f32 %v7232_v30, %v7101_v2  ;;  %v7109_v33 = vmul.f32 %v15653_v57, %v15653_v57  ;;  %v6938_v62 = vadd.f32 %v6937_v25, %v15651_v61 }
 0x585   :  { %18920 = vst [vmem:[#allocation40_spill] sm:$0xff] %v15686_v59  ;;  %v7234_v18 = vadd.f32 %v7233_v3, %v7105_v39  ;;  %v7121_v39 = vmul.f32 %v15667_v19, %v15667_v19 }
 0x587   :  { %v7235_v8 = vadd.f32 %v7234_v18, %v7109_v33  ;;  %v7125_v33 = vmul.f32 %v15669_v14, %v15669_v14 }
 0x588   :  { %v6063_v16 = vpop.f32.mrf.mxu2  ;;  %v5888_v54 = vpop.f32.mrf.mxu0 }
 0x589   :  { %v6064_v4 = vadd.f32 %v6063_v16, %v5975_v5  ;;  %v6152_v38 = vpop.f32.mrf.mxu3  ;;  %v5977_v26 = vpop.f32.mrf.mxu1  ;;  %v6939_v5 = vadd.f32 %v6938_v62, %v15653_v57  ;;  %v7236_v2 = vadd.f32 %v7235_v8, %v7113_v27 }
 0x58a   :  { %v5978_v12 = vadd.f32 %v5977_v26, %v5888_v54 }
 0x58b   :  { %v15700_v11 = vadd.f32 %v6152_v38, %v6064_v4  ;;  %5927 = vmatmul.bf16.gmra.mxu0 %v18852_v46  ;;  %v6940_v35 = vadd.f32 %v6939_v5, %v15659_v9  ;;  %v7237_v38 = vadd.f32 %v7236_v2, %v7117_v44  ;;  %v7129_v5 = vmul.f32 %v15686_v59, %v15686_v59 }
 0x58c   :  { %6016 = vmatmul.bf16.gmra.mxu1 %v18853_v7 }
 0x58d   :  { %18921 = vst [vmem:[#allocation140_spill] sm:$0xff] %v15700_v11  ;;  %6105 = vmatmul.bf16.gmra.mxu2 %v18854_v32  ;;  %v6941_v30 = vadd.f32 %v6940_v35, %v15661_v52  ;;  %v7238_v18 = vadd.f32 %v7237_v38, %v7121_v39  ;;  %v7133_v44 = vmul.f32 %v15700_v11, %v15700_v11 }
 0x58e   :  { %6194 = vmatmul.bf16.gmra.mxu3 %v18855_v23 }
 0x58f   :  { %v6942_v3 = vadd.f32 %v6941_v30, %v15667_v19  ;;  %v7239_v8 = vadd.f32 %v7238_v18, %v7125_v33 }
 0x590   :  { %v6066_v22 = vpop.f32.mrf.mxu2  ;;  %v5890_v4 = vpop.f32.mrf.mxu0 }
 0x591   :  { %v6067_v16 = vadd.f32 %v6066_v22, %v5978_v12  ;;  %v6155_v25 = vpop.f32.mrf.mxu3  ;;  %v5979_v54 = vpop.f32.mrf.mxu1  ;;  %v6943_v27 = vadd.f32 %v6942_v3, %v15669_v14  ;;  %v7240_v2 = vadd.f32 %v7239_v8, %v7129_v5 }
 0x592   :  { %v5980_v62 = vadd.f32 %v5979_v54, %v5890_v4 }
 0x593   :  { %v15718_v26 = vadd.f32 %v6155_v25, %v6067_v16  ;;  %v6944_v12 = vadd.f32 %v6943_v27, %v15686_v59  ;;  %v7241_v38 = vadd.f32 %v7240_v2, %v7133_v44 }
 0x595   :  { %18922 = vst [vmem:[#allocation84_spill] sm:$0xff] %v15718_v26  ;;  %v6945_v22 = vadd.f32 %v6944_v12, %v15700_v11  ;;  %v7137_v30 = vmul.f32 %v15718_v26, %v15718_v26 }
 0x597   :  { %v6946_v54 = vadd.f32 %v6945_v22, %v15718_v26  ;;  %v7242_v18 = vadd.f32 %v7241_v38, %v7137_v30  ;;  %v18924_v30 = vsub.f32 %v15502_v24, %v15506_v43 }
 0x598   :  { %v6068_v35 = vpop.f32.mrf.mxu2  ;;  %v5893_v25 = vpop.f32.mrf.mxu0 }
 0x599   :  { %v6069_v16 = vadd.f32 %v6068_v35, %v5980_v62  ;;  %v6157_v39 = vpop.f32.mrf.mxu3  ;;  %v5982_v4 = vpop.f32.mrf.mxu1 }
 0x59a   :  { %v5983_v33 = vadd.f32 %v5982_v4, %v5893_v25 }
 0x59b   :  { %v15730_v3 = vadd.f32 %v6157_v39, %v6069_v16  ;;  %6208 = vmatmul.bf16.vlgmr.msra.gmra.mxu0 %v14931_v21  ;;  %v7408_v39 = vmax.f32 %v18924_v30, 0.0 }
 0x59c   :  { %6297 = vmatmul.bf16.vlgmr.msra.gmra.mxu1 %v14937_v28 }
 0x59d   :  { %18923 = vst [vmem:[#allocation95_spill] sm:$0xff] %v15730_v3  ;;  %v6947_v27 = vadd.f32 %v6946_v54, %v15730_v3  ;;  %v7141_v5 = vmul.f32 %v15730_v3, %v15730_v3  ;;  %6386 = vmatmul.bf16.vlgmr.msra.gmra.mxu2 %v14945_v15  ;;  %v15744_v51 = vadd.f32 1e-05, %v7408_v39 }
 0x59e   :  { %6475 = vmatmul.bf16.vlgmr.msra.gmra.mxu3 %v14951_v48 }
 0x59f   :  { %v6948_v62 = vrot.slane %v6947_v27, 4  ;;  %v7243_v8 = vadd.f32 %v7242_v18, %v7141_v5  ;;  %10219 = vrsqrt.f32 %v15744_v51  ;;  %vm7430_vm10 = vweird.f32 %v15744_v51 }
 0x5a0   :  { %v6071_v12 = vpop.f32.mrf.mxu2  ;;  %v5895_v16 = vpop.f32.mrf.mxu0 }
 0x5a1   :  { %v6949_v44 = vadd.f32 %v6948_v62, %v6947_v27  ;;  %v7244_v35 = vrot.slane %v7243_v8, 4  ;;  %v6072_v2 = vadd.f32 %v6071_v12, %v5983_v33  ;;  %v6160_v22 = vpop.f32.mrf.mxu3  ;;  %v5984_v25 = vpop.f32.mrf.mxu1 }
 0x5a2   :  { %v5985_v13 = vadd.f32 %v5984_v25, %v5895_v16 }
 0x5a3   :  { %v6950_v4 = vrot.slane %v6949_v44, 2  ;;  %v7245_v38 = vadd.f32 %v7244_v35, %v7243_v8  ;;  %v15742_v54 = vadd.f32 %v6160_v22, %v6072_v2 }
 0x5a5   :  { %18925 = vst [vmem:[#allocation48_spill] sm:$0xff] %v15742_v54  ;;  %v6951_v40 = vadd.f32 %v6950_v4, %v6949_v44  ;;  %v7246_v37 = vrot.slane %v7245_v38, 2 }
 0x5a7   :  { %v6952_v18 = vrot.slane %v6951_v40, 1  ;;  %v7247_v27 = vadd.f32 %v7246_v37, %v7245_v38 }
 0x5a8   :  { %v6073_v5 = vpop.f32.mrf.mxu2  ;;  %v5898_v60 = vpop.f32.mrf.mxu0 }
 0x5a9   :  { %v6953_v33 = vadd.f32 %v6952_v18, %v6951_v40  ;;  %v7248_v62 = vrot.slane %v7247_v27, 1  ;;  %v6074_v12 = vadd.f32 %v6073_v5, %v5985_v13  ;;  %v6162_v34 = vpop.f32.mrf.mxu3  ;;  %v5987_v24 = vpop.f32.mrf.mxu1 }
 0x5aa   :  { %v5988_v44 = vadd.f32 %v5987_v24, %v5898_v60  ;;  %v10220_v40 = vpop.eup %10219 }
 0x5ab   :  { %v7249_v43 = vadd.f32 %v7248_v62, %v7247_v27  ;;  %v15747_v8 = vmul.f32 0.0078125, %v6953_v33  ;;  %v15749_v35 = vadd.f32 %v6162_v34, %v6074_v12  ;;  %6213 = vmatmul.bf16.gmra.mxu0 %v14957_v56  ;;  %v7425_v18 = vmul.f32 %v10220_v40, %v15744_v51  ;;  %v10146_v51 = vld [vmem:[#allocation2 + $0x3ec] sm:$0xf] }
 0x5ac   :  { %6302 = vmatmul.bf16.gmra.mxu1 %v14963_v42  ;;  %vm7431_vm7 = vweird.f32 %v10220_v40 }
 0x5ad   :  { %18926 = vst [vmem:[#allocation157_spill] sm:$0xff] %v15747_v8  ;;  %v7385_v2 = vmul.f32 0.0078125, %v7249_v43  ;;  %v7393_v37 = vmul.f32 %v15747_v8, %v15747_v8  ;;  %6391 = vmatmul.bf16.gmra.mxu2 %v14971_v29  ;;  %v7426_v27 = vmul.f32 %v10220_v40, %v7425_v18  ;;  %vm7432_vm11 = vmor %vm7430_vm10, %vm7431_vm7  ;;  %vm19064_vm10 = vcmask 1041408  }
 0x5ae   :  { %18927 = vst [vmem:[#allocation164_spill] sm:$0xff] %v15749_v35  ;;  %6480 = vmatmul.bf16.gmra.mxu3 %v14977_v31 }
 0x5af   :  { %v7401_v13 = vsub.f32 %v7385_v2, %v7393_v37  ;;  %v7427_v37 = vmul.f32 0.5, %v7426_v27 }
 0x5b0   :  { %v6076_v22 = vpop.f32.mrf.mxu2  ;;  %v5900_v39 = vpop.f32.mrf.mxu0 }
 0x5b1   :  { %v7409_v16 = vmax.f32 %v7401_v13, 0.0  ;;  %v6077_v30 = vadd.f32 %v6076_v22, %v5988_v44  ;;  %v6165_v34 = vpop.f32.mrf.mxu3  ;;  %v5989_v60 = vpop.f32.mrf.mxu1 }
 0x5b2   :  { %v5990_v38 = vadd.f32 %v5989_v60, %v5900_v39 }
 0x5b3   :  { %v7417_v25 = vadd.f32 1e-05, %v7409_v16  ;;  %v15757_v4 = vadd.f32 %v6165_v34, %v6077_v30  ;;  %v7428_v16 = vsub.f32 1.5, %v7427_v37 }
 0x5b5   :  { %18928 = vst [vmem:[#allocation49_spill] sm:$0xff] %v15757_v4  ;;  %10221 = vrsqrt.f32 %v7417_v25  ;;  %vm7440_vm8 = vweird.f32 %v7417_v25 }
 0x5b8   :  { %v6078_v5 = vpop.f32.mrf.mxu2  ;;  %v5903_v12 = vpop.f32.mrf.mxu0 }
 0x5b9   :  { %v6079_v33 = vadd.f32 %v6078_v5, %v5990_v38  ;;  %v6167_v62 = vpop.f32.mrf.mxu3  ;;  %v5992_v24 = vpop.f32.mrf.mxu1 }
 0x5ba   :  { %v5993_v44 = vadd.f32 %v5992_v24, %v5903_v12 }
 0x5bb   :  { %v10222_v43 = vpop.eup %10221  ;;  %v15760_v2 = vadd.f32 %v6167_v62, %v6079_v33  ;;  %6218 = vmatmul.bf16.gmra.mxu0 %v14983_v49  ;;  %v7429_v62 = vmul.f32 %v10220_v40, %v7428_v16 }
 0x5bc   :  { %v7435_v13 = vmul.f32 %v10222_v43, %v7417_v25  ;;  %6307 = vmatmul.bf16.gmra.mxu1 %v14989_v53  ;;  %vm7441_vm6 = vweird.f32 %v10222_v43 }
 0x5bd   :  { %18929 = vst [vmem:[#allocation158_spill] sm:$0xff] %v15760_v2  ;;  %6396 = vmatmul.bf16.gmra.mxu2 %v14995_v36  ;;  %vm7442_vm9 = vmor %vm7440_vm8, %vm7441_vm6 }
 0x5be   :  { %v7436_v22 = vmul.f32 %v10222_v43, %v7435_v13  ;;  %6485 = vmatmul.bf16.gmra.mxu3 %v15001_v20  ;;  %v10114_v13 = vld [vmem:[#allocation2 + $0x2ec] sm:$0xf] }
 0x5c0   :  { %v7437_v30 = vmul.f32 0.5, %v7436_v22  ;;  %v6081_v34 = vpop.f32.mrf.mxu2  ;;  %v5905_v38 = vpop.f32.mrf.mxu0  ;;  %v7433_v22 = vsel %vm7432_vm11, %v10220_v40, %v7429_v62  ;;  %v9757_v40 = vld [vmem:[#allocation2 + $0x3f8] sm:$0xf0] }
 0x5c1   :  { %v6082_v39 = vadd.f32 %v6081_v34, %v5993_v44  ;;  %v6170_v60 = vpop.f32.mrf.mxu3  ;;  %v5994_v5 = vpop.f32.mrf.mxu1  ;;  %v9629_v44 = vld [vmem:[#allocation2 + $0x2f8] sm:$0xf0] }
 0x5c2   :  { %v7438_v18 = vsub.f32 1.5, %v7437_v30  ;;  %v5995_v33 = vadd.f32 %v5994_v5, %v5905_v38  ;;  %v9632_v30 = vor.u32 %v10114_v13, %v9629_v44  ;;  %v9373_v62 = vld [vmem:[#allocation2 + $0xf8] sm:$0xf0] }
 0x5c3   :  { %v15766_v27 = vadd.f32 %v6170_v60, %v6082_v39 }
 0x5c4   :  { %v7439_v12 = vmul.f32 %v10222_v43, %v7438_v18  ;;  %6734 = vmatpush.bf16.msrb.mxu2 %v9632_v30 }
 0x5c5   :  { %18930 = vst [vmem:[#allocation105_spill] sm:$0xff] %v15766_v27 }
 0x5c6   :  { %v7443_v24 = vsel %vm7442_vm9, %v10222_v43, %v7439_v12  ;;  %v10050_v43 = vld [vmem:[#allocation2 + $0xec] sm:$0xf]  ;;  %vm19062_vm9 = vcmask 1042434  }
 0x5c7   :  { %v7512_v37 = vrot.slane %v7443_v24, 7  ;;  %v10082_v12 = vld [vmem:[#allocation2 + $0x1ec] sm:$0xf]  ;;  %v9501_v24 = vld [vmem:[#allocation2 + $0x1f8] sm:$0xf0]  ;;  %vm19073_vm11 = vmmov %vm19062_vm9 }
 0x5c8   :  { %v6083_v34 = vpop.f32.mrf.mxu2  ;;  %v5908_v16 = vpop.f32.mrf.mxu0 }
 0x5c9   :  { %v15770_v61 = vsel %vm2393_vm0, %v7433_v22, %v7512_v37  ;;  %v6084_v39 = vadd.f32 %v6083_v34, %v5995_v33  ;;  %v6172_v60 = vpop.f32.mrf.mxu3  ;;  %v5997_v38 = vpop.f32.mrf.mxu1  ;;  %v9760_v33 = vor.u32 %v10146_v51, %v9757_v40  ;;  %v9376_v22 = vor.u32 %v10050_v43, %v9373_v62 }
 0x5ca   :  { %18931 = vst [vmem:[#allocation50_spill] sm:$0xff] %v15770_v61  ;;  %v5998_v18 = vadd.f32 %v5997_v38, %v5908_v16  ;;  %v9504_v34 = vor.u32 %v10082_v12, %v9501_v24 }
 0x5cb   :  { %v15772_v25 = vadd.f32 %v6172_v60, %v6084_v39  ;;  %6223 = vmatmul.bf16.gmra.mxu0 %v18813_v63  ;;  %6823 = vmatpush.bf16.msrb.mxu3 %v9760_v33 }
 0x5cc   :  { %6312 = vmatmul.bf16.gmra.mxu1 %v18814_v45  ;;  %6556 = vmatpush.bf16.msrb.mxu0 %v9376_v22 }
 0x5cd   :  { %18932 = vst [vmem:[#allocation106_spill] sm:$0xff] %v15772_v25  ;;  %6401 = vmatmul.bf16.gmra.mxu2 %v18815_v1  ;;  %6645 = vmatpush.bf16.msrb.mxu1 %v9504_v34 }
 0x5ce   :  { %6490 = vmatmul.bf16.gmra.mxu3 %v18816_v47 }
 0x5d0   :  { %v6086_v5 = vpop.f32.mrf.mxu2  ;;  %v5910_v44 = vpop.f32.mrf.mxu0 }
 0x5d1   :  { %v6087_v37 = vadd.f32 %v6086_v5, %v5998_v18  ;;  %v6175_v13 = vpop.f32.mrf.mxu3  ;;  %v5999_v30 = vpop.f32.mrf.mxu1 }
 0x5d2   :  { %v6000_v60 = vadd.f32 %v5999_v30, %v5910_v44 }
 0x5d3   :  { %v15778_v39 = vadd.f32 %v6175_v13, %v6087_v37  ;;  %v10110_v37 = vld [vmem:[#allocation2 + $0x2cc] sm:$0xf] }
 0x5d5   :  { %18933 = vst [vmem:[#allocation142_spill] sm:$0xff] %v15778_v39 }
 0x5d8   :  { %v6088_v16 = vpop.f32.mrf.mxu2  ;;  %v5913_v9 = vpop.f32.mrf.mxu0 }
 0x5d9   :  { %v6089_v38 = vadd.f32 %v6088_v16, %v6000_v60  ;;  %v6177_v57 = vpop.f32.mrf.mxu3  ;;  %v6002_v51 = vpop.f32.mrf.mxu1 }
 0x5da   :  { %v6003_v52 = vadd.f32 %v6002_v51, %v5913_v9  ;;  %v18939_v51 = vld [vmem:[#allocation78_spill] sm:$0xff] }
 0x5db   :  { %v15780_v40 = vadd.f32 %v6177_v57, %v6089_v38  ;;  %6228 = vmatmul.bf16.gmra.mxu0 %v15031_v0  ;;  %v9613_v57 = vld [vmem:[#allocation2 + $0x2d8] sm:$0xf0]  ;;  %v18937_v38 = vld [vmem:[#allocation76_spill] sm:$0xff] }
 0x5dc   :  { %6317 = vmatmul.bf16.gmra.mxu1 %v15037_v50  ;;  %v9616_v9 = vor.u32 %v10110_v37, %v9613_v57  ;;  %v9357_v37 = vld [vmem:[#allocation2 + $0xd8] sm:$0xf0]  ;;  %v10078_v57 = vld [vmem:[#allocation2 + $0x1cc] sm:$0xf] }
 0x5dd   :  { %18934 = vst [vmem:[#allocation55_spill] sm:$0xff] %v15780_v40  ;;  %6406 = vmatmul.bf16.gmra.mxu2 %v15043_v41 }
 0x5de   :  { %6495 = vmatmul.bf16.gmra.mxu3 %v15049_v55  ;;  %6735 = vmatpush.bf16.msrb.mxu2 %v9616_v9 }
 0x5e0   :  { %v6091_v18 = vpop.f32.mrf.mxu2  ;;  %v5915_v33 = vpop.f32.mrf.mxu0 }
 0x5e1   :  { %v6092_v43 = vadd.f32 %v6091_v18, %v6003_v52  ;;  %v6180_v5 = vpop.f32.mrf.mxu3  ;;  %v6004_v62 = vpop.f32.mrf.mxu1  ;;  %v18938_v52 = vld [vmem:[#allocation77_spill] sm:$0xff]  ;;  %v18940_v18 = vld [vmem:[#allocation79_spill] sm:$0xff] }
 0x5e2   :  { %v6005_v24 = vadd.f32 %v6004_v62, %v5915_v33  ;;  %v10046_v33 = vld [vmem:[#allocation2 + $0xcc] sm:$0xf] }
 0x5e3   :  { %v15786_v12 = vadd.f32 %v6180_v5, %v6092_v43  ;;  %v10142_v43 = vld [vmem:[#allocation2 + $0x3cc] sm:$0xf]  ;;  %v9741_v5 = vld [vmem:[#allocation2 + $0x3d8] sm:$0xf0] }
 0x5e5   :  { %18935 = vst [vmem:[#allocation143_spill] sm:$0xff] %v15786_v12 }
 0x5e8   :  { %v6093_v13 = vpop.f32.mrf.mxu2  ;;  %v5918_v34 = vpop.f32.mrf.mxu0 }
 0x5e9   :  { %v6094_v44 = vadd.f32 %v6093_v13, %v6005_v24  ;;  %v6182_v22 = vpop.f32.mrf.mxu3  ;;  %v6007_v30 = vpop.f32.mrf.mxu1  ;;  %v9744_v24 = vor.u32 %v10142_v43, %v9741_v5  ;;  %v9485_v13 = vld [vmem:[#allocation2 + $0x1d8] sm:$0xf0] }
 0x5ea   :  { %v6008_v16 = vadd.f32 %v6007_v30, %v5918_v34  ;;  %v9360_v34 = vor.u32 %v10046_v33, %v9357_v37  ;;  %v9488_v30 = vor.u32 %v10078_v57, %v9485_v13  ;;  %v18945_v33 = vld [vmem:[#allocation23_spill] sm:$0xff] }
 0x5eb   :  { %v15788_v60 = vadd.f32 %v6182_v22, %v6094_v44  ;;  %6233 = vmatmul.bf16.gmra.mxu0 %v18937_v38  ;;  %6824 = vmatpush.bf16.msrb.mxu3 %v9744_v24  ;;  %v7149_v24 = vmul.f32 %v15749_v35, %v15749_v35 }
 0x5ec   :  { %6322 = vmatmul.bf16.gmra.mxu1 %v18938_v52  ;;  %6557 = vmatpush.bf16.msrb.mxu0 %v9360_v34 }
 0x5ed   :  { %18936 = vst [vmem:[#allocation56_spill] sm:$0xff] %v15788_v60  ;;  %6411 = vmatmul.bf16.gmra.mxu2 %v18939_v51  ;;  %6646 = vmatpush.bf16.msrb.mxu1 %v9488_v30 }
 0x5ee   :  { %6500 = vmatmul.bf16.gmra.mxu3 %v18940_v18 }
 0x5f0   :  { %v6096_v62 = vpop.f32.mrf.mxu2  ;;  %v5920_v22 = vpop.f32.mrf.mxu0 }
 0x5f1   :  { %v6097_v9 = vadd.f32 %v6096_v62, %v6008_v16  ;;  %v6185_v44 = vpop.f32.mrf.mxu3  ;;  %v6009_v19 = vpop.f32.mrf.mxu1  ;;  %v18943_v16 = vld [vmem:[#allocation123_spill] sm:$0xff]  ;;  %v18944_v62 = vld [vmem:[#allocation124_spill] sm:$0xff] }
 0x5f2   :  { %v6010_v59 = vadd.f32 %v6009_v19, %v5920_v22  ;;  %v18946_v19 = vld [vmem:[#allocation24_spill] sm:$0xff] }
 0x5f3   :  { %v15794_v14 = vadd.f32 %v6185_v44, %v6097_v9  ;;  %v7157_v9 = vmul.f32 %v15760_v2, %v15760_v2 }
 0x5f5   :  { %18941 = vst [vmem:[#allocation61_spill] sm:$0xff] %v15794_v14 }
 0x5f8   :  { %v6098_v11 = vpop.f32.mrf.mxu2  ;;  %v5923_v8 = vpop.f32.mrf.mxu0 }
 0x5f9   :  { %v6099_v26 = vadd.f32 %v6098_v11, %v6010_v59  ;;  %v6187_v3 = vpop.f32.mrf.mxu3  ;;  %v6012_v43 = vpop.f32.mrf.mxu1  ;;  %v7145_v59 = vmul.f32 %v15742_v54, %v15742_v54  ;;  %v7153_v11 = vmul.f32 %v15757_v4, %v15757_v4 }
 0x5fa   :  { %v6013_v61 = vadd.f32 %v6012_v43, %v5923_v8 }
 0x5fb   :  { %v15796_v5 = vadd.f32 %v6187_v3, %v6099_v26  ;;  %6238 = vmatmul.bf16.gmra.mxu0 %v18943_v16  ;;  %v7017_v3 = vadd.f32 %v15749_v35, %v15742_v54  ;;  %v7313_v13 = vadd.f32 %v7149_v24, %v7145_v59  ;;  %v18949_v35 = vld [vmem:[#allocation115_spill] sm:$0xff] }
 0x5fc   :  { %6327 = vmatmul.bf16.gmra.mxu1 %v18944_v62 }
 0x5fd   :  { %18942 = vst [vmem:[#allocation53_spill] sm:$0xff] %v15796_v5  ;;  %6416 = vmatmul.bf16.gmra.mxu2 %v18945_v33  ;;  %v7018_v22 = vadd.f32 %v7017_v3, %v15757_v4  ;;  %v7314_v43 = vadd.f32 %v7313_v13, %v7153_v11 }
 0x5fe   :  { %6505 = vmatmul.bf16.gmra.mxu3 %v18946_v19  ;;  %v7161_v19 = vmul.f32 %v15766_v27, %v15766_v27 }
 0x5ff   :  { %v7019_v33 = vadd.f32 %v7018_v22, %v15760_v2  ;;  %v7315_v54 = vadd.f32 %v7314_v43, %v7157_v9 }
 0x600   :  { %v6101_v26 = vpop.f32.mrf.mxu2  ;;  %v5925_v57 = vpop.f32.mrf.mxu0 }
 0x601   :  { %v6102_v8 = vadd.f32 %v6101_v26, %v6013_v61  ;;  %v6190_v37 = vpop.f32.mrf.mxu3  ;;  %v6014_v44 = vpop.f32.mrf.mxu1  ;;  %v7165_v61 = vmul.f32 %v15772_v25, %v15772_v25  ;;  %v7020_v24 = vadd.f32 %v7019_v33, %v15766_v27  ;;  %v7316_v59 = vadd.f32 %v7315_v54, %v7161_v19 }
 0x602   :  { %v6015_v30 = vadd.f32 %v6014_v44, %v5925_v57  ;;  %v7169_v26 = vmul.f32 %v15778_v39, %v15778_v39  ;;  %v7173_v44 = vmul.f32 %v15780_v40, %v15780_v40  ;;  %v7177_v19 = vmul.f32 %v15786_v12, %v15786_v12 }
 0x603   :  { %v15813_v34 = vadd.f32 %v6190_v37, %v6102_v8  ;;  %v7021_v8 = vadd.f32 %v7020_v24, %v15772_v25  ;;  %v7317_v13 = vadd.f32 %v7316_v59, %v7165_v61  ;;  %v18950_v24 = vld [vmem:[#allocation116_spill] sm:$0xff]  ;;  %v18951_v61 = vld [vmem:[#allocation117_spill] sm:$0xff] }
 0x605   :  { %18947 = vst [vmem:[#allocation62_spill] sm:$0xff] %v15813_v34  ;;  %v7022_v22 = vadd.f32 %v7021_v8, %v15778_v39  ;;  %v7318_v54 = vadd.f32 %v7317_v13, %v7169_v26  ;;  %v18952_v8 = vld [vmem:[#allocation118_spill] sm:$0xff]  ;;  %v7185_v13 = vmul.f32 %v15794_v14, %v15794_v14 }
 0x607   :  { %v7319_v59 = vadd.f32 %v7318_v54, %v7173_v44  ;;  %v7189_v54 = vmul.f32 %v15796_v5, %v15796_v5 }
 0x608   :  { %v6103_v3 = vpop.f32.mrf.mxu2  ;;  %v5928_v57 = vpop.f32.mrf.mxu0 }
 0x609   :  { %v6104_v37 = vadd.f32 %v6103_v3, %v6015_v30  ;;  %v6192_v11 = vpop.f32.mrf.mxu3  ;;  %v6017_v9 = vpop.f32.mrf.mxu1  ;;  %v7023_v30 = vadd.f32 %v7022_v22, %v15780_v40  ;;  %v7181_v3 = vmul.f32 %v15788_v60, %v15788_v60  ;;  %v7320_v26 = vadd.f32 %v7319_v59, %v7177_v19 }
 0x60a   :  { %v6018_v33 = vadd.f32 %v6017_v9, %v5928_v57 }
 0x60b   :  { %v15827_v43 = vadd.f32 %v6192_v11, %v6104_v37  ;;  %6243 = vmatmul.bf16.gmra.mxu0 %v18949_v35  ;;  %v7024_v37 = vadd.f32 %v7023_v30, %v15786_v12  ;;  %v7321_v2 = vadd.f32 %v7320_v26, %v7181_v3 }
 0x60c   :  { %6332 = vmatmul.bf16.gmra.mxu1 %v18950_v24 }
 0x60d   :  { %18948 = vst [vmem:[#allocation54_spill] sm:$0xff] %v15827_v43  ;;  %6421 = vmatmul.bf16.gmra.mxu2 %v18951_v61  ;;  %v7025_v57 = vadd.f32 %v7024_v37, %v15788_v60  ;;  %v7322_v19 = vadd.f32 %v7321_v2, %v7185_v13  ;;  %v7193_v37 = vmul.f32 %v15813_v34, %v15813_v34 }
 0x60e   :  { %6510 = vmatmul.bf16.gmra.mxu3 %v18952_v8  ;;  %v7197_v3 = vmul.f32 %v15827_v43, %v15827_v43 }
 0x60f   :  { %v7026_v44 = vadd.f32 %v7025_v57, %v15794_v14  ;;  %v7323_v39 = vadd.f32 %v7322_v19, %v7189_v54 }
 0x610   :  { %v6106_v11 = vpop.f32.mrf.mxu2  ;;  %v5930_v4 = vpop.f32.mrf.mxu0 }
 0x611   :  { %v6107_v9 = vadd.f32 %v6106_v11, %v6018_v33  ;;  %v6195_v22 = vpop.f32.mrf.mxu3  ;;  %v6019_v27 = vpop.f32.mrf.mxu1  ;;  %v7027_v59 = vadd.f32 %v7026_v44, %v15796_v5  ;;  %v7324_v11 = vadd.f32 %v7323_v39, %v7193_v37 }
 0x612   :  { %v6020_v30 = vadd.f32 %v6019_v27, %v5930_v4 }
 0x613   :  { %v15845_v25 = vadd.f32 %v6195_v22, %v6107_v9  ;;  %v7028_v33 = vadd.f32 %v7027_v59, %v15813_v34  ;;  %v7325_v22 = vadd.f32 %v7324_v11, %v7197_v3  ;;  %v18955_v59 = vld [vmem:[#allocation87_spill] sm:$0xff] }
 0x615   :  { %18953 = vst [vmem:[#allocation159_spill] sm:$0xff] %v15845_v25  ;;  %v7029_v57 = vadd.f32 %v7028_v33, %v15827_v43  ;;  %v7201_v9 = vmul.f32 %v15845_v25, %v15845_v25  ;;  %v18956_v33 = vld [vmem:[#allocation88_spill] sm:$0xff] }
 0x617   :  { %v7030_v44 = vadd.f32 %v7029_v57, %v15845_v25  ;;  %v7326_v40 = vadd.f32 %v7325_v22, %v7201_v9  ;;  %v18959_v9 = vld [vmem:[#allocation68_spill] sm:$0xff]  ;;  %v18960_v22 = vld [vmem:[#allocation59_spill] sm:$0xff] }
 0x618   :  { %v6108_v26 = vpop.f32.mrf.mxu2  ;;  %v6209_v27 = vpop.f32.mrf.mxu0 }
 0x619   :  { %v6109_v4 = vadd.f32 %v6108_v26, %v6020_v30  ;;  %v6197_v2 = vpop.f32.mrf.mxu3  ;;  %v6298_v13 = vpop.f32.mrf.mxu1  ;;  %v18957_v30 = vld [vmem:[#allocation89_spill] sm:$0xff]  ;;  %v18958_v26 = vld [vmem:[#allocation90_spill] sm:$0xff] }
 0x61a   :  { %v6299_v19 = vadd.f32 %v6298_v13, %v6209_v27 }
 0x61b   :  { %v15857_v54 = vadd.f32 %v6197_v2, %v6109_v4  ;;  %6248 = vmatmul.bf16.gmra.mxu0 %v18955_v59 }
 0x61c   :  { %6337 = vmatmul.bf16.gmra.mxu1 %v18956_v33  ;;  %v9597_v33 = vld [vmem:[#allocation2 + $0x2b8] sm:$0xf0] }
 0x61d   :  { %18954 = vst [vmem:[#allocation139_spill] sm:$0xff] %v15857_v54  ;;  %v7031_v39 = vadd.f32 %v7030_v44, %v15857_v54  ;;  %v7205_v37 = vmul.f32 %v15857_v54, %v15857_v54  ;;  %6426 = vmatmul.bf16.gmra.mxu2 %v18957_v30  ;;  %v18961_v44 = vsub.f32 %v18959_v9, %v18960_v22 }
 0x61e   :  { %6515 = vmatmul.bf16.gmra.mxu3 %v18958_v26 }
 0x61f   :  { %v7032_v3 = vrot.slane %v7031_v39, 4  ;;  %v7327_v11 = vadd.f32 %v7326_v40, %v7205_v37  ;;  %v7412_v60 = vmax.f32 %v18961_v44, 0.0  ;;  %v9469_v44 = vld [vmem:[#allocation2 + $0x1b8] sm:$0xf0] }
 0x620   :  { %v6387_v57 = vpop.f32.mrf.mxu2  ;;  %v6211_v12 = vpop.f32.mrf.mxu0 }
 0x621   :  { %v7033_v4 = vadd.f32 %v7032_v3, %v7031_v39  ;;  %v7328_v2 = vrot.slane %v7327_v11, 4  ;;  %v6388_v27 = vadd.f32 %v6387_v57, %v6299_v19  ;;  %v6476_v13 = vpop.f32.mrf.mxu3  ;;  %v6300_v14 = vpop.f32.mrf.mxu1  ;;  %v15871_v30 = vadd.f32 1e-05, %v7412_v60  ;;  %v10106_v57 = vld [vmem:[#allocation2 + $0x2ac] sm:$0xf] }
 0x622   :  { %v6301_v25 = vadd.f32 %v6300_v14, %v6211_v12  ;;  %v10042_v12 = vld [vmem:[#allocation2 + $0xac] sm:$0xf] }
 0x623   :  { %v7034_v5 = vrot.slane %v7033_v4, 2  ;;  %v7329_v34 = vadd.f32 %v7328_v2, %v7327_v11  ;;  %v15869_v43 = vadd.f32 %v6476_v13, %v6388_v27  ;;  %10223 = vrsqrt.f32 %v15871_v30  ;;  %v10138_v2 = vld [vmem:[#allocation2 + $0x3ac] sm:$0xf]  ;;  %v9725_v27 = vld [vmem:[#allocation2 + $0x3b8] sm:$0xf0] }
 0x624   :  { %v9600_v11 = vor.u32 %v10106_v57, %v9597_v33  ;;  %v9581_v33 = vld [vmem:[#allocation2 + $0x298] sm:$0xf0]  ;;  %vm7470_vm5 = vweird.f32 %v15871_v30 }
 0x625   :  { %18962 = vst [vmem:[#allocation160_spill] sm:$0xff] %v15869_v43  ;;  %v7035_v54 = vadd.f32 %v7034_v5, %v7033_v4  ;;  %v7330_v26 = vrot.slane %v7329_v34, 2 }
 0x626   :  { %6736 = vmatpush.bf16.msrb.mxu2 %v9600_v11  ;;  %v10134_v11 = vld [vmem:[#allocation2 + $0x38c] sm:$0xf] }
 0x627   :  { %v7036_v40 = vrot.slane %v7035_v54, 1  ;;  %v7331_v39 = vadd.f32 %v7330_v26, %v7329_v34  ;;  %v9728_v34 = vor.u32 %v10138_v2, %v9725_v27  ;;  %v10074_v26 = vld [vmem:[#allocation2 + $0x1ac] sm:$0xf]  ;;  %v9709_v2 = vld [vmem:[#allocation2 + $0x398] sm:$0xf0] }
 0x628   :  { %v6389_v37 = vpop.f32.mrf.mxu2  ;;  %v6214_v22 = vpop.f32.mrf.mxu0  ;;  %v10038_v27 = vld [vmem:[#allocation2 + $0x8c] sm:$0xf] }
 0x629   :  { %v7037_v19 = vadd.f32 %v7036_v40, %v7035_v54  ;;  %v7332_v3 = vrot.slane %v7331_v39, 1  ;;  %v6390_v59 = vadd.f32 %v6389_v37, %v6301_v25  ;;  %v6478_v9 = vpop.f32.mrf.mxu3  ;;  %v6303_v14 = vpop.f32.mrf.mxu1  ;;  %v9341_v54 = vld [vmem:[#allocation2 + $0xb8] sm:$0xf0]  ;;  %v18965_v40 = vld [vmem:[#allocation15_spill] sm:$0xff]  ;;  %v10102_v37 = vld [vmem:[#allocation2 + $0x28c] sm:$0xf]  ;;  %6825 = vmatpush.bf16.msrb.mxu3 %v9728_v34 }
 0x62a   :  { %v6304_v13 = vadd.f32 %v6303_v14, %v6214_v22  ;;  %v9344_v25 = vor.u32 %v10042_v12, %v9341_v54  ;;  %v18968_v22 = vld [vmem:[#allocation18_spill] sm:$0xff]  ;;  %v15884_v14 = vpop.eup %10223  ;;  %v10070_v54 = vld [vmem:[#allocation2 + $0x18c] sm:$0xf] }
 0x62b   :  { %v7333_v5 = vadd.f32 %v7332_v3, %v7331_v39  ;;  %v15874_v60 = vmul.f32 0.0078125, %v7037_v19  ;;  %v15876_v4 = vadd.f32 %v6478_v9, %v6390_v59  ;;  %6253 = vmatmul.bf16.gmra.mxu0 %v18965_v40  ;;  %v18966_v39 = vld [vmem:[#allocation16_spill] sm:$0xff]  ;;  %v9472_v59 = vor.u32 %v10074_v26, %v9469_v44  ;;  %v18967_v19 = vld [vmem:[#allocation17_spill] sm:$0xff]  ;;  %v9325_v34 = vld [vmem:[#allocation2 + $0x98] sm:$0xf0] }
 0x62c   :  { %6342 = vmatmul.bf16.gmra.mxu1 %v18966_v39  ;;  %6558 = vmatpush.bf16.msrb.mxu0 %v9344_v25  ;;  %v9584_v3 = vor.u32 %v10102_v37, %v9581_v33  ;;  %v9328_v37 = vor.u32 %v10038_v27, %v9325_v34  ;;  %vm7471_vm13 = vweird.f32 %v15884_v14 }
 0x62d   :  { %18963 = vst [vmem:[#allocation134_spill] sm:$0xff] %v15874_v60  ;;  %v7389_v57 = vmul.f32 0.0078125, %v7333_v5  ;;  %v7397_v43 = vmul.f32 %v15874_v60, %v15874_v60  ;;  %6431 = vmatmul.bf16.gmra.mxu2 %v18967_v19  ;;  %6647 = vmatpush.bf16.msrb.mxu1 %v9472_v59  ;;  %v9712_v5 = vor.u32 %v10134_v11, %v9709_v2  ;;  %v9453_v60 = vld [vmem:[#allocation2 + $0x198] sm:$0xf0]  ;;  %vm7472_vm14 = vmor %vm7470_vm5, %vm7471_vm13 }
 0x62e   :  { %18964 = vst [vmem:[#allocation135_spill] sm:$0xff] %v15876_v4  ;;  %6520 = vmatmul.bf16.gmra.mxu3 %v18968_v22  ;;  %6737 = vmatpush.bf16.msrb.mxu2 %v9584_v3  ;;  %v7465_v59 = vmul.f32 %v15884_v14, %v15871_v30 }
 0x62f   :  { %v7405_v9 = vsub.f32 %v7389_v57, %v7397_v43  ;;  %v9456_v43 = vor.u32 %v10070_v54, %v9453_v60  ;;  %6826 = vmatpush.bf16.msrb.mxu3 %v9712_v5 }
 0x630   :  { %v6392_v12 = vpop.f32.mrf.mxu2  ;;  %v6216_v4 = vpop.f32.mrf.mxu0  ;;  %6559 = vmatpush.bf16.msrb.mxu0 %v9328_v37  ;;  %v7466_v3 = vmul.f32 %v15884_v14, %v7465_v59  ;;  %v18974_v37 = vld [vmem:[#allocation102_spill] sm:$0xff] }
 0x631   :  { %v7413_v25 = vmax.f32 %v7405_v9, 0.0  ;;  %v6393_v26 = vadd.f32 %v6392_v12, %v6304_v13  ;;  %v6481_v44 = vpop.f32.mrf.mxu3  ;;  %v6305_v33 = vpop.f32.mrf.mxu1  ;;  %6648 = vmatpush.bf16.msrb.mxu1 %v9456_v43 }
 0x632   :  { %v6306_v19 = vadd.f32 %v6305_v33, %v6216_v4  ;;  %v7467_v34 = vmul.f32 0.5, %v7466_v3  ;;  %v18971_v4 = vld [vmem:[#allocation98_spill] sm:$0xff] }
 0x633   :  { %v7421_v57 = vadd.f32 1e-05, %v7413_v25  ;;  %v15886_v22 = vadd.f32 %v6481_v44, %v6393_v26  ;;  %v18972_v25 = vld [vmem:[#allocation99_spill] sm:$0xff]  ;;  %v18973_v44 = vld [vmem:[#allocation100_spill] sm:$0xff] }
 0x634   :  { %v7468_v43 = vsub.f32 1.5, %v7467_v34 }
 0x635   :  { %18969 = vst [vmem:[#allocation114_spill] sm:$0xff] %v15886_v22  ;;  %10225 = vrsqrt.f32 %v7421_v57  ;;  %vm7480_vm1 = vweird.f32 %v7421_v57 }
 0x638   :  { %v6394_v9 = vpop.f32.mrf.mxu2  ;;  %v6219_v2 = vpop.f32.mrf.mxu0 }
 0x639   :  { %v6395_v13 = vadd.f32 %v6394_v9, %v6306_v19  ;;  %v6483_v11 = vpop.f32.mrf.mxu3  ;;  %v6308_v27 = vpop.f32.mrf.mxu1 }
 0x63a   :  { %v6309_v5 = vadd.f32 %v6308_v27, %v6219_v2  ;;  %v7469_v27 = vmul.f32 %v15884_v14, %v7468_v43 }
 0x63b   :  { %v10226_v60 = vpop.eup %10225  ;;  %v15891_v12 = vadd.f32 %v6483_v11, %v6395_v13  ;;  %6258 = vmatmul.bf16.gmra.mxu0 %v18971_v4  ;;  %v9661_v4 = vld [vmem:[#allocation2 + $0x338] sm:$0xf0] }
 0x63c   :  { %v7475_v54 = vmul.f32 %v10226_v60, %v7421_v57  ;;  %6347 = vmatmul.bf16.gmra.mxu1 %v18972_v25  ;;  %vm7481_vm12 = vweird.f32 %v10226_v60 }
 0x63d   :  { %18970 = vst [vmem:[#allocation136_spill] sm:$0xff] %v15891_v12  ;;  %6436 = vmatmul.bf16.gmra.mxu2 %v18973_v44  ;;  %vm7482_vm3 = vmor %vm7480_vm1, %vm7481_vm12 }
 0x63e   :  { %v7476_v26 = vmul.f32 %v10226_v60, %v7475_v54  ;;  %6525 = vmatmul.bf16.gmra.mxu3 %v18974_v37  ;;  %vm19074_vm12 = vmmov %vm19064_vm10 }
 0x640   :  { %v7477_v19 = vmul.f32 0.5, %v7476_v26  ;;  %v6397_v33 = vpop.f32.mrf.mxu2  ;;  %v6221_v22 = vpop.f32.mrf.mxu0  ;;  %v10098_v26 = vld [vmem:[#allocation2 + $0x26c] sm:$0xf] }
 0x641   :  { %v6398_v59 = vadd.f32 %v6397_v33, %v6309_v5  ;;  %v6486_v9 = vpop.f32.mrf.mxu3  ;;  %v6310_v11 = vpop.f32.mrf.mxu1  ;;  %v9565_v33 = vld [vmem:[#allocation2 + $0x278] sm:$0xf0] }
 0x642   :  { %v7478_v13 = vsub.f32 1.5, %v7477_v19  ;;  %v6311_v2 = vadd.f32 %v6310_v11, %v6221_v22  ;;  %v7473_v19 = vsel %vm7472_vm14, %v15884_v14, %v7469_v27  ;;  %v18981_v14 = vld [vmem:[#allocation33_spill] sm:$0xff]  ;;  %v10130_v27 = vld [vmem:[#allocation2 + $0x36c] sm:$0xf] }
 0x643   :  { %v15897_v3 = vadd.f32 %v6486_v9, %v6398_v59  ;;  %v9568_v59 = vor.u32 %v10098_v26, %v9565_v33  ;;  %v9693_v26 = vld [vmem:[#allocation2 + $0x378] sm:$0xf0] }
 0x644   :  { %v7479_v54 = vmul.f32 %v10226_v60, %v7478_v13 }
 0x645   :  { %18975 = vst [vmem:[#allocation147_spill] sm:$0xff] %v15897_v3  ;;  %6738 = vmatpush.bf16.msrb.mxu2 %v9568_v59 }
 0x646   :  { %v7483_v34 = vsel %vm7482_vm3, %v10226_v60, %v7479_v54  ;;  %v18978_v60 = vld [vmem:[#allocation29_spill] sm:$0xff]  ;;  %v18979_v54 = vld [vmem:[#allocation31_spill] sm:$0xff] }
 0x647   :  { %v7515_v5 = vrot.slane %v7483_v34, 7  ;;  %v18980_v34 = vld [vmem:[#allocation32_spill] sm:$0xff] }
 0x648   :  { %v6399_v12 = vpop.f32.mrf.mxu2  ;;  %v6224_v11 = vpop.f32.mrf.mxu0 }
 0x649   :  { %v15904_v22 = vsel %vm2393_vm0, %v7473_v19, %v7515_v5  ;;  %v6400_v43 = vadd.f32 %v6399_v12, %v6311_v2  ;;  %v6488_v9 = vpop.f32.mrf.mxu3  ;;  %v6313_v13 = vpop.f32.mrf.mxu1  ;;  %v10034_v5 = vld [vmem:[#allocation2 + $0x6c] sm:$0xf]  ;;  %v9696_v12 = vor.u32 %v10130_v27, %v9693_v26  ;;  %v9309_v2 = vld [vmem:[#allocation2 + $0x78] sm:$0xf0] }
 0x64a   :  { %18976 = vst [vmem:[#allocation113_spill] sm:$0xff] %v15904_v22  ;;  %v6314_v30 = vadd.f32 %v6313_v13, %v6224_v11  ;;  %v10066_v19 = vld [vmem:[#allocation2 + $0x16c] sm:$0xf]  ;;  %v9437_v22 = vld [vmem:[#allocation2 + $0x178] sm:$0xf0]  ;;  %v9312_v11 = vor.u32 %v10034_v5, %v9309_v2 }
 0x64b   :  { %v15906_v57 = vadd.f32 %v6488_v9, %v6400_v43  ;;  %6263 = vmatmul.bf16.gmra.mxu0 %v18978_v60  ;;  %v9440_v13 = vor.u32 %v10066_v19, %v9437_v22  ;;  %6827 = vmatpush.bf16.msrb.mxu3 %v9696_v12  ;;  %v18986_v22 = vld [vmem:[#allocation27_spill] sm:$0xff]  ;;  %v18987_v5 = vld [vmem:[#allocation28_spill] sm:$0xff] }
 0x64c   :  { %6352 = vmatmul.bf16.gmra.mxu1 %v18979_v54  ;;  %6560 = vmatpush.bf16.msrb.mxu0 %v9312_v11 }
 0x64d   :  { %18977 = vst [vmem:[#allocation63_spill] sm:$0xff] %v15906_v57  ;;  %6441 = vmatmul.bf16.gmra.mxu2 %v18980_v34  ;;  %6649 = vmatpush.bf16.msrb.mxu1 %v9440_v13 }
 0x64e   :  { %6530 = vmatmul.bf16.gmra.mxu3 %v18981_v14 }
 0x650   :  { %v6402_v33 = vpop.f32.mrf.mxu2  ;;  %v6226_v9 = vpop.f32.mrf.mxu0 }
 0x651   :  { %v6403_v59 = vadd.f32 %v6402_v33, %v6314_v30  ;;  %v6491_v43 = vpop.f32.mrf.mxu3  ;;  %v6315_v57 = vpop.f32.mrf.mxu1  ;;  %v18984_v30 = vld [vmem:[#allocation25_spill] sm:$0xff]  ;;  %v18985_v33 = vld [vmem:[#allocation26_spill] sm:$0xff] }
 0x652   :  { %v6316_v34 = vadd.f32 %v6315_v57, %v6226_v9 }
 0x653   :  { %v15912_v3 = vadd.f32 %v6491_v43, %v6403_v59  ;;  %v10094_v43 = vld [vmem:[#allocation2 + $0x24c] sm:$0xf] }
 0x655   :  { %18982 = vst [vmem:[#allocation146_spill] sm:$0xff] %v15912_v3 }
 0x658   :  { %v6404_v14 = vpop.f32.mrf.mxu2  ;;  %v6229_v37 = vpop.f32.mrf.mxu0 }
 0x659   :  { %v6405_v54 = vadd.f32 %v6404_v14, %v6316_v34  ;;  %v6493_v60 = vpop.f32.mrf.mxu3  ;;  %v6318_v27 = vpop.f32.mrf.mxu1 }
 0x65a   :  { %v6319_v44 = vadd.f32 %v6318_v27, %v6229_v37 }
 0x65b   :  { %v15914_v26 = vadd.f32 %v6493_v60, %v6405_v54  ;;  %6268 = vmatmul.bf16.gmra.mxu0 %v18984_v30  ;;  %v9549_v60 = vld [vmem:[#allocation2 + $0x258] sm:$0xf0] }
 0x65c   :  { %6357 = vmatmul.bf16.gmra.mxu1 %v18985_v33  ;;  %v9552_v37 = vor.u32 %v10094_v43, %v9549_v60  ;;  %v9293_v60 = vld [vmem:[#allocation2 + $0x58] sm:$0xf0] }
 0x65d   :  { %18983 = vst [vmem:[#allocation64_spill] sm:$0xff] %v15914_v26  ;;  %6446 = vmatmul.bf16.gmra.mxu2 %v18986_v22  ;;  %v10058_v22 = vld [vmem:[#allocation2 + $0x12c] sm:$0xf]  ;;  %v9533_v30 = vld [vmem:[#allocation2 + $0x238] sm:$0xf0] }
 0x65e   :  { %6535 = vmatmul.bf16.gmra.mxu3 %v18987_v5  ;;  %6739 = vmatpush.bf16.msrb.mxu2 %v9552_v37  ;;  %v18990_v5 = vld [vmem:[#allocation153_spill] sm:$0xff] }
 0x660   :  { %v6407_v12 = vpop.f32.mrf.mxu2  ;;  %v6231_v19 = vpop.f32.mrf.mxu0 }
 0x661   :  { %v6408_v57 = vadd.f32 %v6407_v12, %v6319_v44  ;;  %v6496_v2 = vpop.f32.mrf.mxu3  ;;  %v6320_v59 = vpop.f32.mrf.mxu1  ;;  %v18991_v44 = vld [vmem:[#allocation154_spill] sm:$0xff]  ;;  %v18992_v12 = vld [vmem:[#allocation155_spill] sm:$0xff] }
 0x662   :  { %v6321_v14 = vadd.f32 %v6320_v59, %v6231_v19  ;;  %v9677_v19 = vld [vmem:[#allocation2 + $0x358] sm:$0xf0]  ;;  %v10030_v59 = vld [vmem:[#allocation2 + $0x4c] sm:$0xf] }
 0x663   :  { %v15920_v34 = vadd.f32 %v6496_v2, %v6408_v57  ;;  %v18993_v57 = vld [vmem:[#allocation156_spill] sm:$0xff] }
 0x664   :  { %v10126_v2 = vld [vmem:[#allocation2 + $0x34c] sm:$0xf] }
 0x665   :  { %18988 = vst [vmem:[#allocation91_spill] sm:$0xff] %v15920_v34  ;;  %v9421_v34 = vld [vmem:[#allocation2 + $0x158] sm:$0xf0] }
 0x668   :  { %v6409_v54 = vpop.f32.mrf.mxu2  ;;  %v6234_v13 = vpop.f32.mrf.mxu0 }
 0x669   :  { %v6410_v9 = vadd.f32 %v6409_v54, %v6321_v14  ;;  %v6498_v11 = vpop.f32.mrf.mxu3  ;;  %v6323_v27 = vpop.f32.mrf.mxu1  ;;  %v9680_v14 = vor.u32 %v10126_v2, %v9677_v19  ;;  %v10062_v54 = vld [vmem:[#allocation2 + $0x14c] sm:$0xf]  ;;  %v9405_v2 = vld [vmem:[#allocation2 + $0x138] sm:$0xf0] }
 0x66a   :  { %v6324_v3 = vadd.f32 %v6323_v27, %v6234_v13  ;;  %v9296_v13 = vor.u32 %v10030_v59, %v9293_v60  ;;  %v9424_v27 = vor.u32 %v10062_v54, %v9421_v34  ;;  %v10090_v19 = vld [vmem:[#allocation2 + $0x22c] sm:$0xf]  ;;  %v9408_v25 = vor.u32 %v10058_v22, %v9405_v2  ;;  %v9517_v22 = vld [vmem:[#allocation2 + $0x218] sm:$0xf0] }
 0x66b   :  { %v15922_v26 = vadd.f32 %v6498_v11, %v6410_v9  ;;  %6273 = vmatmul.bf16.gmra.mxu0 %v18990_v5  ;;  %6828 = vmatpush.bf16.msrb.mxu3 %v9680_v14 }
 0x66c   :  { %6362 = vmatmul.bf16.gmra.mxu1 %v18991_v44  ;;  %6561 = vmatpush.bf16.msrb.mxu0 %v9296_v13  ;;  %v10086_v13 = vld [vmem:[#allocation2 + $0x20c] sm:$0xf] }
 0x66d   :  { %18989 = vst [vmem:[#allocation75_spill] sm:$0xff] %v15922_v26  ;;  %6451 = vmatmul.bf16.gmra.mxu2 %v18992_v12  ;;  %6650 = vmatpush.bf16.msrb.mxu1 %v9424_v27  ;;  %v9277_v26 = vld [vmem:[#allocation2 + $0x38] sm:$0xf0] }
 0x66e   :  { %6540 = vmatmul.bf16.gmra.mxu3 %v18993_v57  ;;  %v10026_v57 = vld [vmem:[#allocation2 + $0x2c] sm:$0xf] }
 0x66f   :  { %v9280_v33 = vor.u32 %v10026_v57, %v9277_v26  ;;  %v9389_v57 = vld [vmem:[#allocation2 + $0x118] sm:$0xf0] }
 0x670   :  { %v6412_v43 = vpop.f32.mrf.mxu2  ;;  %v6236_v11 = vpop.f32.mrf.mxu0 }
 0x671   :  { %v6413_v37 = vadd.f32 %v6412_v43, %v6324_v3  ;;  %v6501_v9 = vpop.f32.mrf.mxu3  ;;  %v6325_v5 = vpop.f32.mrf.mxu1  ;;  %v9536_v3 = vor.u32 %v10090_v19, %v9533_v30  ;;  %v10122_v43 = vld [vmem:[#allocation2 + $0x32c] sm:$0xf]  ;;  %6562 = vmatpush.bf16.msrb.mxu0 %v9280_v33  ;;  %6651 = vmatpush.bf16.msrb.mxu1 %v9408_v25  ;;  %v9520_v33 = vor.u32 %v10086_v13, %v9517_v22 }
 0x672   :  { %v6326_v12 = vadd.f32 %v6325_v5, %v6236_v11  ;;  %v9664_v34 = vor.u32 %v10122_v43, %v9661_v4  ;;  %v10022_v5 = vld [vmem:[#allocation2 + $0xc] sm:$0xf] }
 0x673   :  { %v15928_v44 = vadd.f32 %v6501_v9, %v6413_v37  ;;  %6740 = vmatpush.bf16.msrb.mxu2 %v9536_v3  ;;  %v9261_v37 = vld [vmem:[#allocation2 + $0x18] sm:$0xf0]  ;;  %v10054_v9 = vld [vmem:[#allocation2 + $0x10c] sm:$0xf] }
 0x674   :  { %6829 = vmatpush.bf16.msrb.mxu3 %v9664_v34  ;;  %v9264_v26 = vor.u32 %v10022_v5, %v9261_v37  ;;  %v9392_v2 = vor.u32 %v10054_v9, %v9389_v57  ;;  %v10118_v4 = vld [vmem:[#allocation2 + $0x30c] sm:$0xf] }
 0x675   :  { %18994 = vst [vmem:[#allocation122_spill] sm:$0xff] %v15928_v44 }
 0x676   :  { %6563 = vmatpush.bf16.msrb.mxu0 %v9264_v26  ;;  %6652 = vmatpush.bf16.msrb.mxu1 %v9392_v2 }
 0x677   :  { %6741 = vmatpush.bf16.msrb.mxu2 %v9520_v33 }
 0x678   :  { %v6414_v59 = vpop.f32.mrf.mxu2  ;;  %v6239_v54 = vpop.f32.mrf.mxu0 }
 0x679   :  { %v6415_v14 = vadd.f32 %v6414_v59, %v6326_v12  ;;  %v6503_v60 = vpop.f32.mrf.mxu3  ;;  %v6328_v11 = vpop.f32.mrf.mxu1  ;;  %v9645_v12 = vld [vmem:[#allocation2 + $0x318] sm:$0xf0] }
 0x67a   :  { %v6329_v27 = vadd.f32 %v6328_v11, %v6239_v54  ;;  %v9648_v25 = vor.u32 %v10118_v4, %v9645_v12 }
 0x67b   :  { %v15930_v30 = vadd.f32 %v6503_v60, %v6415_v14  ;;  %6278 = vmatmul.bf16.gmra.mxu0 %v15274_v10 }
 0x67c   :  { %6367 = vmatmul.bf16.gmra.mxu1 %v15280_v6  ;;  %6830 = vmatpush.bf16.msrb.mxu3 %v9648_v25 }
 0x67d   :  { %18995 = vst [vmem:[#allocation97_spill] sm:$0xff] %v15930_v30  ;;  %6456 = vmatmul.bf16.gmra.mxu2 %v15286_v17 }
 0x67e   :  { %6545 = vmatmul.bf16.gmra.mxu3 %v15292_v58 }
 0x680   :  { %v6417_v19 = vpop.f32.mrf.mxu2  ;;  %v6241_v59 = vpop.f32.mrf.mxu0 }
 0x681   :  { %v6418_v3 = vadd.f32 %v6417_v19, %v6329_v27  ;;  %v6506_v43 = vpop.f32.mrf.mxu3  ;;  %v6330_v34 = vpop.f32.mrf.mxu1 }
 0x682   :  { %v6331_v60 = vadd.f32 %v6330_v34, %v6241_v59 }
 0x683   :  { %v15936_v14 = vadd.f32 %v6506_v43, %v6418_v3 }
 0x685   :  { %18996 = vst [vmem:[#allocation73_spill] sm:$0xff] %v15936_v14 }
 0x688   :  { %v6419_v54 = vpop.f32.mrf.mxu2  ;;  %v6244_v9 = vpop.f32.mrf.mxu0 }
 0x689   :  { %v6420_v5 = vadd.f32 %v6419_v54, %v6331_v60  ;;  %v6508_v37 = vpop.f32.mrf.mxu3  ;;  %v6333_v11 = vpop.f32.mrf.mxu1 }
 0x68a   :  { %v6334_v57 = vadd.f32 %v6333_v11, %v6244_v9 }
 0x68b   :  { %v15938_v26 = vadd.f32 %v6508_v37, %v6420_v5  ;;  %6283 = vmatmul.bf16.gmra.mxu0 %v18852_v46 }
 0x68c   :  { %6372 = vmatmul.bf16.gmra.mxu1 %v18853_v7 }
 0x68d   :  { %18997 = vst [vmem:[#allocation74_spill] sm:$0xff] %v15938_v26  ;;  %6461 = vmatmul.bf16.gmra.mxu2 %v18854_v32 }
 0x68e   :  { %6550 = vmatmul.bf16.gmra.mxu3 %v18855_v23 }
 0x690   :  { %v6422_v13 = vpop.f32.mrf.mxu2  ;;  %v6246_v2 = vpop.f32.mrf.mxu0 }
 0x691   :  { %v6423_v22 = vadd.f32 %v6422_v13, %v6334_v57  ;;  %v6511_v27 = vpop.f32.mrf.mxu3  ;;  %v6335_v33 = vpop.f32.mrf.mxu1 }
 0x692   :  { %v6336_v12 = vadd.f32 %v6335_v33, %v6246_v2 }
 0x693   :  { %v15944_v4 = vadd.f32 %v6511_v27, %v6423_v22 }
 0x698   :  { %v6424_v25 = vpop.f32.mrf.mxu2  ;;  %v6249_v43 = vpop.f32.mrf.mxu0 }
 0x699   :  { %v6425_v19 = vadd.f32 %v6424_v25, %v6336_v12  ;;  %v6513_v3 = vpop.f32.mrf.mxu3  ;;  %v6338_v59 = vpop.f32.mrf.mxu1 }
 0x69a   :  { %v6339_v60 = vadd.f32 %v6338_v59, %v6249_v43 }
 0x69b   :  { %v15946_v34 = vadd.f32 %v6513_v3, %v6425_v19  ;;  %6564 = vmatmul.bf16.vlgmr.msrb.gmra.mxu0 %v14931_v21 }
 0x69c   :  { %6653 = vmatmul.bf16.vlgmr.msrb.gmra.mxu1 %v14937_v28 }
 0x69d   :  { %6742 = vmatmul.bf16.vlgmr.msrb.gmra.mxu2 %v14945_v15 }
 0x69e   :  { %6831 = vmatmul.bf16.vlgmr.msrb.gmra.mxu3 %v14951_v48 }
 0x6a0   :  { %v6427_v54 = vpop.f32.mrf.mxu2  ;;  %v6251_v9 = vpop.f32.mrf.mxu0 }
 0x6a1   :  { %v6428_v5 = vadd.f32 %v6427_v54, %v6339_v60  ;;  %v6516_v37 = vpop.f32.mrf.mxu3  ;;  %v6340_v11 = vpop.f32.mrf.mxu1 }
 0x6a2   :  { %v6341_v13 = vadd.f32 %v6340_v11, %v6251_v9 }
 0x6a3   :  { %v15952_v57 = vadd.f32 %v6516_v37, %v6428_v5 }
 0x6a5   :  { %18998 = vst [vmem:[#allocation71_spill] sm:$0xff] %v15952_v57 }
 0x6a8   :  { %v6429_v22 = vpop.f32.mrf.mxu2  ;;  %v6254_v33 = vpop.f32.mrf.mxu0 }
 0x6a9   :  { %v6430_v27 = vadd.f32 %v6429_v22, %v6341_v13  ;;  %v6518_v2 = vpop.f32.mrf.mxu3  ;;  %v6343_v12 = vpop.f32.mrf.mxu1 }
 0x6aa   :  { %v6344_v28 = vadd.f32 %v6343_v12, %v6254_v33 }
 0x6ab   :  { %v15954_v21 = vadd.f32 %v6518_v2, %v6430_v27  ;;  %6569 = vmatmul.bf16.gmra.mxu0 %v14957_v56 }
 0x6ac   :  { %6658 = vmatmul.bf16.gmra.mxu1 %v14963_v42 }
 0x6ad   :  { %18999 = vst [vmem:[#allocation125_spill] sm:$0xff] %v15954_v21  ;;  %6747 = vmatmul.bf16.gmra.mxu2 %v14971_v29 }
 0x6ae   :  { %6836 = vmatmul.bf16.gmra.mxu3 %v14977_v31 }
 0x6b0   :  { %v6432_v15 = vpop.f32.mrf.mxu2  ;;  %v6256_v48 = vpop.f32.mrf.mxu0 }
 0x6b1   :  { %v6433_v25 = vadd.f32 %v6432_v15, %v6344_v28  ;;  %v6521_v19 = vpop.f32.mrf.mxu3  ;;  %v6345_v3 = vpop.f32.mrf.mxu1 }
 0x6b2   :  { %v6346_v43 = vadd.f32 %v6345_v3, %v6256_v48 }
 0x6b3   :  { %v15960_v59 = vadd.f32 %v6521_v19, %v6433_v25 }
 0x6b5   :  { %19000 = vst [vmem:[#allocation127_spill] sm:$0xff] %v15960_v59 }
 0x6b8   :  { %v6434_v60 = vpop.f32.mrf.mxu2  ;;  %v6259_v54 = vpop.f32.mrf.mxu0 }
 0x6b9   :  { %v6435_v5 = vadd.f32 %v6434_v60, %v6346_v43  ;;  %v6523_v37 = vpop.f32.mrf.mxu3  ;;  %v6348_v9 = vpop.f32.mrf.mxu1 }
 0x6ba   :  { %v6349_v56 = vadd.f32 %v6348_v9, %v6259_v54 }
 0x6bb   :  { %v15962_v11 = vadd.f32 %v6523_v37, %v6435_v5  ;;  %6574 = vmatmul.bf16.gmra.mxu0 %v14983_v49 }
 0x6bc   :  { %6663 = vmatmul.bf16.gmra.mxu1 %v14989_v53 }
 0x6bd   :  { %19001 = vst [vmem:[#allocation70_spill] sm:$0xff] %v15962_v11  ;;  %6752 = vmatmul.bf16.gmra.mxu2 %v14995_v36 }
 0x6be   :  { %6841 = vmatmul.bf16.gmra.mxu3 %v15001_v20 }
 0x6c0   :  { %v6437_v42 = vpop.f32.mrf.mxu2  ;;  %v6261_v29 = vpop.f32.mrf.mxu0 }
 0x6c1   :  { %v6438_v31 = vadd.f32 %v6437_v42, %v6349_v56  ;;  %v6526_v13 = vpop.f32.mrf.mxu3  ;;  %v6350_v22 = vpop.f32.mrf.mxu1 }
 0x6c2   :  { %v6351_v27 = vadd.f32 %v6350_v22, %v6261_v29 }
 0x6c3   :  { %v15968_v2 = vadd.f32 %v6526_v13, %v6438_v31 }
 0x6c5   :  { %19002 = vst [vmem:[#allocation72_spill] sm:$0xff] %v15968_v2 }
 0x6c8   :  { %v6439_v33 = vpop.f32.mrf.mxu2  ;;  %v6264_v12 = vpop.f32.mrf.mxu0 }
 0x6c9   :  { %v6440_v28 = vadd.f32 %v6439_v33, %v6351_v27  ;;  %v6528_v15 = vpop.f32.mrf.mxu3  ;;  %v6353_v48 = vpop.f32.mrf.mxu1 }
 0x6ca   :  { %v6354_v49 = vadd.f32 %v6353_v48, %v6264_v12 }
 0x6cb   :  { %v15970_v25 = vadd.f32 %v6528_v15, %v6440_v28  ;;  %6579 = vmatmul.bf16.gmra.mxu0 %v18813_v63 }
 0x6cc   :  { %6668 = vmatmul.bf16.gmra.mxu1 %v18814_v45 }
 0x6cd   :  { %19003 = vst [vmem:[#allocation128_spill] sm:$0xff] %v15970_v25  ;;  %6757 = vmatmul.bf16.gmra.mxu2 %v18815_v1 }
 0x6ce   :  { %6846 = vmatmul.bf16.gmra.mxu3 %v18816_v47 }
 0x6d0   :  { %v6442_v53 = vpop.f32.mrf.mxu2  ;;  %v6266_v36 = vpop.f32.mrf.mxu0 }
 0x6d1   :  { %v6443_v20 = vadd.f32 %v6442_v53, %v6354_v49  ;;  %v6531_v19 = vpop.f32.mrf.mxu3  ;;  %v6355_v3 = vpop.f32.mrf.mxu1 }
 0x6d2   :  { %v6356_v43 = vadd.f32 %v6355_v3, %v6266_v36 }
 0x6d3   :  { %v15976_v60 = vadd.f32 %v6531_v19, %v6443_v20 }
 0x6d5   :  { %19004 = vst [vmem:[#allocation19_spill] sm:$0xff] %v15976_v60 }
 0x6d8   :  { %v6444_v54 = vpop.f32.mrf.mxu2  ;;  %v6269_v5 = vpop.f32.mrf.mxu0 }
 0x6d9   :  { %v6445_v37 = vadd.f32 %v6444_v54, %v6356_v43  ;;  %v6533_v9 = vpop.f32.mrf.mxu3  ;;  %v6358_v56 = vpop.f32.mrf.mxu1 }
 0x6da   :  { %v6359_v63 = vadd.f32 %v6358_v56, %v6269_v5 }
 0x6db   :  { %v15978_v42 = vadd.f32 %v6533_v9, %v6445_v37  ;;  %6584 = vmatmul.bf16.gmra.mxu0 %v15031_v0 }
 0x6dc   :  { %6673 = vmatmul.bf16.gmra.mxu1 %v15037_v50 }
 0x6dd   :  { %19005 = vst [vmem:[#allocation20_spill] sm:$0xff] %v15978_v42  ;;  %6762 = vmatmul.bf16.gmra.mxu2 %v15043_v41 }
 0x6de   :  { %6851 = vmatmul.bf16.gmra.mxu3 %v15049_v55 }
 0x6e0   :  { %v6447_v45 = vpop.f32.mrf.mxu2  ;;  %v6271_v1 = vpop.f32.mrf.mxu0 }
 0x6e1   :  { %v6448_v47 = vadd.f32 %v6447_v45, %v6359_v63  ;;  %v6536_v29 = vpop.f32.mrf.mxu3  ;;  %v6360_v31 = vpop.f32.mrf.mxu1 }
 0x6e2   :  { %v6361_v13 = vadd.f32 %v6360_v31, %v6271_v1 }
 0x6e3   :  { %v15984_v22 = vadd.f32 %v6536_v29, %v6448_v47 }
 0x6e5   :  { %19006 = vst [vmem:[#allocation82_spill] sm:$0xff] %v15984_v22 }
 0x6e8   :  { %v6449_v27 = vpop.f32.mrf.mxu2  ;;  %v6274_v33 = vpop.f32.mrf.mxu0 }
 0x6e9   :  { %v6450_v12 = vadd.f32 %v6449_v27, %v6361_v13  ;;  %v6538_v28 = vpop.f32.mrf.mxu3  ;;  %v6363_v15 = vpop.f32.mrf.mxu1 }
 0x6ea   :  { %v6364_v0 = vadd.f32 %v6363_v15, %v6274_v33 }
 0x6eb   :  { %v15986_v48 = vadd.f32 %v6538_v28, %v6450_v12  ;;  %6589 = vmatmul.bf16.gmra.mxu0 %v18937_v38 }
 0x6ec   :  { %6678 = vmatmul.bf16.gmra.mxu1 %v18938_v52  ;;  %v19010_v52 = vld [vmem:[#allocation23_spill] sm:$0xff] }
 0x6ed   :  { %19007 = vst [vmem:[#allocation83_spill] sm:$0xff] %v15986_v48  ;;  %6767 = vmatmul.bf16.gmra.mxu2 %v18939_v51  ;;  %v19011_v51 = vld [vmem:[#allocation24_spill] sm:$0xff] }
 0x6ee   :  { %6856 = vmatmul.bf16.gmra.mxu3 %v18940_v18 }
 0x6f0   :  { %v6452_v41 = vpop.f32.mrf.mxu2  ;;  %v6276_v55 = vpop.f32.mrf.mxu0 }
 0x6f1   :  { %v6453_v50 = vadd.f32 %v6452_v41, %v6364_v0  ;;  %v6541_v49 = vpop.f32.mrf.mxu3  ;;  %v6365_v53 = vpop.f32.mrf.mxu1 }
 0x6f2   :  { %v6366_v36 = vadd.f32 %v6365_v53, %v6276_v55 }
 0x6f3   :  { %v15992_v20 = vadd.f32 %v6541_v49, %v6453_v50 }
 0x6f5   :  { %19008 = vst [vmem:[#allocation51_spill] sm:$0xff] %v15992_v20 }
 0x6f8   :  { %v6454_v19 = vpop.f32.mrf.mxu2  ;;  %v6279_v3 = vpop.f32.mrf.mxu0 }
 0x6f9   :  { %v6455_v43 = vadd.f32 %v6454_v19, %v6366_v36  ;;  %v6543_v54 = vpop.f32.mrf.mxu3  ;;  %v6368_v5 = vpop.f32.mrf.mxu1 }
 0x6fa   :  { %v6369_v38 = vadd.f32 %v6368_v5, %v6279_v3 }
 0x6fb   :  { %v15994_v37 = vadd.f32 %v6543_v54, %v6455_v43  ;;  %6594 = vmatmul.bf16.gmra.mxu0 %v18943_v16  ;;  %v19019_v54 = vld [vmem:[#allocation90_spill] sm:$0xff] }
 0x6fc   :  { %6683 = vmatmul.bf16.gmra.mxu1 %v18944_v62 }
 0x6fd   :  { %19009 = vst [vmem:[#allocation137_spill] sm:$0xff] %v15994_v37  ;;  %6772 = vmatmul.bf16.gmra.mxu2 %v19010_v52 }
 0x6fe   :  { %6861 = vmatmul.bf16.gmra.mxu3 %v19011_v51 }
 0x700   :  { %v6457_v18 = vpop.f32.mrf.mxu2  ;;  %v6281_v9 = vpop.f32.mrf.mxu0 }
 0x701   :  { %v6458_v56 = vadd.f32 %v6457_v18, %v6369_v38  ;;  %v6546_v63 = vpop.f32.mrf.mxu3  ;;  %v6370_v45 = vpop.f32.mrf.mxu1 }
 0x702   :  { %v6371_v1 = vadd.f32 %v6370_v45, %v6281_v9 }
 0x703   :  { %v16000_v47 = vadd.f32 %v6546_v63, %v6458_v56 }
 0x705   :  { %19012 = vst [vmem:[#allocation110_spill] sm:$0xff] %v16000_v47 }
 0x708   :  { %v6459_v29 = vpop.f32.mrf.mxu2  ;;  %v6284_v31 = vpop.f32.mrf.mxu0 }
 0x709   :  { %v6460_v13 = vadd.f32 %v6459_v29, %v6371_v1  ;;  %v6548_v27 = vpop.f32.mrf.mxu3  ;;  %v6373_v33 = vpop.f32.mrf.mxu1 }
 0x70a   :  { %v6374_v16 = vadd.f32 %v6373_v33, %v6284_v31  ;;  %v19020_v33 = vld [vmem:[#allocation17_spill] sm:$0xff] }
 0x70b   :  { %v16002_v12 = vadd.f32 %v6548_v27, %v6460_v13  ;;  %6599 = vmatmul.bf16.gmra.mxu0 %v18949_v35 }
 0x70c   :  { %6688 = vmatmul.bf16.gmra.mxu1 %v18950_v24  ;;  %v19016_v24 = vld [vmem:[#allocation87_spill] sm:$0xff] }
 0x70d   :  { %19013 = vst [vmem:[#allocation152_spill] sm:$0xff] %v16002_v12  ;;  %6777 = vmatmul.bf16.gmra.mxu2 %v18951_v61  ;;  %v19017_v61 = vld [vmem:[#allocation88_spill] sm:$0xff] }
 0x70e   :  { %6866 = vmatmul.bf16.gmra.mxu3 %v18952_v8  ;;  %v19018_v8 = vld [vmem:[#allocation89_spill] sm:$0xff]  ;;  %v19041_v12 = vld [vmem:[#allocation64_spill] sm:$0xff] }
 0x710   :  { %v6462_v62 = vpop.f32.mrf.mxu2  ;;  %v6286_v28 = vpop.f32.mrf.mxu0 }
 0x711   :  { %v6463_v15 = vadd.f32 %v6462_v62, %v6374_v16  ;;  %v6551_v0 = vpop.f32.mrf.mxu3  ;;  %v6375_v41 = vpop.f32.mrf.mxu1  ;;  %v19021_v16 = vld [vmem:[#allocation18_spill] sm:$0xff] }
 0x712   :  { %v6376_v55 = vadd.f32 %v6375_v41, %v6286_v28 }
 0x713   :  { %v16008_v50 = vadd.f32 %v6551_v0, %v6463_v15 }
 0x715   :  { %19014 = vst [vmem:[#allocation94_spill] sm:$0xff] %v16008_v50 }
 0x718   :  { %v6464_v49 = vpop.f32.mrf.mxu2  ;;  %v6565_v53 = vpop.f32.mrf.mxu0 }
 0x719   :  { %v6465_v36 = vadd.f32 %v6464_v49, %v6376_v55  ;;  %v6553_v19 = vpop.f32.mrf.mxu3  ;;  %v6654_v3 = vpop.f32.mrf.mxu1 }
 0x71a   :  { %v6655_v35 = vadd.f32 %v6654_v3, %v6565_v53 }
 0x71b   :  { %v16010_v43 = vadd.f32 %v6553_v19, %v6465_v36  ;;  %6604 = vmatmul.bf16.gmra.mxu0 %v19016_v24 }
 0x71c   :  { %6693 = vmatmul.bf16.gmra.mxu1 %v19017_v61  ;;  %v19023_v61 = vld [vmem:[#allocation99_spill] sm:$0xff] }
 0x71d   :  { %19015 = vst [vmem:[#allocation151_spill] sm:$0xff] %v16010_v43  ;;  %6782 = vmatmul.bf16.gmra.mxu2 %v19018_v8  ;;  %v19024_v8 = vld [vmem:[#allocation100_spill] sm:$0xff]  ;;  %v19038_v43 = vld [vmem:[#allocation147_spill] sm:$0xff] }
 0x71e   :  { %6871 = vmatmul.bf16.gmra.mxu3 %v19019_v54  ;;  %v19025_v54 = vld [vmem:[#allocation102_spill] sm:$0xff] }
 0x720   :  { %v6743_v5 = vpop.f32.mrf.mxu2  ;;  %v6567_v38 = vpop.f32.mrf.mxu0 }
 0x721   :  { %v6744_v52 = vadd.f32 %v6743_v5, %v6655_v35  ;;  %v6832_v51 = vpop.f32.mrf.mxu3  ;;  %v6656_v18 = vpop.f32.mrf.mxu1 }
 0x722   :  { %v6657_v9 = vadd.f32 %v6656_v18, %v6567_v38 }
 0x723   :  { %v16016_v56 = vadd.f32 %v6832_v51, %v6744_v52 }
 0x728   :  { %v6745_v63 = vpop.f32.mrf.mxu2  ;;  %v6570_v45 = vpop.f32.mrf.mxu0 }
 0x729   :  { %v6746_v1 = vadd.f32 %v6745_v63, %v6657_v9  ;;  %v6834_v29 = vpop.f32.mrf.mxu3  ;;  %v6659_v31 = vpop.f32.mrf.mxu1 }
 0x72a   :  { %v6660_v13 = vadd.f32 %v6659_v31, %v6570_v45  ;;  %v19026_v31 = vld [vmem:[#allocation29_spill] sm:$0xff] }
 0x72b   :  { %v16018_v27 = vadd.f32 %v6834_v29, %v6746_v1  ;;  %6609 = vmatmul.bf16.gmra.mxu0 %v18965_v40 }
 0x72c   :  { %6698 = vmatmul.bf16.gmra.mxu1 %v18966_v39  ;;  %v19022_v39 = vld [vmem:[#allocation98_spill] sm:$0xff] }
 0x72d   :  { %6787 = vmatmul.bf16.gmra.mxu2 %v19020_v33  ;;  %v19028_v33 = vld [vmem:[#allocation32_spill] sm:$0xff] }
 0x72e   :  { %6876 = vmatmul.bf16.gmra.mxu3 %v19021_v16  ;;  %v19029_v16 = vld [vmem:[#allocation33_spill] sm:$0xff] }
 0x730   :  { %v6748_v62 = vpop.f32.mrf.mxu2  ;;  %v6572_v28 = vpop.f32.mrf.mxu0 }
 0x731   :  { %v6749_v15 = vadd.f32 %v6748_v62, %v6660_v13  ;;  %v6837_v0 = vpop.f32.mrf.mxu3  ;;  %v6661_v41 = vpop.f32.mrf.mxu1  ;;  %v19027_v13 = vld [vmem:[#allocation31_spill] sm:$0xff] }
 0x732   :  { %v6662_v55 = vadd.f32 %v6661_v41, %v6572_v28 }
 0x733   :  { %v16024_v49 = vadd.f32 %v6837_v0, %v6749_v15 }
 0x738   :  { %v6750_v53 = vpop.f32.mrf.mxu2  ;;  %v6575_v36 = vpop.f32.mrf.mxu0 }
 0x739   :  { %v6751_v19 = vadd.f32 %v6750_v53, %v6662_v55  ;;  %v6839_v3 = vpop.f32.mrf.mxu3  ;;  %v6664_v35 = vpop.f32.mrf.mxu1  ;;  %v19030_v53 = vld [vmem:[#allocation160_spill] sm:$0xff] }
 0x73a   :  { %v6665_v40 = vadd.f32 %v6664_v35, %v6575_v36  ;;  %v19031_v36 = vld [vmem:[#allocation135_spill] sm:$0xff] }
 0x73b   :  { %v16026_v24 = vadd.f32 %v6839_v3, %v6751_v19  ;;  %6614 = vmatmul.bf16.gmra.mxu0 %v19022_v39  ;;  %v6954_v19 = vadd.f32 %v19031_v36, %v19030_v53  ;;  %v7086_v3 = vmul.f32 %v19031_v36, %v19031_v36  ;;  %v7082_v39 = vmul.f32 %v19030_v53, %v19030_v53  ;;  %v19037_v36 = vld [vmem:[#allocation28_spill] sm:$0xff] }
 0x73c   :  { %6703 = vmatmul.bf16.gmra.mxu1 %v19023_v61  ;;  %v19032_v61 = vld [vmem:[#allocation114_spill] sm:$0xff] }
 0x73d   :  { %6792 = vmatmul.bf16.gmra.mxu2 %v19024_v8  ;;  %v6955_v8 = vadd.f32 %v6954_v19, %v19032_v61 }
 0x73e   :  { %6881 = vmatmul.bf16.gmra.mxu3 %v19025_v54  ;;  %v7090_v54 = vmul.f32 %v19032_v61, %v19032_v61  ;;  %v7098_v61 = vmul.f32 %v19038_v43, %v19038_v43 }
 0x740   :  { %v6753_v5 = vpop.f32.mrf.mxu2  ;;  %v16032_v38 = vpop.f32.mrf.mxu0 }
 0x741   :  { %v6754_v52 = vadd.f32 %v6753_v5, %v6665_v40  ;;  %v6842_v51 = vpop.f32.mrf.mxu3  ;;  %v16034_v18 = vpop.f32.mrf.mxu1  ;;  %v19033_v5 = vld [vmem:[#allocation25_spill] sm:$0xff] }
 0x743   :  { %v16036_v9 = vadd.f32 %v6842_v51, %v6754_v52  ;;  %v19034_v52 = vld [vmem:[#allocation26_spill] sm:$0xff]  ;;  %v7250_v51 = vadd.f32 %v7086_v3, %v7082_v39  ;;  %v19039_v39 = vld [vmem:[#allocation63_spill] sm:$0xff] }
 0x745   :  { %v7251_v53 = vadd.f32 %v7250_v51, %v7090_v54  ;;  %v19040_v54 = vld [vmem:[#allocation146_spill] sm:$0xff] }
 0x748   :  { %v16038_v63 = vpop.f32.mrf.mxu2  ;;  %v16040_v45 = vpop.f32.mrf.mxu0 }
 0x749   :  { %v16042_v1 = vpop.f32.mrf.mxu3  ;;  %v16044_v29 = vpop.f32.mrf.mxu1 }
 0x74b   :  { %6619 = vmatmul.bf16.gmra.mxu0 %v19026_v31  ;;  %v19035_v31 = vld [vmem:[#allocation136_spill] sm:$0xff] }
 0x74c   :  { %6708 = vmatmul.bf16.gmra.mxu1 %v19027_v13  ;;  %v6956_v13 = vadd.f32 %v6955_v8, %v19035_v31 }
 0x74d   :  { %6797 = vmatmul.bf16.gmra.mxu2 %v19028_v33  ;;  %v7094_v33 = vmul.f32 %v19035_v31, %v19035_v31 }
 0x74e   :  { %6886 = vmatmul.bf16.gmra.mxu3 %v19029_v16  ;;  %v19036_v16 = vld [vmem:[#allocation27_spill] sm:$0xff]  ;;  %v6957_v19 = vadd.f32 %v6956_v13, %v19038_v43  ;;  %v7106_v13 = vmul.f32 %v19040_v54, %v19040_v54 }
 0x74f   :  { %v7252_v3 = vadd.f32 %v7251_v53, %v7094_v33  ;;  %v7110_v53 = vmul.f32 %v19041_v12, %v19041_v12 }
 0x750   :  { %v16050_v62 = vpop.f32.mrf.mxu2  ;;  %v16052_v28 = vpop.f32.mrf.mxu0  ;;  %v6958_v8 = vadd.f32 %v6957_v19, %v19039_v39  ;;  %v19042_v19 = vld [vmem:[#allocation91_spill] sm:$0xff] }
 0x751   :  { %v16054_v15 = vpop.f32.mrf.mxu3  ;;  %v16056_v0 = vpop.f32.mrf.mxu1 }
 0x752   :  { %v6959_v51 = vadd.f32 %v6958_v8, %v19040_v54  ;;  %v19043_v8 = vld [vmem:[#allocation75_spill] sm:$0xff]  ;;  %v19044_v54 = vld [vmem:[#allocation153_spill] sm:$0xff] }
 0x754   :  { %v6960_v47 = vadd.f32 %v6959_v51, %v19041_v12  ;;  %v19045_v12 = vld [vmem:[#allocation154_spill] sm:$0xff] }
 0x756   :  { %v6961_v37 = vadd.f32 %v6960_v47, %v19042_v19 }
 0x758   :  { %v16058_v41 = vpop.f32.mrf.mxu2  ;;  %v16060_v55 = vpop.f32.mrf.mxu0  ;;  %v6962_v48 = vadd.f32 %v6961_v37, %v19043_v8 }
 0x759   :  { %v16066_v35 = vpop.f32.mrf.mxu3  ;;  %v16068_v40 = vpop.f32.mrf.mxu1 }
 0x75a   :  { %v6963_v47 = vadd.f32 %v6962_v48, %v15928_v44 }
 0x75b   :  { %6624 = vmatmul.bf16.gmra.mxu0 %v19033_v5 }
 0x75c   :  { %6713 = vmatmul.bf16.gmra.mxu1 %v19034_v52  ;;  %v7102_v52 = vmul.f32 %v19039_v39, %v19039_v39  ;;  %v7114_v39 = vmul.f32 %v19042_v19, %v19042_v19  ;;  %v6964_v37 = vadd.f32 %v6963_v47, %v15930_v30  ;;  %v19046_v19 = vld [vmem:[#allocation155_spill] sm:$0xff] }
 0x75d   :  { %6802 = vmatmul.bf16.gmra.mxu2 %v19036_v16 }
 0x75e   :  { %6891 = vmatmul.bf16.gmra.mxu3 %v19037_v36  ;;  %v7253_v36 = vadd.f32 %v7252_v3, %v7098_v61  ;;  %v6965_v48 = vadd.f32 %v6964_v37, %v15936_v14 }
 0x760   :  { %v16085_v50 = vpop.f32.mrf.mxu2  ;;  %v16087_v5 = vpop.f32.mrf.mxu0  ;;  %v7254_v43 = vadd.f32 %v7253_v36, %v7102_v52  ;;  %v7118_v52 = vmul.f32 %v19043_v8, %v19043_v8  ;;  %v19047_v8 = vld [vmem:[#allocation156_spill] sm:$0xff] }
 0x761   :  { %v16092_v31 = vpop.f32.mrf.mxu3  ;;  %v16094_v16 = vpop.f32.mrf.mxu1 }
 0x762   :  { %v7255_v33 = vadd.f32 %v7254_v43, %v7106_v13  ;;  %v7122_v13 = vmul.f32 %v15928_v44, %v15928_v44 }
 0x764   :  { %v7256_v3 = vadd.f32 %v7255_v33, %v7110_v53  ;;  %v7126_v33 = vmul.f32 %v15930_v30, %v15930_v30 }
 0x766   :  { %v7257_v43 = vadd.f32 %v7256_v3, %v7114_v39  ;;  %v7130_v3 = vmul.f32 %v15936_v14, %v15936_v14 }
 0x768   :  { %v16105_v20 = vpop.f32.mrf.mxu2  ;;  %v16107_v61 = vpop.f32.mrf.mxu0  ;;  %v7258_v53 = vadd.f32 %v7257_v43, %v7118_v52  ;;  %v6966_v52 = vadd.f32 %v6965_v48, %v15938_v26  ;;  %v7134_v43 = vmul.f32 %v15938_v26, %v15938_v26 }
 0x769   :  { %v16112_v36 = vpop.f32.mrf.mxu3  ;;  %v16114_v51 = vpop.f32.mrf.mxu1 }
 0x76a   :  { %v7259_v39 = vadd.f32 %v7258_v53, %v7122_v13  ;;  %v6967_v13 = vadd.f32 %v6966_v52, %v15944_v4  ;;  %v7138_v53 = vmul.f32 %v15944_v4, %v15944_v4  ;;  %v6670_v52 = vadd.f32 %v16044_v29, %v16040_v45 }
 0x76b   :  { %6629 = vmatmul.bf16.gmra.mxu0 %v19044_v54 }
 0x76c   :  { %6718 = vmatmul.bf16.gmra.mxu1 %v19045_v12  ;;  %v7260_v12 = vadd.f32 %v7259_v39, %v7126_v33  ;;  %v6968_v30 = vadd.f32 %v6967_v13, %v15946_v34  ;;  %v7142_v33 = vmul.f32 %v15946_v34, %v15946_v34  ;;  %v7087_v13 = vmul.f32 %v16018_v27, %v16018_v27 }
 0x76d   :  { %6807 = vmatmul.bf16.gmra.mxu2 %v19046_v19 }
 0x76e   :  { %6896 = vmatmul.bf16.gmra.mxu3 %v19047_v8  ;;  %v7261_v8 = vadd.f32 %v7260_v12, %v7130_v3  ;;  %v6969_v26 = vrot.slane %v6968_v30, 4  ;;  %v6667_v12 = vadd.f32 %v16034_v18, %v16032_v38  ;;  %v7091_v38 = vmul.f32 %v16024_v49, %v16024_v49 }
 0x770   :  { %v16129_v44 = vpop.f32.mrf.mxu2  ;;  %v16131_v54 = vpop.f32.mrf.mxu0  ;;  %v7262_v37 = vadd.f32 %v7261_v8, %v7134_v43  ;;  %v6970_v43 = vadd.f32 %v6969_v26, %v6968_v30  ;;  %v6759_v30 = vadd.f32 %v16050_v62, %v6670_v52  ;;  %v6672_v26 = vadd.f32 %v16056_v0, %v16052_v28 }
 0x771   :  { %v16136_v47 = vpop.f32.mrf.mxu3  ;;  %v16138_v19 = vpop.f32.mrf.mxu1 }
 0x772   :  { %v7263_v39 = vadd.f32 %v7262_v37, %v7138_v53  ;;  %v6756_v53 = vadd.f32 %v16038_v63, %v6667_v12  ;;  %v7095_v12 = vmul.f32 %v16026_v24, %v16026_v24  ;;  %v6761_v28 = vadd.f32 %v16058_v41, %v6672_v26 }
 0x774   :  { %v7264_v22 = vadd.f32 %v7263_v39, %v7142_v33  ;;  %v16176_v62 = vadd.f32 %v16042_v1, %v6756_v53  ;;  %v6680_v1 = vadd.f32 %v16114_v51, %v16107_v61 }
 0x776   :  { %v7265_v8 = vrot.slane %v7264_v22, 4  ;;  %v6769_v26 = vadd.f32 %v16129_v44, %v6680_v1 }
 0x778   :  { %v16146_v48 = vpop.f32.mrf.mxu2  ;;  %v6595_v14 = vpop.f32.mrf.mxu0  ;;  %v7266_v45 = vadd.f32 %v7265_v8, %v7264_v22  ;;  %v16183_v22 = vadd.f32 %v16054_v15, %v6759_v30 }
 0x779   :  { %v16148_v42 = vpop.f32.mrf.mxu3  ;;  %v6684_v3 = vpop.f32.mrf.mxu1 }
 0x77b   :  { %6634 = vmatmul.bf16.gmra.mxu0 %v15274_v10  ;;  %v7083_v10 = vmul.f32 %v16016_v56, %v16016_v56 }
 0x77c   :  { %6723 = vmatmul.bf16.gmra.mxu1 %v15280_v6  ;;  %v6975_v6 = vadd.f32 %v16018_v27, %v16016_v56 }
 0x77d   :  { %6812 = vmatmul.bf16.gmra.mxu2 %v15286_v17  ;;  %v6675_v17 = vadd.f32 %v16068_v40, %v16060_v55  ;;  %v7271_v29 = vadd.f32 %v7087_v13, %v7083_v10  ;;  %v7099_v40 = vmul.f32 %v16036_v9, %v16036_v9  ;;  %v7267_v13 = vrot.slane %v7266_v45, 2 }
 0x77e   :  { %6901 = vmatmul.bf16.gmra.mxu3 %v15292_v58  ;;  %v6971_v58 = vrot.slane %v6970_v43, 2  ;;  %v6976_v39 = vadd.f32 %v6975_v6, %v16024_v49  ;;  %v6677_v10 = vadd.f32 %v16094_v16, %v16087_v5  ;;  %v16194_v6 = vadd.f32 %v16066_v35, %v6761_v28 }
 0x77f   :  { %v7272_v0 = vadd.f32 %v7271_v29, %v7091_v38  ;;  %v6764_v52 = vadd.f32 %v16085_v50, %v6675_v17  ;;  %v7103_v38 = vmul.f32 %v16176_v62, %v16176_v62  ;;  %v7107_v5 = vmul.f32 %v16183_v22, %v16183_v22 }
 0x780   :  { %v6773_v18 = vpop.f32.mrf.mxu2  ;;  %v6597_v63 = vpop.f32.mrf.mxu0  ;;  %v6977_v55 = vadd.f32 %v6976_v39, %v16026_v24  ;;  %v6972_v8 = vadd.f32 %v6971_v58, %v6970_v43  ;;  %v6766_v15 = vadd.f32 %v16105_v20, %v6677_v10  ;;  %v6682_v35 = vadd.f32 %v16138_v19, %v16131_v54 }
 0x781   :  { %v6862_v37 = vpop.f32.mrf.mxu3  ;;  %v6686_v33 = vpop.f32.mrf.mxu1  ;;  %v7273_v41 = vadd.f32 %v7272_v0, %v7095_v12  ;;  %v16201_v16 = vadd.f32 %v16092_v31, %v6764_v52  ;;  %v6685_v17 = vadd.f32 %v6684_v3, %v6595_v14  ;;  %v7268_v29 = vadd.f32 %v7267_v13, %v7266_v45 }
 0x782   :  { %v6978_v53 = vadd.f32 %v6977_v55, %v16036_v9  ;;  %v6973_v30 = vrot.slane %v6972_v8, 1  ;;  %v7111_v28 = vmul.f32 %v16194_v6, %v16194_v6  ;;  %v16210_v31 = vadd.f32 %v16112_v36, %v6766_v15 }
 0x783   :  { %v7274_v50 = vadd.f32 %v7273_v41, %v7099_v40  ;;  %v6771_v0 = vadd.f32 %v16146_v48, %v6682_v35  ;;  %v7115_v14 = vmul.f32 %v16201_v16, %v16201_v16  ;;  %v16219_v19 = vadd.f32 %v16136_v47, %v6769_v26 }
 0x784   :  { %v6979_v43 = vadd.f32 %v6978_v53, %v16176_v62  ;;  %v6774_v3 = vadd.f32 %v6773_v18, %v6685_v17  ;;  %v6687_v45 = vadd.f32 %v6686_v33, %v6597_v63  ;;  %v6974_v36 = vadd.f32 %v6973_v30, %v6972_v8 }
 0x785   :  { %v7275_v39 = vadd.f32 %v7274_v50, %v7103_v38  ;;  %v7269_v48 = vrot.slane %v7268_v29, 1  ;;  %v7119_v52 = vmul.f32 %v16210_v31, %v16210_v31 }
 0x786   :  { %v6980_v12 = vadd.f32 %v6979_v43, %v16183_v22  ;;  %v16232_v8 = vadd.f32 %v6862_v37, %v6774_v3  ;;  %v16234_v53 = vmul.f32 0.0078125, %v6974_v36 }
 0x787   :  { %v7276_v44 = vadd.f32 %v7275_v39, %v7107_v5  ;;  %v7270_v41 = vadd.f32 %v7269_v48, %v7268_v29  ;;  %v7038_v48 = vadd.f32 %v15954_v21, %v15952_v57 }
 0x788   :  { %v6775_v61 = vpop.f32.mrf.mxu2  ;;  %v6600_v51 = vpop.f32.mrf.mxu0  ;;  %v6981_v54 = vadd.f32 %v6980_v12, %v16194_v6  ;;  %v7131_v37 = vmul.f32 %v16232_v8, %v16232_v8  ;;  %v7394_v30 = vmul.f32 %v16234_v53, %v16234_v53 }
 0x789   :  { %v6864_v58 = vpop.f32.mrf.mxu3  ;;  %v6689_v20 = vpop.f32.mrf.mxu1  ;;  %v7277_v40 = vadd.f32 %v7276_v44, %v7111_v28  ;;  %v6776_v47 = vadd.f32 %v6775_v61, %v6687_v45 }
 0x78a   :  { %v6690_v55 = vadd.f32 %v6689_v20, %v6600_v51  ;;  %v7386_v51 = vmul.f32 0.0078125, %v7270_v41 }
 0x78b   :  { %6639 = vmatmul.bf16.gmra.mxu0 %v18852_v46  ;;  %v6982_v46 = vadd.f32 %v6981_v54, %v16201_v16  ;;  %v7278_v13 = vadd.f32 %v7277_v40, %v7115_v14  ;;  %v16239_v50 = vadd.f32 %v6864_v58, %v6776_v47 }
 0x78c   :  { %6728 = vmatmul.bf16.gmra.mxu1 %v18853_v7  ;;  %v16227_v7 = vadd.f32 %v16148_v42, %v6771_v0  ;;  %v7402_v14 = vsub.f32 %v7386_v51, %v7394_v30  ;;  %v7158_v30 = vmul.f32 %v15962_v11, %v15962_v11 }
 0x78d   :  { %6817 = vmatmul.bf16.gmra.mxu2 %v18854_v32  ;;  %v6983_v33 = vadd.f32 %v6982_v46, %v16210_v31  ;;  %v7123_v32 = vmul.f32 %v16219_v19, %v16219_v19  ;;  %v7279_v38 = vadd.f32 %v7278_v13, %v7119_v52  ;;  %v7135_v17 = vmul.f32 %v16239_v50, %v16239_v50 }
 0x78e   :  { %6906 = vmatmul.bf16.gmra.mxu3 %v18855_v23  ;;  %v7127_v15 = vmul.f32 %v16227_v7, %v16227_v7  ;;  %v7410_v47 = vmax.f32 %v7402_v14, 0.0  ;;  %v7150_v13 = vmul.f32 %v15954_v21, %v15954_v21 }
 0x78f   :  { %v6984_v42 = vadd.f32 %v6983_v33, %v16219_v19  ;;  %v7280_v43 = vadd.f32 %v7279_v38, %v7123_v32  ;;  %v7146_v32 = vmul.f32 %v15952_v57, %v15952_v57 }
 0x790   :  { %v6778_v18 = vpop.f32.mrf.mxu2  ;;  %v6602_v63 = vpop.f32.mrf.mxu0 }
 0x791   :  { %v6779_v23 = vadd.f32 %v6778_v18, %v6690_v55  ;;  %v6867_v10 = vpop.f32.mrf.mxu3  ;;  %v6691_v1 = vpop.f32.mrf.mxu1  ;;  %v6985_v5 = vadd.f32 %v6984_v42, %v16227_v7  ;;  %v7281_v26 = vadd.f32 %v7280_v43, %v7127_v15  ;;  %v7039_v18 = vadd.f32 %v7038_v48, %v15960_v59 }
 0x792   :  { %v6692_v58 = vadd.f32 %v6691_v1, %v6602_v63  ;;  %v7334_v51 = vadd.f32 %v7150_v13, %v7146_v32  ;;  %v7170_v48 = vmul.f32 %v15976_v60, %v15976_v60 }
 0x793   :  { %v16244_v61 = vadd.f32 %v6867_v10, %v6779_v23  ;;  %v6986_v35 = vadd.f32 %v6985_v5, %v16232_v8  ;;  %v7282_v39 = vadd.f32 %v7281_v26, %v7131_v37  ;;  %v7154_v23 = vmul.f32 %v15960_v59, %v15960_v59 }
 0x794   :  { %v7040_v41 = vadd.f32 %v7039_v18, %v15962_v11  ;;  %v16270_v37 = vadd.f32 1e-05, %v7410_v47 }
 0x795   :  { %v6987_v12 = vadd.f32 %v6986_v35, %v16239_v50  ;;  %v7139_v28 = vmul.f32 %v16244_v61, %v16244_v61  ;;  %v7283_v45 = vadd.f32 %v7282_v39, %v7135_v17  ;;  %v7162_v39 = vmul.f32 %v15968_v2, %v15968_v2 }
 0x796   :  { %v7041_v35 = vadd.f32 %v7040_v41, %v15968_v2  ;;  %10227 = vrsqrt.f32 %v16270_v37  ;;  %v19050_v41 = vld [vmem:[#allocation82_spill] sm:$0xff]  ;;  %vm7450_vm4 = vweird.f32 %v16270_v37  ;;  %v19072_v2 = vld [vmem:[#allocation84_spill] sm:$0xff] }
 0x797   :  { %v6988_v55 = vadd.f32 %v6987_v12, %v16244_v61  ;;  %v7284_v40 = vadd.f32 %v7283_v45, %v7139_v28 }
 0x798   :  { %v6780_v20 = vpop.f32.mrf.mxu2  ;;  %v6605_v29 = vpop.f32.mrf.mxu0  ;;  %v7042_v12 = vadd.f32 %v7041_v35, %v15970_v25 }
 0x799   :  { %v6781_v0 = vadd.f32 %v6780_v20, %v6692_v58  ;;  %v6869_v44 = vpop.f32.mrf.mxu3  ;;  %v6694_v54 = vpop.f32.mrf.mxu1 }
 0x79a   :  { %v6695_v3 = vadd.f32 %v6694_v54, %v6605_v29  ;;  %v7335_v29 = vadd.f32 %v7334_v51, %v7154_v23  ;;  %v7166_v54 = vmul.f32 %v15970_v25, %v15970_v25  ;;  %v7043_v14 = vadd.f32 %v7042_v12, %v15976_v60  ;;  %v19053_v12 = vld [vmem:[#allocation51_spill] sm:$0xff]  ;;  %v19076_v60 = vld [vmem:[#allocation38_spill] sm:$0xff] }
 0x79b   :  { %v16255_v36 = vadd.f32 %v6869_v44, %v6781_v0  ;;  %v7178_v51 = vmul.f32 %v19050_v41, %v19050_v41 }
 0x79c   :  { %v7336_v44 = vadd.f32 %v7335_v29, %v7158_v30  ;;  %v16296_v30 = vpop.eup %10227 }
 0x79d   :  { %v6989_v46 = vadd.f32 %v6988_v55, %v16255_v36  ;;  %v7143_v52 = vmul.f32 %v16255_v36, %v16255_v36  ;;  %vm7451_vm15 = vweird.f32 %v16296_v30 }
 0x79e   :  { %v7337_v55 = vadd.f32 %v7336_v44, %v7162_v39  ;;  %v7445_v44 = vmul.f32 %v16296_v30, %v16270_v37  ;;  %vm7452_vm6 = vmor %vm7450_vm4, %vm7451_vm15 }
 0x79f   :  { %v6990_v63 = vrot.slane %v6989_v46, 4  ;;  %v7285_v33 = vadd.f32 %v7284_v40, %v7143_v52  ;;  %v19049_v52 = vld [vmem:[#allocation20_spill] sm:$0xff]  ;;  %vm19119_vm4 = vmmov %vm19062_vm9 }
 0x7a0   :  { %v6783_v10 = vpop.f32.mrf.mxu2  ;;  %v6607_v1 = vpop.f32.mrf.mxu0  ;;  %v7044_v47 = vadd.f32 %v7043_v14, %v19049_v52  ;;  %v7338_v23 = vadd.f32 %v7337_v55, %v7166_v54  ;;  %v19054_v55 = vld [vmem:[#allocation137_spill] sm:$0xff] }
 0x7a1   :  { %v6991_v38 = vadd.f32 %v6990_v63, %v6989_v46  ;;  %v7286_v42 = vrot.slane %v7285_v33, 4  ;;  %v6784_v15 = vadd.f32 %v6783_v10, %v6695_v3  ;;  %v6872_v43 = vpop.f32.mrf.mxu3  ;;  %v6696_v5 = vpop.f32.mrf.mxu1  ;;  %v7174_v10 = vmul.f32 %v19049_v52, %v19049_v52 }
 0x7a2   :  { %v6697_v26 = vadd.f32 %v6696_v5, %v6607_v1  ;;  %v7339_v5 = vadd.f32 %v7338_v23, %v7170_v48 }
 0x7a3   :  { %v6992_v17 = vrot.slane %v6991_v38, 2  ;;  %v7287_v58 = vadd.f32 %v7286_v42, %v7285_v33  ;;  %v16275_v20 = vadd.f32 %v6872_v43, %v6784_v15 }
 0x7a4   :  { %v7340_v29 = vadd.f32 %v7339_v5, %v7174_v10 }
 0x7a5   :  { %19048 = vst [vmem:[#allocation111_spill] sm:$0xff] %v16275_v20  ;;  %v6993_v28 = vadd.f32 %v6992_v17, %v6991_v38  ;;  %v7288_v0 = vrot.slane %v7287_v58, 2  ;;  %v7045_v38 = vadd.f32 %v7044_v47, %v19050_v41  ;;  %v19082_v41 = vld [vmem:[#allocation73_spill] sm:$0xff] }
 0x7a6   :  { %v7341_v54 = vadd.f32 %v7340_v29, %v7178_v51  ;;  %v19058_v29 = vld [vmem:[#allocation94_spill] sm:$0xff] }
 0x7a7   :  { %v6994_v3 = vrot.slane %v6993_v28, 1  ;;  %v7289_v45 = vadd.f32 %v7288_v0, %v7287_v58 }
 0x7a8   :  { %v6785_v40 = vpop.f32.mrf.mxu2  ;;  %v6610_v46 = vpop.f32.mrf.mxu0 }
 0x7a9   :  { %v6995_v13 = vadd.f32 %v6994_v3, %v6993_v28  ;;  %v7290_v18 = vrot.slane %v7289_v45, 1  ;;  %v6786_v63 = vadd.f32 %v6785_v40, %v6697_v26  ;;  %v6874_v33 = vpop.f32.mrf.mxu3  ;;  %v6699_v32 = vpop.f32.mrf.mxu1  ;;  %v19052_v26 = vld [vmem:[#allocation83_spill] sm:$0xff] }
 0x7aa   :  { %v6700_v1 = vadd.f32 %v6699_v32, %v6610_v46  ;;  %v7046_v35 = vadd.f32 %v7045_v38, %v19052_v26  ;;  %v7182_v39 = vmul.f32 %v19052_v26, %v19052_v26  ;;  %v19055_v32 = vld [vmem:[#allocation110_spill] sm:$0xff] }
 0x7ab   :  { %v7291_v42 = vadd.f32 %v7290_v18, %v7289_v45  ;;  %v16290_v15 = vmul.f32 0.0078125, %v6995_v13  ;;  %v16292_v43 = vadd.f32 %v6874_v33, %v6786_v63  ;;  %v7186_v45 = vmul.f32 %v19053_v12, %v19053_v12 }
 0x7ac   :  { %v7047_v28 = vadd.f32 %v7046_v35, %v19053_v12  ;;  %v7342_v18 = vadd.f32 %v7341_v54, %v7182_v39  ;;  %v7190_v33 = vmul.f32 %v19054_v55, %v19054_v55  ;;  %v7194_v51 = vmul.f32 %v19055_v32, %v19055_v32  ;;  %v19057_v35 = vld [vmem:[#allocation152_spill] sm:$0xff] }
 0x7ad   :  { %19051 = vst [vmem:[#allocation144_spill] sm:$0xff] %v16292_v43  ;;  %v7387_v17 = vmul.f32 0.0078125, %v7291_v42  ;;  %v7395_v58 = vmul.f32 %v16290_v15, %v16290_v15  ;;  %v7446_v42 = vmul.f32 %v16296_v30, %v7445_v44  ;;  %v7202_v44 = vmul.f32 %v19058_v29, %v19058_v29 }
 0x7ae   :  { %v7048_v48 = vadd.f32 %v7047_v28, %v19054_v55  ;;  %v7343_v5 = vadd.f32 %v7342_v18, %v7186_v45 }
 0x7af   :  { %v7403_v0 = vsub.f32 %v7387_v17, %v7395_v58  ;;  %v7198_v58 = vmul.f32 %v19057_v35, %v19057_v35  ;;  %v7447_v28 = vmul.f32 0.5, %v7446_v42 }
 0x7b0   :  { %v6788_v14 = vpop.f32.mrf.mxu2  ;;  %v6612_v3 = vpop.f32.mrf.mxu0  ;;  %v7049_v23 = vadd.f32 %v7048_v48, %v19055_v32  ;;  %v7344_v17 = vadd.f32 %v7343_v5, %v7190_v33 }
 0x7b1   :  { %v7411_v40 = vmax.f32 %v7403_v0, 0.0  ;;  %v6789_v46 = vadd.f32 %v6788_v14, %v6700_v1  ;;  %v6877_v47 = vpop.f32.mrf.mxu3  ;;  %v6701_v13 = vpop.f32.mrf.mxu1  ;;  %v7448_v42 = vsub.f32 1.5, %v7447_v28 }
 0x7b2   :  { %v6702_v63 = vadd.f32 %v6701_v13, %v6612_v3  ;;  %v7050_v1 = vadd.f32 %v7049_v23, %v19057_v35  ;;  %v7345_v14 = vadd.f32 %v7344_v17, %v7194_v51  ;;  %v19059_v3 = vld [vmem:[#allocation151_spill] sm:$0xff] }
 0x7b3   :  { %v7419_v10 = vadd.f32 1e-05, %v7411_v40  ;;  %v16312_v38 = vadd.f32 %v6877_v47, %v6789_v46  ;;  %v7206_v33 = vmul.f32 %v19059_v3, %v19059_v3  ;;  %v7449_v21 = vmul.f32 %v16296_v30, %v7448_v42 }
 0x7b4   :  { %v7051_v39 = vadd.f32 %v7050_v1, %v19058_v29  ;;  %v7346_v18 = vadd.f32 %v7345_v14, %v7198_v58 }
 0x7b5   :  { %19056 = vst [vmem:[#allocation145_spill] sm:$0xff] %v16312_v38  ;;  %10229 = vrsqrt.f32 %v7419_v10  ;;  %vm7460_vm7 = vweird.f32 %v7419_v10 }
 0x7b6   :  { %v7052_v45 = vadd.f32 %v7051_v39, %v19059_v3  ;;  %v7347_v1 = vadd.f32 %v7346_v18, %v7202_v44 }
 0x7b8   :  { %v6790_v0 = vpop.f32.mrf.mxu2  ;;  %v6615_v54 = vpop.f32.mrf.mxu0  ;;  %v7053_v51 = vrot.slane %v7052_v45, 4  ;;  %v7348_v57 = vadd.f32 %v7347_v1, %v7206_v33  ;;  %v7151_v1 = vmul.f32 %v16292_v43, %v16292_v43 }
 0x7b9   :  { %v6791_v48 = vadd.f32 %v6790_v0, %v6702_v63  ;;  %v6879_v40 = vpop.f32.mrf.mxu3  ;;  %v6704_v46 = vpop.f32.mrf.mxu1 }
 0x7ba   :  { %v6705_v47 = vadd.f32 %v6704_v46, %v6615_v54  ;;  %v7054_v54 = vadd.f32 %v7053_v51, %v7052_v45  ;;  %v7349_v28 = vrot.slane %v7348_v57, 4 }
 0x7bb   :  { %v10230_v13 = vpop.eup %10229  ;;  %v16326_v23 = vadd.f32 %v6879_v40, %v6791_v48  ;;  %v7453_v40 = vsel %vm7452_vm6, %v16296_v30, %v7449_v21  ;;  %v7147_v21 = vmul.f32 %v16275_v20, %v16275_v20  ;;  %vm19130_vm6 = vmmov %vm19119_vm4 }
 0x7bc   :  { %v7455_v5 = vmul.f32 %v10230_v13, %v7419_v10  ;;  %vm7461_vm2 = vweird.f32 %v10230_v13  ;;  %v7055_v33 = vrot.slane %v7054_v54, 2  ;;  %v7350_v45 = vadd.f32 %v7349_v28, %v7348_v57 }
 0x7bd   :  { %19060 = vst [vmem:[#allocation65_spill] sm:$0xff] %v16326_v23  ;;  %vm7462_vm8 = vmor %vm7460_vm7, %vm7461_vm2  ;;  %v7059_v57 = vadd.f32 %v16292_v43, %v16275_v20  ;;  %v7355_v28 = vadd.f32 %v7151_v1, %v7147_v21  ;;  %v19067_v1 = vld [vmem:[#allocation107_spill] sm:$0xff] }
 0x7be   :  { %v7456_v17 = vmul.f32 %v10230_v13, %v7455_v5  ;;  %v7513_v5 = vrot.slane %v7453_v40, 6  ;;  %v19070_v20 = vld [vmem:[#allocation95_spill] sm:$0xff]  ;;  %vm19121_vm2 = vmmov %vm19064_vm10 }
 0x7bf   :  { %v7060_v40 = vadd.f32 %v7059_v57, %v16312_v38  ;;  %v19068_v57 = vld [vmem:[#allocation157_spill] sm:$0xff]  ;;  %vm19131_vm7 = vmmov %vm19121_vm2 }
 0x7c0   :  { %v7457_v63 = vmul.f32 0.5, %v7456_v17  ;;  %v6793_v39 = vpop.f32.mrf.mxu2  ;;  %v6617_v0 = vpop.f32.mrf.mxu0 }
 0x7c1   :  { %v6794_v58 = vadd.f32 %v6793_v39, %v6705_v47  ;;  %v6882_v14 = vpop.f32.mrf.mxu3  ;;  %v6706_v46 = vpop.f32.mrf.mxu1 }
 0x7c2   :  { %v7458_v48 = vsub.f32 1.5, %v7457_v63  ;;  %v6707_v37 = vadd.f32 %v6706_v46, %v6617_v0  ;;  %v7056_v63 = vadd.f32 %v7055_v33, %v7054_v54  ;;  %v7351_v46 = vrot.slane %v7350_v45, 2 }
 0x7c3   :  { %v16331_v44 = vadd.f32 %v6882_v14, %v6794_v58  ;;  %v19063_v58 = vld [vmem:[#allocation50_spill] sm:$0xff]  ;;  %v7155_v14 = vmul.f32 %v16312_v38, %v16312_v38 }
 0x7c4   :  { %v7459_v18 = vmul.f32 %v10230_v13, %v7458_v48  ;;  %v19065_v48 = vld [vmem:[#allocation37_spill] sm:$0xff]  ;;  %v16382_v25 = vadd.f32 %v7351_v46, %v7350_v45 }
 0x7c5   :  { %19061 = vst [vmem:[#allocation41_spill] sm:$0xff] %v16331_v44 }
 0x7c6   :  { %v7463_v42 = vsel %vm7462_vm8, %v10230_v13, %v7459_v18  ;;  %v7159_v18 = vmul.f32 %v16326_v23, %v16326_v23 }
 0x7c7   :  { %v7514_v47 = vrot.slane %v7463_v42, 5 }
 0x7c8   :  { %v6795_v51 = vpop.f32.mrf.mxu2  ;;  %v6620_v17 = vpop.f32.mrf.mxu0 }
 0x7c9   :  { %v7519_v39 = vsel %vm19062_vm9, %v7513_v5, %v7514_v47  ;;  %v6884_v30 = vpop.f32.mrf.mxu3  ;;  %v6709_v10 = vpop.f32.mrf.mxu1  ;;  %v6796_v0 = vadd.f32 %v6795_v51, %v6707_v37  ;;  %v7356_v37 = vadd.f32 %v7355_v28, %v7155_v14  ;;  %v7061_v51 = vadd.f32 %v7060_v40, %v16326_v23 }
 0x7ca   :  { %v7520_v13 = vsel %vm19064_vm10, %v19063_v58, %v7519_v39  ;;  %v6710_v33 = vadd.f32 %v6709_v10, %v6620_v17  ;;  %v7057_v58 = vrot.slane %v7056_v63, 1  ;;  %v7163_v14 = vmul.f32 %v16331_v44, %v16331_v44 }
 0x7cb   :  { %v7526_v54 = vmul.f32 %v7520_v13, %v19065_v48  ;;  %v16358_v13 = vadd.f32 %v6884_v30, %v6796_v0  ;;  %v19069_v30 = vld [vmem:[#allocation22_spill] sm:$0xff] }
 0x7cd   :  { %v16349_v42 = vperm.slane %v7526_v54, 0  ;;  %v16351_v5 = vperm.slane %v7526_v54, 1  ;;  %v16353_v47 = vperm.slane %v7526_v54, 2  ;;  %v16355_v39 = vperm.slane %v7526_v54, 3  ;;  %19066 = vst [vmem:[#allocation42_spill] sm:$0xff] %v16358_v13 }
 0x7ce   :  { %v7357_v54 = vadd.f32 %v7356_v37, %v7159_v18  ;;  %v19071_v37 = vld [vmem:[#allocation21_spill] sm:$0xff] }
 0x7cf   :  { %v7546_v21 = vmul.f32 %v16349_v42, %v19067_v1  ;;  %v7547_v17 = vmul.f32 %v16351_v5, %v19068_v57  ;;  %v7548_v10 = vmul.f32 %v16353_v47, %v16234_v53  ;;  %v7549_v48 = vmul.f32 %v16355_v39, %v16290_v15 }
 0x7d0   :  { %v6798_v28 = vpop.f32.mrf.mxu2  ;;  %v6622_v40 = vpop.f32.mrf.mxu0  ;;  %v7638_v0 = vmul.f32 %v16349_v42, %v19069_v30  ;;  %v7639_v1 = vmul.f32 %v16351_v5, %v19070_v20  ;;  %v7167_v15 = vmul.f32 %v16358_v13, %v16358_v13  ;;  %v7640_v18 = vmul.f32 %v16353_v47, %v15946_v34 }
 0x7d1   :  { %v7562_v43 = vrot.slane %v7547_v17, 7  ;;  %v7563_v57 = vrot.slane %v7548_v10, 6  ;;  %v7564_v38 = vrot.slane %v7549_v48, 5  ;;  %v6799_v59 = vadd.f32 %v6798_v28, %v6710_v33  ;;  %v6887_v53 = vpop.f32.mrf.mxu3  ;;  %v6711_v23 = vpop.f32.mrf.mxu1 }
 0x7d2   :  { %v7634_v11 = vmul.f32 %v16349_v42, %v19071_v37  ;;  %v7635_v30 = vmul.f32 %v16351_v5, %v19072_v2  ;;  %v7062_v17 = vadd.f32 %v7061_v51, %v16331_v44  ;;  %v7358_v48 = vadd.f32 %v7357_v54, %v7163_v14 }
 0x7d3   :  { %v7568_v20 = vsel %vm2393_vm0, %v7546_v21, %v7562_v43  ;;  %v7569_v33 = vsel %vm19073_vm11, %v7563_v57, %v7564_v38  ;;  %v16388_v28 = vadd.f32 %v6887_v53, %v6799_v59  ;;  %v7637_v34 = vmul.f32 %v16355_v39, %v16244_v61  ;;  %v19077_v21 = vld [vmem:[#allocation126_spill] sm:$0xff] }
 0x7d4   :  { %v7570_v10 = vsel %vm19074_vm12, %v7568_v20, %v7569_v33  ;;  %v16392_v37 = vadd.f32 %v7057_v58, %v7056_v63  ;;  %v7641_v45 = vmul.f32 %v16355_v39, %v16255_v36  ;;  %v7063_v43 = vadd.f32 %v7062_v17, %v16358_v13  ;;  %v19079_v57 = vld [vmem:[#allocation74_spill] sm:$0xff] }
 0x7d5   :  { %19075 = vst [vmem:[#allocation43_spill] sm:$0xff] %v16388_v28  ;;  %v7576_v2 = vsub.f32 %v19076_v60, %v7570_v10  ;;  %v7359_v38 = vadd.f32 %v7358_v48, %v7167_v15  ;;  %v6712_v46 = vadd.f32 %v6711_v23, %v6622_v40  ;;  %v7636_v51 = vmul.f32 %v16353_v47, %v15944_v4  ;;  %v19078_v4 = vld [vmem:[#allocation140_spill] sm:$0xff] }
 0x7d6   :  { %v7630_v59 = vmul.f32 %v16349_v42, %v19077_v21  ;;  %v16411_v36 = vadd.f32 %v7063_v43, %v16388_v28  ;;  %v7171_v23 = vmul.f32 %v16388_v28, %v16388_v28  ;;  %v7631_v40 = vmul.f32 %v16351_v5, %v19078_v4  ;;  %v19080_v4 = vld [vmem:[#allocation69_spill] sm:$0xff]  ;;  %v19081_v28 = vld [vmem:[#allocation40_spill] sm:$0xff] }
 0x7d7   :  { %v16402_v54 = vperm.slane %v7576_v2, 0  ;;  %v16404_v61 = vperm.slane %v7576_v2, 1  ;;  %v16406_v63 = vperm.slane %v7576_v2, 2  ;;  %v16408_v60 = vperm.slane %v7576_v2, 3 }
 0x7d8   :  { %v6800_v58 = vpop.f32.mrf.mxu2  ;;  %v6625_v14 = vpop.f32.mrf.mxu0  ;;  %v7632_v53 = vmul.f32 %v16353_v47, %v19079_v57  ;;  %v7633_v48 = vmul.f32 %v16355_v39, %v16239_v50  ;;  %v7626_v57 = vmul.f32 %v16349_v42, %v19080_v4  ;;  %v7628_v50 = vmul.f32 %v16353_v47, %v19082_v41 }
 0x7d9   :  { %v7787_v15 = vadd.f32 %v16408_v60, %v7641_v45  ;;  %v6889_v20 = vpop.f32.mrf.mxu3  ;;  %v7784_v33 = vadd.f32 %v16402_v54, %v7638_v0  ;;  %v7785_v17 = vadd.f32 %v16404_v61, %v7639_v1  ;;  %v6714_v10 = vpop.f32.mrf.mxu1  ;;  %v7786_v2 = vadd.f32 %v16406_v63, %v7640_v18 }
 0x7da   :  { %v7780_v43 = vadd.f32 %v16402_v54, %v7634_v11  ;;  %v7781_v21 = vadd.f32 %v16404_v61, %v7635_v30  ;;  %v7627_v0 = vmul.f32 %v16351_v5, %v19081_v28  ;;  %v7782_v52 = vadd.f32 %v16406_v63, %v7636_v51 }
 0x7db   :  { %v7912_v44 = vmax.f32 %v7784_v33, 0.0  ;;  %v7913_v45 = vmax.f32 %v7785_v17, 0.0  ;;  %v7915_v13 = vmax.f32 %v7787_v15, 0.0  ;;  %v7914_v1 = vmax.f32 %v7786_v2, 0.0 }
 0x7dc   :  { %v7629_v11 = vmul.f32 %v16355_v39, %v16232_v8  ;;  %v6801_v18 = vadd.f32 %v6800_v58, %v6712_v46  ;;  %v6715_v30 = vadd.f32 %v6714_v10, %v6625_v14  ;;  %v7783_v33 = vadd.f32 %v16408_v60, %v7637_v34  ;;  %v19083_v10 = vld [vmem:[#allocation104_spill] sm:$0xff] }
 0x7dd   :  { %8001 = vmatpush.xpose.msra.mxu0 %v7912_v44  ;;  %8021 = vmatpush.xpose.msra.mxu1 %v7913_v45  ;;  %v7776_v15 = vadd.f32 %v16402_v54, %v7630_v59  ;;  %v7777_v28 = vadd.f32 %v16404_v61, %v7631_v40  ;;  %v7778_v51 = vadd.f32 %v16406_v63, %v7632_v53  ;;  %v7908_v17 = vmax.f32 %v7780_v43, 0.0 }
 0x7de   :  { %8041 = vmatpush.xpose.msra.mxu2 %v7914_v1  ;;  %8061 = vmatpush.xpose.msra.mxu3 %v7915_v13  ;;  %v7909_v2 = vmax.f32 %v7781_v21, 0.0  ;;  %v7779_v41 = vadd.f32 %v16408_v60, %v7633_v48  ;;  %v7772_v8 = vadd.f32 %v16402_v54, %v7626_v57  ;;  %v7910_v44 = vmax.f32 %v7782_v52, 0.0  ;;  %v19084_v48 = vld [vmem:[#allocation163_spill] sm:$0xff] }
 0x7df   :  { %v7911_v58 = vmax.f32 %v7783_v33, 0.0  ;;  %v7773_v34 = vadd.f32 %v16404_v61, %v7627_v0  ;;  %v7622_v13 = vmul.f32 %v16349_v42, %v19083_v10  ;;  %v16445_v59 = vadd.f32 %v6889_v20, %v6801_v18  ;;  %v19085_v18 = vld [vmem:[#allocation97_spill] sm:$0xff] }
 0x7e0   :  { %v6803_v46 = vpop.f32.mrf.mxu2  ;;  %v6627_v14 = vpop.f32.mrf.mxu0  ;;  %v7774_v43 = vadd.f32 %v16406_v63, %v7628_v50  ;;  %v7623_v21 = vmul.f32 %v16351_v5, %v19084_v48  ;;  %v7360_v4 = vadd.f32 %v7359_v38, %v7171_v23  ;;  %v7904_v52 = vmax.f32 %v7776_v15, 0.0  ;;  %v19086_v38 = vld [vmem:[#allocation103_spill] sm:$0xff] }
 0x7e1   :  { %8002 = vmatpush.xpose.msra.mxu0 %v7908_v17  ;;  %8022 = vmatpush.xpose.msra.mxu1 %v7909_v2  ;;  %v6892_v40 = vpop.f32.mrf.mxu3  ;;  %v6716_v53 = vpop.f32.mrf.mxu1  ;;  %v7775_v57 = vadd.f32 %v16408_v60, %v7629_v11  ;;  %v7768_v45 = vadd.f32 %v16402_v54, %v7622_v13  ;;  %v6804_v0 = vadd.f32 %v6803_v46, %v6715_v30  ;;  %v7905_v20 = vmax.f32 %v7777_v28, 0.0 }
 0x7e2   :  { %8042 = vmatpush.xpose.msra.mxu2 %v7910_v44  ;;  %8062 = vmatpush.xpose.msra.mxu3 %v7911_v58  ;;  %v7769_v1 = vadd.f32 %v16404_v61, %v7623_v21  ;;  %v7624_v33 = vmul.f32 %v16353_v47, %v19085_v18  ;;  %v7906_v17 = vmax.f32 %v7778_v51, 0.0  ;;  %v7907_v50 = vmax.f32 %v7779_v41, 0.0  ;;  %v19087_v41 = vld [vmem:[#allocation46_spill] sm:$0xff]  ;;  %v19089_v18 = vld [vmem:[#allocation101_spill] sm:$0xff] }
 0x7e3   :  { %v7625_v2 = vmul.f32 %v16355_v39, %v16227_v7  ;;  %v7618_v23 = vmul.f32 %v16349_v42, %v19086_v38  ;;  %v7065_v11 = vadd.f32 %v16411_v36, %v16445_v59  ;;  %v7175_v30 = vmul.f32 %v16445_v59, %v16445_v59  ;;  %v19088_v58 = vld [vmem:[#allocation122_spill] sm:$0xff] }
 0x7e4   :  { %v7770_v15 = vadd.f32 %v16406_v63, %v7624_v33  ;;  %v7900_v28 = vmax.f32 %v7772_v8, 0.0  ;;  %v7619_v46 = vmul.f32 %v16351_v5, %v19087_v41  ;;  %v16468_v44 = vadd.f32 %v6892_v40, %v6804_v0 }
 0x7e5   :  { %8003 = vmatpush.xpose.msra.mxu0 %v7904_v52  ;;  %8023 = vmatpush.xpose.msra.mxu1 %v7905_v20  ;;  %v7771_v51 = vadd.f32 %v16408_v60, %v7625_v2  ;;  %v7764_v7 = vadd.f32 %v16402_v54, %v7618_v23  ;;  %v7901_v36 = vmax.f32 %v7773_v34, 0.0  ;;  %v7620_v10 = vmul.f32 %v16353_v47, %v19088_v58  ;;  %v19090_v2 = vld [vmem:[#allocation162_spill] sm:$0xff] }
 0x7e6   :  { %8043 = vmatpush.xpose.msra.mxu2 %v7906_v17  ;;  %8063 = vmatpush.xpose.msra.mxu3 %v7907_v50  ;;  %v7621_v13 = vmul.f32 %v16355_v39, %v16219_v19  ;;  %v7902_v21 = vmax.f32 %v7774_v43, 0.0  ;;  %v7903_v52 = vmax.f32 %v7775_v57, 0.0  ;;  %v7765_v20 = vadd.f32 %v16404_v61, %v7619_v46 }
 0x7e7   :  { %v7614_v33 = vmul.f32 %v16349_v42, %v19089_v18  ;;  %v7361_v17 = vadd.f32 %v7360_v4, %v7175_v30  ;;  %v7766_v0 = vadd.f32 %v16406_v63, %v7620_v10  ;;  %v6717_v19 = vadd.f32 %v6716_v53, %v6627_v14  ;;  %v19092_v53 = vld [vmem:[#allocation148_spill] sm:$0xff] }
 0x7e8   :  { %v6805_v48 = vpop.f32.mrf.mxu2  ;;  %v16474_v8 = vpop.f32.mrf.mxu0  ;;  %v7767_v50 = vadd.f32 %v16408_v60, %v7621_v13  ;;  %v7896_v43 = vmax.f32 %v7768_v45, 0.0  ;;  %v7615_v38 = vmul.f32 %v16351_v5, %v19090_v2  ;;  %v16485_v23 = vadd.f32 %v7065_v11, %v16468_v44 }
 0x7e9   :  { %8004 = vmatpush.xpose.msra.mxu0 %v7900_v28  ;;  %8024 = vmatpush.xpose.msra.mxu1 %v7901_v36  ;;  %v6894_v34 = vpop.f32.mrf.mxu3  ;;  %v6719_v40 = vpop.f32.mrf.mxu1  ;;  %v7760_v57 = vadd.f32 %v16402_v54, %v7614_v33  ;;  %v7897_v4 = vmax.f32 %v7769_v1, 0.0  ;;  %v7898_v30 = vmax.f32 %v7770_v15, 0.0  ;;  %v19091_v28 = vld [vmem:[#allocation75_spill] sm:$0xff]  ;;  %v7899_v46 = vmax.f32 %v7771_v51, 0.0  ;;  %v19093_v51 = vld [vmem:[#allocation138_spill] sm:$0xff] }
 0x7ea   :  { %8044 = vmatpush.xpose.msra.mxu2 %v7902_v21  ;;  %8064 = vmatpush.xpose.msra.mxu3 %v7903_v52  ;;  %v7616_v41 = vmul.f32 %v16353_v47, %v19091_v28  ;;  %v7761_v36 = vadd.f32 %v16404_v61, %v7615_v38  ;;  %v7617_v14 = vmul.f32 %v16355_v39, %v16210_v31  ;;  %v7892_v13 = vmax.f32 %v7764_v7, 0.0  ;;  %v19094_v52 = vld [vmem:[#allocation91_spill] sm:$0xff] }
 0x7eb   :  { %v7610_v45 = vmul.f32 %v16349_v42, %v19092_v53  ;;  %v7179_v58 = vmul.f32 %v16468_v44, %v16468_v44  ;;  %v6806_v10 = vadd.f32 %v6805_v48, %v6717_v19  ;;  %v7611_v31 = vmul.f32 %v16351_v5, %v19093_v51 }
 0x7ec   :  { %v7762_v1 = vadd.f32 %v16406_v63, %v7616_v41  ;;  %v7763_v11 = vadd.f32 %v16408_v60, %v7617_v14  ;;  %v7893_v21 = vmax.f32 %v7765_v20, 0.0  ;;  %v7612_v18 = vmul.f32 %v16353_v47, %v19094_v52 }
 0x7ed   :  { %8005 = vmatpush.xpose.msra.mxu0 %v7896_v43  ;;  %8025 = vmatpush.xpose.msra.mxu1 %v7897_v4  ;;  %v7756_v15 = vadd.f32 %v16402_v54, %v7610_v45  ;;  %v7613_v48 = vmul.f32 %v16355_v39, %v16201_v16  ;;  %v7894_v19 = vmax.f32 %v7766_v0, 0.0  ;;  %v7895_v43 = vmax.f32 %v7767_v50, 0.0  ;;  %v19095_v4 = vld [vmem:[#allocation47_spill] sm:$0xff] }
 0x7ee   :  { %8045 = vmatpush.xpose.msra.mxu2 %v7898_v30  ;;  %8065 = vmatpush.xpose.msra.mxu3 %v7899_v46  ;;  %v7757_v38 = vadd.f32 %v16404_v61, %v7611_v31  ;;  %v7606_v30 = vmul.f32 %v16349_v42, %v19095_v4  ;;  %v16510_v28 = vadd.f32 %v6894_v34, %v6806_v10  ;;  %v19096_v46 = vld [vmem:[#allocation86_spill] sm:$0xff]  ;;  %v7888_v53 = vmax.f32 %v7760_v57, 0.0  ;;  %v19097_v10 = vld [vmem:[#allocation64_spill] sm:$0xff] }
 0x7ef   :  { %v7758_v41 = vadd.f32 %v16406_v63, %v7612_v18  ;;  %v7759_v16 = vadd.f32 %v16408_v60, %v7613_v48  ;;  %v7362_v0 = vadd.f32 %v7361_v17, %v7179_v58  ;;  %v7607_v14 = vmul.f32 %v16351_v5, %v19096_v46  ;;  %v19098_v17 = vld [vmem:[#allocation45_spill] sm:$0xff] }
 0x7f0   :  { %v6808_v33 = vpop.f32.mrf.mxu2  ;;  %v16505_v2 = vpop.f32.mrf.mxu0  ;;  %v7752_v50 = vadd.f32 %v16402_v54, %v7606_v30  ;;  %v7889_v34 = vmax.f32 %v7761_v36, 0.0  ;;  %v7890_v45 = vmax.f32 %v7762_v1, 0.0  ;;  %v7608_v51 = vmul.f32 %v16353_v47, %v19097_v10 }
 0x7f1   :  { %8006 = vmatpush.xpose.msra.mxu0 %v7892_v13  ;;  %8026 = vmatpush.xpose.msra.mxu1 %v7893_v21  ;;  %v6897_v7 = vpop.f32.mrf.mxu3  ;;  %v16512_v20 = vpop.f32.mrf.mxu1  ;;  %v7891_v31 = vmax.f32 %v7763_v11, 0.0  ;;  %v7753_v13 = vadd.f32 %v16404_v61, %v7607_v14  ;;  %v7609_v21 = vmul.f32 %v16355_v39, %v16194_v6  ;;  %v7602_v58 = vmul.f32 %v16349_v42, %v19098_v17  ;;  %v19099_v11 = vld [vmem:[#allocation129_spill] sm:$0xff] }
 0x7f2   :  { %8046 = vmatpush.xpose.msra.mxu2 %v7894_v19  ;;  %8066 = vmatpush.xpose.msra.mxu3 %v7895_v43  ;;  %v7183_v52 = vmul.f32 %v16510_v28, %v16510_v28  ;;  %v6720_v18 = vadd.f32 %v6719_v40, %v16474_v8  ;;  %v7754_v57 = vadd.f32 %v16406_v63, %v7608_v51  ;;  %v7884_v48 = vmax.f32 %v7756_v15, 0.0  ;;  %v19100_v43 = vld [vmem:[#allocation146_spill] sm:$0xff] }
 0x7f3   :  { %v7755_v36 = vadd.f32 %v16408_v60, %v7609_v21  ;;  %v7748_v1 = vadd.f32 %v16402_v54, %v7602_v58  ;;  %v7603_v6 = vmul.f32 %v16351_v5, %v19099_v11  ;;  %v7885_v19 = vmax.f32 %v7757_v38, 0.0 }
 0x7f4   :  { %v7604_v4 = vmul.f32 %v16353_v47, %v19100_v43  ;;  %v7605_v8 = vmul.f32 %v16355_v39, %v16183_v22  ;;  %v7886_v30 = vmax.f32 %v7758_v41, 0.0  ;;  %v7887_v46 = vmax.f32 %v7759_v16, 0.0 }
 0x7f5   :  { %8007 = vmatpush.xpose.msra.mxu0 %v7888_v53  ;;  %8027 = vmatpush.xpose.msra.mxu1 %v7889_v34  ;;  %v7749_v53 = vadd.f32 %v16404_v61, %v7603_v6  ;;  %v19101_v34 = vld [vmem:[#allocation133_spill] sm:$0xff]  ;;  %v6809_v10 = vadd.f32 %v6808_v33, %v6720_v18  ;;  %v16551_v41 = vadd.f32 %v16485_v23, %v16510_v28  ;;  %v7880_v21 = vmax.f32 %v7752_v50, 0.0  ;;  %v19103_v18 = vld [vmem:[#allocation63_spill] sm:$0xff] }
 0x7f6   :  { %8047 = vmatpush.xpose.msra.mxu2 %v7890_v45  ;;  %8067 = vmatpush.xpose.msra.mxu3 %v7891_v31  ;;  %v7598_v45 = vmul.f32 %v16349_v42, %v19101_v34  ;;  %v7750_v51 = vadd.f32 %v16406_v63, %v7604_v4  ;;  %v7751_v22 = vadd.f32 %v16408_v60, %v7605_v8  ;;  %v19102_v31 = vld [vmem:[#allocation36_spill] sm:$0xff]  ;;  %v7881_v17 = vmax.f32 %v7753_v13, 0.0  ;;  %v19106_v34 = vld [vmem:[#allocation147_spill] sm:$0xff] }
 0x7f7   :  { %v7599_v33 = vmul.f32 %v16351_v5, %v19102_v31  ;;  %v7882_v58 = vmax.f32 %v7754_v57, 0.0  ;;  %v7600_v11 = vmul.f32 %v16353_v47, %v19103_v18  ;;  %v7883_v6 = vmax.f32 %v7755_v36, 0.0  ;;  %v19105_v36 = vld [vmem:[#allocation34_spill] sm:$0xff] }
 0x7f8   :  { %v16538_v40 = vpop.f32.mrf.mxu2  ;;  %v16540_v14 = vpop.f32.mrf.mxu0  ;;  %v7744_v16 = vadd.f32 %v16402_v54, %v7598_v45  ;;  %v7601_v23 = vmul.f32 %v16355_v39, %v16176_v62  ;;  %v16563_v4 = vadd.f32 %v7362_v0, %v7183_v52  ;;  %v16565_v8 = vadd.f32 %v6897_v7, %v6809_v10 }
 0x7f9   :  { %8008 = vmatpush.xpose.msra.mxu0 %v7884_v48  ;;  %8028 = vmatpush.xpose.msra.mxu1 %v7885_v19  ;;  %v16545_v15 = vpop.f32.mrf.mxu3  ;;  %v6724_v38 = vpop.f32.mrf.mxu1  ;;  %v7745_v48 = vadd.f32 %v16404_v61, %v7599_v33  ;;  %v19104_v19 = vld [vmem:[#allocation85_spill] sm:$0xff]  ;;  %v7746_v50 = vadd.f32 %v16406_v63, %v7600_v11  ;;  %v7595_v62 = vmul.f32 %v16351_v5, %v19105_v36  ;;  %v7878_v45 = vmax.f32 %v7750_v51, 0.0  ;;  %v19108_v11 = vld [vmem:[#allocation66_spill] sm:$0xff] }
 0x7fa   :  { %8048 = vmatpush.xpose.msra.mxu2 %v7886_v30  ;;  %8068 = vmatpush.xpose.msra.mxu3 %v7887_v46  ;;  %v7594_v43 = vmul.f32 %v16349_v42, %v19104_v19  ;;  %v7747_v13 = vadd.f32 %v16408_v60, %v7601_v23  ;;  %v7876_v30 = vmax.f32 %v7748_v1, 0.0  ;;  %v7877_v46 = vmax.f32 %v7749_v53, 0.0  ;;  %v19109_v19 = vld [vmem:[#allocation136_spill] sm:$0xff] }
 0x7fb   :  { %v7596_v0 = vmul.f32 %v16353_v47, %v19106_v34  ;;  %v7597_v7 = vmul.f32 %v16355_v39, %v16036_v9  ;;  %v7879_v10 = vmax.f32 %v7751_v22, 0.0  ;;  %v7741_v33 = vadd.f32 %v16404_v61, %v7595_v62 }
 0x7fc   :  { %v7740_v57 = vadd.f32 %v16402_v54, %v7594_v43  ;;  %v6722_v1 = vadd.f32 %v16512_v20, %v16505_v2  ;;  %v16589_v22 = vmul.f32 %v16565_v8, %v16565_v8  ;;  %v7591_v2 = vmul.f32 %v16351_v5, %v19108_v11 }
 0x7fd   :  { %8009 = vmatpush.xpose.msra.mxu0 %v7880_v21  ;;  %8029 = vmatpush.xpose.msra.mxu1 %v7881_v17  ;;  %v19107_v21 = vld [vmem:[#allocation132_spill] sm:$0xff]  ;;  %v7742_v9 = vadd.f32 %v16406_v63, %v7596_v0  ;;  %v7743_v51 = vadd.f32 %v16408_v60, %v7597_v7  ;;  %v7872_v20 = vmax.f32 %v7744_v16, 0.0  ;;  %v7874_v23 = vmax.f32 %v7746_v50, 0.0 }
 0x7fe   :  { %8049 = vmatpush.xpose.msra.mxu2 %v7882_v58  ;;  %8069 = vmatpush.xpose.msra.mxu3 %v7883_v6  ;;  %v7590_v17 = vmul.f32 %v16349_v42, %v19107_v21  ;;  %v7873_v6 = vmax.f32 %v7745_v48, 0.0  ;;  %v7592_v43 = vmul.f32 %v16353_v47, %v19109_v19  ;;  %v7875_v36 = vmax.f32 %v7747_v13, 0.0  ;;  %v19111_v13 = vld [vmem:[#allocation30_spill] sm:$0xff] }
 0x7ff   :  { %v7737_v62 = vadd.f32 %v16404_v61, %v7591_v2  ;;  %v6811_v0 = vadd.f32 %v16538_v40, %v6722_v1  ;;  %v6725_v7 = vadd.f32 %v6724_v38, %v16540_v14  ;;  %v19112_v21 = vld [vmem:[#allocation114_spill] sm:$0xff]  ;;  %v7589_v14 = vmul.f32 %v16355_v39, %v16024_v49 }
 0x800   :  { %v6813_v52 = vpop.f32.mrf.mxu2  ;;  %v16576_v31 = vpop.f32.mrf.mxu0  ;;  %v7736_v18 = vadd.f32 %v16402_v54, %v7590_v17  ;;  %v7738_v16 = vadd.f32 %v16406_v63, %v7592_v43  ;;  %v7588_v40 = vmul.f32 %v16353_v47, %v19112_v21  ;;  %v7870_v17 = vmax.f32 %v7742_v9, 0.0  ;;  %v19113_v2 = vld [vmem:[#allocation130_spill] sm:$0xff] }
 0x801   :  { %8010 = vmatpush.xpose.msra.mxu0 %v7876_v30  ;;  %8030 = vmatpush.xpose.msra.mxu1 %v7877_v46  ;;  %v16583_v53 = vpop.f32.mrf.mxu3  ;;  %v6726_v58 = vpop.f32.mrf.mxu1  ;;  %v7593_v30 = vmul.f32 %v16355_v39, %v16026_v24  ;;  %v19110_v46 = vld [vmem:[#allocation131_spill] sm:$0xff]  ;;  %v7587_v24 = vmul.f32 %v16351_v5, %v19111_v13  ;;  %v7871_v1 = vmax.f32 %v7743_v51, 0.0  ;;  %v6814_v19 = vadd.f32 %v6813_v52, %v6725_v7  ;;  %v19114_v43 = vld [vmem:[#allocation58_spill] sm:$0xff] }
 0x802   :  { %8050 = vmatpush.xpose.msra.mxu2 %v7878_v45  ;;  %8070 = vmatpush.xpose.msra.mxu3 %v7879_v10  ;;  %v7586_v34 = vmul.f32 %v16349_v42, %v19110_v46  ;;  %v7868_v45 = vmax.f32 %v7740_v57, 0.0  ;;  %v7869_v10 = vmax.f32 %v7741_v33, 0.0  ;;  %v7734_v33 = vadd.f32 %v16406_v63, %v7588_v40  ;;  %v19116_v7 = vld [vmem:[#allocation35_spill] sm:$0xff] }
 0x803   :  { %v7739_v48 = vadd.f32 %v16408_v60, %v7593_v30  ;;  %v7733_v11 = vadd.f32 %v16404_v61, %v7587_v24  ;;  %v7864_v30 = vmax.f32 %v7736_v18, 0.0  ;;  %v7866_v46 = vmax.f32 %v7738_v16, 0.0 }
 0x804   :  { %v7732_v50 = vadd.f32 %v16402_v54, %v7586_v34  ;;  %v19115_v34 = vld [vmem:[#allocation135_spill] sm:$0xff]  ;;  %v7585_v52 = vmul.f32 %v16355_v39, %v16018_v27  ;;  %v6727_v21 = vadd.f32 %v6726_v58, %v16576_v31  ;;  %v19117_v27 = vld [vmem:[#allocation57_spill] sm:$0xff]  ;;  %v7581_v58 = vmul.f32 %v16355_v39, %v16016_v56 }
 0x805   :  { %8011 = vmatpush.xpose.msra.mxu0 %v7872_v20  ;;  %8031 = vmatpush.xpose.msra.mxu1 %v7873_v6  ;;  %v7582_v20 = vmul.f32 %v16349_v42, %v19113_v2  ;;  %v16616_v6 = vadd.f32 %v16545_v15, %v6811_v0  ;;  %v7865_v15 = vmax.f32 %v7737_v62, 0.0  ;;  %v7584_v0 = vmul.f32 %v16353_v47, %v19115_v34 }
 0x806   :  { %8051 = vmatpush.xpose.msra.mxu2 %v7874_v23  ;;  %8071 = vmatpush.xpose.msra.mxu3 %v7875_v36  ;;  %v7735_v23 = vadd.f32 %v16408_v60, %v7589_v14  ;;  %v7583_v36 = vmul.f32 %v16351_v5, %v19114_v43  ;;  %v7867_v13 = vmax.f32 %v7739_v48, 0.0  ;;  %v7860_v16 = vmax.f32 %v7732_v50, 0.0 }
 0x807   :  { %v7728_v51 = vadd.f32 %v16402_v54, %v7582_v20  ;;  %v7730_v62 = vadd.f32 %v16406_v63, %v7584_v0  ;;  %v7731_v48 = vadd.f32 %v16408_v60, %v7585_v52  ;;  %v7579_v14 = vmul.f32 %v16351_v5, %v19117_v27 }
 0x808   :  { %v6815_v38 = vpop.f32.mrf.mxu2  ;;  %v6640_v49 = vpop.f32.mrf.mxu0  ;;  %v7729_v24 = vadd.f32 %v16404_v61, %v7583_v36  ;;  %v16642_v2 = vadd.f32 %v16583_v53, %v6814_v19  ;;  %v7862_v50 = vmax.f32 %v7734_v33, 0.0  ;;  %v16649_v56 = vmul.f32 0.0078125, %v16392_v37 }
 0x809   :  { %8012 = vmatpush.xpose.msra.mxu0 %v7868_v45  ;;  %8032 = vmatpush.xpose.msra.mxu1 %v7869_v10  ;;  %v6904_v57 = vpop.f32.mrf.mxu3  ;;  %v6729_v9 = vpop.f32.mrf.mxu1  ;;  %v7578_v45 = vmul.f32 %v16349_v42, %v19116_v7  ;;  %v7353_v10 = vrot.slane %v16382_v25, 1  ;;  %v6816_v42 = vadd.f32 %v6815_v38, %v6727_v21  ;;  %v7068_v39 = vadd.f32 %v16551_v41, %v16565_v8 }
 0x80a   :  { %8052 = vmatpush.xpose.msra.mxu2 %v7870_v17  ;;  %8072 = vmatpush.xpose.msra.mxu3 %v7871_v1  ;;  %v6730_v18 = vadd.f32 %v6729_v9, %v6640_v49  ;;  %v7861_v17 = vmax.f32 %v7733_v11, 0.0  ;;  %v19118_v1 = vld [vmem:[#allocation160_spill] sm:$0xff]  ;;  %v7863_v49 = vmax.f32 %v7735_v23, 0.0  ;;  %v7725_v9 = vadd.f32 %v16404_v61, %v7579_v14 }
 0x80b   :  { %v7724_v40 = vadd.f32 %v16402_v54, %v7578_v45  ;;  %v7580_v31 = vmul.f32 %v16353_v47, %v19118_v1  ;;  %v7727_v11 = vadd.f32 %v16408_v60, %v7581_v58  ;;  %v7354_v47 = vadd.f32 %v7353_v10, %v16382_v25 }
 0x80c   :  { %v7191_v53 = vmul.f32 %v16616_v6, %v16616_v6  ;;  %v7364_v61 = vadd.f32 %v16563_v4, %v16589_v22  ;;  %v16657_v33 = vadd.f32 %v6904_v57, %v6816_v42  ;;  %v7857_v60 = vmax.f32 %v7729_v24, 0.0 }
 0x80d   :  { %8013 = vmatpush.xpose.msra.mxu0 %v7864_v30  ;;  %8033 = vmatpush.xpose.msra.mxu1 %v7865_v15  ;;  %v7726_v38 = vadd.f32 %v16406_v63, %v7580_v31  ;;  %v7856_v63 = vmax.f32 %v7728_v51, 0.0  ;;  %v7069_v25 = vadd.f32 %v7068_v39, %v16616_v6  ;;  %v7195_v37 = vmul.f32 %v16642_v2, %v16642_v2 }
 0x80e   :  { %8053 = vmatpush.xpose.msra.mxu2 %v7866_v46  ;;  %8073 = vmatpush.xpose.msra.mxu3 %v7867_v13  ;;  %v7858_v23 = vmax.f32 %v7730_v62, 0.0  ;;  %v7859_v19 = vmax.f32 %v7731_v48, 0.0  ;;  %v7390_v30 = vmul.f32 0.0078125, %v7354_v47  ;;  %v7398_v4 = vmul.f32 %v16649_v56, %v16649_v56 }
 0x80f   :  { %v7365_v22 = vadd.f32 %v7364_v61, %v7191_v53  ;;  %v7070_v57 = vadd.f32 %v7069_v25, %v16642_v2  ;;  %v7199_v51 = vmul.f32 %v16657_v33, %v16657_v33  ;;  %v7852_v46 = vmax.f32 %v7724_v40, 0.0 }
 0x810   :  { %v6818_v20 = vpop.f32.mrf.mxu2  ;;  %v6642_v41 = vpop.f32.mrf.mxu0  ;;  %v7853_v34 = vmax.f32 %v7725_v9, 0.0  ;;  %v7854_v24 = vmax.f32 %v7726_v38, 0.0  ;;  %v7855_v52 = vmax.f32 %v7727_v11, 0.0 }
 0x811   :  { %v6819_v54 = vadd.f32 %v6818_v20, %v6730_v18  ;;  %8014 = vmatpush.xpose.msra.mxu0 %v7860_v16  ;;  %8034 = vmatpush.xpose.msra.mxu1 %v7861_v17  ;;  %v6907_v5 = vpop.f32.mrf.mxu3  ;;  %v6731_v43 = vpop.f32.mrf.mxu1  ;;  %v7366_v0 = vadd.f32 %v7365_v22, %v7195_v37  ;;  %v7071_v7 = vadd.f32 %v7070_v57, %v16657_v33 }
 0x812   :  { %8054 = vmatpush.xpose.msra.mxu2 %v7862_v50  ;;  %8074 = vmatpush.xpose.msra.mxu3 %v7863_v49  ;;  %v6732_v15 = vadd.f32 %v6731_v43, %v6642_v41  ;;  %v7406_v18 = vsub.f32 %v7390_v30, %v7398_v4 }
 0x813   :  { %v16662_v36 = vadd.f32 %v6907_v5, %v6819_v54  ;;  %v7367_v62 = vadd.f32 %v7366_v0, %v7199_v51 }
 0x814   :  { %v7414_v42 = vmax.f32 %v7406_v18, 0.0 }
 0x815   :  { %8015 = vmatpush.xpose.msra.mxu0 %v7856_v63  ;;  %8035 = vmatpush.xpose.msra.mxu1 %v7857_v60  ;;  %v7203_v45 = vmul.f32 %v16662_v36, %v16662_v36  ;;  %v7072_v16 = vadd.f32 %v7071_v7, %v16662_v36 }
 0x816   :  { %8055 = vmatpush.xpose.msra.mxu2 %v7858_v23  ;;  %8075 = vmatpush.xpose.msra.mxu3 %v7859_v19  ;;  %v7422_v20 = vadd.f32 1e-05, %v7414_v42  ;;  %v19124_v42 = vld [vmem:[#allocation67_spill] sm:$0xff] }
 0x817   :  { %v7368_v40 = vadd.f32 %v7367_v62, %v7203_v45  ;;  %v19120_v45 = vld [vmem:[#allocation113_spill] sm:$0xff] }
 0x818   :  { %v6820_v13 = vpop.f32.mrf.mxu2  ;;  %10231 = vrsqrt.f32 %v7422_v20  ;;  %vm7490_vm1 = vweird.f32 %v7422_v20 }
 0x819   :  { %v6821_v10 = vadd.f32 %v6820_v13, %v6732_v15  ;;  %8016 = vmatpush.xpose.msra.mxu0 %v7852_v46  ;;  %8036 = vmatpush.xpose.msra.mxu1 %v7853_v34  ;;  %v6909_v21 = vpop.f32.mrf.mxu3 }
 0x81a   :  { %8056 = vmatpush.xpose.msra.mxu2 %v7854_v24  ;;  %8076 = vmatpush.xpose.msra.mxu3 %v7855_v52 }
 0x81b   :  { %v16673_v48 = vadd.f32 %v6909_v21, %v6821_v10  ;;  %v19122_v21 = vld [vmem:[#allocation161_spill] sm:$0xff] }
 0x81c   :  { %v19123_v18 = vrot.slane %v19122_v21, 1 }
 0x81d   :  { %v7073_v27 = vadd.f32 %v7072_v16, %v16673_v48  ;;  %v7207_v14 = vmul.f32 %v16673_v48, %v16673_v48 }
 0x81e   :  { %v10232_v61 = vpop.eup %10231 }
 0x81f   :  { %v7074_v17 = vrot.slane %v7073_v27, 4  ;;  %v7369_v1 = vadd.f32 %v7368_v40, %v7207_v14  ;;  %v7485_v37 = vmul.f32 %v10232_v61, %v7422_v20  ;;  %vm7491_vm13 = vweird.f32 %v10232_v61 }
 0x820   :  { %vm7492_vm5 = vmor %vm7490_vm1, %vm7491_vm13 }
 0x821   :  { %v7075_v31 = vadd.f32 %v7074_v17, %v7073_v27  ;;  %v7370_v58 = vrot.slane %v7369_v1, 4  ;;  %v7486_v41 = vmul.f32 %v10232_v61, %v7485_v37 }
 0x823   :  { %v7076_v50 = vrot.slane %v7075_v31, 2  ;;  %v7371_v49 = vadd.f32 %v7370_v58, %v7369_v1  ;;  %v7487_v43 = vmul.f32 0.5, %v7486_v41  ;;  %v19125_v1 = vld [vmem:[#allocation134_spill] sm:$0xff] }
 0x825   :  { %v7077_v9 = vadd.f32 %v7076_v50, %v7075_v31  ;;  %v7372_v54 = vrot.slane %v7371_v49, 2  ;;  %v7488_v4 = vsub.f32 1.5, %v7487_v43  ;;  %v19126_v50 = vld [vmem:[#allocation121_spill] sm:$0xff] }
 0x827   :  { %v7078_v5 = vrot.slane %v7077_v9, 1  ;;  %v7373_v38 = vadd.f32 %v7372_v54, %v7371_v49  ;;  %v7489_v51 = vmul.f32 %v10232_v61, %v7488_v4 }
 0x829   :  { %v7079_v11 = vadd.f32 %v7078_v5, %v7077_v9  ;;  %v7374_v47 = vrot.slane %v7373_v38, 1  ;;  %v7493_v34 = vsel %vm7492_vm5, %v10232_v61, %v7489_v51  ;;  %v19127_v9 = vld [vmem:[#allocation139_spill] sm:$0xff] }
 0x82a   :  { %v7516_v24 = vrot.slane %v7493_v34, 6 }
 0x82b   :  { %v7375_v39 = vadd.f32 %v7374_v47, %v7373_v38  ;;  %v7383_v53 = vmul.f32 0.0078125, %v7079_v11 }
 0x82d   :  { %v7391_v63 = vmul.f32 0.0078125, %v7375_v39  ;;  %v7399_v60 = vmul.f32 %v7383_v53, %v7383_v53  ;;  %v19128_v39 = vld [vmem:[#allocation81_spill] sm:$0xff] }
 0x82f   :  { %v7407_v25 = vsub.f32 %v7391_v63, %v7399_v60  ;;  %v19129_v63 = vld [vmem:[#allocation159_spill] sm:$0xff] }
 0x831   :  { %v7415_v23 = vmax.f32 %v7407_v25, 0.0 }
 0x833   :  { %v7423_v19 = vadd.f32 1e-05, %v7415_v23  ;;  %v19132_v23 = vld [vmem:[#allocation60_spill] sm:$0xff] }
 0x835   :  { %10233 = vrsqrt.f32 %v7423_v19  ;;  %vm7500_vm14 = vweird.f32 %v7423_v19 }
 0x83b   :  { %v10234_v30 = vpop.eup %10233 }
 0x83c   :  { %v7495_v22 = vmul.f32 %v10234_v30, %v7423_v19  ;;  %vm7501_vm3 = vweird.f32 %v10234_v30  ;;  %v19133_v19 = vrot.slane %v19132_v23, 1 }
 0x83d   :  { %vm7502_vm15 = vmor %vm7500_vm14, %vm7501_vm3 }
 0x83e   :  { %v7496_v57 = vmul.f32 %v10234_v30, %v7495_v22  ;;  %v19135_v22 = vld [vmem:[#allocation54_spill] sm:$0xff] }
 0x840   :  { %v7497_v15 = vmul.f32 0.5, %v7496_v57 }
 0x842   :  { %v7498_v46 = vsub.f32 1.5, %v7497_v15  ;;  %v19136_v15 = vld [vmem:[#allocation80_spill] sm:$0xff] }
 0x844   :  { %v7499_v0 = vmul.f32 %v10234_v30, %v7498_v46  ;;  %v19137_v46 = vld [vmem:[#allocation62_spill] sm:$0xff] }
 0x846   :  { %v7503_v13 = vsel %vm7502_vm15, %v10234_v30, %v7499_v0  ;;  %v19134_v30 = vld [vmem:[#allocation120_spill] sm:$0xff] }
 0x847   :  { %v7517_v52 = vrot.slane %v7503_v13, 5 }
 0x849   :  { %v7522_v7 = vsel %vm19119_vm4, %v7516_v24, %v7517_v52  ;;  %v19138_v52 = vld [vmem:[#allocation119_spill] sm:$0xff] }
 0x84a   :  { %v7523_v10 = vsel %vm19121_vm2, %v19120_v45, %v7522_v7  ;;  %v19139_v45 = vld [vmem:[#allocation53_spill] sm:$0xff] }
 0x84b   :  { %v7527_v62 = vmul.f32 %v7523_v10, %v19123_v18 }
 0x84d   :  { %v16683_v16 = vperm.slane %v7527_v62, 0  ;;  %v16685_v40 = vperm.slane %v7527_v62, 1  ;;  %v16687_v27 = vperm.slane %v7527_v62, 2  ;;  %v16689_v14 = vperm.slane %v7527_v62, 3 }
 0x84f   :  { %v7550_v17 = vmul.f32 %v16683_v16, %v19124_v42  ;;  %v7551_v31 = vmul.f32 %v16685_v40, %v19125_v1  ;;  %v7552_v58 = vmul.f32 %v16687_v27, %v16649_v56  ;;  %v7553_v20 = vmul.f32 %v16689_v14, %v7383_v53 }
 0x850   :  { %v7702_v49 = vmul.f32 %v16683_v16, %v19126_v50  ;;  %v7703_v54 = vmul.f32 %v16685_v40, %v19127_v9  ;;  %v7704_v5 = vmul.f32 %v16687_v27, %v19059_v3  ;;  %v7698_v61 = vmul.f32 %v16683_v16, %v19128_v39 }
 0x851   :  { %v7565_v38 = vrot.slane %v7551_v31, 7  ;;  %v7566_v11 = vrot.slane %v7552_v58, 6  ;;  %v7567_v47 = vrot.slane %v7553_v20, 5  ;;  %v7699_v56 = vmul.f32 %v16685_v40, %v19129_v63 }
 0x852   :  { %v7701_v53 = vmul.f32 %v16689_v14, %v16662_v36  ;;  %v7705_v3 = vmul.f32 %v16689_v14, %v16673_v48  ;;  %v7700_v43 = vmul.f32 %v16687_v27, %v19058_v29  ;;  %v7694_v4 = vmul.f32 %v16683_v16, %v19134_v30 }
 0x853   :  { %v7571_v60 = vsel %vm2393_vm0, %v7550_v17, %v7565_v38  ;;  %v7572_v25 = vsel %vm19130_vm6, %v7566_v11, %v7567_v47  ;;  %v7695_v36 = vmul.f32 %v16685_v40, %v19135_v22  ;;  %v7696_v57 = vmul.f32 %v16687_v27, %v19057_v35  ;;  %v19141_v38 = vld [vmem:[#allocation61_spill] sm:$0xff] }
 0x854   :  { %v7573_v37 = vsel %vm19131_vm7, %v7571_v60, %v7572_v25  ;;  %v7697_v51 = vmul.f32 %v16689_v14, %v16657_v33  ;;  %v7690_v48 = vmul.f32 %v16683_v16, %v19136_v15  ;;  %v7691_v34 = vmul.f32 %v16685_v40, %v19137_v46 }
 0x855   :  { %v7577_v41 = vsub.f32 %v19133_v19, %v7573_v37  ;;  %v7692_v35 = vmul.f32 %v16687_v27, %v19055_v32  ;;  %v7693_v33 = vmul.f32 %v16689_v14, %v16642_v2  ;;  %v7686_v7 = vmul.f32 %v16683_v16, %v19138_v52 }
 0x856   :  { %v7687_v10 = vmul.f32 %v16685_v40, %v19139_v45  ;;  %v7688_v9 = vmul.f32 %v16687_v27, %v19054_v55  ;;  %v7683_v11 = vmul.f32 %v16685_v40, %v19141_v38  ;;  %v7684_v25 = vmul.f32 %v16687_v27, %v19053_v12 }
 0x857   :  { %v16731_v0 = vperm.slane %v7577_v41, 0  ;;  %v16733_v29 = vperm.slane %v7577_v41, 1  ;;  %v16735_v13 = vperm.slane %v7577_v41, 2  ;;  %v16737_v24 = vperm.slane %v7577_v41, 3 }
 0x858   :  { %v7685_v19 = vmul.f32 %v16689_v14, %v16565_v8 }
 0x859   :  { %v7851_v21 = vadd.f32 %v16737_v24, %v7705_v3  ;;  %v7848_v18 = vadd.f32 %v16731_v0, %v7702_v49  ;;  %v7849_v62 = vadd.f32 %v16733_v29, %v7703_v54  ;;  %v7850_v42 = vadd.f32 %v16735_v13, %v7704_v5  ;;  %v19140_v54 = vld [vmem:[#allocation141_spill] sm:$0xff] }
 0x85a   :  { %v7844_v17 = vadd.f32 %v16731_v0, %v7698_v61  ;;  %v7845_v32 = vadd.f32 %v16733_v29, %v7699_v56  ;;  %v7846_v2 = vadd.f32 %v16735_v13, %v7700_v43  ;;  %v7847_v1 = vadd.f32 %v16737_v24, %v7701_v53 }
 0x85b   :  { %v7976_v31 = vmax.f32 %v7848_v18, 0.0  ;;  %v7977_v58 = vmax.f32 %v7849_v62, 0.0  ;;  %v7978_v20 = vmax.f32 %v7850_v42, 0.0  ;;  %v7979_v50 = vmax.f32 %v7851_v21, 0.0  ;;  %v19144_v62 = vld [vmem:[#allocation93_spill] sm:$0xff] }
 0x85c   :  { %v7689_v49 = vmul.f32 %v16689_v14, %v16616_v6  ;;  %v7682_v5 = vmul.f32 %v16683_v16, %v19140_v54  ;;  %v7840_v47 = vadd.f32 %v16731_v0, %v7694_v4  ;;  %v7841_v39 = vadd.f32 %v16733_v29, %v7695_v36  ;;  %v19147_v54 = vld [vmem:[#allocation92_spill] sm:$0xff] }
 0x85d   :  { %8112 = vmatpush.xpose.msrb.mxu0 %v7976_v31  ;;  %8132 = vmatpush.xpose.msrb.mxu1 %v7977_v58  ;;  %v7842_v61 = vadd.f32 %v16735_v13, %v7696_v57  ;;  %v7843_v55 = vadd.f32 %v16737_v24, %v7697_v51  ;;  %v7836_v6 = vadd.f32 %v16731_v0, %v7690_v48  ;;  %v7972_v56 = vmax.f32 %v7844_v17, 0.0  ;;  %v19142_v51 = vld [vmem:[#allocation112_spill] sm:$0xff]  ;;  %v19145_v17 = vld [vmem:[#allocation143_spill] sm:$0xff]  ;;  %v19146_v58 = vld [vmem:[#allocation82_spill] sm:$0xff] }
 0x85e   :  { %8152 = vmatpush.xpose.msrb.mxu2 %v7978_v20  ;;  %8172 = vmatpush.xpose.msrb.mxu3 %v7979_v50  ;;  %v7837_v63 = vadd.f32 %v16733_v29, %v7691_v34  ;;  %v7973_v53 = vmax.f32 %v7845_v32, 0.0  ;;  %v7838_v60 = vadd.f32 %v16735_v13, %v7692_v35  ;;  %v7974_v37 = vmax.f32 %v7846_v2, 0.0 }
 0x85f   :  { %v7975_v3 = vmax.f32 %v7847_v1, 0.0  ;;  %v7839_v23 = vadd.f32 %v16737_v24, %v7693_v33  ;;  %v7832_v41 = vadd.f32 %v16731_v0, %v7686_v7  ;;  %v7833_v43 = vadd.f32 %v16733_v29, %v7687_v10  ;;  %v19143_v7 = vld [vmem:[#allocation56_spill] sm:$0xff] }
 0x860   :  { %v7834_v30 = vadd.f32 %v16735_v13, %v7688_v9  ;;  %v7835_v4 = vadd.f32 %v16737_v24, %v7689_v49  ;;  %v16780_v12 = vadd.f32 %v16731_v0, %v7682_v5  ;;  %v16783_v22 = vadd.f32 %v16733_v29, %v7683_v11 }
 0x861   :  { %8113 = vmatpush.xpose.msrb.mxu0 %v7972_v56  ;;  %8133 = vmatpush.xpose.msrb.mxu1 %v7973_v53  ;;  %v7968_v36 = vmax.f32 %v7840_v47, 0.0  ;;  %v7969_v8 = vmax.f32 %v7841_v39, 0.0  ;;  %v16786_v57 = vadd.f32 %v16735_v13, %v7684_v25  ;;  %v7678_v15 = vmul.f32 %v16683_v16, %v19142_v51 }
 0x862   :  { %8153 = vmatpush.xpose.msrb.mxu2 %v7974_v37  ;;  %8173 = vmatpush.xpose.msrb.mxu3 %v7975_v3  ;;  %v7970_v48 = vmax.f32 %v7842_v61, 0.0  ;;  %v7971_v46 = vmax.f32 %v7843_v55, 0.0  ;;  %v7964_v34 = vmax.f32 %v7836_v6, 0.0  ;;  %v7831_v35 = vadd.f32 %v16737_v24, %v7685_v19  ;;  %v19149_v6 = vld [vmem:[#allocation20_spill] sm:$0xff]  ;;  %v19151_v37 = vld [vmem:[#allocation142_spill] sm:$0xff] }
 0x863   :  { %v7965_v33 = vmax.f32 %v7837_v63, 0.0  ;;  %v16792_v52 = vadd.f32 %v16731_v0, %v7678_v15  ;;  %v7679_v45 = vmul.f32 %v16685_v40, %v19143_v7  ;;  %v7680_v10 = vmul.f32 %v16687_v27, %v19052_v26  ;;  %v19153_v15 = vld [vmem:[#allocation43_spill] sm:$0xff] }
 0x864   :  { %v7966_v21 = vmax.f32 %v7838_v60, 0.0  ;;  %v7681_v18 = vmul.f32 %v16689_v14, %v16510_v28  ;;  %v7674_v42 = vmul.f32 %v16683_v16, %v19144_v62  ;;  %v7675_v32 = vmul.f32 %v16685_v40, %v19145_v17  ;;  %v19150_v60 = vld [vmem:[#allocation96_spill] sm:$0xff]  ;;  %v19157_v62 = vld [vmem:[#allocation42_spill] sm:$0xff]  ;;  %v19158_v17 = vld [vmem:[#allocation109_spill] sm:$0xff] }
 0x865   :  { %8114 = vmatpush.xpose.msrb.mxu0 %v7968_v36  ;;  %8134 = vmatpush.xpose.msrb.mxu1 %v7969_v8  ;;  %v7967_v2 = vmax.f32 %v7839_v23, 0.0  ;;  %v7825_v1 = vadd.f32 %v16733_v29, %v7679_v45  ;;  %v16806_v31 = vadd.f32 %v16735_v13, %v7680_v10  ;;  %v7676_v26 = vmul.f32 %v16687_v27, %v19146_v58 }
 0x866   :  { %8154 = vmatpush.xpose.msrb.mxu2 %v7970_v48  ;;  %8174 = vmatpush.xpose.msrb.mxu3 %v7971_v46  ;;  %v16811_v20 = vadd.f32 %v16737_v24, %v7681_v18  ;;  %v16814_v28 = vadd.f32 %v16731_v0, %v7674_v42  ;;  %v16817_v50 = vadd.f32 %v16733_v29, %v7675_v32  ;;  %v7960_v38 = vmax.f32 %v7832_v41, 0.0  ;;  %v19152_v41 = vld [vmem:[#allocation19_spill] sm:$0xff] }
 0x867   :  { %v7677_v9 = vmul.f32 %v16689_v14, %v16468_v44  ;;  %v16822_v49 = vadd.f32 %v16735_v13, %v7676_v26  ;;  %v7670_v5 = vmul.f32 %v16683_v16, %v19147_v54  ;;  %v7961_v11 = vmax.f32 %v7833_v43, 0.0  ;;  %v19148_v44 = vld [vmem:[#allocation55_spill] sm:$0xff]  ;;  %v19159_v26 = vld [vmem:[#allocation105_spill] sm:$0xff] }
 0x868   :  { %v7962_v39 = vmax.f32 %v7834_v30, 0.0  ;;  %v7671_v55 = vmul.f32 %v16685_v40, %v19148_v44  ;;  %v7672_v63 = vmul.f32 %v16687_v27, %v19149_v6  ;;  %v7963_v56 = vmax.f32 %v7835_v4, 0.0 }
 0x869   :  { %8115 = vmatpush.xpose.msrb.mxu0 %v7964_v34  ;;  %8135 = vmatpush.xpose.msrb.mxu1 %v7965_v33  ;;  %v16827_v47 = vadd.f32 %v16737_v24, %v7677_v9  ;;  %v16830_v61 = vadd.f32 %v16731_v0, %v7670_v5  ;;  %v7673_v53 = vmul.f32 %v16689_v14, %v16445_v59  ;;  %v7956_v36 = vmax.f32 %v16780_v12, 0.0  ;;  %v19154_v33 = vld [vmem:[#allocation39_spill] sm:$0xff] }
 0x86a   :  { %8155 = vmatpush.xpose.msrb.mxu2 %v7966_v21  ;;  %8175 = vmatpush.xpose.msrb.mxu3 %v7967_v2  ;;  %v7666_v25 = vmul.f32 %v16683_v16, %v19150_v60  ;;  %v7667_v3 = vmul.f32 %v16685_v40, %v19151_v37  ;;  %v16843_v23 = vadd.f32 %v16733_v29, %v7671_v55  ;;  %v7957_v8 = vmax.f32 %v16783_v22, 0.0  ;;  %v19155_v22 = vld [vmem:[#allocation106_spill] sm:$0xff]  ;;  %v19156_v21 = vld [vmem:[#allocation128_spill] sm:$0xff] }
 0x86b   :  { %v16846_v19 = vadd.f32 %v16735_v13, %v7672_v63  ;;  %v7668_v43 = vmul.f32 %v16687_v27, %v19152_v41  ;;  %v16851_v59 = vadd.f32 %v16737_v24, %v7673_v53  ;;  %v7669_v48 = vmul.f32 %v16689_v14, %v19153_v15  ;;  %v19162_v63 = vld [vmem:[#allocation150_spill] sm:$0xff] }
 0x86c   :  { %v16854_v30 = vadd.f32 %v16731_v0, %v7666_v25  ;;  %v16857_v4 = vadd.f32 %v16733_v29, %v7667_v3  ;;  %v7958_v46 = vmax.f32 %v16786_v57, 0.0  ;;  %v7959_v34 = vmax.f32 %v7831_v35, 0.0  ;;  %v19163_v25 = vld [vmem:[#allocation158_spill] sm:$0xff] }
 0x86d   :  { %8116 = vmatpush.xpose.msrb.mxu0 %v7960_v38  ;;  %8136 = vmatpush.xpose.msrb.mxu1 %v7961_v11  ;;  %v16862_v51 = vadd.f32 %v16735_v13, %v7668_v43  ;;  %v7662_v7 = vmul.f32 %v16683_v16, %v19154_v33  ;;  %v7952_v45 = vmax.f32 %v16792_v52, 0.0  ;;  %v16871_v12 = vadd.f32 %v16737_v24, %v7669_v48  ;;  %v19160_v38 = vld [vmem:[#allocation72_spill] sm:$0xff]  ;;  %v19164_v3 = vld [vmem:[#allocation70_spill] sm:$0xff]  ;;  %v19165_v43 = vld [vmem:[#allocation65_spill] sm:$0xff] }
 0x86e   :  { %8156 = vmatpush.xpose.msrb.mxu2 %v7962_v39  ;;  %8176 = vmatpush.xpose.msrb.mxu3 %v7963_v56  ;;  %v7663_v10 = vmul.f32 %v16685_v40, %v19155_v22  ;;  %v7664_v18 = vmul.f32 %v16687_v27, %v19156_v21  ;;  %v7953_v57 = vmax.f32 %v7825_v1, 0.0  ;;  %v7665_v42 = vmul.f32 %v16689_v14, %v19157_v62  ;;  %v19161_v39 = vld [vmem:[#allocation41_spill] sm:$0xff]  ;;  %v7981_v22 = vld [vmem:[%s17039_s7 + $0x8] sm:$0x77] }
 0x86f   :  { %v16878_v35 = vadd.f32 %v16731_v0, %v7662_v7  ;;  %v7658_v52 = vmul.f32 %v16683_v16, %v19158_v17  ;;  %v7954_v32 = vmax.f32 %v16806_v31, 0.0  ;;  %v7659_v1 = vmul.f32 %v16685_v40, %v19159_v26  ;;  %v19168_v7 = vld [vmem:[#allocation127_spill] sm:$0xff]  ;;  %v19169_v62 = vld [vmem:[#allocation145_spill] sm:$0xff]  ;;  %7992 = vst [vmem:[#allocation1 + $0x10] ss:$2 sm:$0xff] %v7981_v22 }
 0x870   :  { %v16886_v2 = vadd.f32 %v16733_v29, %v7663_v10  ;;  %v16889_v58 = vadd.f32 %v16735_v13, %v7664_v18  ;;  %v7955_v9 = vmax.f32 %v16811_v20, 0.0  ;;  %v16895_v54 = vadd.f32 %v16737_v24, %v7665_v42  ;;  %v7980_v10 = vld [vmem:[%s17039_s7] sm:$0x77]  ;;  %v19170_v26 = vld [vmem:[#allocation149_spill] sm:$0xff] }
 0x871   :  { %8117 = vmatpush.xpose.msrb.mxu0 %v7956_v36  ;;  %8137 = vmatpush.xpose.msrb.mxu1 %v7957_v8  ;;  %v16898_v5 = vadd.f32 %v16731_v0, %v7658_v52  ;;  %v7660_v31 = vmul.f32 %v16687_v27, %v19160_v38  ;;  %v16903_v11 = vadd.f32 %v16733_v29, %v7659_v1  ;;  %v7948_v20 = vmax.f32 %v16814_v28, 0.0  ;;  %v19166_v8 = vld [vmem:[#allocation108_spill] sm:$0xff] }
 0x872   :  { %8157 = vmatpush.xpose.msrb.mxu2 %v7958_v46  ;;  %8177 = vmatpush.xpose.msrb.mxu3 %v7959_v34  ;;  %v7661_v44 = vmul.f32 %v16689_v14, %v19161_v39  ;;  %v7949_v55 = vmax.f32 %v16817_v50, 0.0  ;;  %v7654_v56 = vmul.f32 %v16683_v16, %v19162_v63  ;;  %v7950_v53 = vmax.f32 %v16822_v49, 0.0  ;;  %v19167_v46 = vld [vmem:[#allocation49_spill] sm:$0xff]  ;;  %7990 = vst [vmem:[#allocation1] ss:$2 sm:$0xff] %v7980_v10 }
 0x873   :  { %v16910_v6 = vadd.f32 %v16735_v13, %v7660_v31  ;;  %v7655_v37 = vmul.f32 %v16685_v40, %v19163_v25  ;;  %v7656_v41 = vmul.f32 %v16687_v27, %v19164_v3  ;;  %v7951_v28 = vmax.f32 %v16827_v47, 0.0  ;;  %v7982_v31 = vld [vmem:[%s17040_s8] sm:$0x7] }
 0x874   :  { %v16916_v60 = vadd.f32 %v16737_v24, %v7661_v44  ;;  %v16924_v50 = vadd.f32 %v16731_v0, %v7654_v56  ;;  %v7657_v36 = vmul.f32 %v16689_v14, %v19165_v43  ;;  %v7650_v49 = vmul.f32 %v16683_v16, %v19166_v8  ;;  %7985 = vperm.xlu0 %10218, %v7982_v31  }
 0x875   :  { %8118 = vmatpush.xpose.msrb.mxu0 %v7952_v45  ;;  %8138 = vmatpush.xpose.msrb.mxu1 %v7953_v57  ;;  %v16931_v15 = vadd.f32 %v16733_v29, %v7655_v37  ;;  %v16934_v48 = vadd.f32 %v16735_v13, %v7656_v41  ;;  %v7651_v47 = vmul.f32 %v16685_v40, %v19167_v46  ;;  %v7944_v21 = vmax.f32 %v16830_v61, 0.0  ;;  %v19175_v37 = vld [vmem:[#allocation48_spill] sm:$0xff] }
 0x876   :  { %8158 = vmatpush.xpose.msrb.mxu2 %v7954_v32  ;;  %8178 = vmatpush.xpose.msrb.mxu3 %v7955_v9  ;;  %v16939_v34 = vadd.f32 %v16737_v24, %v7657_v36  ;;  %v16942_v33 = vadd.f32 %v16731_v0, %v7650_v49  ;;  %v7652_v45 = vmul.f32 %v16687_v27, %v19168_v7  ;;  %v7945_v18 = vmax.f32 %v16843_v23, 0.0  ;;  %v19171_v9 = vld [vmem:[#allocation164_spill] sm:$0xff]  ;;  %v19177_v36 = vld [vmem:[#allocation111_spill] sm:$0xff]  ;;  %v7996_v7 = vld.sshfl [vmem:[#allocation1 + $0x18] sm:$0xff pattern:$0x75316420] }
 0x877   :  { %v16955_v57 = vadd.f32 %v16733_v29, %v7651_v47  ;;  %v7653_v42 = vmul.f32 %v16689_v14, %v19169_v62  ;;  %v7946_v17 = vmax.f32 %v16846_v19, 0.0  ;;  %v7947_v52 = vmax.f32 %v16851_v59, 0.0  ;;  %v19172_v19 = vld [vmem:[#allocation125_spill] sm:$0xff]  ;;  %8077 = vmatmul.f32.vlgmr.msra.gmra.mxu3 %v7996_v7 }
 0x878   :  { %v16962_v32 = vadd.f32 %v16735_v13, %v7652_v45  ;;  %v7646_v1 = vmul.f32 %v16683_v16, %v19170_v26  ;;  %v7940_v61 = vmax.f32 %v16854_v30, 0.0  ;;  %v7647_v38 = vmul.f32 %v16685_v40, %v19171_v9  ;;  %v19173_v30 = vld [vmem:[#allocation144_spill] sm:$0xff] }
 0x879   :  { %8119 = vmatpush.xpose.msrb.mxu0 %v7948_v20  ;;  %8139 = vmatpush.xpose.msrb.mxu1 %v7949_v55  ;;  %v16968_v23 = vadd.f32 %v16737_v24, %v7653_v42  ;;  %v7648_v59 = vmul.f32 %v16687_v27, %v19172_v19  ;;  %v7941_v39 = vmax.f32 %v16857_v4, 0.0  ;;  %v7649_v20 = vmul.f32 %v16689_v14, %v19173_v30  ;;  %v19174_v55 = vld [vmem:[#allocation52_spill] sm:$0xff] }
 0x87a   :  { %8159 = vmatpush.xpose.msrb.mxu2 %v7950_v53  ;;  %8179 = vmatpush.xpose.msrb.mxu3 %v7951_v28  ;;  %v16979_v44 = vadd.f32 %v16731_v0, %v7646_v1  ;;  %v7642_v63 = vmul.f32 %v16683_v16, %v19174_v55  ;;  %v7942_v56 = vmax.f32 %v16862_v51, 0.0  ;;  %v16987_v53 = vadd.f32 %v16733_v29, %v7647_v38  ;;  %v19176_v16 = vld [vmem:[#allocation71_spill] sm:$0xff] }
 0x87b   :  { %v16990_v25 = vadd.f32 %v16735_v13, %v7648_v59  ;;  %v7643_v4 = vmul.f32 %v16685_v40, %v19175_v37  ;;  %v7943_v3 = vmax.f32 %v16871_v12, 0.0  ;;  %v7795_v41 = vadd.f32 %v16737_v24, %v7649_v20  ;;  %v7995_v12 = vld.sshfl [vmem:[#allocation1 + $0x10] sm:$0xff pattern:$0x75316420] }
 0x87c   :  { %v16997_v28 = vadd.f32 %v16731_v0, %v7642_v63  ;;  %v7644_v51 = vmul.f32 %v16687_v27, %v19176_v16  ;;  %v7645_v8 = vmul.f32 %v16689_v14, %v19177_v36  ;;  %v7936_v49 = vmax.f32 %v16878_v35, 0.0  ;;  %8057 = vmatmul.f32.vlgmr.msra.gmra.mxu2 %v7995_v12  ;;  %v7993_v27 = vld.sshfl [vmem:[#allocation1] sm:$0xff pattern:$0x75316420]  ;;  %8103 = vst [vmem:[#allocation1 + $0x10] ss:$2 sm:$0xff] %v7981_v22 }
 0x87d   :  { %8120 = vmatpush.xpose.msrb.mxu0 %v7944_v21  ;;  %8140 = vmatpush.xpose.msrb.mxu1 %v7945_v18  ;;  %v7789_v43 = vadd.f32 %v16733_v29, %v7643_v4  ;;  %v7937_v0 = vmax.f32 %v16886_v2, 0.0  ;;  %v7938_v47 = vmax.f32 %v16889_v58, 0.0  ;;  %v7939_v29 = vmax.f32 %v16895_v54, 0.0  ;;  %v7994_v14 = vld.sshfl [vmem:[#allocation1 + $0x8] sm:$0xff pattern:$0x75316420] }
 0x87e   :  { %8160 = vmatpush.xpose.msrb.mxu2 %v7946_v17  ;;  %8180 = vmatpush.xpose.msrb.mxu3 %v7947_v52  ;;  %v7790_v40 = vadd.f32 %v16735_v13, %v7644_v51  ;;  %v7791_v46 = vadd.f32 %v16737_v24, %v7645_v8  ;;  %8101 = vst [vmem:[#allocation1] ss:$2 sm:$0xff] %v7980_v10  ;;  %v7932_v13 = vmax.f32 %v16898_v5, 0.0  ;;  %v7933_v35 = vmax.f32 %v16903_v11, 0.0 }
 0x87f   :  { %8017 = vmatmul.f32.vlgmr.msra.gmra.mxu0 %v7993_v27  ;;  %8037 = vmatmul.f32.vlgmr.msra.gmra.mxu1 %v7994_v14  ;;  %v7934_v24 = vmax.f32 %v16910_v6, 0.0  ;;  %v7935_v2 = vmax.f32 %v16916_v60, 0.0  ;;  %v7928_v58 = vmax.f32 %v16924_v50, 0.0  ;;  %v7929_v54 = vmax.f32 %v16931_v15, 0.0 }
 0x880   :  { %v7930_v45 = vmax.f32 %v16934_v48, 0.0  ;;  %v7931_v5 = vmax.f32 %v16939_v34, 0.0  ;;  %v7924_v11 = vmax.f32 %v16942_v33, 0.0  ;;  %v7925_v6 = vmax.f32 %v16955_v57, 0.0 }
 0x881   :  { %8121 = vmatpush.xpose.msrb.mxu0 %v7940_v61  ;;  %8141 = vmatpush.xpose.msrb.mxu1 %v7941_v39  ;;  %v7926_v60 = vmax.f32 %v16962_v32, 0.0  ;;  %v7927_v22 = vmax.f32 %v16968_v23, 0.0  ;;  %v7920_v50 = vmax.f32 %v16979_v44, 0.0  ;;  %v7921_v15 = vmax.f32 %v16987_v53, 0.0 }
 0x882   :  { %8161 = vmatpush.xpose.msrb.mxu2 %v7942_v56  ;;  %8181 = vmatpush.xpose.msrb.mxu3 %v7943_v3  ;;  %v7922_v48 = vmax.f32 %v16990_v25, 0.0  ;;  %v7923_v34 = vmax.f32 %v7795_v41, 0.0  ;;  %v7916_v33 = vmax.f32 %v16997_v28, 0.0  ;;  %v7917_v10 = vmax.f32 %v7789_v43, 0.0 }
 0x883   :  { %v7918_v21 = vmax.f32 %v7790_v40, 0.0  ;;  %v7919_v18 = vmax.f32 %v7791_v46, 0.0  ;;  %v8106_v42 = vld.sshfl [vmem:[#allocation1 + $0x10] sm:$0xff pattern:$0x75316420] }
 0x884   :  { %v8107_v17 = vld.sshfl [vmem:[#allocation1 + $0x18] sm:$0xff pattern:$0x75316420] }
 0x885   :  { %8122 = vmatpush.xpose.msrb.mxu0 %v7936_v49  ;;  %8142 = vmatpush.xpose.msrb.mxu1 %v7937_v0  ;;  %v8104_v57 = vld.sshfl [vmem:[#allocation1] sm:$0xff pattern:$0x75316420]  ;;  %v8105_v62 = vld.sshfl [vmem:[#allocation1 + $0x8] sm:$0xff pattern:$0x75316420] }
 0x886   :  { %8162 = vmatpush.xpose.msrb.mxu2 %v7938_v47  ;;  %8182 = vmatpush.xpose.msrb.mxu3 %v7939_v29 }
 0x889   :  { %8123 = vmatpush.xpose.msrb.mxu0 %v7932_v13  ;;  %8143 = vmatpush.xpose.msrb.mxu1 %v7933_v35 }
 0x88a   :  { %8163 = vmatpush.xpose.msrb.mxu2 %v7934_v24  ;;  %8183 = vmatpush.xpose.msrb.mxu3 %v7935_v2 }
 0x88d   :  { %8124 = vmatpush.xpose.msrb.mxu0 %v7928_v58  ;;  %8144 = vmatpush.xpose.msrb.mxu1 %v7929_v54 }
 0x88e   :  { %8164 = vmatpush.xpose.msrb.mxu2 %v7930_v45  ;;  %8184 = vmatpush.xpose.msrb.mxu3 %v7931_v5 }
 0x891   :  { %8125 = vmatpush.xpose.msrb.mxu0 %v7924_v11  ;;  %8145 = vmatpush.xpose.msrb.mxu1 %v7925_v6 }
 0x892   :  { %8165 = vmatpush.xpose.msrb.mxu2 %v7926_v60  ;;  %8185 = vmatpush.xpose.msrb.mxu3 %v7927_v22 }
 0x895   :  { %8126 = vmatpush.xpose.msrb.mxu0 %v7920_v50  ;;  %8146 = vmatpush.xpose.msrb.mxu1 %v7921_v15 }
 0x896   :  { %8166 = vmatpush.xpose.msrb.mxu2 %v7922_v48  ;;  %8186 = vmatpush.xpose.msrb.mxu3 %v7923_v34 }
 0x899   :  { %8127 = vmatpush.xpose.msrb.mxu0 %v7916_v33  ;;  %8147 = vmatpush.xpose.msrb.mxu1 %v7917_v10 }
 0x89a   :  { %8167 = vmatpush.xpose.msrb.mxu2 %v7918_v21  ;;  %8187 = vmatpush.xpose.msrb.mxu3 %v7919_v18 }
 0x89c   :  { %8128 = vmatmul.f32.vlgmr.msrb.gmra.mxu0 %v8104_v57  ;;  %8148 = vmatmul.f32.vlgmr.msrb.gmra.mxu1 %v8105_v62 }
 0x89d   :  { %8168 = vmatmul.f32.vlgmr.msrb.gmra.mxu2 %v8106_v42  ;;  %8188 = vmatmul.f32.vlgmr.msrb.gmra.mxu3 %v8107_v17 }
 0x8e6   :  { %v7986_v52 = vpop.permute.xlu0 %7985 }
 0x8fa   :  { %v8078_v38 = vpop.f32.mrf.mxu3 }
 0x8fc   :  { %v8018_v32 = vpop.f32.mrf.mxu0  ;;  %v8038_v1 = vpop.f32.mrf.mxu1 }
 0x8fd   :  { %v8019_v26 = vadd.f32 %v8018_v32, %v7986_v52 }
 0x8ff   :  { %v8039_v61 = vadd.f32 %v8038_v1, %v8019_v26  ;;  %v8058_v23 = vpop.f32.mrf.mxu2 }
 0x901   :  { %v8059_v9 = vadd.f32 %v8058_v23, %v8039_v61 }
 0x903   :  { %v8079_v19 = vadd.f32 %v8078_v38, %v8059_v9 }
 0x905   :  { %v9761_v59 = vmul.f32 -1.442695, %v8079_v19 }
 0x907   :  { %10235 = vpow2.f32 %v9761_v59 }
 0x90d   :  { %v10236_v31 = vpop.eup %10235 }
 0x90e   :  { %v8084_v39 = vadd.f32 1.0, %v10236_v31 }
 0x910   :  { %10237 = vrcp.f32 %v8084_v39  ;;  %vm8090_vm0 = vweird.f32 %v8084_v39  ;;  %v8096_v53 = vand.u32 2147483648, %v8084_v39  ;;  %v8094_v3 = vand.u32 2147483647, %v8084_v39 }
 0x912   :  { %v8097_v51 = vor.u32 1.1754944e-38, %v8096_v53  ;;  %vm8095_vm10 = vcmp.eq.f32.partialorder %v8094_v3, 8.507059e+37 }
 0x916   :  { %v10238_v63 = vpop.eup %10237 }
 0x917   :  { %v8086_v56 = vmul.f32 %v10238_v63, %v8084_v39  ;;  %vm8091_vm8 = vweird.f32 %v10238_v63 }
 0x918   :  { %vm8092_vm9 = vmor %vm8090_vm0, %vm8091_vm8 }
 0x919   :  { %v8129_v44 = vpop.f32.mrf.mxu0  ;;  %v8149_v20 = vpop.f32.mrf.mxu1  ;;  %v8087_v4 = vsub.f32 1.0, %v8086_v56 }
 0x91a   :  { %v8130_v30 = vadd.f32 %v8129_v44, %v7986_v52 }
 0x91b   :  { %v8088_v28 = vmul.f32 %v10238_v63, %v8087_v4 }
 0x91c   :  { %v8150_v55 = vadd.f32 %v8149_v20, %v8130_v30 }
 0x91d   :  { %v8089_v43 = vadd.f32 %v10238_v63, %v8088_v28 }
 0x91f   :  { %v8093_v8 = vsel %vm8092_vm9, %v10238_v63, %v8089_v43 }
 0x920   :  { %v8169_v25 = vpop.f32.mrf.mxu2  ;;  %v8189_v37 = vpop.f32.mrf.mxu3  ;;  %v8098_v40 = vsel %vm8095_vm10, %v8097_v51, %v8093_v8 }
 0x921   :  { %v8170_v41 = vadd.f32 %v8169_v25, %v8150_v55  ;;  %8100 = vst [vmem:[%s17041_s9] sm:$0x7] %v8098_v40 }
 0x923   :  { %v8190_v16 = vadd.f32 %v8189_v37, %v8170_v41 }
 0x925   :  { %v9762_v36 = vmul.f32 -1.442695, %v8190_v16 }
 0x927   :  { %10239 = vpow2.f32 %v9762_v36 }
 0x92d   :  { %v10240_v12 = vpop.eup %10239 }
 0x92e   :  { %v8195_v49 = vadd.f32 1.0, %v10240_v12 }
 0x930   :  { %10241 = vrcp.f32 %v8195_v49  ;;  %v8207_v47 = vand.u32 2147483648, %v8195_v49  ;;  %v8205_v7 = vand.u32 2147483647, %v8195_v49  ;;  %vm8201_vm12 = vweird.f32 %v8195_v49 }
 0x932   :  { %v8208_v13 = vor.u32 1.1754944e-38, %v8207_v47  ;;  %vm8206_vm1 = vcmp.eq.f32.partialorder %v8205_v7, 8.507059e+37 }
 0x936   :  { %v10242_v0 = vpop.eup %10241 }
 0x937   :  { %v8197_v46 = vmul.f32 %v10242_v0, %v8195_v49  ;;  %vm8202_vm11 = vweird.f32 %v10242_v0 }
 0x938   :  { %vm8203_vm13 = vmor %vm8201_vm12, %vm8202_vm11 }
 0x939   :  { %v8198_v27 = vsub.f32 1.0, %v8197_v46 }
 0x93b   :  { %v8199_v29 = vmul.f32 %v10242_v0, %v8198_v27 }
 0x93d   :  { %v8200_v14 = vadd.f32 %v10242_v0, %v8199_v29 }
 0x93f   :  { %v8204_v35 = vsel %vm8203_vm13, %v10242_v0, %v8200_v14 }
 0x940   :  { %v8209_v24 = vsel %vm8206_vm1, %v8208_v13, %v8204_v35 }
 0x941   :  { %9763 = vst [vmem:[%s17041_s9 + $0x4] sm:$0x7] %v8209_v24 }
 0x942   :  { %8217 = vsyncpa [#allocation5], 1 }
 0x943   :  { %8218 = vsyncpa [#allocation7], 1 }
 0x944   :  { %8219 = vsyncmov [#allocation3] }
 0x947   :  { %s8220_s15 = vpop.sfrf %8219 }
 0x948   :  { %p9764_p0 = scmp.ne.s32.totalorder %s8220_s15, 0 }
 0x94a   :  { %8224 = shalt.err (%p9764_p0)  }

</bundles_post_ra>
